<compile_context>
chip_gen: v5e
topology: v5e:2x2
jax: 0.10.0
libtpu: 0.0.40
codegen_flags: <defaults>
</compile_context>

<pallas_src>
import functools

import jax
import jax.numpy as jnp
from jax import lax
from jax.experimental import pallas as pl
from jax.experimental.pallas import tpu as pltpu


# ----------------------------------------------------------------------------
# Small helpers
# ----------------------------------------------------------------------------
def _round_up(n, m):
    return ((n + m - 1) // m) * m


def _pick_block(n, cap):
    """Largest divisor of n that is <= cap (>= 1)."""
    best = 1
    for d in range(1, min(n, cap) + 1):
        if n % d == 0:
            best = d
    return best


def _batch_block(bp):
    # Split the padded batch into two blocks so the "parallel" grid axis can
    # shard across the 2 TensorCores on v7x; keep blocks sublane-aligned.
    if bp >= 16 and (bp // 2) % 8 == 0:
        return bp // 2
    return bp


_VMEM_LIMIT = 64 * 1024 * 1024  # raise the default scoped-VMEM limit (v5e: 16 MiB)


# ----------------------------------------------------------------------------
# LSTM layer kernel
# ----------------------------------------------------------------------------
def _lstm_layer_kernel(x_ref, wih_ref, whh_ref, b_ref, y_ref,
                       gx_scr, h_scr, c_scr):
    t = pl.program_id(1)

    @pl.when(t == 0)
    def _():
        h_scr[...] = jnp.zeros_like(h_scr)
        c_scr[...] = jnp.zeros_like(c_scr)

    tt, bb, din = x_ref.shape
    hp = h_scr.shape[1]

    # Hoisted input projection: one (tt*bb, din) x (din, 4hp) MXU matmul per
    # time chunk instead of tt tiny matmuls on the serial critical path.
    gx = (jnp.dot(x_ref[...].reshape(tt * bb, din), wih_ref[...],
                  preferred_element_type=jnp.float32)
          + b_ref[...])
    gx_scr[...] = gx.reshape(tt, bb, 4 * hp)

    whh = whh_ref[...]
    h = h_scr[...]
    c = c_scr[...]

    # Sequential recurrence over the chunk (tt is static -> fully unrolled,
    # giving the scheduler visibility to overlap h@W_hh with gate math).
    for k in range(tt):
        gates = gx_scr[k] + jnp.dot(h, whh, preferred_element_type=jnp.float32)
        # Lane-aligned gate slices (hp is a multiple of 128); PyTorch order i,f,g,o.
        i = jax.nn.sigmoid(gates[:, 0:hp])
        f = jax.nn.sigmoid(gates[:, hp:2 * hp])
        g = jnp.tanh(gates[:, 2 * hp:3 * hp])
        o = jax.nn.sigmoid(gates[:, 3 * hp:4 * hp])
        c = f * c + i * g
        h = o * jnp.tanh(c)
        y_ref[k] = h

    h_scr[...] = h
    c_scr[...] = c


def lstm_layer(x_tm, wih_p, whh_p, b_p, *, tt, bb):
    """x_tm: [T, Bp, Din]  wih_p: [Din, 4Hp]  whh_p: [Hp, 4Hp]  b_p: [1, 4Hp]."""
    T, Bp, Din = x_tm.shape
    Hp = whh_p.shape[0]
    nt = T // tt
    nb = Bp // bb
    # TODO(synk): for production-size H on v7x, single-buffer the (constant)
    # weight inputs (pipeline_mode=pl.Buffered(1)) and consider bf16 weights.
    return pl.pallas_call(
        _lstm_layer_kernel,
        out_shape=jax.ShapeDtypeStruct((T, Bp, Hp), jnp.float32),
        grid_spec=pltpu.PrefetchScalarGridSpec(
            num_scalar_prefetch=0,
            grid=(nb, nt),
            in_specs=[
                pl.BlockSpec((tt, bb, Din), lambda bI, tI: (tI, bI, 0)),
                pl.BlockSpec((Din, 4 * Hp), lambda bI, tI: (0, 0)),
                pl.BlockSpec((Hp, 4 * Hp), lambda bI, tI: (0, 0)),
                pl.BlockSpec((1, 4 * Hp), lambda bI, tI: (0, 0)),
            ],
            out_specs=pl.BlockSpec((tt, bb, Hp), lambda bI, tI: (tI, bI, 0)),
            scratch_shapes=[
                pltpu.VMEM((tt, bb, 4 * Hp), jnp.float32),  # hoisted x-gates
                pltpu.VMEM((bb, Hp), jnp.float32),           # h state
                pltpu.VMEM((bb, Hp), jnp.float32),           # c state
            ],
        ),
        compiler_params=pltpu.CompilerParams(
            dimension_semantics=("parallel", "arbitrary"),
            vmem_limit_bytes=_VMEM_LIMIT),
        cost_estimate=pl.CostEstimate(
            flops=2 * T * Bp * (Din + Hp) * 4 * Hp,
            transcendentals=5 * T * Bp * Hp,
            bytes_accessed=4 * (T * Bp * Din + T * Bp * Hp
                                + (Din + Hp + 1) * 4 * Hp)),
    )(x_tm, wih_p, whh_p, b_p)


# ----------------------------------------------------------------------------
# Attention + FC head kernel (tiled over time, online accumulation)
# ----------------------------------------------------------------------------
def _attn_fc_kernel(y_ref, wa_ref, ba_ref, wfc_ref, bfc_ref,
                    out_ref, attn_ref, l_scr, ctx_scr):
    t = pl.program_id(1)

    @pl.when(t == 0)
    def _():
        l_scr[...] = jnp.zeros_like(l_scr)
        ctx_scr[...] = jnp.zeros_like(ctx_scr)

    tt, bb, hp = y_ref.shape
    y = y_ref[...]

    # Attention scores via MXU matmul (instead of mul + cross-lane reduce).
    s = jnp.dot(y.reshape(tt * bb, hp), wa_ref[...],
                preferred_element_type=jnp.float32)           # [tt*bb, 1]
    s = jnp.tanh(s + ba_ref[...]).reshape(tt, bb, 1)
    # tanh bounds scores to [-1, 1] -> exp() is numerically safe without the
    # running-max subtraction -> single-pass online softmax accumulation.
    e = jnp.exp(s)                                            # [tt, bb, 1]

    attn_ref[...] = e                          # unnormalized; wrapper divides
    l_scr[...] += jnp.sum(e, axis=0)           # [bb, 1]  softmax denominator
    ctx_scr[...] += jnp.sum(e * y, axis=0)     # [bb, hp] weighted context

    @pl.when(t == pl.num_programs(1) - 1)
    def _():
        ctx = ctx_scr[...] / l_scr[...]        # exact division for accuracy
        out_ref[...] = (jnp.dot(ctx, wfc_ref[...],
                                preferred_element_type=jnp.float32)
                        + bfc_ref[...])


def attn_fc(y_tm, wa, ba, wfc, bfc, *, tt, bb):
    """y_tm: [T, Bp, Hp]  wa: [Hp, 1]  ba: [1, 1]  wfc: [Hp, O]  bfc: [1, O]."""
    T, Bp, Hp = y_tm.shape
    O = wfc.shape[1]
    nt = T // tt
    nb = Bp // bb
    return pl.pallas_call(
        _attn_fc_kernel,
        out_shape=(jax.ShapeDtypeStruct((Bp, O), jnp.float32),
                   jax.ShapeDtypeStruct((T, Bp, 1), jnp.float32)),
        grid_spec=pltpu.PrefetchScalarGridSpec(
            num_scalar_prefetch=0,
            grid=(nb, nt),
            in_specs=[
                pl.BlockSpec((tt, bb, Hp), lambda bI, tI: (tI, bI, 0)),
                pl.BlockSpec((Hp, 1), lambda bI, tI: (0, 0)),
                pl.BlockSpec((1, 1), lambda bI, tI: (0, 0)),
                pl.BlockSpec((Hp, O), lambda bI, tI: (0, 0)),
                pl.BlockSpec((1, O), lambda bI, tI: (0, 0)),
            ],
            out_specs=(
                pl.BlockSpec((bb, O), lambda bI, tI: (bI, 0)),
                pl.BlockSpec((tt, bb, 1), lambda bI, tI: (tI, bI, 0)),
            ),
            scratch_shapes=[
                pltpu.VMEM((bb, 1), jnp.float32),   # softmax denominator
                pltpu.VMEM((bb, Hp), jnp.float32),  # context accumulator
            ],
        ),
        compiler_params=pltpu.CompilerParams(
            dimension_semantics=("parallel", "arbitrary"),
            vmem_limit_bytes=_VMEM_LIMIT),
        cost_estimate=pl.CostEstimate(
            flops=4 * T * Bp * Hp + 2 * Bp * Hp * O,
            transcendentals=2 * T * Bp,
            bytes_accessed=4 * (T * Bp * Hp + T * Bp + Bp * O + Hp * (O + 1))),
    )(y_tm, wa, ba, wfc, bfc)


# ----------------------------------------------------------------------------
# Full forward (eval-mode semantics: dropout layers are identity).
# ----------------------------------------------------------------------------
def lstm_with_attention(x, packed, is_attn=False):
    # x: [B, T, input_dim]  (PyTorch batch_first convention)
    B, T, _ = x.shape
    Bp = _round_up(max(B, 1), 8)
    tt = _pick_block(T, 16)
    bb = _batch_block(Bp)

    xp = jnp.pad(x.astype(jnp.float32), ((0, Bp - B), (0, 0), (0, 0)))
    h = jnp.transpose(xp, (1, 0, 2))          # time-major once; tiny input
    for (wih_p, whh_p, b_p) in packed["lstm"]:
        h = lstm_layer(h, wih_p, whh_p, b_p, tt=tt, bb=bb)
        # TODO(synk): inter-layer LSTM dropout is train-only; eval forward is identity.

    out_p, e_p = attn_fc(h, packed["wa"], packed["ba"],
                         packed["wfc"], packed["bfc"], tt=tt, bb=bb)
    out = out_p[:B]
    # nn.Dropout(context) is identity in eval mode.
    if not is_attn:
        return out
    e = jnp.transpose(e_p[:, :B, 0])                       # [B, T] exp(scores)
    attn_w = e / jnp.sum(e, axis=1, keepdims=True)         # softmax over time
    return out, attn_w


# ----------------------------------------------------------------------------
# Parameter init (PyTorch layouts) and packing into padded Pallas layouts.
# ----------------------------------------------------------------------------
def init_raw_params(key, input_dim, hidden_dim, output_dim, num_layers):
    raw = {"lstm": []}
    scale = 1.0 / jnp.sqrt(hidden_dim)
    for l in range(num_layers):
        din = input_dim if l == 0 else hidden_dim
        key, k1, k2, k3, k4 = jax.random.split(key, 5)
        w_ih = jax.random.uniform(k1, (4 * hidden_dim, din), jnp.float32, -scale, scale)
        w_hh = jax.random.uniform(k2, (4 * hidden_dim, hidden_dim), jnp.float32, -scale, scale)
        b_ih = jax.random.uniform(k3, (4 * hidden_dim,), jnp.float32, -scale, scale)
        b_hh = jax.random.uniform(k4, (4 * hidden_dim,), jnp.float32, -scale, scale)
        raw["lstm"].append((w_ih, w_hh, b_ih, b_hh))
    key, k1, k2, k3, k4 = jax.random.split(key, 5)
    raw["w_attn"] = jax.random.uniform(k1, (1, hidden_dim), jnp.float32, -scale, scale)
    raw["b_attn"] = jax.random.uniform(k2, (1,), jnp.float32, -scale, scale)
    raw["w_fc"] = jax.random.uniform(k3, (output_dim, hidden_dim), jnp.float32, -scale, scale)
    raw["b_fc"] = jax.random.uniform(k4, (output_dim,), jnp.float32, -scale, scale)
    return raw


def pack_params(raw):
    """Transpose + zero-pad weights so every gate block is a lane-aligned
    multiple of 128 and padded hidden units stay exactly zero."""
    H = raw["lstm"][0][1].shape[1]
    Hp = _round_up(H, 128)
    packed = {"lstm": []}
    for li, (w_ih, w_hh, b_ih, b_hh) in enumerate(raw["lstm"]):
        din = w_ih.shape[1]
        din_p = din if li == 0 else Hp

        def pad_gates(w, cols_p):
            # [4H, C] -> per-gate zero-pad rows H->Hp and cols C->cols_p
            wg = w.reshape(4, H, w.shape[1])
            wg = jnp.pad(wg, ((0, 0), (0, Hp - H), (0, cols_p - w.shape[1])))
            return wg.reshape(4 * Hp, cols_p)

        wih_p = pad_gates(w_ih, din_p).T                    # [din_p, 4Hp]
        whh_p = pad_gates(w_hh, Hp).T                       # [Hp, 4Hp]
        bg = (b_ih + b_hh).reshape(4, H)
        b_p = jnp.pad(bg, ((0, 0), (0, Hp - H))).reshape(1, 4 * Hp)
        packed["lstm"].append((wih_p, whh_p, b_p))
    packed["wa"] = jnp.pad(raw["w_attn"].T, ((0, Hp - H), (0, 0)))   # [Hp, 1]
    packed["ba"] = raw["b_attn"][None, :]                            # [1, 1]
    packed["wfc"] = jnp.pad(raw["w_fc"].T, ((0, Hp - H), (0, 0)))    # [Hp, O]
    packed["bfc"] = raw["b_fc"][None, :]                             # [1, O]
    return packed


# ----------------------------------------------------------------------------
# Pure-JAX reference (lax.scan) for correctness checking.
# ----------------------------------------------------------------------------
def ref_forward(x, raw):
    h_seq = jnp.transpose(x, (1, 0, 2))
    for (w_ih, w_hh, b_ih, b_hh) in raw["lstm"]:
        H = w_hh.shape[1]
        B = h_seq.shape[1]
        wih_t, whh_t, b = w_ih.T, w_hh.T, b_ih + b_hh

        def step(carry, x_t, wih_t=wih_t, whh_t=whh_t, b=b, H=H):
            h, c = carry
            gates = x_t @ wih_t + h @ whh_t + b
            i = jax.nn.sigmoid(gates[:, :H])
            f = jax.nn.sigmoid(gates[:, H:2 * H])
            g = jnp.tanh(gates[:, 2 * H:3 * H])
            o = jax.nn.sigmoid(gates[:, 3 * H:4 * H])
            c = f * c + i * g
            h = o * jnp.tanh(c)
            return (h, c), h

        init = (jnp.zeros((B, H), jnp.float32), jnp.zeros((B, H), jnp.float32))
        (_, _), h_seq = lax.scan(step, init, h_seq)

    y = h_seq                                              # [T, B, H]
    scores = jnp.tanh(jnp.einsum('tbh,h->tb', y, raw["w_attn"][0])
                      + raw["b_attn"][0])
    w = jax.nn.softmax(scores, axis=0)
    context = jnp.einsum('tb,tbh->bh', w, y)
    out = context @ raw["w_fc"].T + raw["b_fc"]
    return out, w.T


if __name__ == "__main__":
    B, T = 2, 8
    input_dim, hidden_dim, output_dim, num_layers = 8, 32, 4, 2

    key = jax.random.PRNGKey(0)
    key, kx = jax.random.split(key)
    x = jax.random.normal(kx, (B, T, input_dim), jnp.float32)
    raw = init_raw_params(key, input_dim, hidden_dim, output_dim, num_layers)
    packed = pack_params(raw)

    fwd = jax.jit(functools.partial(lstm_with_attention, is_attn=True))
    out, attn_w = fwd(x, packed)
    out = jax.block_until_ready(out)
    attn_w = jax.block_until_ready(attn_w)

    ref_out, ref_attn = ref_forward(x, raw)
    assert out.shape == (B, output_dim)
    assert attn_w.shape == (B, T)
    assert jnp.allclose(out, ref_out, atol=5e-5, rtol=5e-5)
    assert jnp.allclose(attn_w, ref_attn, atol=5e-5, rtol=5e-5)

    print("KERNEL_OK")
</pallas_src>

<mosaic_0001>
module attributes {stable_mosaic.version = 11 : i64} {
  func.func @_lstm_layer_kernel(%arg0: i32, %arg1: i32, %arg2: memref<8x8x128xf32, #tpu.memory_space<vmem>>, %arg3: memref<128x512xf32, #tpu.memory_space<vmem>>, %arg4: memref<128x512xf32, #tpu.memory_space<vmem>>, %arg5: memref<1x512xf32, #tpu.memory_space<vmem>>, %arg6: memref<8x8x128xf32, #tpu.memory_space<vmem>>, %arg7: memref<8x8x512xf32, #tpu.memory_space<vmem>>, %arg8: memref<8x128xf32, #tpu.memory_space<vmem>>, %arg9: memref<8x128xf32, #tpu.memory_space<vmem>>) attributes {dimension_semantics = [#tpu.dimension_semantics<parallel>, #tpu.dimension_semantics<arbitrary>], iteration_bounds = array<i64: 1, 1>, scalar_prefetch = 0 : i64, scratch_operands = 3 : i64, tpu.core_type = #tpu.core_type<tc>, window_params = [{transform_indices = @transform_0, window_bounds = array<i64: 8, 8, 128>}, {pipeline_mode = #tpu.pipeline_mode<synchronous>, transform_indices = @transform_1, window_bounds = array<i64: 128, 512>}, {pipeline_mode = #tpu.pipeline_mode<synchronous>, transform_indices = @transform_2, window_bounds = array<i64: 128, 512>}, {pipeline_mode = #tpu.pipeline_mode<synchronous>, transform_indices = @transform_3, window_bounds = array<i64: 1, 512>}, {transform_indices = @transform_4, window_bounds = array<i64: 8, 8, 128>}]} {
    %c0_i32 = arith.constant 0 : i32
    %0 = arith.cmpi eq, %arg1, %c0_i32 : i32
    %1 = arith.extui %0 : i1 to i32
    %c0_i32_0 = arith.constant 0 : i32
    %2 = arith.cmpi ne, %1, %c0_i32_0 : i32
    scf.if %2 {
      %cst_93 = arith.constant 0.000000e+00 : f32
      %273 = vector.broadcast %cst_93 : f32 to vector<8x128xf32>
      %c0_94 = arith.constant 0 : index
      %c0_95 = arith.constant 0 : index
      %274 = vector.load %arg8[%c0_94, %c0_95] : memref<8x128xf32, #tpu.memory_space<vmem>>, vector<8x128xf32>
      tpu.vector_store %arg8[%c0_94, %c0_95], %273 {strides = array<i32>} : memref<8x128xf32, #tpu.memory_space<vmem>>, vector<8x128xf32>,
      %cst_96 = arith.constant 0.000000e+00 : f32
      %275 = vector.broadcast %cst_96 : f32 to vector<8x128xf32>
      %c0_97 = arith.constant 0 : index
      %c0_98 = arith.constant 0 : index
      %276 = vector.load %arg9[%c0_97, %c0_98] : memref<8x128xf32, #tpu.memory_space<vmem>>, vector<8x128xf32>
      tpu.vector_store %arg9[%c0_97, %c0_98], %275 {strides = array<i32>} : memref<8x128xf32, #tpu.memory_space<vmem>>, vector<8x128xf32>,
    } else {
    }
    %c0 = arith.constant 0 : index
    %c0_1 = arith.constant 0 : index
    %c0_2 = arith.constant 0 : index
    %3 = vector.load %arg2[%c0, %c0_1, %c0_2] : memref<8x8x128xf32, #tpu.memory_space<vmem>>, vector<8x8x128xf32>
    %4 = vector.shape_cast %3 : vector<8x8x128xf32> to vector<64x128xf32>
    %c0_3 = arith.constant 0 : index
    %c0_4 = arith.constant 0 : index
    %5 = vector.load %arg3[%c0_3, %c0_4] : memref<128x512xf32, #tpu.memory_space<vmem>>, vector<128x512xf32>
    %cst = arith.constant dense<0.000000e+00> : vector<64x512xf32>
    %6 = tpu.matmul %4, %5, %cst {dimension_numbers = #tpu.dot_dimension_numbers<[1], [0], [0], [1], [0, 0, 1, 1], [], []>} : vector<64x128xf32>, vector<128x512xf32>, vector<64x512xf32> -> vector<64x512xf32>
    %c0_5 = arith.constant 0 : index
    %c0_6 = arith.constant 0 : index
    %7 = vector.load %arg5[%c0_5, %c0_6] : memref<1x512xf32, #tpu.memory_space<vmem>>, vector<1x512xf32>
    %8 = vector.broadcast %7 : vector<1x512xf32> to vector<64x512xf32>
    %9 = arith.addf %6, %8 : vector<64x512xf32>
    %10 = vector.shape_cast %9 : vector<64x512xf32> to vector<8x8x512xf32>
    %c0_7 = arith.constant 0 : index
    %c0_8 = arith.constant 0 : index
    %c0_9 = arith.constant 0 : index
    %11 = vector.load %arg7[%c0_7, %c0_8, %c0_9] : memref<8x8x512xf32, #tpu.memory_space<vmem>>, vector<8x8x512xf32>
    tpu.vector_store %arg7[%c0_7, %c0_8, %c0_9], %10 {strides = array<i32>} : memref<8x8x512xf32, #tpu.memory_space<vmem>>, vector<8x8x512xf32>,
    %c0_10 = arith.constant 0 : index
    %c0_11 = arith.constant 0 : index
    %12 = vector.load %arg4[%c0_10, %c0_11] : memref<128x512xf32, #tpu.memory_space<vmem>>, vector<128x512xf32>
    %c0_12 = arith.constant 0 : index
    %c0_13 = arith.constant 0 : index
    %13 = vector.load %arg8[%c0_12, %c0_13] : memref<8x128xf32, #tpu.memory_space<vmem>>, vector<8x128xf32>
    %c0_14 = arith.constant 0 : index
    %c0_15 = arith.constant 0 : index
    %14 = vector.load %arg9[%c0_14, %c0_15] : memref<8x128xf32, #tpu.memory_space<vmem>>, vector<8x128xf32>
    %c0_16 = arith.constant 0 : index
    %c0_17 = arith.constant 0 : index
    %c0_18 = arith.constant 0 : index
    %15 = vector.load %arg7[%c0_16, %c0_17, %c0_18] : memref<8x8x512xf32, #tpu.memory_space<vmem>>, vector<1x8x512xf32>
    %16 = vector.shape_cast %15 : vector<1x8x512xf32> to vector<8x512xf32>
    %cst_19 = arith.constant dense<0.000000e+00> : vector<8x512xf32>
    %17 = tpu.matmul %13, %12, %cst_19 {dimension_numbers = #tpu.dot_dimension_numbers<[1], [0], [0], [1], [0, 0, 1, 1], [], []>} : vector<8x128xf32>, vector<128x512xf32>, vector<8x512xf32> -> vector<8x512xf32>
    %18 = arith.addf %16, %17 : vector<8x512xf32>
    %19 = vector.extract_strided_slice %18 {offsets = [0, 0], sizes = [8, 128], strides = [1, 1]} : vector<8x512xf32> to vector<8x128xf32>
    %20 = arith.negf %19 : vector<8x128xf32>
    %21 = math.exp %20 : vector<8x128xf32>
    %cst_20 = arith.constant 1.000000e+00 : f32
    %22 = vector.broadcast %cst_20 : f32 to vector<8x128xf32>
    %23 = arith.addf %22, %21 : vector<8x128xf32>
    %24 = arith.divf %22, %23 : vector<8x128xf32>
    %25 = vector.extract_strided_slice %18 {offsets = [0, 128], sizes = [8, 128], strides = [1, 1]} : vector<8x512xf32> to vector<8x128xf32>
    %26 = arith.negf %25 : vector<8x128xf32>
    %27 = math.exp %26 : vector<8x128xf32>
    %cst_21 = arith.constant 1.000000e+00 : f32
    %28 = vector.broadcast %cst_21 : f32 to vector<8x128xf32>
    %29 = arith.addf %28, %27 : vector<8x128xf32>
    %30 = arith.divf %28, %29 : vector<8x128xf32>
    %31 = vector.extract_strided_slice %18 {offsets = [0, 256], sizes = [8, 128], strides = [1, 1]} : vector<8x512xf32> to vector<8x128xf32>
    %32 = math.tanh %31 : vector<8x128xf32>
    %33 = vector.extract_strided_slice %18 {offsets = [0, 384], sizes = [8, 128], strides = [1, 1]} : vector<8x512xf32> to vector<8x128xf32>
    %34 = arith.negf %33 : vector<8x128xf32>
    %35 = math.exp %34 : vector<8x128xf32>
    %cst_22 = arith.constant 1.000000e+00 : f32
    %36 = vector.broadcast %cst_22 : f32 to vector<8x128xf32>
    %37 = arith.addf %36, %35 : vector<8x128xf32>
    %38 = arith.divf %36, %37 : vector<8x128xf32>
    %39 = arith.mulf %30, %14 : vector<8x128xf32>
    %40 = arith.mulf %24, %32 : vector<8x128xf32>
    %41 = arith.addf %39, %40 : vector<8x128xf32>
    %42 = math.tanh %41 : vector<8x128xf32>
    %43 = arith.mulf %38, %42 : vector<8x128xf32>
    %c0_23 = arith.constant 0 : index
    %c0_24 = arith.constant 0 : index
    %c0_25 = arith.constant 0 : index
    %44 = vector.load %arg6[%c0_23, %c0_24, %c0_25] : memref<8x8x128xf32, #tpu.memory_space<vmem>>, vector<1x8x128xf32>
    %45 = vector.shape_cast %44 : vector<1x8x128xf32> to vector<8x128xf32>
    %46 = vector.shape_cast %43 : vector<8x128xf32> to vector<1x8x128xf32>
    tpu.vector_store %arg6[%c0_23, %c0_24, %c0_25], %46 {strides = array<i32>} : memref<8x8x128xf32, #tpu.memory_space<vmem>>, vector<1x8x128xf32>,
    %c1 = arith.constant 1 : index
    %c0_26 = arith.constant 0 : index
    %c0_27 = arith.constant 0 : index
    %47 = vector.load %arg7[%c1, %c0_26, %c0_27] : memref<8x8x512xf32, #tpu.memory_space<vmem>>, vector<1x8x512xf32>
    %48 = vector.shape_cast %47 : vector<1x8x512xf32> to vector<8x512xf32>
    %cst_28 = arith.constant dense<0.000000e+00> : vector<8x512xf32>
    %49 = tpu.matmul %43, %12, %cst_28 {dimension_numbers = #tpu.dot_dimension_numbers<[1], [0], [0], [1], [0, 0, 1, 1], [], []>} : vector<8x128xf32>, vector<128x512xf32>, vector<8x512xf32> -> vector<8x512xf32>
    %50 = arith.addf %48, %49 : vector<8x512xf32>
    %51 = vector.extract_strided_slice %50 {offsets = [0, 0], sizes = [8, 128], strides = [1, 1]} : vector<8x512xf32> to vector<8x128xf32>
    %52 = arith.negf %51 : vector<8x128xf32>
    %53 = math.exp %52 : vector<8x128xf32>
    %cst_29 = arith.constant 1.000000e+00 : f32
    %54 = vector.broadcast %cst_29 : f32 to vector<8x128xf32>
    %55 = arith.addf %54, %53 : vector<8x128xf32>
    %56 = arith.divf %54, %55 : vector<8x128xf32>
    %57 = vector.extract_strided_slice %50 {offsets = [0, 128], sizes = [8, 128], strides = [1, 1]} : vector<8x512xf32> to vector<8x128xf32>
    %58 = arith.negf %57 : vector<8x128xf32>
    %59 = math.exp %58 : vector<8x128xf32>
    %cst_30 = arith.constant 1.000000e+00 : f32
    %60 = vector.broadcast %cst_30 : f32 to vector<8x128xf32>
    %61 = arith.addf %60, %59 : vector<8x128xf32>
    %62 = arith.divf %60, %61 : vector<8x128xf32>
    %63 = vector.extract_strided_slice %50 {offsets = [0, 256], sizes = [8, 128], strides = [1, 1]} : vector<8x512xf32> to vector<8x128xf32>
    %64 = math.tanh %63 : vector<8x128xf32>
    %65 = vector.extract_strided_slice %50 {offsets = [0, 384], sizes = [8, 128], strides = [1, 1]} : vector<8x512xf32> to vector<8x128xf32>
    %66 = arith.negf %65 : vector<8x128xf32>
    %67 = math.exp %66 : vector<8x128xf32>
    %cst_31 = arith.constant 1.000000e+00 : f32
    %68 = vector.broadcast %cst_31 : f32 to vector<8x128xf32>
    %69 = arith.addf %68, %67 : vector<8x128xf32>
    %70 = arith.divf %68, %69 : vector<8x128xf32>
    %71 = arith.mulf %62, %41 : vector<8x128xf32>
    %72 = arith.mulf %56, %64 : vector<8x128xf32>
    %73 = arith.addf %71, %72 : vector<8x128xf32>
    %74 = math.tanh %73 : vector<8x128xf32>
    %75 = arith.mulf %70, %74 : vector<8x128xf32>
    %c1_32 = arith.constant 1 : index
    %c0_33 = arith.constant 0 : index
    %c0_34 = arith.constant 0 : index
    %76 = vector.load %arg6[%c1_32, %c0_33, %c0_34] : memref<8x8x128xf32, #tpu.memory_space<vmem>>, vector<1x8x128xf32>
    %77 = vector.shape_cast %76 : vector<1x8x128xf32> to vector<8x128xf32>
    %78 = vector.shape_cast %75 : vector<8x128xf32> to vector<1x8x128xf32>
    tpu.vector_store %arg6[%c1_32, %c0_33, %c0_34], %78 {strides = array<i32>} : memref<8x8x128xf32, #tpu.memory_space<vmem>>, vector<1x8x128xf32>,
    %c2 = arith.constant 2 : index
    %c0_35 = arith.constant 0 : index
    %c0_36 = arith.constant 0 : index
    %79 = vector.load %arg7[%c2, %c0_35, %c0_36] : memref<8x8x512xf32, #tpu.memory_space<vmem>>, vector<1x8x512xf32>
    %80 = vector.shape_cast %79 : vector<1x8x512xf32> to vector<8x512xf32>
    %cst_37 = arith.constant dense<0.000000e+00> : vector<8x512xf32>
    %81 = tpu.matmul %75, %12, %cst_37 {dimension_numbers = #tpu.dot_dimension_numbers<[1], [0], [0], [1], [0, 0, 1, 1], [], []>} : vector<8x128xf32>, vector<128x512xf32>, vector<8x512xf32> -> vector<8x512xf32>
    %82 = arith.addf %80, %81 : vector<8x512xf32>
    %83 = vector.extract_strided_slice %82 {offsets = [0, 0], sizes = [8, 128], strides = [1, 1]} : vector<8x512xf32> to vector<8x128xf32>
    %84 = arith.negf %83 : vector<8x128xf32>
    %85 = math.exp %84 : vector<8x128xf32>
    %cst_38 = arith.constant 1.000000e+00 : f32
    %86 = vector.broadcast %cst_38 : f32 to vector<8x128xf32>
    %87 = arith.addf %86, %85 : vector<8x128xf32>
    %88 = arith.divf %86, %87 : vector<8x128xf32>
    %89 = vector.extract_strided_slice %82 {offsets = [0, 128], sizes = [8, 128], strides = [1, 1]} : vector<8x512xf32> to vector<8x128xf32>
    %90 = arith.negf %89 : vector<8x128xf32>
    %91 = math.exp %90 : vector<8x128xf32>
    %cst_39 = arith.constant 1.000000e+00 : f32
    %92 = vector.broadcast %cst_39 : f32 to vector<8x128xf32>
    %93 = arith.addf %92, %91 : vector<8x128xf32>
    %94 = arith.divf %92, %93 : vector<8x128xf32>
    %95 = vector.extract_strided_slice %82 {offsets = [0, 256], sizes = [8, 128], strides = [1, 1]} : vector<8x512xf32> to vector<8x128xf32>
    %96 = math.tanh %95 : vector<8x128xf32>
    %97 = vector.extract_strided_slice %82 {offsets = [0, 384], sizes = [8, 128], strides = [1, 1]} : vector<8x512xf32> to vector<8x128xf32>
    %98 = arith.negf %97 : vector<8x128xf32>
    %99 = math.exp %98 : vector<8x128xf32>
    %cst_40 = arith.constant 1.000000e+00 : f32
    %100 = vector.broadcast %cst_40 : f32 to vector<8x128xf32>
    %101 = arith.addf %100, %99 : vector<8x128xf32>
    %102 = arith.divf %100, %101 : vector<8x128xf32>
    %103 = arith.mulf %94, %73 : vector<8x128xf32>
    %104 = arith.mulf %88, %96 : vector<8x128xf32>
    %105 = arith.addf %103, %104 : vector<8x128xf32>
    %106 = math.tanh %105 : vector<8x128xf32>
    %107 = arith.mulf %102, %106 : vector<8x128xf32>
    %c2_41 = arith.constant 2 : index
    %c0_42 = arith.constant 0 : index
    %c0_43 = arith.constant 0 : index
    %108 = vector.load %arg6[%c2_41, %c0_42, %c0_43] : memref<8x8x128xf32, #tpu.memory_space<vmem>>, vector<1x8x128xf32>
    %109 = vector.shape_cast %108 : vector<1x8x128xf32> to vector<8x128xf32>
    %110 = vector.shape_cast %107 : vector<8x128xf32> to vector<1x8x128xf32>
    tpu.vector_store %arg6[%c2_41, %c0_42, %c0_43], %110 {strides = array<i32>} : memref<8x8x128xf32, #tpu.memory_space<vmem>>, vector<1x8x128xf32>,
    %c3 = arith.constant 3 : index
    %c0_44 = arith.constant 0 : index
    %c0_45 = arith.constant 0 : index
    %111 = vector.load %arg7[%c3, %c0_44, %c0_45] : memref<8x8x512xf32, #tpu.memory_space<vmem>>, vector<1x8x512xf32>
    %112 = vector.shape_cast %111 : vector<1x8x512xf32> to vector<8x512xf32>
    %cst_46 = arith.constant dense<0.000000e+00> : vector<8x512xf32>
    %113 = tpu.matmul %107, %12, %cst_46 {dimension_numbers = #tpu.dot_dimension_numbers<[1], [0], [0], [1], [0, 0, 1, 1], [], []>} : vector<8x128xf32>, vector<128x512xf32>, vector<8x512xf32> -> vector<8x512xf32>
    %114 = arith.addf %112, %113 : vector<8x512xf32>
    %115 = vector.extract_strided_slice %114 {offsets = [0, 0], sizes = [8, 128], strides = [1, 1]} : vector<8x512xf32> to vector<8x128xf32>
    %116 = arith.negf %115 : vector<8x128xf32>
    %117 = math.exp %116 : vector<8x128xf32>
    %cst_47 = arith.constant 1.000000e+00 : f32
    %118 = vector.broadcast %cst_47 : f32 to vector<8x128xf32>
    %119 = arith.addf %118, %117 : vector<8x128xf32>
    %120 = arith.divf %118, %119 : vector<8x128xf32>
    %121 = vector.extract_strided_slice %114 {offsets = [0, 128], sizes = [8, 128], strides = [1, 1]} : vector<8x512xf32> to vector<8x128xf32>
    %122 = arith.negf %121 : vector<8x128xf32>
    %123 = math.exp %122 : vector<8x128xf32>
    %cst_48 = arith.constant 1.000000e+00 : f32
    %124 = vector.broadcast %cst_48 : f32 to vector<8x128xf32>
    %125 = arith.addf %124, %123 : vector<8x128xf32>
    %126 = arith.divf %124, %125 : vector<8x128xf32>
    %127 = vector.extract_strided_slice %114 {offsets = [0, 256], sizes = [8, 128], strides = [1, 1]} : vector<8x512xf32> to vector<8x128xf32>
    %128 = math.tanh %127 : vector<8x128xf32>
    %129 = vector.extract_strided_slice %114 {offsets = [0, 384], sizes = [8, 128], strides = [1, 1]} : vector<8x512xf32> to vector<8x128xf32>
    %130 = arith.negf %129 : vector<8x128xf32>
    %131 = math.exp %130 : vector<8x128xf32>
    %cst_49 = arith.constant 1.000000e+00 : f32
    %132 = vector.broadcast %cst_49 : f32 to vector<8x128xf32>
    %133 = arith.addf %132, %131 : vector<8x128xf32>
    %134 = arith.divf %132, %133 : vector<8x128xf32>
    %135 = arith.mulf %126, %105 : vector<8x128xf32>
    %136 = arith.mulf %120, %128 : vector<8x128xf32>
    %137 = arith.addf %135, %136 : vector<8x128xf32>
    %138 = math.tanh %137 : vector<8x128xf32>
    %139 = arith.mulf %134, %138 : vector<8x128xf32>
    %c3_50 = arith.constant 3 : index
    %c0_51 = arith.constant 0 : index
    %c0_52 = arith.constant 0 : index
    %140 = vector.load %arg6[%c3_50, %c0_51, %c0_52] : memref<8x8x128xf32, #tpu.memory_space<vmem>>, vector<1x8x128xf32>
    %141 = vector.shape_cast %140 : vector<1x8x128xf32> to vector<8x128xf32>
    %142 = vector.shape_cast %139 : vector<8x128xf32> to vector<1x8x128xf32>
    tpu.vector_store %arg6[%c3_50, %c0_51, %c0_52], %142 {strides = array<i32>} : memref<8x8x128xf32, #tpu.memory_space<vmem>>, vector<1x8x128xf32>,
    %c4 = arith.constant 4 : index
    %c0_53 = arith.constant 0 : index
    %c0_54 = arith.constant 0 : index
    %143 = vector.load %arg7[%c4, %c0_53, %c0_54] : memref<8x8x512xf32, #tpu.memory_space<vmem>>, vector<1x8x512xf32>
    %144 = vector.shape_cast %143 : vector<1x8x512xf32> to vector<8x512xf32>
    %cst_55 = arith.constant dense<0.000000e+00> : vector<8x512xf32>
    %145 = tpu.matmul %139, %12, %cst_55 {dimension_numbers = #tpu.dot_dimension_numbers<[1], [0], [0], [1], [0, 0, 1, 1], [], []>} : vector<8x128xf32>, vector<128x512xf32>, vector<8x512xf32> -> vector<8x512xf32>
    %146 = arith.addf %144, %145 : vector<8x512xf32>
    %147 = vector.extract_strided_slice %146 {offsets = [0, 0], sizes = [8, 128], strides = [1, 1]} : vector<8x512xf32> to vector<8x128xf32>
    %148 = arith.negf %147 : vector<8x128xf32>
    %149 = math.exp %148 : vector<8x128xf32>
    %cst_56 = arith.constant 1.000000e+00 : f32
    %150 = vector.broadcast %cst_56 : f32 to vector<8x128xf32>
    %151 = arith.addf %150, %149 : vector<8x128xf32>
    %152 = arith.divf %150, %151 : vector<8x128xf32>
    %153 = vector.extract_strided_slice %146 {offsets = [0, 128], sizes = [8, 128], strides = [1, 1]} : vector<8x512xf32> to vector<8x128xf32>
    %154 = arith.negf %153 : vector<8x128xf32>
    %155 = math.exp %154 : vector<8x128xf32>
    %cst_57 = arith.constant 1.000000e+00 : f32
    %156 = vector.broadcast %cst_57 : f32 to vector<8x128xf32>
    %157 = arith.addf %156, %155 : vector<8x128xf32>
    %158 = arith.divf %156, %157 : vector<8x128xf32>
    %159 = vector.extract_strided_slice %146 {offsets = [0, 256], sizes = [8, 128], strides = [1, 1]} : vector<8x512xf32> to vector<8x128xf32>
    %160 = math.tanh %159 : vector<8x128xf32>
    %161 = vector.extract_strided_slice %146 {offsets = [0, 384], sizes = [8, 128], strides = [1, 1]} : vector<8x512xf32> to vector<8x128xf32>
    %162 = arith.negf %161 : vector<8x128xf32>
    %163 = math.exp %162 : vector<8x128xf32>
    %cst_58 = arith.constant 1.000000e+00 : f32
    %164 = vector.broadcast %cst_58 : f32 to vector<8x128xf32>
    %165 = arith.addf %164, %163 : vector<8x128xf32>
    %166 = arith.divf %164, %165 : vector<8x128xf32>
    %167 = arith.mulf %158, %137 : vector<8x128xf32>
    %168 = arith.mulf %152, %160 : vector<8x128xf32>
    %169 = arith.addf %167, %168 : vector<8x128xf32>
    %170 = math.tanh %169 : vector<8x128xf32>
    %171 = arith.mulf %166, %170 : vector<8x128xf32>
    %c4_59 = arith.constant 4 : index
    %c0_60 = arith.constant 0 : index
    %c0_61 = arith.constant 0 : index
    %172 = vector.load %arg6[%c4_59, %c0_60, %c0_61] : memref<8x8x128xf32, #tpu.memory_space<vmem>>, vector<1x8x128xf32>
    %173 = vector.shape_cast %172 : vector<1x8x128xf32> to vector<8x128xf32>
    %174 = vector.shape_cast %171 : vector<8x128xf32> to vector<1x8x128xf32>
    tpu.vector_store %arg6[%c4_59, %c0_60, %c0_61], %174 {strides = array<i32>} : memref<8x8x128xf32, #tpu.memory_space<vmem>>, vector<1x8x128xf32>,
    %c5 = arith.constant 5 : index
    %c0_62 = arith.constant 0 : index
    %c0_63 = arith.constant 0 : index
    %175 = vector.load %arg7[%c5, %c0_62, %c0_63] : memref<8x8x512xf32, #tpu.memory_space<vmem>>, vector<1x8x512xf32>
    %176 = vector.shape_cast %175 : vector<1x8x512xf32> to vector<8x512xf32>
    %cst_64 = arith.constant dense<0.000000e+00> : vector<8x512xf32>
    %177 = tpu.matmul %171, %12, %cst_64 {dimension_numbers = #tpu.dot_dimension_numbers<[1], [0], [0], [1], [0, 0, 1, 1], [], []>} : vector<8x128xf32>, vector<128x512xf32>, vector<8x512xf32> -> vector<8x512xf32>
    %178 = arith.addf %176, %177 : vector<8x512xf32>
    %179 = vector.extract_strided_slice %178 {offsets = [0, 0], sizes = [8, 128], strides = [1, 1]} : vector<8x512xf32> to vector<8x128xf32>
    %180 = arith.negf %179 : vector<8x128xf32>
    %181 = math.exp %180 : vector<8x128xf32>
    %cst_65 = arith.constant 1.000000e+00 : f32
    %182 = vector.broadcast %cst_65 : f32 to vector<8x128xf32>
    %183 = arith.addf %182, %181 : vector<8x128xf32>
    %184 = arith.divf %182, %183 : vector<8x128xf32>
    %185 = vector.extract_strided_slice %178 {offsets = [0, 128], sizes = [8, 128], strides = [1, 1]} : vector<8x512xf32> to vector<8x128xf32>
    %186 = arith.negf %185 : vector<8x128xf32>
    %187 = math.exp %186 : vector<8x128xf32>
    %cst_66 = arith.constant 1.000000e+00 : f32
    %188 = vector.broadcast %cst_66 : f32 to vector<8x128xf32>
    %189 = arith.addf %188, %187 : vector<8x128xf32>
    %190 = arith.divf %188, %189 : vector<8x128xf32>
    %191 = vector.extract_strided_slice %178 {offsets = [0, 256], sizes = [8, 128], strides = [1, 1]} : vector<8x512xf32> to vector<8x128xf32>
    %192 = math.tanh %191 : vector<8x128xf32>
    %193 = vector.extract_strided_slice %178 {offsets = [0, 384], sizes = [8, 128], strides = [1, 1]} : vector<8x512xf32> to vector<8x128xf32>
    %194 = arith.negf %193 : vector<8x128xf32>
    %195 = math.exp %194 : vector<8x128xf32>
    %cst_67 = arith.constant 1.000000e+00 : f32
    %196 = vector.broadcast %cst_67 : f32 to vector<8x128xf32>
    %197 = arith.addf %196, %195 : vector<8x128xf32>
    %198 = arith.divf %196, %197 : vector<8x128xf32>
    %199 = arith.mulf %190, %169 : vector<8x128xf32>
    %200 = arith.mulf %184, %192 : vector<8x128xf32>
    %201 = arith.addf %199, %200 : vector<8x128xf32>
    %202 = math.tanh %201 : vector<8x128xf32>
    %203 = arith.mulf %198, %202 : vector<8x128xf32>
    %c5_68 = arith.constant 5 : index
    %c0_69 = arith.constant 0 : index
    %c0_70 = arith.constant 0 : index
    %204 = vector.load %arg6[%c5_68, %c0_69, %c0_70] : memref<8x8x128xf32, #tpu.memory_space<vmem>>, vector<1x8x128xf32>
    %205 = vector.shape_cast %204 : vector<1x8x128xf32> to vector<8x128xf32>
    %206 = vector.shape_cast %203 : vector<8x128xf32> to vector<1x8x128xf32>
    tpu.vector_store %arg6[%c5_68, %c0_69, %c0_70], %206 {strides = array<i32>} : memref<8x8x128xf32, #tpu.memory_space<vmem>>, vector<1x8x128xf32>,
    %c6 = arith.constant 6 : index
    %c0_71 = arith.constant 0 : index
    %c0_72 = arith.constant 0 : index
    %207 = vector.load %arg7[%c6, %c0_71, %c0_72] : memref<8x8x512xf32, #tpu.memory_space<vmem>>, vector<1x8x512xf32>
    %208 = vector.shape_cast %207 : vector<1x8x512xf32> to vector<8x512xf32>
    %cst_73 = arith.constant dense<0.000000e+00> : vector<8x512xf32>
    %209 = tpu.matmul %203, %12, %cst_73 {dimension_numbers = #tpu.dot_dimension_numbers<[1], [0], [0], [1], [0, 0, 1, 1], [], []>} : vector<8x128xf32>, vector<128x512xf32>, vector<8x512xf32> -> vector<8x512xf32>
    %210 = arith.addf %208, %209 : vector<8x512xf32>
    %211 = vector.extract_strided_slice %210 {offsets = [0, 0], sizes = [8, 128], strides = [1, 1]} : vector<8x512xf32> to vector<8x128xf32>
    %212 = arith.negf %211 : vector<8x128xf32>
    %213 = math.exp %212 : vector<8x128xf32>
    %cst_74 = arith.constant 1.000000e+00 : f32
    %214 = vector.broadcast %cst_74 : f32 to vector<8x128xf32>
    %215 = arith.addf %214, %213 : vector<8x128xf32>
    %216 = arith.divf %214, %215 : vector<8x128xf32>
    %217 = vector.extract_strided_slice %210 {offsets = [0, 128], sizes = [8, 128], strides = [1, 1]} : vector<8x512xf32> to vector<8x128xf32>
    %218 = arith.negf %217 : vector<8x128xf32>
    %219 = math.exp %218 : vector<8x128xf32>
    %cst_75 = arith.constant 1.000000e+00 : f32
    %220 = vector.broadcast %cst_75 : f32 to vector<8x128xf32>
    %221 = arith.addf %220, %219 : vector<8x128xf32>
    %222 = arith.divf %220, %221 : vector<8x128xf32>
    %223 = vector.extract_strided_slice %210 {offsets = [0, 256], sizes = [8, 128], strides = [1, 1]} : vector<8x512xf32> to vector<8x128xf32>
    %224 = math.tanh %223 : vector<8x128xf32>
    %225 = vector.extract_strided_slice %210 {offsets = [0, 384], sizes = [8, 128], strides = [1, 1]} : vector<8x512xf32> to vector<8x128xf32>
    %226 = arith.negf %225 : vector<8x128xf32>
    %227 = math.exp %226 : vector<8x128xf32>
    %cst_76 = arith.constant 1.000000e+00 : f32
    %228 = vector.broadcast %cst_76 : f32 to vector<8x128xf32>
    %229 = arith.addf %228, %227 : vector<8x128xf32>
    %230 = arith.divf %228, %229 : vector<8x128xf32>
    %231 = arith.mulf %222, %201 : vector<8x128xf32>
    %232 = arith.mulf %216, %224 : vector<8x128xf32>
    %233 = arith.addf %231, %232 : vector<8x128xf32>
    %234 = math.tanh %233 : vector<8x128xf32>
    %235 = arith.mulf %230, %234 : vector<8x128xf32>
    %c6_77 = arith.constant 6 : index
    %c0_78 = arith.constant 0 : index
    %c0_79 = arith.constant 0 : index
    %236 = vector.load %arg6[%c6_77, %c0_78, %c0_79] : memref<8x8x128xf32, #tpu.memory_space<vmem>>, vector<1x8x128xf32>
    %237 = vector.shape_cast %236 : vector<1x8x128xf32> to vector<8x128xf32>
    %238 = vector.shape_cast %235 : vector<8x128xf32> to vector<1x8x128xf32>
    tpu.vector_store %arg6[%c6_77, %c0_78, %c0_79], %238 {strides = array<i32>} : memref<8x8x128xf32, #tpu.memory_space<vmem>>, vector<1x8x128xf32>,
    %c7 = arith.constant 7 : index
    %c0_80 = arith.constant 0 : index
    %c0_81 = arith.constant 0 : index
    %239 = vector.load %arg7[%c7, %c0_80, %c0_81] : memref<8x8x512xf32, #tpu.memory_space<vmem>>, vector<1x8x512xf32>
    %240 = vector.shape_cast %239 : vector<1x8x512xf32> to vector<8x512xf32>
    %cst_82 = arith.constant dense<0.000000e+00> : vector<8x512xf32>
    %241 = tpu.matmul %235, %12, %cst_82 {dimension_numbers = #tpu.dot_dimension_numbers<[1], [0], [0], [1], [0, 0, 1, 1], [], []>} : vector<8x128xf32>, vector<128x512xf32>, vector<8x512xf32> -> vector<8x512xf32>
    %242 = arith.addf %240, %241 : vector<8x512xf32>
    %243 = vector.extract_strided_slice %242 {offsets = [0, 0], sizes = [8, 128], strides = [1, 1]} : vector<8x512xf32> to vector<8x128xf32>
    %244 = arith.negf %243 : vector<8x128xf32>
    %245 = math.exp %244 : vector<8x128xf32>
    %cst_83 = arith.constant 1.000000e+00 : f32
    %246 = vector.broadcast %cst_83 : f32 to vector<8x128xf32>
    %247 = arith.addf %246, %245 : vector<8x128xf32>
    %248 = arith.divf %246, %247 : vector<8x128xf32>
    %249 = vector.extract_strided_slice %242 {offsets = [0, 128], sizes = [8, 128], strides = [1, 1]} : vector<8x512xf32> to vector<8x128xf32>
    %250 = arith.negf %249 : vector<8x128xf32>
    %251 = math.exp %250 : vector<8x128xf32>
    %cst_84 = arith.constant 1.000000e+00 : f32
    %252 = vector.broadcast %cst_84 : f32 to vector<8x128xf32>
    %253 = arith.addf %252, %251 : vector<8x128xf32>
    %254 = arith.divf %252, %253 : vector<8x128xf32>
    %255 = vector.extract_strided_slice %242 {offsets = [0, 256], sizes = [8, 128], strides = [1, 1]} : vector<8x512xf32> to vector<8x128xf32>
    %256 = math.tanh %255 : vector<8x128xf32>
    %257 = vector.extract_strided_slice %242 {offsets = [0, 384], sizes = [8, 128], strides = [1, 1]} : vector<8x512xf32> to vector<8x128xf32>
    %258 = arith.negf %257 : vector<8x128xf32>
    %259 = math.exp %258 : vector<8x128xf32>
    %cst_85 = arith.constant 1.000000e+00 : f32
    %260 = vector.broadcast %cst_85 : f32 to vector<8x128xf32>
    %261 = arith.addf %260, %259 : vector<8x128xf32>
    %262 = arith.divf %260, %261 : vector<8x128xf32>
    %263 = arith.mulf %254, %233 : vector<8x128xf32>
    %264 = arith.mulf %248, %256 : vector<8x128xf32>
    %265 = arith.addf %263, %264 : vector<8x128xf32>
    %266 = math.tanh %265 : vector<8x128xf32>
    %267 = arith.mulf %262, %266 : vector<8x128xf32>
    %c7_86 = arith.constant 7 : index
    %c0_87 = arith.constant 0 : index
    %c0_88 = arith.constant 0 : index
    %268 = vector.load %arg6[%c7_86, %c0_87, %c0_88] : memref<8x8x128xf32, #tpu.memory_space<vmem>>, vector<1x8x128xf32>
    %269 = vector.shape_cast %268 : vector<1x8x128xf32> to vector<8x128xf32>
    %270 = vector.shape_cast %267 : vector<8x128xf32> to vector<1x8x128xf32>
    tpu.vector_store %arg6[%c7_86, %c0_87, %c0_88], %270 {strides = array<i32>} : memref<8x8x128xf32, #tpu.memory_space<vmem>>, vector<1x8x128xf32>,
    %c0_89 = arith.constant 0 : index
    %c0_90 = arith.constant 0 : index
    %271 = vector.load %arg8[%c0_89, %c0_90] : memref<8x128xf32, #tpu.memory_space<vmem>>, vector<8x128xf32>
    tpu.vector_store %arg8[%c0_89, %c0_90], %267 {strides = array<i32>} : memref<8x128xf32, #tpu.memory_space<vmem>>, vector<8x128xf32>,
    %c0_91 = arith.constant 0 : index
    %c0_92 = arith.constant 0 : index
    %272 = vector.load %arg9[%c0_91, %c0_92] : memref<8x128xf32, #tpu.memory_space<vmem>>, vector<8x128xf32>
    tpu.vector_store %arg9[%c0_91, %c0_92], %265 {strides = array<i32>} : memref<8x128xf32, #tpu.memory_space<vmem>>, vector<8x128xf32>,
    return
  }
  func.func @transform_0(%arg0: i32, %arg1: i32) -> (i32, i32, i32) {
    %c0_i32 = arith.constant 0 : i32
    %c0_i32_0 = arith.constant 0 : i32
    return %arg1, %arg0, %c0_i32 : i32, i32, i32
  }
  func.func @transform_1(%arg0: i32, %arg1: i32) -> (i32, i32) {
    %c0_i32 = arith.constant 0 : i32
    %c0_i32_0 = arith.constant 0 : i32
    %c0_i32_1 = arith.constant 0 : i32
    return %c0_i32, %c0_i32_0 : i32, i32
  }
  func.func @transform_2(%arg0: i32, %arg1: i32) -> (i32, i32) {
    %c0_i32 = arith.constant 0 : i32
    %c0_i32_0 = arith.constant 0 : i32
    %c0_i32_1 = arith.constant 0 : i32
    return %c0_i32, %c0_i32_0 : i32, i32
  }
  func.func @transform_3(%arg0: i32, %arg1: i32) -> (i32, i32) {
    %c0_i32 = arith.constant 0 : i32
    %c0_i32_0 = arith.constant 0 : i32
    %c0_i32_1 = arith.constant 0 : i32
    return %c0_i32, %c0_i32_0 : i32, i32
  }
  func.func @transform_4(%arg0: i32, %arg1: i32) -> (i32, i32, i32) {
    %c0_i32 = arith.constant 0 : i32
    %c0_i32_0 = arith.constant 0 : i32
    return %arg1, %arg0, %c0_i32 : i32, i32, i32
  }
}

module attributes {stable_mosaic.version = 11 : i64} {
  func.func @_lstm_layer_kernel(%arg0: i32, %arg1: i32, %arg2: memref<8x8x8xf32, #tpu.memory_space<vmem>>, %arg3: memref<8x512xf32, #tpu.memory_space<vmem>>, %arg4: memref<128x512xf32, #tpu.memory_space<vmem>>, %arg5: memref<1x512xf32, #tpu.memory_space<vmem>>, %arg6: memref<8x8x128xf32, #tpu.memory_space<vmem>>, %arg7: memref<8x8x512xf32, #tpu.memory_space<vmem>>, %arg8: memref<8x128xf32, #tpu.memory_space<vmem>>, %arg9: memref<8x128xf32, #tpu.memory_space<vmem>>) attributes {dimension_semantics = [#tpu.dimension_semantics<parallel>, #tpu.dimension_semantics<arbitrary>], iteration_bounds = array<i64: 1, 1>, scalar_prefetch = 0 : i64, scratch_operands = 3 : i64, tpu.core_type = #tpu.core_type<tc>, window_params = [{transform_indices = @transform_0, window_bounds = array<i64: 8, 8, 8>}, {pipeline_mode = #tpu.pipeline_mode<synchronous>, transform_indices = @transform_1, window_bounds = array<i64: 8, 512>}, {pipeline_mode = #tpu.pipeline_mode<synchronous>, transform_indices = @transform_2, window_bounds = array<i64: 128, 512>}, {pipeline_mode = #tpu.pipeline_mode<synchronous>, transform_indices = @transform_3, window_bounds = array<i64: 1, 512>}, {transform_indices = @transform_4, window_bounds = array<i64: 8, 8, 128>}]} {
    %c0_i32 = arith.constant 0 : i32
    %0 = arith.cmpi eq, %arg1, %c0_i32 : i32
    %1 = arith.extui %0 : i1 to i32
    %c0_i32_0 = arith.constant 0 : i32
    %2 = arith.cmpi ne, %1, %c0_i32_0 : i32
    scf.if %2 {
      %cst_93 = arith.constant 0.000000e+00 : f32
      %273 = vector.broadcast %cst_93 : f32 to vector<8x128xf32>
      %c0_94 = arith.constant 0 : index
      %c0_95 = arith.constant 0 : index
      %274 = vector.load %arg8[%c0_94, %c0_95] : memref<8x128xf32, #tpu.memory_space<vmem>>, vector<8x128xf32>
      tpu.vector_store %arg8[%c0_94, %c0_95], %273 {strides = array<i32>} : memref<8x128xf32, #tpu.memory_space<vmem>>, vector<8x128xf32>,
      %cst_96 = arith.constant 0.000000e+00 : f32
      %275 = vector.broadcast %cst_96 : f32 to vector<8x128xf32>
      %c0_97 = arith.constant 0 : index
      %c0_98 = arith.constant 0 : index
      %276 = vector.load %arg9[%c0_97, %c0_98] : memref<8x128xf32, #tpu.memory_space<vmem>>, vector<8x128xf32>
      tpu.vector_store %arg9[%c0_97, %c0_98], %275 {strides = array<i32>} : memref<8x128xf32, #tpu.memory_space<vmem>>, vector<8x128xf32>,
    } else {
    }
    %c0 = arith.constant 0 : index
    %c0_1 = arith.constant 0 : index
    %c0_2 = arith.constant 0 : index
    %3 = vector.load %arg2[%c0, %c0_1, %c0_2] : memref<8x8x8xf32, #tpu.memory_space<vmem>>, vector<8x8x8xf32>
    %4 = vector.shape_cast %3 : vector<8x8x8xf32> to vector<64x8xf32>
    %c0_3 = arith.constant 0 : index
    %c0_4 = arith.constant 0 : index
    %5 = vector.load %arg3[%c0_3, %c0_4] : memref<8x512xf32, #tpu.memory_space<vmem>>, vector<8x512xf32>
    %cst = arith.constant dense<0.000000e+00> : vector<64x512xf32>
    %6 = tpu.matmul %4, %5, %cst {dimension_numbers = #tpu.dot_dimension_numbers<[1], [0], [0], [1], [0, 0, 1, 1], [], []>} : vector<64x8xf32>, vector<8x512xf32>, vector<64x512xf32> -> vector<64x512xf32>
    %c0_5 = arith.constant 0 : index
    %c0_6 = arith.constant 0 : index
    %7 = vector.load %arg5[%c0_5, %c0_6] : memref<1x512xf32, #tpu.memory_space<vmem>>, vector<1x512xf32>
    %8 = vector.broadcast %7 : vector<1x512xf32> to vector<64x512xf32>
    %9 = arith.addf %6, %8 : vector<64x512xf32>
    %10 = vector.shape_cast %9 : vector<64x512xf32> to vector<8x8x512xf32>
    %c0_7 = arith.constant 0 : index
    %c0_8 = arith.constant 0 : index
    %c0_9 = arith.constant 0 : index
    %11 = vector.load %arg7[%c0_7, %c0_8, %c0_9] : memref<8x8x512xf32, #tpu.memory_space<vmem>>, vector<8x8x512xf32>
    tpu.vector_store %arg7[%c0_7, %c0_8, %c0_9], %10 {strides = array<i32>} : memref<8x8x512xf32, #tpu.memory_space<vmem>>, vector<8x8x512xf32>,
    %c0_10 = arith.constant 0 : index
    %c0_11 = arith.constant 0 : index
    %12 = vector.load %arg4[%c0_10, %c0_11] : memref<128x512xf32, #tpu.memory_space<vmem>>, vector<128x512xf32>
    %c0_12 = arith.constant 0 : index
    %c0_13 = arith.constant 0 : index
    %13 = vector.load %arg8[%c0_12, %c0_13] : memref<8x128xf32, #tpu.memory_space<vmem>>, vector<8x128xf32>
    %c0_14 = arith.constant 0 : index
    %c0_15 = arith.constant 0 : index
    %14 = vector.load %arg9[%c0_14, %c0_15] : memref<8x128xf32, #tpu.memory_space<vmem>>, vector<8x128xf32>
    %c0_16 = arith.constant 0 : index
    %c0_17 = arith.constant 0 : index
    %c0_18 = arith.constant 0 : index
    %15 = vector.load %arg7[%c0_16, %c0_17, %c0_18] : memref<8x8x512xf32, #tpu.memory_space<vmem>>, vector<1x8x512xf32>
    %16 = vector.shape_cast %15 : vector<1x8x512xf32> to vector<8x512xf32>
    %cst_19 = arith.constant dense<0.000000e+00> : vector<8x512xf32>
    %17 = tpu.matmul %13, %12, %cst_19 {dimension_numbers = #tpu.dot_dimension_numbers<[1], [0], [0], [1], [0, 0, 1, 1], [], []>} : vector<8x128xf32>, vector<128x512xf32>, vector<8x512xf32> -> vector<8x512xf32>
    %18 = arith.addf %16, %17 : vector<8x512xf32>
    %19 = vector.extract_strided_slice %18 {offsets = [0, 0], sizes = [8, 128], strides = [1, 1]} : vector<8x512xf32> to vector<8x128xf32>
    %20 = arith.negf %19 : vector<8x128xf32>
    %21 = math.exp %20 : vector<8x128xf32>
    %cst_20 = arith.constant 1.000000e+00 : f32
    %22 = vector.broadcast %cst_20 : f32 to vector<8x128xf32>
    %23 = arith.addf %22, %21 : vector<8x128xf32>
    %24 = arith.divf %22, %23 : vector<8x128xf32>
    %25 = vector.extract_strided_slice %18 {offsets = [0, 128], sizes = [8, 128], strides = [1, 1]} : vector<8x512xf32> to vector<8x128xf32>
    %26 = arith.negf %25 : vector<8x128xf32>
    %27 = math.exp %26 : vector<8x128xf32>
    %cst_21 = arith.constant 1.000000e+00 : f32
    %28 = vector.broadcast %cst_21 : f32 to vector<8x128xf32>
    %29 = arith.addf %28, %27 : vector<8x128xf32>
    %30 = arith.divf %28, %29 : vector<8x128xf32>
    %31 = vector.extract_strided_slice %18 {offsets = [0, 256], sizes = [8, 128], strides = [1, 1]} : vector<8x512xf32> to vector<8x128xf32>
    %32 = math.tanh %31 : vector<8x128xf32>
    %33 = vector.extract_strided_slice %18 {offsets = [0, 384], sizes = [8, 128], strides = [1, 1]} : vector<8x512xf32> to vector<8x128xf32>
    %34 = arith.negf %33 : vector<8x128xf32>
    %35 = math.exp %34 : vector<8x128xf32>
    %cst_22 = arith.constant 1.000000e+00 : f32
    %36 = vector.broadcast %cst_22 : f32 to vector<8x128xf32>
    %37 = arith.addf %36, %35 : vector<8x128xf32>
    %38 = arith.divf %36, %37 : vector<8x128xf32>
    %39 = arith.mulf %30, %14 : vector<8x128xf32>
    %40 = arith.mulf %24, %32 : vector<8x128xf32>
    %41 = arith.addf %39, %40 : vector<8x128xf32>
    %42 = math.tanh %41 : vector<8x128xf32>
    %43 = arith.mulf %38, %42 : vector<8x128xf32>
    %c0_23 = arith.constant 0 : index
    %c0_24 = arith.constant 0 : index
    %c0_25 = arith.constant 0 : index
    %44 = vector.load %arg6[%c0_23, %c0_24, %c0_25] : memref<8x8x128xf32, #tpu.memory_space<vmem>>, vector<1x8x128xf32>
    %45 = vector.shape_cast %44 : vector<1x8x128xf32> to vector<8x128xf32>
    %46 = vector.shape_cast %43 : vector<8x128xf32> to vector<1x8x128xf32>
    tpu.vector_store %arg6[%c0_23, %c0_24, %c0_25], %46 {strides = array<i32>} : memref<8x8x128xf32, #tpu.memory_space<vmem>>, vector<1x8x128xf32>,
    %c1 = arith.constant 1 : index
    %c0_26 = arith.constant 0 : index
    %c0_27 = arith.constant 0 : index
    %47 = vector.load %arg7[%c1, %c0_26, %c0_27] : memref<8x8x512xf32, #tpu.memory_space<vmem>>, vector<1x8x512xf32>
    %48 = vector.shape_cast %47 : vector<1x8x512xf32> to vector<8x512xf32>
    %cst_28 = arith.constant dense<0.000000e+00> : vector<8x512xf32>
    %49 = tpu.matmul %43, %12, %cst_28 {dimension_numbers = #tpu.dot_dimension_numbers<[1], [0], [0], [1], [0, 0, 1, 1], [], []>} : vector<8x128xf32>, vector<128x512xf32>, vector<8x512xf32> -> vector<8x512xf32>
    %50 = arith.addf %48, %49 : vector<8x512xf32>
    %51 = vector.extract_strided_slice %50 {offsets = [0, 0], sizes = [8, 128], strides = [1, 1]} : vector<8x512xf32> to vector<8x128xf32>
    %52 = arith.negf %51 : vector<8x128xf32>
    %53 = math.exp %52 : vector<8x128xf32>
    %cst_29 = arith.constant 1.000000e+00 : f32
    %54 = vector.broadcast %cst_29 : f32 to vector<8x128xf32>
    %55 = arith.addf %54, %53 : vector<8x128xf32>
    %56 = arith.divf %54, %55 : vector<8x128xf32>
    %57 = vector.extract_strided_slice %50 {offsets = [0, 128], sizes = [8, 128], strides = [1, 1]} : vector<8x512xf32> to vector<8x128xf32>
    %58 = arith.negf %57 : vector<8x128xf32>
    %59 = math.exp %58 : vector<8x128xf32>
    %cst_30 = arith.constant 1.000000e+00 : f32
    %60 = vector.broadcast %cst_30 : f32 to vector<8x128xf32>
    %61 = arith.addf %60, %59 : vector<8x128xf32>
    %62 = arith.divf %60, %61 : vector<8x128xf32>
    %63 = vector.extract_strided_slice %50 {offsets = [0, 256], sizes = [8, 128], strides = [1, 1]} : vector<8x512xf32> to vector<8x128xf32>
    %64 = math.tanh %63 : vector<8x128xf32>
    %65 = vector.extract_strided_slice %50 {offsets = [0, 384], sizes = [8, 128], strides = [1, 1]} : vector<8x512xf32> to vector<8x128xf32>
    %66 = arith.negf %65 : vector<8x128xf32>
    %67 = math.exp %66 : vector<8x128xf32>
    %cst_31 = arith.constant 1.000000e+00 : f32
    %68 = vector.broadcast %cst_31 : f32 to vector<8x128xf32>
    %69 = arith.addf %68, %67 : vector<8x128xf32>
    %70 = arith.divf %68, %69 : vector<8x128xf32>
    %71 = arith.mulf %62, %41 : vector<8x128xf32>
    %72 = arith.mulf %56, %64 : vector<8x128xf32>
    %73 = arith.addf %71, %72 : vector<8x128xf32>
    %74 = math.tanh %73 : vector<8x128xf32>
    %75 = arith.mulf %70, %74 : vector<8x128xf32>
    %c1_32 = arith.constant 1 : index
    %c0_33 = arith.constant 0 : index
    %c0_34 = arith.constant 0 : index
    %76 = vector.load %arg6[%c1_32, %c0_33, %c0_34] : memref<8x8x128xf32, #tpu.memory_space<vmem>>, vector<1x8x128xf32>
    %77 = vector.shape_cast %76 : vector<1x8x128xf32> to vector<8x128xf32>
    %78 = vector.shape_cast %75 : vector<8x128xf32> to vector<1x8x128xf32>
    tpu.vector_store %arg6[%c1_32, %c0_33, %c0_34], %78 {strides = array<i32>} : memref<8x8x128xf32, #tpu.memory_space<vmem>>, vector<1x8x128xf32>,
    %c2 = arith.constant 2 : index
    %c0_35 = arith.constant 0 : index
    %c0_36 = arith.constant 0 : index
    %79 = vector.load %arg7[%c2, %c0_35, %c0_36] : memref<8x8x512xf32, #tpu.memory_space<vmem>>, vector<1x8x512xf32>
    %80 = vector.shape_cast %79 : vector<1x8x512xf32> to vector<8x512xf32>
    %cst_37 = arith.constant dense<0.000000e+00> : vector<8x512xf32>
    %81 = tpu.matmul %75, %12, %cst_37 {dimension_numbers = #tpu.dot_dimension_numbers<[1], [0], [0], [1], [0, 0, 1, 1], [], []>} : vector<8x128xf32>, vector<128x512xf32>, vector<8x512xf32> -> vector<8x512xf32>
    %82 = arith.addf %80, %81 : vector<8x512xf32>
    %83 = vector.extract_strided_slice %82 {offsets = [0, 0], sizes = [8, 128], strides = [1, 1]} : vector<8x512xf32> to vector<8x128xf32>
    %84 = arith.negf %83 : vector<8x128xf32>
    %85 = math.exp %84 : vector<8x128xf32>
    %cst_38 = arith.constant 1.000000e+00 : f32
    %86 = vector.broadcast %cst_38 : f32 to vector<8x128xf32>
    %87 = arith.addf %86, %85 : vector<8x128xf32>
    %88 = arith.divf %86, %87 : vector<8x128xf32>
    %89 = vector.extract_strided_slice %82 {offsets = [0, 128], sizes = [8, 128], strides = [1, 1]} : vector<8x512xf32> to vector<8x128xf32>
    %90 = arith.negf %89 : vector<8x128xf32>
    %91 = math.exp %90 : vector<8x128xf32>
    %cst_39 = arith.constant 1.000000e+00 : f32
    %92 = vector.broadcast %cst_39 : f32 to vector<8x128xf32>
    %93 = arith.addf %92, %91 : vector<8x128xf32>
    %94 = arith.divf %92, %93 : vector<8x128xf32>
    %95 = vector.extract_strided_slice %82 {offsets = [0, 256], sizes = [8, 128], strides = [1, 1]} : vector<8x512xf32> to vector<8x128xf32>
    %96 = math.tanh %95 : vector<8x128xf32>
    %97 = vector.extract_strided_slice %82 {offsets = [0, 384], sizes = [8, 128], strides = [1, 1]} : vector<8x512xf32> to vector<8x128xf32>
    %98 = arith.negf %97 : vector<8x128xf32>
    %99 = math.exp %98 : vector<8x128xf32>
    %cst_40 = arith.constant 1.000000e+00 : f32
    %100 = vector.broadcast %cst_40 : f32 to vector<8x128xf32>
    %101 = arith.addf %100, %99 : vector<8x128xf32>
    %102 = arith.divf %100, %101 : vector<8x128xf32>
    %103 = arith.mulf %94, %73 : vector<8x128xf32>
    %104 = arith.mulf %88, %96 : vector<8x128xf32>
    %105 = arith.addf %103, %104 : vector<8x128xf32>
    %106 = math.tanh %105 : vector<8x128xf32>
    %107 = arith.mulf %102, %106 : vector<8x128xf32>
    %c2_41 = arith.constant 2 : index
    %c0_42 = arith.constant 0 : index
    %c0_43 = arith.constant 0 : index
    %108 = vector.load %arg6[%c2_41, %c0_42, %c0_43] : memref<8x8x128xf32, #tpu.memory_space<vmem>>, vector<1x8x128xf32>
    %109 = vector.shape_cast %108 : vector<1x8x128xf32> to vector<8x128xf32>
    %110 = vector.shape_cast %107 : vector<8x128xf32> to vector<1x8x128xf32>
    tpu.vector_store %arg6[%c2_41, %c0_42, %c0_43], %110 {strides = array<i32>} : memref<8x8x128xf32, #tpu.memory_space<vmem>>, vector<1x8x128xf32>,
    %c3 = arith.constant 3 : index
    %c0_44 = arith.constant 0 : index
    %c0_45 = arith.constant 0 : index
    %111 = vector.load %arg7[%c3, %c0_44, %c0_45] : memref<8x8x512xf32, #tpu.memory_space<vmem>>, vector<1x8x512xf32>
    %112 = vector.shape_cast %111 : vector<1x8x512xf32> to vector<8x512xf32>
    %cst_46 = arith.constant dense<0.000000e+00> : vector<8x512xf32>
    %113 = tpu.matmul %107, %12, %cst_46 {dimension_numbers = #tpu.dot_dimension_numbers<[1], [0], [0], [1], [0, 0, 1, 1], [], []>} : vector<8x128xf32>, vector<128x512xf32>, vector<8x512xf32> -> vector<8x512xf32>
    %114 = arith.addf %112, %113 : vector<8x512xf32>
    %115 = vector.extract_strided_slice %114 {offsets = [0, 0], sizes = [8, 128], strides = [1, 1]} : vector<8x512xf32> to vector<8x128xf32>
    %116 = arith.negf %115 : vector<8x128xf32>
    %117 = math.exp %116 : vector<8x128xf32>
    %cst_47 = arith.constant 1.000000e+00 : f32
    %118 = vector.broadcast %cst_47 : f32 to vector<8x128xf32>
    %119 = arith.addf %118, %117 : vector<8x128xf32>
    %120 = arith.divf %118, %119 : vector<8x128xf32>
    %121 = vector.extract_strided_slice %114 {offsets = [0, 128], sizes = [8, 128], strides = [1, 1]} : vector<8x512xf32> to vector<8x128xf32>
    %122 = arith.negf %121 : vector<8x128xf32>
    %123 = math.exp %122 : vector<8x128xf32>
    %cst_48 = arith.constant 1.000000e+00 : f32
    %124 = vector.broadcast %cst_48 : f32 to vector<8x128xf32>
    %125 = arith.addf %124, %123 : vector<8x128xf32>
    %126 = arith.divf %124, %125 : vector<8x128xf32>
    %127 = vector.extract_strided_slice %114 {offsets = [0, 256], sizes = [8, 128], strides = [1, 1]} : vector<8x512xf32> to vector<8x128xf32>
    %128 = math.tanh %127 : vector<8x128xf32>
    %129 = vector.extract_strided_slice %114 {offsets = [0, 384], sizes = [8, 128], strides = [1, 1]} : vector<8x512xf32> to vector<8x128xf32>
    %130 = arith.negf %129 : vector<8x128xf32>
    %131 = math.exp %130 : vector<8x128xf32>
    %cst_49 = arith.constant 1.000000e+00 : f32
    %132 = vector.broadcast %cst_49 : f32 to vector<8x128xf32>
    %133 = arith.addf %132, %131 : vector<8x128xf32>
    %134 = arith.divf %132, %133 : vector<8x128xf32>
    %135 = arith.mulf %126, %105 : vector<8x128xf32>
    %136 = arith.mulf %120, %128 : vector<8x128xf32>
    %137 = arith.addf %135, %136 : vector<8x128xf32>
    %138 = math.tanh %137 : vector<8x128xf32>
    %139 = arith.mulf %134, %138 : vector<8x128xf32>
    %c3_50 = arith.constant 3 : index
    %c0_51 = arith.constant 0 : index
    %c0_52 = arith.constant 0 : index
    %140 = vector.load %arg6[%c3_50, %c0_51, %c0_52] : memref<8x8x128xf32, #tpu.memory_space<vmem>>, vector<1x8x128xf32>
    %141 = vector.shape_cast %140 : vector<1x8x128xf32> to vector<8x128xf32>
    %142 = vector.shape_cast %139 : vector<8x128xf32> to vector<1x8x128xf32>
    tpu.vector_store %arg6[%c3_50, %c0_51, %c0_52], %142 {strides = array<i32>} : memref<8x8x128xf32, #tpu.memory_space<vmem>>, vector<1x8x128xf32>,
    %c4 = arith.constant 4 : index
    %c0_53 = arith.constant 0 : index
    %c0_54 = arith.constant 0 : index
    %143 = vector.load %arg7[%c4, %c0_53, %c0_54] : memref<8x8x512xf32, #tpu.memory_space<vmem>>, vector<1x8x512xf32>
    %144 = vector.shape_cast %143 : vector<1x8x512xf32> to vector<8x512xf32>
    %cst_55 = arith.constant dense<0.000000e+00> : vector<8x512xf32>
    %145 = tpu.matmul %139, %12, %cst_55 {dimension_numbers = #tpu.dot_dimension_numbers<[1], [0], [0], [1], [0, 0, 1, 1], [], []>} : vector<8x128xf32>, vector<128x512xf32>, vector<8x512xf32> -> vector<8x512xf32>
    %146 = arith.addf %144, %145 : vector<8x512xf32>
    %147 = vector.extract_strided_slice %146 {offsets = [0, 0], sizes = [8, 128], strides = [1, 1]} : vector<8x512xf32> to vector<8x128xf32>
    %148 = arith.negf %147 : vector<8x128xf32>
    %149 = math.exp %148 : vector<8x128xf32>
    %cst_56 = arith.constant 1.000000e+00 : f32
    %150 = vector.broadcast %cst_56 : f32 to vector<8x128xf32>
    %151 = arith.addf %150, %149 : vector<8x128xf32>
    %152 = arith.divf %150, %151 : vector<8x128xf32>
    %153 = vector.extract_strided_slice %146 {offsets = [0, 128], sizes = [8, 128], strides = [1, 1]} : vector<8x512xf32> to vector<8x128xf32>
    %154 = arith.negf %153 : vector<8x128xf32>
    %155 = math.exp %154 : vector<8x128xf32>
    %cst_57 = arith.constant 1.000000e+00 : f32
    %156 = vector.broadcast %cst_57 : f32 to vector<8x128xf32>
    %157 = arith.addf %156, %155 : vector<8x128xf32>
    %158 = arith.divf %156, %157 : vector<8x128xf32>
    %159 = vector.extract_strided_slice %146 {offsets = [0, 256], sizes = [8, 128], strides = [1, 1]} : vector<8x512xf32> to vector<8x128xf32>
    %160 = math.tanh %159 : vector<8x128xf32>
    %161 = vector.extract_strided_slice %146 {offsets = [0, 384], sizes = [8, 128], strides = [1, 1]} : vector<8x512xf32> to vector<8x128xf32>
    %162 = arith.negf %161 : vector<8x128xf32>
    %163 = math.exp %162 : vector<8x128xf32>
    %cst_58 = arith.constant 1.000000e+00 : f32
    %164 = vector.broadcast %cst_58 : f32 to vector<8x128xf32>
    %165 = arith.addf %164, %163 : vector<8x128xf32>
    %166 = arith.divf %164, %165 : vector<8x128xf32>
    %167 = arith.mulf %158, %137 : vector<8x128xf32>
    %168 = arith.mulf %152, %160 : vector<8x128xf32>
    %169 = arith.addf %167, %168 : vector<8x128xf32>
    %170 = math.tanh %169 : vector<8x128xf32>
    %171 = arith.mulf %166, %170 : vector<8x128xf32>
    %c4_59 = arith.constant 4 : index
    %c0_60 = arith.constant 0 : index
    %c0_61 = arith.constant 0 : index
    %172 = vector.load %arg6[%c4_59, %c0_60, %c0_61] : memref<8x8x128xf32, #tpu.memory_space<vmem>>, vector<1x8x128xf32>
    %173 = vector.shape_cast %172 : vector<1x8x128xf32> to vector<8x128xf32>
    %174 = vector.shape_cast %171 : vector<8x128xf32> to vector<1x8x128xf32>
    tpu.vector_store %arg6[%c4_59, %c0_60, %c0_61], %174 {strides = array<i32>} : memref<8x8x128xf32, #tpu.memory_space<vmem>>, vector<1x8x128xf32>,
    %c5 = arith.constant 5 : index
    %c0_62 = arith.constant 0 : index
    %c0_63 = arith.constant 0 : index
    %175 = vector.load %arg7[%c5, %c0_62, %c0_63] : memref<8x8x512xf32, #tpu.memory_space<vmem>>, vector<1x8x512xf32>
    %176 = vector.shape_cast %175 : vector<1x8x512xf32> to vector<8x512xf32>
    %cst_64 = arith.constant dense<0.000000e+00> : vector<8x512xf32>
    %177 = tpu.matmul %171, %12, %cst_64 {dimension_numbers = #tpu.dot_dimension_numbers<[1], [0], [0], [1], [0, 0, 1, 1], [], []>} : vector<8x128xf32>, vector<128x512xf32>, vector<8x512xf32> -> vector<8x512xf32>
    %178 = arith.addf %176, %177 : vector<8x512xf32>
    %179 = vector.extract_strided_slice %178 {offsets = [0, 0], sizes = [8, 128], strides = [1, 1]} : vector<8x512xf32> to vector<8x128xf32>
    %180 = arith.negf %179 : vector<8x128xf32>
    %181 = math.exp %180 : vector<8x128xf32>
    %cst_65 = arith.constant 1.000000e+00 : f32
    %182 = vector.broadcast %cst_65 : f32 to vector<8x128xf32>
    %183 = arith.addf %182, %181 : vector<8x128xf32>
    %184 = arith.divf %182, %183 : vector<8x128xf32>
    %185 = vector.extract_strided_slice %178 {offsets = [0, 128], sizes = [8, 128], strides = [1, 1]} : vector<8x512xf32> to vector<8x128xf32>
    %186 = arith.negf %185 : vector<8x128xf32>
    %187 = math.exp %186 : vector<8x128xf32>
    %cst_66 = arith.constant 1.000000e+00 : f32
    %188 = vector.broadcast %cst_66 : f32 to vector<8x128xf32>
    %189 = arith.addf %188, %187 : vector<8x128xf32>
    %190 = arith.divf %188, %189 : vector<8x128xf32>
    %191 = vector.extract_strided_slice %178 {offsets = [0, 256], sizes = [8, 128], strides = [1, 1]} : vector<8x512xf32> to vector<8x128xf32>
    %192 = math.tanh %191 : vector<8x128xf32>
    %193 = vector.extract_strided_slice %178 {offsets = [0, 384], sizes = [8, 128], strides = [1, 1]} : vector<8x512xf32> to vector<8x128xf32>
    %194 = arith.negf %193 : vector<8x128xf32>
    %195 = math.exp %194 : vector<8x128xf32>
    %cst_67 = arith.constant 1.000000e+00 : f32
    %196 = vector.broadcast %cst_67 : f32 to vector<8x128xf32>
    %197 = arith.addf %196, %195 : vector<8x128xf32>
    %198 = arith.divf %196, %197 : vector<8x128xf32>
    %199 = arith.mulf %190, %169 : vector<8x128xf32>
    %200 = arith.mulf %184, %192 : vector<8x128xf32>
    %201 = arith.addf %199, %200 : vector<8x128xf32>
    %202 = math.tanh %201 : vector<8x128xf32>
    %203 = arith.mulf %198, %202 : vector<8x128xf32>
    %c5_68 = arith.constant 5 : index
    %c0_69 = arith.constant 0 : index
    %c0_70 = arith.constant 0 : index
    %204 = vector.load %arg6[%c5_68, %c0_69, %c0_70] : memref<8x8x128xf32, #tpu.memory_space<vmem>>, vector<1x8x128xf32>
    %205 = vector.shape_cast %204 : vector<1x8x128xf32> to vector<8x128xf32>
    %206 = vector.shape_cast %203 : vector<8x128xf32> to vector<1x8x128xf32>
    tpu.vector_store %arg6[%c5_68, %c0_69, %c0_70], %206 {strides = array<i32>} : memref<8x8x128xf32, #tpu.memory_space<vmem>>, vector<1x8x128xf32>,
    %c6 = arith.constant 6 : index
    %c0_71 = arith.constant 0 : index
    %c0_72 = arith.constant 0 : index
    %207 = vector.load %arg7[%c6, %c0_71, %c0_72] : memref<8x8x512xf32, #tpu.memory_space<vmem>>, vector<1x8x512xf32>
    %208 = vector.shape_cast %207 : vector<1x8x512xf32> to vector<8x512xf32>
    %cst_73 = arith.constant dense<0.000000e+00> : vector<8x512xf32>
    %209 = tpu.matmul %203, %12, %cst_73 {dimension_numbers = #tpu.dot_dimension_numbers<[1], [0], [0], [1], [0, 0, 1, 1], [], []>} : vector<8x128xf32>, vector<128x512xf32>, vector<8x512xf32> -> vector<8x512xf32>
    %210 = arith.addf %208, %209 : vector<8x512xf32>
    %211 = vector.extract_strided_slice %210 {offsets = [0, 0], sizes = [8, 128], strides = [1, 1]} : vector<8x512xf32> to vector<8x128xf32>
    %212 = arith.negf %211 : vector<8x128xf32>
    %213 = math.exp %212 : vector<8x128xf32>
    %cst_74 = arith.constant 1.000000e+00 : f32
    %214 = vector.broadcast %cst_74 : f32 to vector<8x128xf32>
    %215 = arith.addf %214, %213 : vector<8x128xf32>
    %216 = arith.divf %214, %215 : vector<8x128xf32>
    %217 = vector.extract_strided_slice %210 {offsets = [0, 128], sizes = [8, 128], strides = [1, 1]} : vector<8x512xf32> to vector<8x128xf32>
    %218 = arith.negf %217 : vector<8x128xf32>
    %219 = math.exp %218 : vector<8x128xf32>
    %cst_75 = arith.constant 1.000000e+00 : f32
    %220 = vector.broadcast %cst_75 : f32 to vector<8x128xf32>
    %221 = arith.addf %220, %219 : vector<8x128xf32>
    %222 = arith.divf %220, %221 : vector<8x128xf32>
    %223 = vector.extract_strided_slice %210 {offsets = [0, 256], sizes = [8, 128], strides = [1, 1]} : vector<8x512xf32> to vector<8x128xf32>
    %224 = math.tanh %223 : vector<8x128xf32>
    %225 = vector.extract_strided_slice %210 {offsets = [0, 384], sizes = [8, 128], strides = [1, 1]} : vector<8x512xf32> to vector<8x128xf32>
    %226 = arith.negf %225 : vector<8x128xf32>
    %227 = math.exp %226 : vector<8x128xf32>
    %cst_76 = arith.constant 1.000000e+00 : f32
    %228 = vector.broadcast %cst_76 : f32 to vector<8x128xf32>
    %229 = arith.addf %228, %227 : vector<8x128xf32>
    %230 = arith.divf %228, %229 : vector<8x128xf32>
    %231 = arith.mulf %222, %201 : vector<8x128xf32>
    %232 = arith.mulf %216, %224 : vector<8x128xf32>
    %233 = arith.addf %231, %232 : vector<8x128xf32>
    %234 = math.tanh %233 : vector<8x128xf32>
    %235 = arith.mulf %230, %234 : vector<8x128xf32>
    %c6_77 = arith.constant 6 : index
    %c0_78 = arith.constant 0 : index
    %c0_79 = arith.constant 0 : index
    %236 = vector.load %arg6[%c6_77, %c0_78, %c0_79] : memref<8x8x128xf32, #tpu.memory_space<vmem>>, vector<1x8x128xf32>
    %237 = vector.shape_cast %236 : vector<1x8x128xf32> to vector<8x128xf32>
    %238 = vector.shape_cast %235 : vector<8x128xf32> to vector<1x8x128xf32>
    tpu.vector_store %arg6[%c6_77, %c0_78, %c0_79], %238 {strides = array<i32>} : memref<8x8x128xf32, #tpu.memory_space<vmem>>, vector<1x8x128xf32>,
    %c7 = arith.constant 7 : index
    %c0_80 = arith.constant 0 : index
    %c0_81 = arith.constant 0 : index
    %239 = vector.load %arg7[%c7, %c0_80, %c0_81] : memref<8x8x512xf32, #tpu.memory_space<vmem>>, vector<1x8x512xf32>
    %240 = vector.shape_cast %239 : vector<1x8x512xf32> to vector<8x512xf32>
    %cst_82 = arith.constant dense<0.000000e+00> : vector<8x512xf32>
    %241 = tpu.matmul %235, %12, %cst_82 {dimension_numbers = #tpu.dot_dimension_numbers<[1], [0], [0], [1], [0, 0, 1, 1], [], []>} : vector<8x128xf32>, vector<128x512xf32>, vector<8x512xf32> -> vector<8x512xf32>
    %242 = arith.addf %240, %241 : vector<8x512xf32>
    %243 = vector.extract_strided_slice %242 {offsets = [0, 0], sizes = [8, 128], strides = [1, 1]} : vector<8x512xf32> to vector<8x128xf32>
    %244 = arith.negf %243 : vector<8x128xf32>
    %245 = math.exp %244 : vector<8x128xf32>
    %cst_83 = arith.constant 1.000000e+00 : f32
    %246 = vector.broadcast %cst_83 : f32 to vector<8x128xf32>
    %247 = arith.addf %246, %245 : vector<8x128xf32>
    %248 = arith.divf %246, %247 : vector<8x128xf32>
    %249 = vector.extract_strided_slice %242 {offsets = [0, 128], sizes = [8, 128], strides = [1, 1]} : vector<8x512xf32> to vector<8x128xf32>
    %250 = arith.negf %249 : vector<8x128xf32>
    %251 = math.exp %250 : vector<8x128xf32>
    %cst_84 = arith.constant 1.000000e+00 : f32
    %252 = vector.broadcast %cst_84 : f32 to vector<8x128xf32>
    %253 = arith.addf %252, %251 : vector<8x128xf32>
    %254 = arith.divf %252, %253 : vector<8x128xf32>
    %255 = vector.extract_strided_slice %242 {offsets = [0, 256], sizes = [8, 128], strides = [1, 1]} : vector<8x512xf32> to vector<8x128xf32>
    %256 = math.tanh %255 : vector<8x128xf32>
    %257 = vector.extract_strided_slice %242 {offsets = [0, 384], sizes = [8, 128], strides = [1, 1]} : vector<8x512xf32> to vector<8x128xf32>
    %258 = arith.negf %257 : vector<8x128xf32>
    %259 = math.exp %258 : vector<8x128xf32>
    %cst_85 = arith.constant 1.000000e+00 : f32
    %260 = vector.broadcast %cst_85 : f32 to vector<8x128xf32>
    %261 = arith.addf %260, %259 : vector<8x128xf32>
    %262 = arith.divf %260, %261 : vector<8x128xf32>
    %263 = arith.mulf %254, %233 : vector<8x128xf32>
    %264 = arith.mulf %248, %256 : vector<8x128xf32>
    %265 = arith.addf %263, %264 : vector<8x128xf32>
    %266 = math.tanh %265 : vector<8x128xf32>
    %267 = arith.mulf %262, %266 : vector<8x128xf32>
    %c7_86 = arith.constant 7 : index
    %c0_87 = arith.constant 0 : index
    %c0_88 = arith.constant 0 : index
    %268 = vector.load %arg6[%c7_86, %c0_87, %c0_88] : memref<8x8x128xf32, #tpu.memory_space<vmem>>, vector<1x8x128xf32>
    %269 = vector.shape_cast %268 : vector<1x8x128xf32> to vector<8x128xf32>
    %270 = vector.shape_cast %267 : vector<8x128xf32> to vector<1x8x128xf32>
    tpu.vector_store %arg6[%c7_86, %c0_87, %c0_88], %270 {strides = array<i32>} : memref<8x8x128xf32, #tpu.memory_space<vmem>>, vector<1x8x128xf32>,
    %c0_89 = arith.constant 0 : index
    %c0_90 = arith.constant 0 : index
    %271 = vector.load %arg8[%c0_89, %c0_90] : memref<8x128xf32, #tpu.memory_space<vmem>>, vector<8x128xf32>
    tpu.vector_store %arg8[%c0_89, %c0_90], %267 {strides = array<i32>} : memref<8x128xf32, #tpu.memory_space<vmem>>, vector<8x128xf32>,
    %c0_91 = arith.constant 0 : index
    %c0_92 = arith.constant 0 : index
    %272 = vector.load %arg9[%c0_91, %c0_92] : memref<8x128xf32, #tpu.memory_space<vmem>>, vector<8x128xf32>
    tpu.vector_store %arg9[%c0_91, %c0_92], %265 {strides = array<i32>} : memref<8x128xf32, #tpu.memory_space<vmem>>, vector<8x128xf32>,
    return
  }
  func.func @transform_0(%arg0: i32, %arg1: i32) -> (i32, i32, i32) {
    %c0_i32 = arith.constant 0 : i32
    %c0_i32_0 = arith.constant 0 : i32
    return %arg1, %arg0, %c0_i32 : i32, i32, i32
  }
  func.func @transform_1(%arg0: i32, %arg1: i32) -> (i32, i32) {
    %c0_i32 = arith.constant 0 : i32
    %c0_i32_0 = arith.constant 0 : i32
    %c0_i32_1 = arith.constant 0 : i32
    return %c0_i32, %c0_i32_0 : i32, i32
  }
  func.func @transform_2(%arg0: i32, %arg1: i32) -> (i32, i32) {
    %c0_i32 = arith.constant 0 : i32
    %c0_i32_0 = arith.constant 0 : i32
    %c0_i32_1 = arith.constant 0 : i32
    return %c0_i32, %c0_i32_0 : i32, i32
  }
  func.func @transform_3(%arg0: i32, %arg1: i32) -> (i32, i32) {
    %c0_i32 = arith.constant 0 : i32
    %c0_i32_0 = arith.constant 0 : i32
    %c0_i32_1 = arith.constant 0 : i32
    return %c0_i32, %c0_i32_0 : i32, i32
  }
  func.func @transform_4(%arg0: i32, %arg1: i32) -> (i32, i32, i32) {
    %c0_i32 = arith.constant 0 : i32
    %c0_i32_0 = arith.constant 0 : i32
    return %arg1, %arg0, %c0_i32 : i32, i32, i32
  }
}

module attributes {stable_mosaic.version = 11 : i64} {
  func.func @_attn_fc_kernel(%arg0: i32, %arg1: i32, %arg2: memref<8x8x128xf32, #tpu.memory_space<vmem>>, %arg3: memref<128x1xf32, #tpu.memory_space<vmem>>, %arg4: memref<1x1xf32, #tpu.memory_space<vmem>>, %arg5: memref<128x4xf32, #tpu.memory_space<vmem>>, %arg6: memref<1x4xf32, #tpu.memory_space<vmem>>, %arg7: memref<8x4xf32, #tpu.memory_space<vmem>>, %arg8: memref<8x8x1xf32, #tpu.memory_space<vmem>>, %arg9: memref<8x1xf32, #tpu.memory_space<vmem>>, %arg10: memref<8x128xf32, #tpu.memory_space<vmem>>) attributes {dimension_semantics = [#tpu.dimension_semantics<parallel>, #tpu.dimension_semantics<arbitrary>], iteration_bounds = array<i64: 1, 1>, scalar_prefetch = 0 : i64, scratch_operands = 2 : i64, tpu.core_type = #tpu.core_type<tc>, window_params = [{transform_indices = @transform_0, window_bounds = array<i64: 8, 8, 128>}, {pipeline_mode = #tpu.pipeline_mode<synchronous>, transform_indices = @transform_1, window_bounds = array<i64: 128, 1>}, {pipeline_mode = #tpu.pipeline_mode<synchronous>, transform_indices = @transform_2, window_bounds = array<i64: 1, 1>}, {pipeline_mode = #tpu.pipeline_mode<synchronous>, transform_indices = @transform_3, window_bounds = array<i64: 128, 4>}, {pipeline_mode = #tpu.pipeline_mode<synchronous>, transform_indices = @transform_4, window_bounds = array<i64: 1, 4>}, {transform_indices = @transform_5, window_bounds = array<i64: 8, 4>}, {transform_indices = @transform_6, window_bounds = array<i64: 8, 8, 1>}]} {
    %c0_i32 = arith.constant 0 : i32
    %0 = arith.cmpi eq, %arg1, %c0_i32 : i32
    %1 = arith.extui %0 : i1 to i32
    %c0_i32_0 = arith.constant 0 : i32
    %2 = arith.cmpi ne, %1, %c0_i32_0 : i32
    scf.if %2 {
      %cst_22 = arith.constant 0.000000e+00 : f32
      %27 = vector.broadcast %cst_22 : f32 to vector<8x1xf32>
      %c0_23 = arith.constant 0 : index
      %c0_24 = arith.constant 0 : index
      %28 = vector.load %arg9[%c0_23, %c0_24] : memref<8x1xf32, #tpu.memory_space<vmem>>, vector<8x1xf32>
      tpu.vector_store %arg9[%c0_23, %c0_24], %27 {strides = array<i32>} : memref<8x1xf32, #tpu.memory_space<vmem>>, vector<8x1xf32>,
      %cst_25 = arith.constant 0.000000e+00 : f32
      %29 = vector.broadcast %cst_25 : f32 to vector<8x128xf32>
      %c0_26 = arith.constant 0 : index
      %c0_27 = arith.constant 0 : index
      %30 = vector.load %arg10[%c0_26, %c0_27] : memref<8x128xf32, #tpu.memory_space<vmem>>, vector<8x128xf32>
      tpu.vector_store %arg10[%c0_26, %c0_27], %29 {strides = array<i32>} : memref<8x128xf32, #tpu.memory_space<vmem>>, vector<8x128xf32>,
    } else {
    }
    %c0 = arith.constant 0 : index
    %c0_1 = arith.constant 0 : index
    %c0_2 = arith.constant 0 : index
    %3 = vector.load %arg2[%c0, %c0_1, %c0_2] : memref<8x8x128xf32, #tpu.memory_space<vmem>>, vector<8x8x128xf32>
    %4 = vector.shape_cast %3 : vector<8x8x128xf32> to vector<64x128xf32>
    %c0_3 = arith.constant 0 : index
    %c0_4 = arith.constant 0 : index
    %5 = vector.load %arg3[%c0_3, %c0_4] : memref<128x1xf32, #tpu.memory_space<vmem>>, vector<128x1xf32>
    %cst = arith.constant dense<0.000000e+00> : vector<64x1xf32>
    %6 = tpu.matmul %4, %5, %cst {dimension_numbers = #tpu.dot_dimension_numbers<[1], [0], [0], [1], [0, 0, 1, 1], [], []>} : vector<64x128xf32>, vector<128x1xf32>, vector<64x1xf32> -> vector<64x1xf32>
    %c0_5 = arith.constant 0 : index
    %c0_6 = arith.constant 0 : index
    %7 = vector.load %arg4[%c0_5, %c0_6] : memref<1x1xf32, #tpu.memory_space<vmem>>, vector<1x1xf32>
    %8 = vector.broadcast %7 : vector<1x1xf32> to vector<64x1xf32>
    %9 = arith.addf %6, %8 : vector<64x1xf32>
    %10 = math.tanh %9 : vector<64x1xf32>
    %11 = vector.shape_cast %10 : vector<64x1xf32> to vector<8x8x1xf32>
    %12 = math.exp %11 : vector<8x8x1xf32>
    %c0_7 = arith.constant 0 : index
    %c0_8 = arith.constant 0 : index
    %c0_9 = arith.constant 0 : index
    %13 = vector.load %arg8[%c0_7, %c0_8, %c0_9] : memref<8x8x1xf32, #tpu.memory_space<vmem>>, vector<8x8x1xf32>
    tpu.vector_store %arg8[%c0_7, %c0_8, %c0_9], %12 {strides = array<i32>} : memref<8x8x1xf32, #tpu.memory_space<vmem>>, vector<8x8x1xf32>,
    %c0_10 = arith.constant 0 : index
    %c0_11 = arith.constant 0 : index
    %14 = vector.load %arg9[%c0_10, %c0_11] : memref<8x1xf32, #tpu.memory_space<vmem>>, vector<8x1xf32>
    %cst_12 = arith.constant dense<0.000000e+00> : vector<8x1xf32>
    %15 = vector.multi_reduction <add>, %12, %cst_12 [0] : vector<8x8x1xf32> to vector<8x1xf32>
    %16 = arith.addf %14, %15 : vector<8x1xf32>
    %c0_13 = arith.constant 0 : index
    %c0_14 = arith.constant 0 : index
    %17 = vector.load %arg9[%c0_13, %c0_14] : memref<8x1xf32, #tpu.memory_space<vmem>>, vector<8x1xf32>
    tpu.vector_store %arg9[%c0_13, %c0_14], %16 {strides = array<i32>} : memref<8x1xf32, #tpu.memory_space<vmem>>, vector<8x1xf32>,
    %c0_15 = arith.constant 0 : index
    %c0_16 = arith.constant 0 : index
    %18 = vector.load %arg10[%c0_15, %c0_16] : memref<8x128xf32, #tpu.memory_space<vmem>>, vector<8x128xf32>
    %19 = vector.broadcast %12 : vector<8x8x1xf32> to vector<8x8x128xf32>
    %20 = arith.mulf %19, %3 : vector<8x8x128xf32>
    %cst_17 = arith.constant dense<0.000000e+00> : vector<8x128xf32>
    %21 = vector.multi_reduction <add>, %20, %cst_17 [0] : vector<8x8x128xf32> to vector<8x128xf32>
    %22 = arith.addf %18, %21 : vector<8x128xf32>
    %c0_18 = arith.constant 0 : index
    %c0_19 = arith.constant 0 : index
    %23 = vector.load %arg10[%c0_18, %c0_19] : memref<8x128xf32, #tpu.memory_space<vmem>>, vector<8x128xf32>
    tpu.vector_store %arg10[%c0_18, %c0_19], %22 {strides = array<i32>} : memref<8x128xf32, #tpu.memory_space<vmem>>, vector<8x128xf32>,
    %c0_i32_20 = arith.constant 0 : i32
    %24 = arith.cmpi eq, %arg1, %c0_i32_20 : i32
    %25 = arith.extui %24 : i1 to i32
    %c0_i32_21 = arith.constant 0 : i32
    %26 = arith.cmpi ne, %25, %c0_i32_21 : i32
    scf.if %26 {
      %c0_22 = arith.constant 0 : index
      %c0_23 = arith.constant 0 : index
      %27 = vector.load %arg10[%c0_22, %c0_23] : memref<8x128xf32, #tpu.memory_space<vmem>>, vector<8x128xf32>
      %c0_24 = arith.constant 0 : index
      %c0_25 = arith.constant 0 : index
      %28 = vector.load %arg9[%c0_24, %c0_25] : memref<8x1xf32, #tpu.memory_space<vmem>>, vector<8x1xf32>
      %29 = vector.broadcast %28 : vector<8x1xf32> to vector<8x128xf32>
      %30 = arith.divf %27, %29 : vector<8x128xf32>
      %c0_26 = arith.constant 0 : index
      %c0_27 = arith.constant 0 : index
      %31 = vector.load %arg5[%c0_26, %c0_27] : memref<128x4xf32, #tpu.memory_space<vmem>>, vector<128x4xf32>
      %cst_28 = arith.constant dense<0.000000e+00> : vector<8x4xf32>
      %32 = tpu.matmul %30, %31, %cst_28 {dimension_numbers = #tpu.dot_dimension_numbers<[1], [0], [0], [1], [0, 0, 1, 1], [], []>} : vector<8x128xf32>, vector<128x4xf32>, vector<8x4xf32> -> vector<8x4xf32>
      %c0_29 = arith.constant 0 : index
      %c0_30 = arith.constant 0 : index
      %33 = vector.load %arg6[%c0_29, %c0_30] : memref<1x4xf32, #tpu.memory_space<vmem>>, vector<1x4xf32>
      %34 = vector.broadcast %33 : vector<1x4xf32> to vector<8x4xf32>
      %35 = arith.addf %32, %34 : vector<8x4xf32>
      %c0_31 = arith.constant 0 : index
      %c0_32 = arith.constant 0 : index
      %36 = vector.load %arg7[%c0_31, %c0_32] : memref<8x4xf32, #tpu.memory_space<vmem>>, vector<8x4xf32>
      tpu.vector_store %arg7[%c0_31, %c0_32], %35 {strides = array<i32>} : memref<8x4xf32, #tpu.memory_space<vmem>>, vector<8x4xf32>,
    } else {
    }
    return
  }
  func.func @transform_0(%arg0: i32, %arg1: i32) -> (i32, i32, i32) {
    %c0_i32 = arith.constant 0 : i32
    %c0_i32_0 = arith.constant 0 : i32
    return %arg1, %arg0, %c0_i32 : i32, i32, i32
  }
  func.func @transform_1(%arg0: i32, %arg1: i32) -> (i32, i32) {
    %c0_i32 = arith.constant 0 : i32
    %c0_i32_0 = arith.constant 0 : i32
    %c0_i32_1 = arith.constant 0 : i32
    return %c0_i32, %c0_i32_0 : i32, i32
  }
  func.func @transform_2(%arg0: i32, %arg1: i32) -> (i32, i32) {
    %c0_i32 = arith.constant 0 : i32
    %c0_i32_0 = arith.constant 0 : i32
    %c0_i32_1 = arith.constant 0 : i32
    return %c0_i32, %c0_i32_0 : i32, i32
  }
  func.func @transform_3(%arg0: i32, %arg1: i32) -> (i32, i32) {
    %c0_i32 = arith.constant 0 : i32
    %c0_i32_0 = arith.constant 0 : i32
    %c0_i32_1 = arith.constant 0 : i32
    return %c0_i32, %c0_i32_0 : i32, i32
  }
  func.func @transform_4(%arg0: i32, %arg1: i32) -> (i32, i32) {
    %c0_i32 = arith.constant 0 : i32
    %c0_i32_0 = arith.constant 0 : i32
    %c0_i32_1 = arith.constant 0 : i32
    return %c0_i32, %c0_i32_0 : i32, i32
  }
  func.func @transform_5(%arg0: i32, %arg1: i32) -> (i32, i32) {
    %c0_i32 = arith.constant 0 : i32
    %c0_i32_0 = arith.constant 0 : i32
    return %arg0, %c0_i32 : i32, i32
  }
  func.func @transform_6(%arg0: i32, %arg1: i32) -> (i32, i32, i32) {
    %c0_i32 = arith.constant 0 : i32
    %c0_i32_0 = arith.constant 0 : i32
    return %arg1, %arg0, %c0_i32 : i32, i32, i32
  }
}

</mosaic_0001>

<bundles_post_ra>
// kernel: lstm_with_attention.5
= control target key start
LH: loop header
LB: loop body
LE: loop exit
PB: predicated region body
PF: predicated region fallthrough
CT: control target
= control target key end

     0   :  { %v357_v25 = vmov 0   ;;  %vm28_vm0 = vcmask 7168   ;;  %v358_v37 = vmov 0.0   ;;  %vm274_vm5 = vcmask 31744   ;;  %s602_s1 = inlined_call_operand.vmem [shape: f32[128,1], index: 1, kind: input, shape index: {}]   ;;  %s603_s2 = inlined_call_operand.<no memory space> [shape: f32[1,1], index: 2, kind: input, shape index: {}]   ;;  %s604_s0 = inlined_call_operand.vmem [shape: f32[8,8,128], index: 0, kind: input, shape index: {}]   ;;  %s605_s6 = inlined_call_operand.vmem [shape: f32[8,8,1], index: 6, kind: output, shape index: {1}]   ;;  %s606_s4 = inlined_call_operand.vmem [shape: f32[1,4], index: 4, kind: input, shape index: {}]   ;;  %s607_s3 = inlined_call_operand.vmem [shape: f32[128,4], index: 3, kind: input, shape index: {}]   ;;  %s608_s5 = inlined_call_operand.vmem [shape: f32[8,4], index: 5, kind: output, shape index: {0}]  }
   0x1   :  { %v54_v0 = vld [vmem:[%s602_s1 + $0x78] sm:$0xff]  ;;  %v53_v1 = vld [vmem:[%s602_s1 + $0x70] sm:$0xff]  ;;  %v52_v2 = vld [vmem:[%s602_s1 + $0x68] sm:$0xff]  ;;  %v12_v11 = vstv %s603_s2  ;;  %319 = vset.pattern.permute.xlu1 %v357_v25  ;;  %320 = vset.pattern.permute.xlu2 %v357_v25  ;;  %29 = vst.msk [vmem:[#allocation2] sm:$0xff] %vm28_vm0, %v358_v37 }
   0x2   :  { %59 = vmatpush.msra.mxu0 %v54_v0  ;;  %284 = vmatpush.msra.mxu2 %v54_v0  ;;  %v51_v3 = vld [vmem:[%s602_s1 + $0x60] sm:$0xff]  ;;  %v50_v4 = vld [vmem:[%s602_s1 + $0x58] sm:$0xff]  ;;  %v49_v5 = vld [vmem:[%s602_s1 + $0x50] sm:$0xff]  ;;  %13 = vst [vmem:[#allocation4] sm:$0x1] %v12_v11 }
   0x3   :  { %285 = vmatpush.msra.mxu3 %v54_v0  ;;  %v48_v6 = vld [vmem:[%s602_s1 + $0x48] sm:$0xff]  ;;  %v47_v7 = vld [vmem:[%s602_s1 + $0x40] sm:$0xff]  ;;  %v46_v8 = vld [vmem:[%s602_s1 + $0x38] sm:$0xff]  ;;  %318 = vset.pattern.permute.xlu0 %v357_v25 }
   0x4   :  { %60 = vmatpush.msra.mxu0 %v53_v1  ;;  %286 = vmatpush.msra.mxu2 %v53_v1  ;;  %v45_v9 = vld [vmem:[%s602_s1 + $0x30] sm:$0xff]  ;;  %v44_v10 = vld [vmem:[%s602_s1 + $0x28] sm:$0xff]  ;;  %v43_v12 = vld [vmem:[%s602_s1 + $0x20] sm:$0xff] }
   0x5   :  { %287 = vmatpush.msra.mxu3 %v53_v1  ;;  %v42_v13 = vld [vmem:[%s602_s1 + $0x18] sm:$0xff]  ;;  %v41_v14 = vld [vmem:[%s602_s1 + $0x10] sm:$0xff]  ;;  %v40_v15 = vld [vmem:[%s602_s1 + $0x8] sm:$0xff] }
   0x6   :  { %61 = vmatpush.msra.mxu0 %v52_v2  ;;  %288 = vmatpush.msra.mxu2 %v52_v2  ;;  %v39_v16 = vld [vmem:[%s602_s1] sm:$0xff]  ;;  %v453_v18 = vld [vmem:[%s604_s0 + $0x10] sm:$0xff]  ;;  %v458_v19 = vld [vmem:[%s604_s0 + $0x28] sm:$0xff] }
   0x7   :  { %289 = vmatpush.msra.mxu3 %v52_v2  ;;  %v448_v17 = vld [vmem:[%s604_s0] sm:$0xff]  ;;  %v466_v20 = vld [vmem:[%s604_s0 + $0x8] sm:$0xff]  ;;  %v471_v21 = vld [vmem:[%s604_s0 + $0x18] sm:$0xff] }
   0x8   :  { %62 = vmatpush.msra.mxu0 %v51_v3  ;;  %290 = vmatpush.msra.mxu2 %v51_v3  ;;  %v476_v22 = vld [vmem:[%s604_s0 + $0x30] sm:$0xff]  ;;  %v484_v23 = vld [vmem:[%s604_s0 + $0x20] sm:$0xff]  ;;  %v489_v24 = vld [vmem:[%s604_s0 + $0x38] sm:$0xff] }
   0x9   :  { %291 = vmatpush.msra.mxu3 %v51_v3  ;;  %v321_v26 = vld [vmem:[#allocation4] ss:$0 sm:$0xff]  ;;  %v242_v37 = vld [vmem:[%s607_s3 + $0x40] sm:$0xff] }
   0xa   :  { %63 = vmatpush.msra.mxu0 %v50_v4  ;;  %292 = vmatpush.msra.mxu2 %v50_v4 }
   0xb   :  { %293 = vmatpush.msra.mxu3 %v50_v4 }
   0xc   :  { %64 = vmatpush.msra.mxu0 %v49_v5  ;;  %294 = vmatpush.msra.mxu2 %v49_v5 }
   0xd   :  { %295 = vmatpush.msra.mxu3 %v49_v5 }
   0xe   :  { %65 = vmatpush.msra.mxu0 %v48_v6  ;;  %296 = vmatpush.msra.mxu2 %v48_v6 }
   0xf   :  { %297 = vmatpush.msra.mxu3 %v48_v6 }
  0x10   :  { %66 = vmatpush.msra.mxu0 %v47_v7  ;;  %298 = vmatpush.msra.mxu2 %v47_v7 }
  0x11   :  { %299 = vmatpush.msra.mxu3 %v47_v7 }
  0x12   :  { %67 = vmatpush.msra.mxu0 %v46_v8  ;;  %300 = vmatpush.msra.mxu2 %v46_v8 }
  0x13   :  { %301 = vmatpush.msra.mxu3 %v46_v8 }
  0x14   :  { %68 = vmatpush.msra.mxu0 %v45_v9  ;;  %302 = vmatpush.msra.mxu2 %v45_v9 }
  0x15   :  { %303 = vmatpush.msra.mxu3 %v45_v9 }
  0x16   :  { %69 = vmatpush.msra.mxu0 %v44_v10  ;;  %304 = vmatpush.msra.mxu2 %v44_v10 }
  0x17   :  { %305 = vmatpush.msra.mxu3 %v44_v10 }
  0x18   :  { %70 = vmatpush.msra.mxu0 %v43_v12  ;;  %306 = vmatpush.msra.mxu2 %v43_v12 }
  0x19   :  { %307 = vmatpush.msra.mxu3 %v43_v12 }
  0x1a   :  { %71 = vmatpush.msra.mxu0 %v42_v13  ;;  %308 = vmatpush.msra.mxu2 %v42_v13 }
  0x1b   :  { %309 = vmatpush.msra.mxu3 %v42_v13 }
  0x1c   :  { %72 = vmatpush.msra.mxu0 %v41_v14  ;;  %310 = vmatpush.msra.mxu2 %v41_v14 }
  0x1d   :  { %311 = vmatpush.msra.mxu3 %v41_v14 }
  0x1e   :  { %73 = vmatpush.msra.mxu0 %v40_v15  ;;  %312 = vmatpush.msra.mxu2 %v40_v15 }
  0x1f   :  { %313 = vmatpush.msra.mxu3 %v40_v15 }
  0x20   :  { %74 = vmatpush.msra.mxu0 %v39_v16  ;;  %314 = vmatpush.msra.mxu2 %v39_v16 }
  0x21   :  { %75 = vmatmul.f32.vlgmr.msra.gmra.mxu0 %v448_v17  ;;  %81 = vmatmul.f32.vlgmr.msra.gmra.mxu2 %v453_v18 }
  0x22   :  { %315 = vmatpush.msra.mxu3 %v39_v16 }
  0x23   :  { %90 = vmatmul.f32.vlgmr.msra.gmra.mxu3 %v458_v19 }
  0x29   :  { %78 = vmatmul.f32.gmra.mxu0 %v466_v20  ;;  %84 = vmatmul.f32.gmra.mxu2 %v471_v21 }
  0x2b   :  { %93 = vmatmul.f32.gmra.mxu3 %v476_v22 }
  0x31   :  { %87 = vmatmul.f32.gmra.mxu2 %v484_v23 }
  0x33   :  { %96 = vmatmul.f32.gmra.mxu3 %v489_v24 }
  0x9e   :  { %v76_v27 = vpop.f32.mrf.mxu0 }
  0x9f   :  { %v77_v28 = vadd.f32 %v321_v26, %v76_v27 }
  0xa1   :  { %323 = vtanh.f32 %v77_v28 }
  0xa4   :  { %v82_v29 = vpop.f32.mrf.mxu2 }
  0xa5   :  { %v83_v30 = vadd.f32 %v321_v26, %v82_v29 }
  0xa6   :  { %v79_v31 = vpop.f32.mrf.mxu0  ;;  %v91_v32 = vpop.f32.mrf.mxu3 }
  0xa7   :  { %v324_v33 = vpop.eup %323  ;;  %325 = vtanh.f32 %v83_v30  ;;  %v80_v34 = vadd.f32 %v321_v26, %v79_v31  ;;  %v92_v35 = vadd.f32 %v321_v26, %v91_v32  ;;  %v249_v30 = vld [vmem:[%s607_s3 + $0x78] sm:$0xff]  ;;  %v248_v31 = vld [vmem:[%s607_s3 + $0x70] sm:$0xff]  ;;  %v247_v32 = vld [vmem:[%s607_s3 + $0x68] sm:$0xff] }
  0xa8   :  { %v108_v36 = vmul.f32 1.442695, %v324_v33  ;;  %254 = vmatpush.msra.mxu1 %v249_v30  ;;  %v246_v33 = vld [vmem:[%s607_s3 + $0x60] sm:$0xff] }
  0xa9   :  { %327 = vtanh.f32 %v80_v34  ;;  %v245_v34 = vld [vmem:[%s607_s3 + $0x58] sm:$0xff] }
  0xaa   :  { %329 = vpow2.f32 %v108_v36  ;;  %255 = vmatpush.msra.mxu1 %v248_v31  ;;  %v243_v36 = vld [vmem:[%s607_s3 + $0x48] sm:$0xff] }
  0xab   :  { %331 = vtanh.f32 %v92_v35  ;;  %v244_v35 = vld [vmem:[%s607_s3 + $0x50] sm:$0xff] }
  0xac   :  { %v85_v38 = vpop.f32.mrf.mxu2  ;;  %256 = vmatpush.msra.mxu1 %v247_v32 }
  0xad   :  { %v326_v39 = vpop.eup %325  ;;  %v86_v40 = vadd.f32 %v321_v26, %v85_v38  ;;  %v241_v38 = vld [vmem:[%s607_s3 + $0x38] sm:$0xff] }
  0xae   :  { %v112_v41 = vmul.f32 1.442695, %v326_v39  ;;  %v94_v42 = vpop.f32.mrf.mxu3  ;;  %257 = vmatpush.msra.mxu1 %v246_v33  ;;  %v240_v39 = vld [vmem:[%s607_s3 + $0x30] sm:$0xff] }
  0xaf   :  { %v328_v43 = vpop.eup %327  ;;  %333 = vtanh.f32 %v86_v40  ;;  %v95_v44 = vadd.f32 %v321_v26, %v94_v42  ;;  %v239_v40 = vld [vmem:[%s607_s3 + $0x28] sm:$0xff]  ;;  %v237_v42 = vld [vmem:[%s607_s3 + $0x18] sm:$0xff] }
  0xb0   :  { %v494_v45 = vpop.eup %329  ;;  %335 = vpow2.f32 %v112_v41  ;;  %v110_v46 = vmul.f32 1.442695, %v328_v43  ;;  %258 = vmatpush.msra.mxu1 %v245_v34  ;;  %v238_v41 = vld [vmem:[%s607_s3 + $0x20] sm:$0xff]  ;;  %v236_v43 = vld [vmem:[%s607_s3 + $0x10] sm:$0xff] }
  0xb1   :  { %v332_v47 = vpop.eup %331  ;;  %125 = vst.msk [vmem:[%s605_s6] sm:$0xff] %vm28_vm0, %v494_v45  ;;  %337 = vtanh.f32 %v95_v44  ;;  %v134_v61 = vsel %vm28_vm0, %v494_v45, 0.0  ;;  %v235_v44 = vld [vmem:[%s607_s3 + $0x8] sm:$0xff] }
  0xb2   :  { %339 = vpow2.f32 %v110_v46  ;;  %v118_v48 = vmul.f32 1.442695, %v332_v47  ;;  %259 = vmatpush.msra.mxu1 %v244_v35 }
  0xb4   :  { %341 = vpow2.f32 %v118_v48  ;;  %v88_v49 = vpop.f32.mrf.mxu2  ;;  %260 = vmatpush.msra.mxu1 %v243_v36 }
  0xb5   :  { %v334_v50 = vpop.eup %333  ;;  %v89_v51 = vadd.f32 %v321_v26, %v88_v49 }
  0xb6   :  { %v336_v52 = vpop.eup %335  ;;  %v114_v53 = vmul.f32 1.442695, %v334_v50  ;;  %v97_v54 = vpop.f32.mrf.mxu3  ;;  %261 = vmatpush.msra.mxu1 %v242_v37 }
  0xb7   :  { %v338_v55 = vpop.eup %337  ;;  %127 = vst.msk [vmem:[%s605_s6 + $0x10] sm:$0xff] %vm28_vm0, %v336_v52  ;;  %343 = vtanh.f32 %v89_v51  ;;  %v98_v56 = vadd.f32 %v321_v26, %v97_v54  ;;  %v137_v5 = vsel %vm28_vm0, %v336_v52, 0.0  ;;  %v133_v26 = vld [vmem:[#allocation2] sm:$0xff] }
  0xb8   :  { %v340_v57 = vpop.eup %339  ;;  %345 = vpow2.f32 %v114_v53  ;;  %v120_v58 = vmul.f32 1.442695, %v338_v55  ;;  %262 = vmatpush.msra.mxu1 %v241_v38 }
  0xb9   :  { %126 = vst.msk [vmem:[%s605_s6 + $0x8] sm:$0xff] %vm28_vm0, %v340_v57  ;;  %159 = vperm.xlu1 %319, %v340_v57   ;;  %347 = vtanh.f32 %v98_v56  ;;  %v135_v62 = vsel %vm28_vm0, %v340_v57, 0.0 }
  0xba   :  { %v342_v59 = vpop.eup %341  ;;  %349 = vpow2.f32 %v120_v58  ;;  %v136_v3 = vadd.f32 %v135_v62, %v134_v61  ;;  %263 = vmatpush.msra.mxu1 %v240_v39 }
  0xbb   :  { %130 = vst.msk [vmem:[%s605_s6 + $0x28] sm:$0xff] %vm28_vm0, %v342_v59  ;;  %v143_v13 = vsel %vm28_vm0, %v342_v59, 0.0 }
  0xbc   :  { %v138_v7 = vadd.f32 %v137_v5, %v136_v3  ;;  %264 = vmatpush.msra.mxu1 %v239_v40 }
  0xbd   :  { %v344_v60 = vpop.eup %343 }
  0xbe   :  { %v346_v63 = vpop.eup %345  ;;  %v116_v0 = vmul.f32 1.442695, %v344_v60  ;;  %265 = vmatpush.msra.mxu1 %v238_v41 }
  0xbf   :  { %v348_v1 = vpop.eup %347  ;;  %128 = vst.msk [vmem:[%s605_s6 + $0x18] sm:$0xff] %vm28_vm0, %v346_v63  ;;  %169 = vperm.xlu2 %320, %v346_v63   ;;  %v139_v6 = vsel %vm28_vm0, %v346_v63, 0.0 }
  0xc0   :  { %v350_v2 = vpop.eup %349  ;;  %351 = vpow2.f32 %v116_v0  ;;  %v122_v4 = vmul.f32 1.442695, %v348_v1  ;;  %v140_v9 = vadd.f32 %v139_v6, %v138_v7  ;;  %266 = vmatpush.msra.mxu1 %v237_v42 }
  0xc1   :  { %131 = vst.msk [vmem:[%s605_s6 + $0x30] sm:$0xff] %vm28_vm0, %v350_v2  ;;  %164 = vperm.xlu1 %319, %v336_v52   ;;  %v145_v15 = vsel %vm28_vm0, %v350_v2, 0.0 }
  0xc2   :  { %353 = vpow2.f32 %v122_v4  ;;  %267 = vmatpush.msra.mxu1 %v236_v43 }
  0xc4   :  { %268 = vmatpush.msra.mxu1 %v235_v44 }
  0xc6   :  { %v352_v8 = vpop.eup %351 }
  0xc7   :  { %129 = vst.msk [vmem:[%s605_s6 + $0x20] sm:$0xff] %vm28_vm0, %v352_v8  ;;  %v141_v10 = vsel %vm28_vm0, %v352_v8, 0.0  ;;  %174 = vperm.xlu2 %320, %v352_v8  }
  0xc8   :  { %v354_v11 = vpop.eup %353  ;;  %v142_v12 = vadd.f32 %v141_v10, %v140_v9 }
  0xc9   :  { %132 = vst.msk [vmem:[%s605_s6 + $0x38] sm:$0xff] %vm28_vm0, %v354_v11  ;;  %184 = vperm.xlu1 %319, %v350_v2   ;;  %v147_v16 = vsel %vm28_vm0, %v354_v11, 0.0 }
  0xca   :  { %v144_v14 = vadd.f32 %v143_v13, %v142_v12 }
  0xcc   :  { %v146_v25 = vadd.f32 %v145_v15, %v144_v14 }
  0xce   :  { %v148_v27 = vadd.f32 %v147_v16, %v146_v25 }
  0xcf   :  { %189 = vperm.xlu2 %320, %v354_v11  }
  0xd0   :  { %v149_v28 = vadd.f32 %v148_v27, %v133_v26 }
  0xd2   :  { %150 = vst.msk [vmem:[#allocation2] sm:$0xff] %vm28_vm0, %v149_v28 }
  0xd9   :  { %v213_v29 = vld [vmem:[#allocation2] sm:$0xff] }
  0xda   :  { %216 = vperm.xlu0 %318, %v213_v29  }
  0xe2   :  { %154 = vperm.xlu0 %318, %v494_v45   ;;  %v234_v45 = vld [vmem:[%s607_s3] sm:$0xff] }
  0xe3   :  { %269 = vmatpush.msra.mxu1 %v234_v45 }
  0xea   :  { %179 = vperm.xlu0 %318, %v342_v59  }
 0x119   :  { %v170_v47 = vpop.permute.xlu2 %169 }
 0x11a   :  { %v195_v59 = vmul.f32 %v170_v47, %v471_v21 }
 0x121   :  { %v175_v51 = vpop.permute.xlu2 %174 }
 0x122   :  { %v196_v62 = vmul.f32 %v175_v51, %v484_v23 }
 0x12b   :  { %v160_v46 = vpop.permute.xlu1 %159 }
 0x12c   :  { %v193_v54 = vmul.f32 %v160_v46, %v466_v20  ;;  %v190_v20 = vpop.permute.xlu2 %189 }
 0x12d   :  { %v199_v21 = vmul.f32 %v190_v20, %v489_v24 }
 0x133   :  { %v165_v49 = vpop.permute.xlu1 %164 }
 0x134   :  { %v194_v57 = vmul.f32 %v165_v49, %v453_v18 }
 0x13b   :  { %v185_v0 = vpop.permute.xlu1 %184 }
 0x13c   :  { %v198_v5 = vmul.f32 %v185_v0, %v476_v22 }
 0x14c   :  { %v217_v48 = vpop.permute.xlu0 %216 }
 0x14d   :  { %355 = vrcp.f32 %v217_v48  ;;  %vm224_vm2 = vweird.f32 %v217_v48  ;;  %v228_v6 = vand.u32 2147483647, %v217_v48 }
 0x14f   :  { %vm229_vm4 = vcmp.eq.f32.partialorder %v228_v6, 8.507059e+37 }
 0x153   :  { %v356_v50 = vpop.eup %355 }
 0x154   :  { %v220_v52 = vmul.f32 %v356_v50, %v217_v48  ;;  %v155_v53 = vpop.permute.xlu0 %154  ;;  %vm225_vm1 = vweird.f32 %v356_v50 }
 0x155   :  { %v192_v55 = vmul.f32 %v155_v53, %v448_v17  ;;  %v230_v17 = vand.u32 2147483648, %v217_v48  ;;  %vm226_vm3 = vmor %vm224_vm2, %vm225_vm1 }
 0x156   :  { %v221_v56 = vsub.f32 1.0, %v220_v52 }
 0x157   :  { %v200_v58 = vadd.f32 %v193_v54, %v192_v55  ;;  %v231_v8 = vor.u32 1.1754944e-38, %v230_v17 }
 0x158   :  { %v222_v60 = vmul.f32 %v356_v50, %v221_v56 }
 0x159   :  { %v201_v61 = vadd.f32 %v200_v58, %v194_v57 }
 0x15a   :  { %v223_v4 = vadd.f32 %v356_v50, %v222_v60 }
 0x15b   :  { %v202_v63 = vadd.f32 %v201_v61, %v195_v59 }
 0x15c   :  { %v180_v1 = vpop.permute.xlu0 %179  ;;  %v227_v23 = vsel %vm226_vm3, %v356_v50, %v223_v4 }
 0x15d   :  { %v203_v2 = vadd.f32 %v202_v63, %v196_v62  ;;  %v197_v3 = vmul.f32 %v180_v1, %v458_v19  ;;  %v232_v10 = vsel %vm229_vm4, %v231_v8, %v227_v23  ;;  %v322_v19 = vld [vmem:[%s606_s4] ss:$0 sm:$0xff] }
 0x15f   :  { %v204_v18 = vadd.f32 %v203_v2, %v197_v3 }
 0x161   :  { %v205_v7 = vadd.f32 %v204_v18, %v198_v5 }
 0x163   :  { %v206_v9 = vadd.f32 %v205_v7, %v199_v21 }
 0x165   :  { %v233_v11 = vmul.f32 %v232_v10, %v206_v9 }
 0x167   :  { %270 = vmatmul.f32.vlgmr.msra.gmra.mxu1 %v233_v11 }
 0x1e4   :  { %v271_v12 = vpop.f32.mrf.mxu1 }
 0x1e5   :  { %v272_v22 = vadd.f32 %v322_v19, %v271_v12 }
 0x1e7   :  { %275 = vst.msk [vmem:[%s608_s5] sm:$0xff] %vm274_vm5, %v272_v22 }

// kernel: lstm_with_attention.3
= control target key start
LH: loop header
LB: loop body
LE: loop exit
PB: predicated region body
PF: predicated region fallthrough
CT: control target
= control target key end

     0   :  { %9 = vsyncpa [#allocation6], 0  ;;  %s2966_s0 = inlined_call_operand.vmem [shape: f32[8,8,8], index: 0, kind: input, shape index: {}]   ;;  %s2967_s1 = inlined_call_operand.hbm [shape: f32[8,512], index: 1, kind: input, shape index: {}]   ;;  %s2968_s2 = inlined_call_operand.hbm [shape: f32[128,512], index: 2, kind: input, shape index: {}]   ;;  %s2969_s3 = inlined_call_operand.hbm [shape: f32[1,512], index: 3, kind: input, shape index: {}]   ;;  %s2970_s4 = inlined_call_operand.vmem [shape: f32[8,8,128], index: 4, kind: output, shape index: {}]  }
   0x1   :  { %10 = vsyncpa [#allocation8], 0  ;;  %s28_s17 = sshll.u32 %s2968_s2, 4  ;;  %s1950_s18 = smov [#allocation7]   ;;  %s29_s17 = int_to_ptr.hbm [resolvable:$true] %s28_s17 }
   0x2   :  { %s30_s19 = sshll.u32 %s1950_s18, 4  ;;  %s18_s22 = sshll.u32 %s2967_s1, 4  ;;  %s31_s19 = int_to_ptr.vmem [resolvable:$true] %s30_s19  ;;  %s19_s22 = int_to_ptr.hbm [resolvable:$true] %s18_s22 }
   0x3   :  { %s1951_s23 = smov 512   ;;  %s1952_s24 = smov 32  }
   0x4   :  { %36 = dma.hbm_to_vmem [thread:$0]  %s29_s17, 8192, %s31_s19, [#allocation8], %s1951_s23, %s1951_s23, %s1952_s24  }
   0x5   :  { %s1953_s25 = smov [#allocation5]   ;;  %s42_s29 = sshll.u32 %s2969_s3, 4  ;;  %s43_s29 = int_to_ptr.hbm [resolvable:$true] %s42_s29 }
   0x6   :  { %s20_s26 = sshll.u32 %s1953_s25, 4  ;;  %s1954_s2 = smov [#allocation9]   ;;  %s21_s26 = int_to_ptr.vmem [resolvable:$true] %s20_s26 }
   0x7   :  { %23 = dma.hbm_to_vmem [thread:$0]  %s19_s22, 512, %s21_s26, [#allocation6]  }
   0x8   :  { %s44_s30 = sshll.u32 %s1954_s2, 4  ;;  %s45_s30 = int_to_ptr.vmem [resolvable:$true] %s44_s30 }
   0x9   :  { %47 = dma.hbm_to_vmem [thread:$0]  %s43_s29, 64, %s45_s30, [#allocation8]  }
   0xa   :  { %1946 = dma.done.wait [#allocation6], 512  }
   0xb   :  { %1947 = vsyncadd [#allocation6], 4294966784 }
   0xc   :  { %1948 = dma.done.wait [#allocation8], 8256  }
   0xd   :  { %1949 = vsyncadd [#allocation8], 4294959040  ;;  %v74_v0 = vld [vmem:[#allocation5] sm:$0xff]  ;;  %v75_v1 = vld [vmem:[#allocation5 + $0x8] sm:$0xff]  ;;  %vm88_vm0 = vcmask 64512  }
   0xe   :  { %v76_v2 = vld [vmem:[#allocation5 + $0x10] sm:$0xff]  ;;  %128 = vmatpush.msra.mxu0 %v74_v0  ;;  %169 = vmatpush.msra.mxu1 %v75_v1  ;;  %v77_v3 = vld [vmem:[#allocation5 + $0x18] sm:$0xff]  ;;  %v66_v4 = vld [vmem:[%s2966_s0] sm:$0xff] }
   0xf   :  { %210 = vmatpush.msra.mxu2 %v76_v2  ;;  %251 = vmatpush.msra.mxu3 %v77_v3  ;;  %v1993_v5 = vld [vmem:[#allocation7 + $0x1e0] sm:$0xff]  ;;  %v1995_v6 = vld [vmem:[#allocation7 + $0x1e8] sm:$0xff]  ;;  %v1999_v7 = vld [vmem:[#allocation7 + $0x1f8] sm:$0xff] }
  0x10   :  { %1613 = vmatmul.msk.f32.vlgmr.msra.gmra.mxu0 %vm88_vm0, %v66_v4  ;;  %1621 = vmatmul.msk.f32.vlgmr.msra.gmra.mxu1 %vm88_vm0, %v66_v4  ;;  %v2003_v8 = vld [vmem:[#allocation7 + $0x1c0] sm:$0xff]  ;;  %v2005_v9 = vld [vmem:[#allocation7 + $0x1c8] sm:$0xff]  ;;  %v2009_v10 = vld [vmem:[#allocation7 + $0x1d8] sm:$0xff] }
  0x11   :  { %1629 = vmatmul.msk.f32.vlgmr.msra.gmra.mxu2 %vm88_vm0, %v66_v4  ;;  %1637 = vmatmul.msk.f32.vlgmr.msra.gmra.mxu3 %vm88_vm0, %v66_v4  ;;  %v2011_v11 = vld [vmem:[#allocation7 + $0x1f0] sm:$0xff]  ;;  %v2014_v12 = vld [vmem:[#allocation7 + $0x1a0] sm:$0xff]  ;;  %v2016_v13 = vld [vmem:[#allocation7 + $0x1a8] sm:$0xff] }
  0x12   :  { %379 = vmatpush.msrb.mxu0 %v1993_v5  ;;  %399 = vmatpush.msrb.mxu1 %v1995_v6  ;;  %v2021_v14 = vld [vmem:[#allocation7 + $0x1b8] sm:$0xff]  ;;  %v2023_v15 = vld [vmem:[#allocation7 + $0x1d0] sm:$0xff]  ;;  %v67_v16 = vld [vmem:[%s2966_s0 + $0x8] sm:$0xff] }
  0x13   :  { %439 = vmatpush.msrb.mxu3 %v1999_v7  ;;  %419 = vmatpush.msrb.mxu2 %v2011_v11  ;;  %v2030_v17 = vld [vmem:[#allocation7 + $0x1b0] sm:$0xff]  ;;  %v2034_v18 = vld [vmem:[#allocation7 + $0x180] sm:$0xff]  ;;  %v2036_v19 = vld [vmem:[#allocation7 + $0x188] sm:$0xff] }
  0x14   :  { %380 = vmatpush.msrb.mxu0 %v2003_v8  ;;  %400 = vmatpush.msrb.mxu1 %v2005_v9  ;;  %v2042_v20 = vld [vmem:[#allocation7 + $0x198] sm:$0xff]  ;;  %v2044_v21 = vld [vmem:[#allocation7 + $0x190] sm:$0xff]  ;;  %v2048_v22 = vld [vmem:[#allocation7 + $0x160] sm:$0xff] }
  0x15   :  { %440 = vmatpush.msrb.mxu3 %v2009_v10  ;;  %420 = vmatpush.msrb.mxu2 %v2023_v15  ;;  %v2050_v23 = vld [vmem:[#allocation7 + $0x168] sm:$0xff]  ;;  %v2054_v24 = vld [vmem:[#allocation7 + $0x178] sm:$0xff]  ;;  %v2056_v25 = vld [vmem:[#allocation7 + $0x170] sm:$0xff] }
  0x16   :  { %381 = vmatpush.msrb.mxu0 %v2014_v12  ;;  %401 = vmatpush.msrb.mxu1 %v2016_v13  ;;  %v2059_v26 = vld [vmem:[#allocation7 + $0x140] sm:$0xff]  ;;  %v2061_v27 = vld [vmem:[#allocation7 + $0x148] sm:$0xff]  ;;  %v2066_v28 = vld [vmem:[#allocation7 + $0x158] sm:$0xff] }
  0x17   :  { %441 = vmatpush.msrb.mxu3 %v2021_v14  ;;  %421 = vmatpush.msrb.mxu2 %v2030_v17  ;;  %v2068_v29 = vld [vmem:[#allocation7 + $0x150] sm:$0xff]  ;;  %v2077_v31 = vld [vmem:[#allocation7 + $0x120] sm:$0xff]  ;;  %v2079_v32 = vld [vmem:[#allocation7 + $0x128] sm:$0xff] }
  0x18   :  { %1614 = vmatmul.msk.f32.gmra.mxu0 %vm88_vm0, %v67_v16  ;;  %1622 = vmatmul.msk.f32.gmra.mxu1 %vm88_vm0, %v67_v16  ;;  %v68_v30 = vld [vmem:[%s2966_s0 + $0x10] sm:$0xff]  ;;  %v2085_v33 = vld [vmem:[#allocation7 + $0x138] sm:$0xff]  ;;  %v2091_v35 = vld [vmem:[#allocation7 + $0x100] sm:$0xff] }
  0x19   :  { %1630 = vmatmul.msk.f32.gmra.mxu2 %vm88_vm0, %v67_v16  ;;  %1638 = vmatmul.msk.f32.gmra.mxu3 %vm88_vm0, %v67_v16  ;;  %v2087_v34 = vld [vmem:[#allocation7 + $0x130] sm:$0xff]  ;;  %v2093_v36 = vld [vmem:[#allocation7 + $0x108] sm:$0xff]  ;;  %v2097_v37 = vld [vmem:[#allocation7 + $0x118] sm:$0xff] }
  0x1a   :  { %382 = vmatpush.msrb.mxu0 %v2034_v18  ;;  %402 = vmatpush.msrb.mxu1 %v2036_v19  ;;  %v2099_v38 = vld [vmem:[#allocation7 + $0x110] sm:$0xff]  ;;  %v2102_v39 = vld [vmem:[#allocation7 + $0xe0] sm:$0xff]  ;;  %v2104_v40 = vld [vmem:[#allocation7 + $0xe8] sm:$0xff] }
  0x1b   :  { %442 = vmatpush.msrb.mxu3 %v2042_v20  ;;  %422 = vmatpush.msrb.mxu2 %v2044_v21  ;;  %v2109_v41 = vld [vmem:[#allocation7 + $0xf8] sm:$0xff]  ;;  %v2111_v42 = vld [vmem:[#allocation7 + $0xf0] sm:$0xff]  ;;  %v2120_v44 = vld [vmem:[#allocation7 + $0xc0] sm:$0xff] }
  0x1c   :  { %383 = vmatpush.msrb.mxu0 %v2048_v22  ;;  %403 = vmatpush.msrb.mxu1 %v2050_v23  ;;  %v69_v43 = vld [vmem:[%s2966_s0 + $0x18] sm:$0xff]  ;;  %v2122_v45 = vld [vmem:[#allocation7 + $0xc8] sm:$0xff]  ;;  %v2130_v47 = vld [vmem:[#allocation7 + $0xd0] sm:$0xff] }
  0x1d   :  { %443 = vmatpush.msrb.mxu3 %v2054_v24  ;;  %423 = vmatpush.msrb.mxu2 %v2056_v25  ;;  %v2128_v46 = vld [vmem:[#allocation7 + $0xd8] sm:$0xff]  ;;  %3059 = vst [vmem:[#allocation13_spill] sm:$0xff] %v2130_v47  ;;  %v2134_v48 = vld [vmem:[#allocation7 + $0xa0] sm:$0xff]  ;;  %v2136_v49 = vld [vmem:[#allocation7 + $0xa8] sm:$0xff] }
  0x1e   :  { %384 = vmatpush.msrb.mxu0 %v2059_v26  ;;  %404 = vmatpush.msrb.mxu1 %v2061_v27  ;;  %3058 = vst [vmem:[#allocation12_spill] sm:$0xff] %v2128_v46  ;;  %v2140_v50 = vld [vmem:[#allocation7 + $0xb8] sm:$0xff]  ;;  %v2142_v51 = vld [vmem:[#allocation7 + $0xb0] sm:$0xff]  ;;  %v2145_v52 = vld [vmem:[#allocation7 + $0x80] sm:$0xff] }
  0x1f   :  { %444 = vmatpush.msrb.mxu3 %v2066_v28  ;;  %424 = vmatpush.msrb.mxu2 %v2068_v29  ;;  %3060 = vst [vmem:[#allocation14_spill] sm:$0xff] %v2134_v48  ;;  %v2147_v53 = vld [vmem:[#allocation7 + $0x88] sm:$0xff]  ;;  %v2152_v54 = vld [vmem:[#allocation7 + $0x98] sm:$0xff]  ;;  %v2154_v55 = vld [vmem:[#allocation7 + $0x90] sm:$0xff] }
  0x20   :  { %1615 = vmatmul.msk.f32.gmra.mxu0 %vm88_vm0, %v68_v30  ;;  %1623 = vmatmul.msk.f32.gmra.mxu1 %vm88_vm0, %v68_v30  ;;  %3061 = vst [vmem:[#allocation15_spill] sm:$0xff] %v2136_v49  ;;  %v70_v56 = vld [vmem:[%s2966_s0 + $0x20] sm:$0xff]  ;;  %v2165_v58 = vld [vmem:[#allocation7 + $0x68] sm:$0xff]  ;;  %v2171_v59 = vld [vmem:[#allocation7 + $0x78] sm:$0xff] }
  0x21   :  { %1631 = vmatmul.msk.f32.gmra.mxu2 %vm88_vm0, %v68_v30  ;;  %1639 = vmatmul.msk.f32.gmra.mxu3 %vm88_vm0, %v68_v30  ;;  %3062 = vst [vmem:[#allocation16_spill] sm:$0xff] %v2140_v50  ;;  %v2163_v57 = vld [vmem:[#allocation7 + $0x60] sm:$0xff]  ;;  %v2173_v60 = vld [vmem:[#allocation7 + $0x70] sm:$0xff]  ;;  %v2179_v62 = vld [vmem:[#allocation7 + $0x48] sm:$0xff] }
  0x22   :  { %385 = vmatpush.msrb.mxu0 %v2077_v31  ;;  %405 = vmatpush.msrb.mxu1 %v2079_v32  ;;  %3063 = vst [vmem:[#allocation17_spill] sm:$0xff] %v2142_v51  ;;  %v2177_v61 = vld [vmem:[#allocation7 + $0x40] sm:$0xff]  ;;  %v2183_v63 = vld [vmem:[#allocation7 + $0x58] sm:$0xff]  ;;  %v2185_v0 = vld [vmem:[#allocation7 + $0x50] sm:$0xff] }
  0x23   :  { %445 = vmatpush.msrb.mxu3 %v2085_v33  ;;  %425 = vmatpush.msrb.mxu2 %v2087_v34  ;;  %3064 = vst [vmem:[#allocation18_spill] sm:$0xff] %v2145_v52  ;;  %v2188_v1 = vld [vmem:[#allocation7 + $0x20] sm:$0xff]  ;;  %v2190_v2 = vld [vmem:[#allocation7 + $0x28] sm:$0xff]  ;;  %v2195_v3 = vld [vmem:[#allocation7 + $0x30] sm:$0xff] }
  0x24   :  { %386 = vmatpush.msrb.mxu0 %v2091_v35  ;;  %406 = vmatpush.msrb.mxu1 %v2093_v36  ;;  %3065 = vst [vmem:[#allocation19_spill] sm:$0xff] %v2147_v53  ;;  %v2197_v4 = vld [vmem:[#allocation7 + $0x38] sm:$0xff]  ;;  %v71_v16 = vld [vmem:[%s2966_s0 + $0x28] sm:$0xff]  ;;  %v2206_v30 = vld [vmem:[#allocation7] sm:$0xff] }
  0x25   :  { %446 = vmatpush.msrb.mxu3 %v2097_v37  ;;  %426 = vmatpush.msrb.mxu2 %v2099_v38  ;;  %3066 = vst [vmem:[#allocation20_spill] sm:$0xff] %v2152_v54 }
  0x26   :  { %387 = vmatpush.msrb.mxu0 %v2102_v39  ;;  %407 = vmatpush.msrb.mxu1 %v2104_v40  ;;  %3067 = vst [vmem:[#allocation21_spill] sm:$0xff] %v2154_v55 }
  0x27   :  { %447 = vmatpush.msrb.mxu3 %v2109_v41  ;;  %427 = vmatpush.msrb.mxu2 %v2111_v42  ;;  %3068 = vst [vmem:[#allocation22_spill] sm:$0xff] %v2163_v57 }
  0x28   :  { %1616 = vmatmul.msk.f32.gmra.mxu0 %vm88_vm0, %v69_v43  ;;  %1624 = vmatmul.msk.f32.gmra.mxu1 %vm88_vm0, %v69_v43  ;;  %3069 = vst [vmem:[#allocation23_spill] sm:$0xff] %v2165_v58 }
  0x29   :  { %1632 = vmatmul.msk.f32.gmra.mxu2 %vm88_vm0, %v69_v43  ;;  %1640 = vmatmul.msk.f32.gmra.mxu3 %vm88_vm0, %v69_v43  ;;  %3070 = vst [vmem:[#allocation24_spill] sm:$0xff] %v2171_v59  ;;  %v2208_v43 = vld [vmem:[#allocation7 + $0x8] sm:$0xff] }
  0x2a   :  { %388 = vmatpush.msrb.mxu0 %v2120_v44  ;;  %408 = vmatpush.msrb.mxu1 %v2122_v45  ;;  %3071 = vst [vmem:[#allocation25_spill] sm:$0xff] %v2173_v60 }
  0x2b   :  { %448 = vmatpush.msrb.mxu3 %v2128_v46  ;;  %428 = vmatpush.msrb.mxu2 %v2130_v47  ;;  %3072 = vst [vmem:[#allocation26_spill] sm:$0xff] %v2177_v61 }
  0x2c   :  { %389 = vmatpush.msrb.mxu0 %v2134_v48  ;;  %409 = vmatpush.msrb.mxu1 %v2136_v49  ;;  %3073 = vst [vmem:[#allocation27_spill] sm:$0xff] %v2179_v62 }
  0x2d   :  { %449 = vmatpush.msrb.mxu3 %v2140_v50  ;;  %429 = vmatpush.msrb.mxu2 %v2142_v51  ;;  %3074 = vst [vmem:[#allocation28_spill] sm:$0xff] %v2183_v63 }
  0x2e   :  { %390 = vmatpush.msrb.mxu0 %v2145_v52  ;;  %410 = vmatpush.msrb.mxu1 %v2147_v53  ;;  %3075 = vst [vmem:[#allocation29_spill] sm:$0xff] %v2185_v0 }
  0x2f   :  { %450 = vmatpush.msrb.mxu3 %v2152_v54  ;;  %430 = vmatpush.msrb.mxu2 %v2154_v55  ;;  %3076 = vst [vmem:[#allocation30_spill] sm:$0xff] %v2188_v1 }
  0x30   :  { %1617 = vmatmul.msk.f32.gmra.mxu0 %vm88_vm0, %v70_v56  ;;  %1625 = vmatmul.msk.f32.gmra.mxu1 %vm88_vm0, %v70_v56  ;;  %3077 = vst [vmem:[#allocation31_spill] sm:$0xff] %v2190_v2 }
  0x31   :  { %1633 = vmatmul.msk.f32.gmra.mxu2 %vm88_vm0, %v70_v56  ;;  %1641 = vmatmul.msk.f32.gmra.mxu3 %vm88_vm0, %v70_v56  ;;  %3078 = vst [vmem:[#allocation32_spill] sm:$0xff] %v2195_v3  ;;  %v2214_v56 = vld [vmem:[#allocation7 + $0x10] sm:$0xff] }
  0x32   :  { %391 = vmatpush.msrb.mxu0 %v2163_v57  ;;  %411 = vmatpush.msrb.mxu1 %v2165_v58  ;;  %3079 = vst [vmem:[#allocation33_spill] sm:$0xff] %v2197_v4 }
  0x33   :  { %451 = vmatpush.msrb.mxu3 %v2171_v59  ;;  %431 = vmatpush.msrb.mxu2 %v2173_v60  ;;  %3080 = vst [vmem:[#allocation34_spill] sm:$0xff] %v2206_v30 }
  0x34   :  { %392 = vmatpush.msrb.mxu0 %v2177_v61  ;;  %412 = vmatpush.msrb.mxu1 %v2179_v62  ;;  %3081 = vst [vmem:[#allocation35_spill] sm:$0xff] %v2208_v43 }
  0x35   :  { %452 = vmatpush.msrb.mxu3 %v2183_v63  ;;  %432 = vmatpush.msrb.mxu2 %v2185_v0  ;;  %3082 = vst [vmem:[#allocation36_spill] sm:$0xff] %v2214_v56  ;;  %v2216_v63 = vld [vmem:[#allocation7 + $0x18] sm:$0xff] }
  0x36   :  { %393 = vmatpush.msrb.mxu0 %v2188_v1  ;;  %413 = vmatpush.msrb.mxu1 %v2190_v2  ;;  %3083 = vst [vmem:[#allocation37_spill] sm:$0xff] %v2216_v63 }
  0x37   :  { %433 = vmatpush.msrb.mxu2 %v2195_v3  ;;  %453 = vmatpush.msrb.mxu3 %v2197_v4  ;;  %v72_v4 = vld [vmem:[%s2966_s0 + $0x30] sm:$0xff] }
  0x38   :  { %1618 = vmatmul.msk.f32.gmra.mxu0 %vm88_vm0, %v71_v16  ;;  %1626 = vmatmul.msk.f32.gmra.mxu1 %vm88_vm0, %v71_v16 }
  0x39   :  { %1634 = vmatmul.msk.f32.gmra.mxu2 %vm88_vm0, %v71_v16  ;;  %1642 = vmatmul.msk.f32.gmra.mxu3 %vm88_vm0, %v71_v16  ;;  %v73_v16 = vld [vmem:[%s2966_s0 + $0x38] sm:$0xff] }
  0x3a   :  { %394 = vmatpush.msrb.mxu0 %v2206_v30  ;;  %414 = vmatpush.msrb.mxu1 %v2208_v43 }
  0x3b   :  { %434 = vmatpush.msrb.mxu2 %v2214_v56  ;;  %454 = vmatpush.msrb.mxu3 %v2216_v63 }
  0x3c   :  { %532 = vmatpush.msra.mxu0 %v1993_v5  ;;  %552 = vmatpush.msra.mxu1 %v1995_v6 }
  0x3d   :  { %572 = vmatpush.msra.mxu2 %v2011_v11  ;;  %592 = vmatpush.msra.mxu3 %v1999_v7 }
  0x3e   :  { %533 = vmatpush.msra.mxu0 %v2003_v8  ;;  %553 = vmatpush.msra.mxu1 %v2005_v9 }
  0x3f   :  { %573 = vmatpush.msra.mxu2 %v2023_v15  ;;  %593 = vmatpush.msra.mxu3 %v2009_v10 }
  0x40   :  { %1619 = vmatmul.msk.f32.gmra.mxu0 %vm88_vm0, %v72_v4  ;;  %1627 = vmatmul.msk.f32.gmra.mxu1 %vm88_vm0, %v72_v4 }
  0x41   :  { %1635 = vmatmul.msk.f32.gmra.mxu2 %vm88_vm0, %v72_v4  ;;  %1643 = vmatmul.msk.f32.gmra.mxu3 %vm88_vm0, %v72_v4  ;;  %v1955_v4 = vmov 0.0  }
  0x42   :  { %534 = vmatpush.msra.mxu0 %v2014_v12  ;;  %554 = vmatpush.msra.mxu1 %v2016_v13 }
  0x43   :  { %574 = vmatpush.msra.mxu2 %v2030_v17  ;;  %594 = vmatpush.msra.mxu3 %v2021_v14 }
  0x44   :  { %535 = vmatpush.msra.mxu0 %v2034_v18  ;;  %555 = vmatpush.msra.mxu1 %v2036_v19 }
  0x45   :  { %575 = vmatpush.msra.mxu2 %v2044_v21  ;;  %595 = vmatpush.msra.mxu3 %v2042_v20 }
  0x46   :  { %536 = vmatpush.msra.mxu0 %v2048_v22  ;;  %556 = vmatpush.msra.mxu1 %v2050_v23 }
  0x47   :  { %576 = vmatpush.msra.mxu2 %v2056_v25  ;;  %596 = vmatpush.msra.mxu3 %v2054_v24 }
  0x48   :  { %1620 = vmatmul.msk.f32.gmra.mxu0 %vm88_vm0, %v73_v16  ;;  %1628 = vmatmul.msk.f32.gmra.mxu1 %vm88_vm0, %v73_v16 }
  0x49   :  { %1636 = vmatmul.msk.f32.gmra.mxu2 %vm88_vm0, %v73_v16  ;;  %1644 = vmatmul.msk.f32.gmra.mxu3 %vm88_vm0, %v73_v16  ;;  %v3084_v16 = vld [vmem:[#allocation28_spill] sm:$0xff] }
  0x4a   :  { %537 = vmatpush.msra.mxu0 %v2059_v26  ;;  %557 = vmatpush.msra.mxu1 %v2061_v27 }
  0x4b   :  { %577 = vmatpush.msra.mxu2 %v2068_v29  ;;  %597 = vmatpush.msra.mxu3 %v2066_v28 }
  0x4c   :  { %538 = vmatpush.msra.mxu0 %v2077_v31  ;;  %558 = vmatpush.msra.mxu1 %v2079_v32 }
  0x4d   :  { %578 = vmatpush.msra.mxu2 %v2087_v34  ;;  %598 = vmatpush.msra.mxu3 %v2085_v33 }
  0x4e   :  { %539 = vmatpush.msra.mxu0 %v2091_v35  ;;  %559 = vmatpush.msra.mxu1 %v2093_v36 }
  0x4f   :  { %579 = vmatpush.msra.mxu2 %v2099_v38  ;;  %599 = vmatpush.msra.mxu3 %v2097_v37 }
  0x50   :  { %395 = vmatmul.f32.vlgmr.msrb.gmra.mxu0 %v1955_v4  ;;  %415 = vmatmul.f32.vlgmr.msrb.gmra.mxu1 %v1955_v4 }
  0x51   :  { %435 = vmatmul.f32.vlgmr.msrb.gmra.mxu2 %v1955_v4  ;;  %455 = vmatmul.f32.vlgmr.msrb.gmra.mxu3 %v1955_v4  ;;  %v3085_v4 = vld [vmem:[#allocation33_spill] sm:$0xff] }
  0x52   :  { %540 = vmatpush.msra.mxu0 %v2102_v39  ;;  %560 = vmatpush.msra.mxu1 %v2104_v40 }
  0x53   :  { %580 = vmatpush.msra.mxu2 %v2111_v42  ;;  %600 = vmatpush.msra.mxu3 %v2109_v41 }
  0x54   :  { %541 = vmatpush.msra.mxu0 %v2120_v44  ;;  %561 = vmatpush.msra.mxu1 %v2122_v45 }
  0x55   :  { %581 = vmatpush.msra.mxu2 %v2130_v47  ;;  %601 = vmatpush.msra.mxu3 %v2128_v46 }
  0x56   :  { %542 = vmatpush.msra.mxu0 %v2134_v48  ;;  %562 = vmatpush.msra.mxu1 %v2136_v49 }
  0x57   :  { %582 = vmatpush.msra.mxu2 %v2142_v51  ;;  %602 = vmatpush.msra.mxu3 %v2140_v50 }
  0x58   :  { %543 = vmatpush.msra.mxu0 %v2145_v52  ;;  %563 = vmatpush.msra.mxu1 %v2147_v53 }
  0x59   :  { %583 = vmatpush.msra.mxu2 %v2154_v55  ;;  %603 = vmatpush.msra.mxu3 %v2152_v54 }
  0x5a   :  { %544 = vmatpush.msra.mxu0 %v2163_v57  ;;  %564 = vmatpush.msra.mxu1 %v2165_v58 }
  0x5b   :  { %584 = vmatpush.msra.mxu2 %v2173_v60  ;;  %604 = vmatpush.msra.mxu3 %v2171_v59 }
  0x5c   :  { %545 = vmatpush.msra.mxu0 %v2177_v61  ;;  %565 = vmatpush.msra.mxu1 %v2179_v62 }
  0x5d   :  { %585 = vmatpush.msra.mxu2 %v2185_v0  ;;  %605 = vmatpush.msra.mxu3 %v3084_v16 }
  0x5e   :  { %546 = vmatpush.msra.mxu0 %v2188_v1  ;;  %566 = vmatpush.msra.mxu1 %v2190_v2 }
  0x5f   :  { %586 = vmatpush.msra.mxu2 %v2195_v3  ;;  %606 = vmatpush.msra.mxu3 %v3085_v4 }
  0x60   :  { %547 = vmatpush.msra.mxu0 %v2206_v30  ;;  %567 = vmatpush.msra.mxu1 %v2208_v43 }
  0x61   :  { %587 = vmatpush.msra.mxu2 %v2214_v56  ;;  %607 = vmatpush.msra.mxu3 %v2216_v63 }
  0x62   :  { %686 = vmatpush.msrb.mxu0 %v1993_v5  ;;  %706 = vmatpush.msrb.mxu1 %v1995_v6 }
  0x63   :  { %726 = vmatpush.msrb.mxu2 %v2011_v11  ;;  %746 = vmatpush.msrb.mxu3 %v1999_v7 }
  0x64   :  { %687 = vmatpush.msrb.mxu0 %v2003_v8  ;;  %707 = vmatpush.msrb.mxu1 %v2005_v9 }
  0x65   :  { %727 = vmatpush.msrb.mxu2 %v2023_v15  ;;  %747 = vmatpush.msrb.mxu3 %v2009_v10 }
  0x66   :  { %688 = vmatpush.msrb.mxu0 %v2014_v12  ;;  %708 = vmatpush.msrb.mxu1 %v2016_v13 }
  0x67   :  { %728 = vmatpush.msrb.mxu2 %v2030_v17  ;;  %748 = vmatpush.msrb.mxu3 %v2021_v14 }
  0x68   :  { %689 = vmatpush.msrb.mxu0 %v2034_v18  ;;  %709 = vmatpush.msrb.mxu1 %v2036_v19 }
  0x69   :  { %729 = vmatpush.msrb.mxu2 %v2044_v21  ;;  %749 = vmatpush.msrb.mxu3 %v2042_v20 }
  0x6a   :  { %690 = vmatpush.msrb.mxu0 %v2048_v22  ;;  %710 = vmatpush.msrb.mxu1 %v2050_v23 }
  0x6b   :  { %730 = vmatpush.msrb.mxu2 %v2056_v25  ;;  %750 = vmatpush.msrb.mxu3 %v2054_v24 }
  0x6c   :  { %691 = vmatpush.msrb.mxu0 %v2059_v26  ;;  %711 = vmatpush.msrb.mxu1 %v2061_v27 }
  0x6d   :  { %731 = vmatpush.msrb.mxu2 %v2068_v29  ;;  %751 = vmatpush.msrb.mxu3 %v2066_v28 }
  0x6e   :  { %692 = vmatpush.msrb.mxu0 %v2077_v31  ;;  %712 = vmatpush.msrb.mxu1 %v2079_v32 }
  0x6f   :  { %732 = vmatpush.msrb.mxu2 %v2087_v34  ;;  %752 = vmatpush.msrb.mxu3 %v2085_v33 }
  0x70   :  { %693 = vmatpush.msrb.mxu0 %v2091_v35  ;;  %713 = vmatpush.msrb.mxu1 %v2093_v36 }
  0x71   :  { %733 = vmatpush.msrb.mxu2 %v2099_v38  ;;  %753 = vmatpush.msrb.mxu3 %v2097_v37 }
  0x72   :  { %694 = vmatpush.msrb.mxu0 %v2102_v39  ;;  %714 = vmatpush.msrb.mxu1 %v2104_v40 }
  0x73   :  { %734 = vmatpush.msrb.mxu2 %v2111_v42  ;;  %754 = vmatpush.msrb.mxu3 %v2109_v41 }
  0x74   :  { %695 = vmatpush.msrb.mxu0 %v2120_v44  ;;  %715 = vmatpush.msrb.mxu1 %v2122_v45 }
  0x75   :  { %735 = vmatpush.msrb.mxu2 %v2130_v47  ;;  %755 = vmatpush.msrb.mxu3 %v2128_v46 }
  0x76   :  { %696 = vmatpush.msrb.mxu0 %v2134_v48  ;;  %716 = vmatpush.msrb.mxu1 %v2136_v49 }
  0x77   :  { %736 = vmatpush.msrb.mxu2 %v2142_v51  ;;  %756 = vmatpush.msrb.mxu3 %v2140_v50 }
  0x78   :  { %697 = vmatpush.msrb.mxu0 %v2145_v52  ;;  %717 = vmatpush.msrb.mxu1 %v2147_v53 }
  0x79   :  { %737 = vmatpush.msrb.mxu2 %v2154_v55  ;;  %757 = vmatpush.msrb.mxu3 %v2152_v54 }
  0x7a   :  { %698 = vmatpush.msrb.mxu0 %v2163_v57  ;;  %718 = vmatpush.msrb.mxu1 %v2165_v58 }
  0x7b   :  { %738 = vmatpush.msrb.mxu2 %v2173_v60  ;;  %758 = vmatpush.msrb.mxu3 %v2171_v59 }
  0x7c   :  { %699 = vmatpush.msrb.mxu0 %v2177_v61  ;;  %719 = vmatpush.msrb.mxu1 %v2179_v62  ;;  %v78_v61 = vld [vmem:[#allocation9] sm:$0xf] }
  0x7d   :  { %739 = vmatpush.msrb.mxu2 %v2185_v0  ;;  %759 = vmatpush.msrb.mxu3 %v3084_v16  ;;  %v80_v16 = vperm.slane %v78_v61, 0  ;;  %v81_v59 = vperm.slane %v78_v61, 1 }
  0x7e   :  { %700 = vmatpush.msrb.mxu0 %v2188_v1  ;;  %720 = vmatpush.msrb.mxu1 %v2190_v2 }
  0x7f   :  { %740 = vmatpush.msrb.mxu2 %v2195_v3  ;;  %760 = vmatpush.msrb.mxu3 %v3085_v4 }
  0x80   :  { %701 = vmatpush.msrb.mxu0 %v2206_v30  ;;  %721 = vmatpush.msrb.mxu1 %v2208_v43  ;;  %v2374_v43 = vperm.slane %v78_v61, 2 }
  0x81   :  { %741 = vmatpush.msrb.mxu2 %v2214_v56  ;;  %761 = vmatpush.msrb.mxu3 %v2216_v63  ;;  %v83_v56 = vperm.slane %v78_v61, 3 }
  0x8d   :  { %v130_v62 = vpop.f32.mrf.mxu0  ;;  %v171_v0 = vpop.f32.mrf.mxu1 }
  0x94   :  { %v2366_v1 = vpop.f32.mrf.mxu2  ;;  %v2368_v2 = vpop.f32.mrf.mxu3 }
  0x95   :  { %v133_v3 = vpop.f32.mrf.mxu0  ;;  %v174_v60 = vpop.f32.mrf.mxu1 }
  0x96   :  { %v2370_v4 = vadd.f32 %v133_v3, %v80_v16  ;;  %v2372_v30 = vadd.f32 %v174_v60, %v81_v59 }
  0x98   :  { %3086 = vst [vmem:[#allocation38_spill] sm:$0xff] %v2370_v4 }
  0x99   :  { %3087 = vst [vmem:[#allocation39_spill] sm:$0xff] %v2372_v30 }
  0x9c   :  { %v215_v58 = vpop.f32.mrf.mxu2  ;;  %v256_v63 = vpop.f32.mrf.mxu3 }
  0x9d   :  { %v2377_v57 = vadd.f32 %v215_v58, %v2374_v43  ;;  %v2379_v54 = vadd.f32 %v256_v63, %v83_v56  ;;  %v136_v55 = vpop.f32.mrf.mxu0  ;;  %v177_v53 = vpop.f32.mrf.mxu1 }
  0x9e   :  { %v2381_v52 = vadd.f32 %v136_v55, %v80_v16  ;;  %v2383_v50 = vadd.f32 %v177_v53, %v81_v59 }
  0x9f   :  { %3088 = vst [vmem:[#allocation40_spill] sm:$0xff] %v2377_v57 }
  0xa0   :  { %3089 = vst [vmem:[#allocation41_spill] sm:$0xff] %v2379_v54 }
  0xa1   :  { %3090 = vst [vmem:[#allocation42_spill] sm:$0xff] %v2381_v52 }
  0xa2   :  { %3091 = vst [vmem:[#allocation43_spill] sm:$0xff] %v2383_v50 }
  0xa4   :  { %v218_v3 = vpop.f32.mrf.mxu2  ;;  %v259_v4 = vpop.f32.mrf.mxu3 }
  0xa5   :  { %v2386_v60 = vadd.f32 %v218_v3, %v2374_v43  ;;  %v2388_v30 = vadd.f32 %v259_v4, %v83_v56  ;;  %v139_v61 = vpop.f32.mrf.mxu0  ;;  %v180_v51 = vpop.f32.mrf.mxu1 }
  0xa6   :  { %v2390_v49 = vadd.f32 %v139_v61, %v80_v16  ;;  %v2392_v58 = vadd.f32 %v180_v51, %v81_v59 }
  0xa7   :  { %3092 = vst [vmem:[#allocation44_spill] sm:$0xff] %v2386_v60 }
  0xa8   :  { %3093 = vst [vmem:[#allocation45_spill] sm:$0xff] %v2388_v30 }
  0xa9   :  { %3094 = vst [vmem:[#allocation46_spill] sm:$0xff] %v2390_v49 }
  0xaa   :  { %3095 = vst [vmem:[#allocation47_spill] sm:$0xff] %v2392_v58 }
  0xac   :  { %v221_v63 = vpop.f32.mrf.mxu2  ;;  %v262_v57 = vpop.f32.mrf.mxu3 }
  0xad   :  { %v2395_v55 = vadd.f32 %v221_v63, %v2374_v43  ;;  %v2397_v53 = vadd.f32 %v262_v57, %v83_v56  ;;  %v142_v50 = vpop.f32.mrf.mxu0  ;;  %v183_v52 = vpop.f32.mrf.mxu1 }
  0xae   :  { %v2399_v54 = vadd.f32 %v142_v50, %v80_v16  ;;  %v2401_v3 = vadd.f32 %v183_v52, %v81_v59 }
  0xaf   :  { %3096 = vst [vmem:[#allocation48_spill] sm:$0xff] %v2395_v55 }
  0xb0   :  { %3097 = vst [vmem:[#allocation49_spill] sm:$0xff] %v2397_v53 }
  0xb1   :  { %3098 = vst [vmem:[#allocation50_spill] sm:$0xff] %v2399_v54 }
  0xb2   :  { %3099 = vst [vmem:[#allocation51_spill] sm:$0xff] %v2401_v3 }
  0xb4   :  { %v224_v4 = vpop.f32.mrf.mxu2  ;;  %v265_v60 = vpop.f32.mrf.mxu3 }
  0xb5   :  { %v2404_v61 = vadd.f32 %v224_v4, %v2374_v43  ;;  %v2406_v51 = vadd.f32 %v265_v60, %v83_v56  ;;  %v145_v58 = vpop.f32.mrf.mxu0  ;;  %v186_v49 = vpop.f32.mrf.mxu1 }
  0xb6   :  { %v2408_v30 = vadd.f32 %v145_v58, %v80_v16  ;;  %v2410_v63 = vadd.f32 %v186_v49, %v81_v59 }
  0xb7   :  { %3100 = vst [vmem:[#allocation52_spill] sm:$0xff] %v2404_v61 }
  0xb8   :  { %3101 = vst [vmem:[#allocation53_spill] sm:$0xff] %v2406_v51 }
  0xb9   :  { %3102 = vst [vmem:[#allocation54_spill] sm:$0xff] %v2408_v30 }
  0xba   :  { %3103 = vst [vmem:[#allocation55_spill] sm:$0xff] %v2410_v63 }
  0xbc   :  { %v227_v57 = vpop.f32.mrf.mxu2  ;;  %v268_v55 = vpop.f32.mrf.mxu3 }
  0xbd   :  { %v2413_v50 = vadd.f32 %v227_v57, %v2374_v43  ;;  %v2415_v52 = vadd.f32 %v268_v55, %v83_v56  ;;  %v148_v3 = vpop.f32.mrf.mxu0  ;;  %v189_v54 = vpop.f32.mrf.mxu1  ;;  %v131_v55 = vadd.f32 %v130_v62, %v80_v16 }
  0xbe   :  { %v2417_v53 = vadd.f32 %v148_v3, %v80_v16  ;;  %v2419_v4 = vadd.f32 %v189_v54, %v81_v59 }
  0xbf   :  { %3104 = vst [vmem:[#allocation56_spill] sm:$0xff] %v2413_v50  ;;  %v172_v50 = vadd.f32 %v171_v0, %v81_v59 }
  0xc0   :  { %3105 = vst [vmem:[#allocation57_spill] sm:$0xff] %v2415_v52 }
  0xc1   :  { %3106 = vst [vmem:[#allocation58_spill] sm:$0xff] %v2417_v53 }
  0xc2   :  { %3107 = vst [vmem:[#allocation59_spill] sm:$0xff] %v2419_v4 }
  0xc4   :  { %v230_v60 = vpop.f32.mrf.mxu2  ;;  %v271_v61 = vpop.f32.mrf.mxu3 }
  0xc5   :  { %v2422_v58 = vadd.f32 %v230_v60, %v2374_v43  ;;  %v2424_v49 = vadd.f32 %v271_v61, %v83_v56  ;;  %v151_v63 = vpop.f32.mrf.mxu0  ;;  %v192_v30 = vpop.f32.mrf.mxu1 }
  0xc6   :  { %v2426_v51 = vadd.f32 %v151_v63, %v80_v16  ;;  %v2428_v57 = vadd.f32 %v192_v30, %v81_v59  ;;  %v254_v63 = vadd.f32 %v2368_v2, %v83_v56 }
  0xc7   :  { %3108 = vst [vmem:[#allocation60_spill] sm:$0xff] %v2422_v58 }
  0xc8   :  { %3109 = vst [vmem:[#allocation61_spill] sm:$0xff] %v2424_v49 }
  0xc9   :  { %3110 = vst [vmem:[#allocation62_spill] sm:$0xff] %v2426_v51 }
  0xca   :  { %3111 = vst [vmem:[#allocation63_spill] sm:$0xff] %v2428_v57 }
  0xcc   :  { %v233_v52 = vpop.f32.mrf.mxu2  ;;  %v274_v3 = vpop.f32.mrf.mxu3 }
  0xcd   :  { %v2431_v54 = vadd.f32 %v233_v52, %v2374_v43  ;;  %v2433_v4 = vadd.f32 %v274_v3, %v83_v56  ;;  %v396_v53 = vpop.f32.mrf.mxu0  ;;  %v416_v60 = vpop.f32.mrf.mxu1 }
  0xce   :  { %v459_v58 = vadd.f32 %v396_v53, %v131_v55  ;;  %v460_v61 = vadd.f32 %v416_v60, %v172_v50  ;;  %v213_v53 = vadd.f32 %v2366_v1, %v2374_v43 }
  0xcf   :  { %3112 = vst [vmem:[#allocation64_spill] sm:$0xff] %v2431_v54 }
  0xd0   :  { %3113 = vst [vmem:[#allocation65_spill] sm:$0xff] %v2433_v4  ;;  %v1645_v49 = vmul.f32 -1.442695, %v459_v58  ;;  %v1646_v48 = vmul.f32 -1.442695, %v460_v61 }
  0xd2   :  { %1682 = vpow2.f32 %v1645_v49 }
  0xd3   :  { %1684 = vpow2.f32 %v1646_v48 }
  0xd4   :  { %v456_v30 = vpop.f32.mrf.mxu3  ;;  %v436_v3 = vpop.f32.mrf.mxu2 }
  0xd5   :  { %v462_v62 = vadd.f32 %v456_v30, %v254_v63  ;;  %v461_v49 = vadd.f32 %v436_v3, %v213_v53 }
  0xd7   :  { %v1647_v59 = vmul.f32 -1.442695, %v462_v62 }
  0xd8   :  { %v1683_v0 = vpop.eup %1682 }
  0xd9   :  { %v1685_v16 = vpop.eup %1684  ;;  %v466_v57 = vadd.f32 1.0, %v1683_v0  ;;  %1686 = vpow2.f32 %v1647_v59 }
  0xda   :  { %v485_v52 = vadd.f32 1.0, %v1685_v16 }
  0xdb   :  { %1688 = vrcp.f32 %v466_v57  ;;  %v478_v61 = vand.u32 2147483648, %v466_v57  ;;  %v476_v62 = vand.u32 2147483647, %v466_v57  ;;  %vm472_vm3 = vweird.f32 %v466_v57 }
  0xdc   :  { %1690 = vrcp.f32 %v485_v52  ;;  %v497_v63 = vand.u32 2147483648, %v485_v52  ;;  %v495_v0 = vand.u32 2147483647, %v485_v52  ;;  %vm491_vm4 = vweird.f32 %v485_v52 }
  0xdd   :  { %v479_v43 = vor.u32 1.1754944e-38, %v478_v61  ;;  %vm477_vm6 = vcmp.eq.f32.partialorder %v476_v62, 8.507059e+37 }
  0xde   :  { %v498_v53 = vor.u32 1.1754944e-38, %v497_v63  ;;  %vm496_vm8 = vcmp.eq.f32.partialorder %v495_v0, 8.507059e+37 }
  0xdf   :  { %v1687_v54 = vpop.eup %1686 }
  0xe0   :  { %v505_v50 = vadd.f32 1.0, %v1687_v54 }
  0xe1   :  { %v1689_v58 = vpop.eup %1688 }
  0xe2   :  { %v1691_v2 = vpop.eup %1690  ;;  %v468_v48 = vmul.f32 %v1689_v58, %v466_v57  ;;  %1692 = vrcp.f32 %v505_v50  ;;  %vm473_vm1 = vweird.f32 %v1689_v58  ;;  %vm511_vm10 = vweird.f32 %v505_v50 }
  0xe3   :  { %v487_v56 = vmul.f32 %v1691_v2, %v485_v52  ;;  %1694 = vtanh.f32 %v461_v49  ;;  %vm492_vm2 = vweird.f32 %v1691_v2  ;;  %vm474_vm5 = vmor %vm472_vm3, %vm473_vm1  ;;  %v517_v52 = vand.u32 2147483648, %v505_v50 }
  0xe4   :  { %v469_v55 = vsub.f32 1.0, %v468_v48  ;;  %vm493_vm7 = vmor %vm491_vm4, %vm492_vm2 }
  0xe5   :  { %v488_v60 = vsub.f32 1.0, %v487_v56  ;;  %v518_v63 = vor.u32 1.1754944e-38, %v517_v52 }
  0xe6   :  { %v470_v30 = vmul.f32 %v1689_v58, %v469_v55 }
  0xe7   :  { %v489_v59 = vmul.f32 %v1691_v2, %v488_v60 }
  0xe8   :  { %v1693_v16 = vpop.eup %1692  ;;  %v471_v1 = vadd.f32 %v1689_v58, %v470_v30 }
  0xe9   :  { %v490_v54 = vadd.f32 %v1691_v2, %v489_v59  ;;  %v507_v3 = vmul.f32 %v1693_v16, %v505_v50  ;;  %v1695_v49 = vpop.eup %1694  ;;  %vm512_vm9 = vweird.f32 %v1693_v16 }
  0xea   :  { %v475_v48 = vsel %vm474_vm5, %v1689_v58, %v471_v1  ;;  %v515_v58 = vand.u32 2147483647, %v505_v50  ;;  %vm513_vm11 = vmor %vm511_vm10, %vm512_vm9 }
  0xeb   :  { %v480_v56 = vsel %vm477_vm6, %v479_v43, %v475_v48  ;;  %v494_v55 = vsel %vm493_vm7, %v1691_v2, %v490_v54  ;;  %v508_v4 = vsub.f32 1.0, %v507_v3  ;;  %v3143_v43 = vld [vmem:[#allocation40_spill] sm:$0xff] }
  0xec   :  { %v499_v60 = vsel %vm496_vm8, %v498_v53, %v494_v55  ;;  %v522_v51 = vmul.f32 %v1695_v49, %v480_v56  ;;  %vm516_vm12 = vcmp.eq.f32.partialorder %v515_v58, 8.507059e+37 }
  0xed   :  { %v521_v46 = vmul.f32 0.0, %v499_v60  ;;  %v509_v47 = vmul.f32 %v1693_v16, %v508_v4 }
  0xef   :  { %v2438_v30 = vadd.f32 %v522_v51, %v521_v46  ;;  %v510_v57 = vadd.f32 %v1693_v16, %v509_v47 }
  0xf1   :  { %1696 = vtanh.f32 %v2438_v30  ;;  %v514_v61 = vsel %vm513_vm11, %v1693_v16, %v510_v57 }
  0xf2   :  { %v519_v62 = vsel %vm516_vm12, %v518_v63, %v514_v61 }
  0xf7   :  { %v1697_v2 = vpop.eup %1696 }
  0xf8   :  { %v525_v59 = vmul.f32 %v1697_v2, %v519_v62 }
  0xfa   :  { %526 = vst [vmem:[%s2970_s4] sm:$0xff] %v525_v59  ;;  %548 = vmatmul.f32.vlgmr.msra.gmra.mxu0 %v525_v59  ;;  %568 = vmatmul.f32.vlgmr.msra.gmra.mxu1 %v525_v59 }
  0xfb   :  { %588 = vmatmul.f32.vlgmr.msra.gmra.mxu2 %v525_v59  ;;  %608 = vmatmul.f32.vlgmr.msra.gmra.mxu3 %v525_v59 }
  0xfc   :  { %840 = vmatpush.msra.mxu0 %v1993_v5  ;;  %860 = vmatpush.msra.mxu1 %v1995_v6  ;;  %v3114_v5 = vld [vmem:[#allocation13_spill] sm:$0xff]  ;;  %v3115_v6 = vld [vmem:[#allocation12_spill] sm:$0xff] }
  0xfd   :  { %880 = vmatpush.msra.mxu2 %v2011_v11  ;;  %900 = vmatpush.msra.mxu3 %v1999_v7  ;;  %v3116_v7 = vld [vmem:[#allocation14_spill] sm:$0xff] }
  0xfe   :  { %841 = vmatpush.msra.mxu0 %v2003_v8  ;;  %861 = vmatpush.msra.mxu1 %v2005_v9  ;;  %v3117_v8 = vld [vmem:[#allocation15_spill] sm:$0xff]  ;;  %v3118_v9 = vld [vmem:[#allocation17_spill] sm:$0xff]  ;;  %v3120_v11 = vld [vmem:[#allocation18_spill] sm:$0xff] }
  0xff   :  { %881 = vmatpush.msra.mxu2 %v2023_v15  ;;  %901 = vmatpush.msra.mxu3 %v2009_v10  ;;  %v3119_v10 = vld [vmem:[#allocation16_spill] sm:$0xff]  ;;  %v3124_v15 = vld [vmem:[#allocation22_spill] sm:$0xff] }
 0x100   :  { %842 = vmatpush.msra.mxu0 %v2014_v12  ;;  %862 = vmatpush.msra.mxu1 %v2016_v13  ;;  %v3121_v12 = vld [vmem:[#allocation19_spill] sm:$0xff]  ;;  %v3122_v13 = vld [vmem:[#allocation21_spill] sm:$0xff] }
 0x101   :  { %882 = vmatpush.msra.mxu2 %v2030_v17  ;;  %902 = vmatpush.msra.mxu3 %v2021_v14  ;;  %v3123_v14 = vld [vmem:[#allocation20_spill] sm:$0xff]  ;;  %v3125_v17 = vld [vmem:[#allocation23_spill] sm:$0xff] }
 0x102   :  { %843 = vmatpush.msra.mxu0 %v2034_v18  ;;  %863 = vmatpush.msra.mxu1 %v2036_v19  ;;  %v3126_v18 = vld [vmem:[#allocation25_spill] sm:$0xff]  ;;  %v3127_v19 = vld [vmem:[#allocation24_spill] sm:$0xff] }
 0x103   :  { %883 = vmatpush.msra.mxu2 %v2044_v21  ;;  %903 = vmatpush.msra.mxu3 %v2042_v20  ;;  %v3128_v20 = vld [vmem:[#allocation26_spill] sm:$0xff]  ;;  %v3129_v21 = vld [vmem:[#allocation27_spill] sm:$0xff] }
 0x104   :  { %844 = vmatpush.msra.mxu0 %v2048_v22  ;;  %864 = vmatpush.msra.mxu1 %v2050_v23  ;;  %v3130_v22 = vld [vmem:[#allocation29_spill] sm:$0xff]  ;;  %v3131_v23 = vld [vmem:[#allocation28_spill] sm:$0xff] }
 0x105   :  { %884 = vmatpush.msra.mxu2 %v2056_v25  ;;  %904 = vmatpush.msra.mxu3 %v2054_v24  ;;  %v3132_v24 = vld [vmem:[#allocation30_spill] sm:$0xff]  ;;  %v3133_v25 = vld [vmem:[#allocation31_spill] sm:$0xff] }
 0x106   :  { %845 = vmatpush.msra.mxu0 %v2059_v26  ;;  %865 = vmatpush.msra.mxu1 %v2061_v27  ;;  %v3134_v26 = vld [vmem:[#allocation32_spill] sm:$0xff]  ;;  %v3135_v27 = vld [vmem:[#allocation33_spill] sm:$0xff] }
 0x107   :  { %885 = vmatpush.msra.mxu2 %v2068_v29  ;;  %905 = vmatpush.msra.mxu3 %v2066_v28  ;;  %v3136_v28 = vld [vmem:[#allocation34_spill] sm:$0xff]  ;;  %v3137_v29 = vld [vmem:[#allocation35_spill] sm:$0xff] }
 0x108   :  { %846 = vmatpush.msra.mxu0 %v2077_v31  ;;  %866 = vmatpush.msra.mxu1 %v2079_v32  ;;  %v3138_v31 = vld [vmem:[#allocation36_spill] sm:$0xff]  ;;  %v3139_v32 = vld [vmem:[#allocation37_spill] sm:$0xff] }
 0x109   :  { %886 = vmatpush.msra.mxu2 %v2087_v34  ;;  %906 = vmatpush.msra.mxu3 %v2085_v33 }
 0x10a   :  { %847 = vmatpush.msra.mxu0 %v2091_v35  ;;  %867 = vmatpush.msra.mxu1 %v2093_v36  ;;  %v3140_v35 = vld [vmem:[#allocation38_spill] sm:$0xff] }
 0x10b   :  { %887 = vmatpush.msra.mxu2 %v2099_v38  ;;  %907 = vmatpush.msra.mxu3 %v2097_v37  ;;  %v3141_v37 = vld [vmem:[#allocation39_spill] sm:$0xff] }
 0x10c   :  { %848 = vmatpush.msra.mxu0 %v2102_v39  ;;  %868 = vmatpush.msra.mxu1 %v2104_v40 }
 0x10d   :  { %888 = vmatpush.msra.mxu2 %v2111_v42  ;;  %908 = vmatpush.msra.mxu3 %v2109_v41  ;;  %v3142_v42 = vld [vmem:[#allocation41_spill] sm:$0xff] }
 0x10e   :  { %849 = vmatpush.msra.mxu0 %v2120_v44  ;;  %869 = vmatpush.msra.mxu1 %v2122_v45 }
 0x10f   :  { %889 = vmatpush.msra.mxu2 %v3114_v5  ;;  %909 = vmatpush.msra.mxu3 %v3115_v6 }
 0x110   :  { %850 = vmatpush.msra.mxu0 %v3116_v7  ;;  %870 = vmatpush.msra.mxu1 %v3117_v8 }
 0x111   :  { %890 = vmatpush.msra.mxu2 %v3118_v9  ;;  %910 = vmatpush.msra.mxu3 %v3119_v10 }
 0x112   :  { %851 = vmatpush.msra.mxu0 %v3120_v11  ;;  %871 = vmatpush.msra.mxu1 %v3121_v12 }
 0x113   :  { %891 = vmatpush.msra.mxu2 %v3122_v13  ;;  %911 = vmatpush.msra.mxu3 %v3123_v14 }
 0x114   :  { %852 = vmatpush.msra.mxu0 %v3124_v15  ;;  %872 = vmatpush.msra.mxu1 %v3125_v17 }
 0x115   :  { %892 = vmatpush.msra.mxu2 %v3126_v18  ;;  %912 = vmatpush.msra.mxu3 %v3127_v19 }
 0x116   :  { %853 = vmatpush.msra.mxu0 %v3128_v20  ;;  %873 = vmatpush.msra.mxu1 %v3129_v21 }
 0x117   :  { %893 = vmatpush.msra.mxu2 %v3130_v22  ;;  %913 = vmatpush.msra.mxu3 %v3131_v23 }
 0x118   :  { %854 = vmatpush.msra.mxu0 %v3132_v24  ;;  %874 = vmatpush.msra.mxu1 %v3133_v25 }
 0x119   :  { %894 = vmatpush.msra.mxu2 %v3134_v26  ;;  %914 = vmatpush.msra.mxu3 %v3135_v27 }
 0x11a   :  { %855 = vmatpush.msra.mxu0 %v3136_v28  ;;  %875 = vmatpush.msra.mxu1 %v3137_v29 }
 0x11b   :  { %895 = vmatpush.msra.mxu2 %v3138_v31  ;;  %915 = vmatpush.msra.mxu3 %v3139_v32 }
 0x177   :  { %v549_v33 = vpop.f32.mrf.mxu0  ;;  %v569_v34 = vpop.f32.mrf.mxu1 }
 0x178   :  { %v612_v36 = vadd.f32 %v549_v33, %v3140_v35  ;;  %v613_v38 = vadd.f32 %v569_v34, %v3141_v37  ;;  %v2522_v33 = vld [vmem:[#allocation7 + $0x1e8] sm:$0xff]  ;;  %v2525_v34 = vld [vmem:[#allocation7 + $0x1f0] sm:$0xff]  ;;  %v2528_v35 = vld [vmem:[#allocation7 + $0x1f8] sm:$0xff] }
 0x179   :  { %v2534_v37 = vld [vmem:[#allocation7 + $0x1c8] sm:$0xff] }
 0x17a   :  { %v1648_v39 = vmul.f32 -1.442695, %v612_v36  ;;  %v1649_v40 = vmul.f32 -1.442695, %v613_v38  ;;  %v2531_v36 = vld [vmem:[#allocation7 + $0x1c0] sm:$0xff]  ;;  %v2537_v38 = vld [vmem:[#allocation7 + $0x1d0] sm:$0xff] }
 0x17c   :  { %1698 = vpow2.f32 %v1648_v39  ;;  %v2540_v39 = vld [vmem:[#allocation7 + $0x1d8] sm:$0xff] }
 0x17d   :  { %1700 = vpow2.f32 %v1649_v40  ;;  %v2543_v40 = vld [vmem:[#allocation7 + $0x1a0] sm:$0xff] }
 0x17e   :  { %v609_v41 = vpop.f32.mrf.mxu3  ;;  %v589_v50 = vpop.f32.mrf.mxu2 }
 0x17f   :  { %v615_v44 = vadd.f32 %v609_v41, %v3142_v42  ;;  %v614_v54 = vadd.f32 %v589_v50, %v3143_v43  ;;  %v2546_v41 = vld [vmem:[#allocation7 + $0x1a8] sm:$0xff]  ;;  %v2549_v42 = vld [vmem:[#allocation7 + $0x1b0] sm:$0xff] }
 0x180   :  { %v2570_v50 = vld [vmem:[#allocation7 + $0x168] sm:$0xff] }
 0x181   :  { %v1650_v45 = vmul.f32 -1.442695, %v615_v44  ;;  %v2552_v44 = vld [vmem:[#allocation7 + $0x1b8] sm:$0xff]  ;;  %v2582_v43 = vld [vmem:[#allocation7 + $0x148] sm:$0xff] }
 0x182   :  { %v1699_v46 = vpop.eup %1698 }
 0x183   :  { %v1701_v47 = vpop.eup %1700  ;;  %v619_v51 = vadd.f32 1.0, %v1699_v46  ;;  %1702 = vpow2.f32 %v1650_v45  ;;  %v2555_v45 = vld [vmem:[#allocation7 + $0x180] sm:$0xff]  ;;  %v2558_v46 = vld [vmem:[#allocation7 + $0x188] sm:$0xff] }
 0x184   :  { %v638_v4 = vadd.f32 1.0, %v1701_v47  ;;  %v2561_v47 = vld [vmem:[#allocation7 + $0x190] sm:$0xff] }
 0x185   :  { %1704 = vrcp.f32 %v619_v51  ;;  %v631_v55 = vand.u32 2147483648, %v619_v51  ;;  %v629_v52 = vand.u32 2147483647, %v619_v51  ;;  %vm625_vm15 = vweird.f32 %v619_v51 }
 0x186   :  { %1706 = vrcp.f32 %v638_v4  ;;  %v650_v60 = vand.u32 2147483648, %v638_v4  ;;  %v648_v61 = vand.u32 2147483647, %v638_v4  ;;  %vm644_vm0 = vweird.f32 %v638_v4 }
 0x187   :  { %v632_v62 = vor.u32 1.1754944e-38, %v631_v55  ;;  %vm630_vm3 = vcmp.eq.f32.partialorder %v629_v52, 8.507059e+37  ;;  %v2603_v55 = vld [vmem:[#allocation7 + $0x100] sm:$0xff]  ;;  %v2612_v52 = vld [vmem:[#allocation7 + $0x118] sm:$0xff] }
 0x188   :  { %v651_v6 = vor.u32 1.1754944e-38, %v650_v60  ;;  %vm649_vm4 = vcmp.eq.f32.partialorder %v648_v61, 8.507059e+37  ;;  %v2606_v60 = vld [vmem:[#allocation7 + $0x108] sm:$0xff] }
 0x189   :  { %v1703_v0 = vpop.eup %1702  ;;  %v2618_v61 = vld [vmem:[#allocation7 + $0xe8] sm:$0xff] }
 0x18a   :  { %v658_v16 = vadd.f32 1.0, %v1703_v0  ;;  %v2573_v0 = vld [vmem:[#allocation7 + $0x170] sm:$0xff] }
 0x18b   :  { %v1705_v1 = vpop.eup %1704 }
 0x18c   :  { %v1707_v3 = vpop.eup %1706  ;;  %v621_v53 = vmul.f32 %v1705_v1, %v619_v51  ;;  %1708 = vrcp.f32 %v658_v16  ;;  %vm626_vm13 = vweird.f32 %v1705_v1  ;;  %v670_v19 = vand.u32 2147483648, %v658_v16  ;;  %v2564_v51 = vld [vmem:[#allocation7 + $0x198] sm:$0xff] }
 0x18d   :  { %v640_v48 = vmul.f32 %v1707_v3, %v638_v4  ;;  %1710 = vtanh.f32 %v614_v54  ;;  %vm645_vm14 = vweird.f32 %v1707_v3  ;;  %vm627_vm1 = vmor %vm625_vm15, %vm626_vm13  ;;  %vm664_vm6 = vweird.f32 %v658_v16  ;;  %v2567_v4 = vld [vmem:[#allocation7 + $0x160] sm:$0xff]  ;;  %v2585_v54 = vld [vmem:[#allocation7 + $0x150] sm:$0xff] }
 0x18e   :  { %v622_v49 = vsub.f32 1.0, %v621_v53  ;;  %vm646_vm2 = vmor %vm644_vm0, %vm645_vm14  ;;  %v668_v20 = vand.u32 2147483647, %v658_v16  ;;  %v671_v22 = vor.u32 1.1754944e-38, %v670_v19  ;;  %v2591_v53 = vld [vmem:[#allocation7 + $0x120] sm:$0xff]  ;;  %v2669_v19 = vld [vmem:[#allocation7 + $0x70] sm:$0xff] }
 0x18f   :  { %v641_v56 = vsub.f32 1.0, %v640_v48  ;;  %v2594_v48 = vld [vmem:[#allocation7 + $0x128] sm:$0xff]  ;;  %3156 = vst [vmem:[#allocation25_spill] sm:$0xff] %v2669_v19 }
 0x190   :  { %v623_v57 = vmul.f32 %v1705_v1, %v622_v49  ;;  %vm669_vm8 = vcmp.eq.f32.partialorder %v668_v20, 8.507059e+37  ;;  %v2597_v49 = vld [vmem:[#allocation7 + $0x130] sm:$0xff]  ;;  %v2672_v20 = vld [vmem:[#allocation7 + $0x78] sm:$0xff] }
 0x191   :  { %v642_v58 = vmul.f32 %v1707_v3, %v641_v56  ;;  %v2600_v56 = vld [vmem:[#allocation7 + $0x138] sm:$0xff]  ;;  %3157 = vst [vmem:[#allocation24_spill] sm:$0xff] %v2672_v20 }
 0x192   :  { %v1709_v63 = vpop.eup %1708  ;;  %v624_v2 = vadd.f32 %v1705_v1, %v623_v57  ;;  %v2609_v57 = vld [vmem:[#allocation7 + $0x110] sm:$0xff] }
 0x193   :  { %v643_v59 = vadd.f32 %v1707_v3, %v642_v58  ;;  %v660_v5 = vmul.f32 %v1709_v63, %v658_v16  ;;  %v1711_v8 = vpop.eup %1710  ;;  %vm665_vm5 = vweird.f32 %v1709_v63  ;;  %v2576_v16 = vld [vmem:[#allocation7 + $0x178] sm:$0xff]  ;;  %v2615_v58 = vld [vmem:[#allocation7 + $0xe0] sm:$0xff] }
 0x194   :  { %v628_v7 = vsel %vm627_vm1, %v1705_v1, %v624_v2  ;;  %vm666_vm7 = vmor %vm664_vm6, %vm665_vm5  ;;  %v2579_v1 = vld [vmem:[#allocation7 + $0x140] sm:$0xff]  ;;  %v2624_v2 = vld [vmem:[#allocation7 + $0xf8] sm:$0xff] }
 0x195   :  { %v633_v9 = vsel %vm630_vm3, %v632_v62, %v628_v7  ;;  %v647_v10 = vsel %vm646_vm2, %v1707_v3, %v643_v59  ;;  %v661_v11 = vsub.f32 1.0, %v660_v5  ;;  %v2588_v3 = vld [vmem:[#allocation7 + $0x158] sm:$0xff]  ;;  %v2627_v62 = vld [vmem:[#allocation7 + $0xc0] sm:$0xff]  ;;  %v2630_v59 = vld [vmem:[#allocation7 + $0xc8] sm:$0xff] }
 0x196   :  { %v652_v12 = vsel %vm649_vm4, %v651_v6, %v647_v10  ;;  %v675_v13 = vmul.f32 %v1711_v8, %v633_v9  ;;  %v2633_v5 = vld [vmem:[#allocation7 + $0xd0] sm:$0xff]  ;;  %v2636_v6 = vld [vmem:[#allocation7 + $0xd8] sm:$0xff]  ;;  %v2639_v7 = vld [vmem:[#allocation7 + $0xa0] sm:$0xff] }
 0x197   :  { %v674_v14 = vmul.f32 %v652_v12, %v2438_v30  ;;  %v662_v15 = vmul.f32 %v1709_v63, %v661_v11  ;;  %v2519_v30 = vld [vmem:[#allocation7 + $0x1e0] sm:$0xff]  ;;  %3144 = vst [vmem:[#allocation13_spill] sm:$0xff] %v2633_v5  ;;  %v2642_v8 = vld [vmem:[#allocation7 + $0xa8] sm:$0xff]  ;;  %v2645_v9 = vld [vmem:[#allocation7 + $0xb0] sm:$0xff] }
 0x198   :  { %3145 = vst [vmem:[#allocation12_spill] sm:$0xff] %v2636_v6  ;;  %v2648_v10 = vld [vmem:[#allocation7 + $0xb8] sm:$0xff]  ;;  %v2651_v11 = vld [vmem:[#allocation7 + $0x80] sm:$0xff]  ;;  %v2654_v12 = vld [vmem:[#allocation7 + $0x88] sm:$0xff] }
 0x199   :  { %v2513_v17 = vadd.f32 %v675_v13, %v674_v14  ;;  %v663_v18 = vadd.f32 %v1709_v63, %v662_v15  ;;  %3146 = vst [vmem:[#allocation14_spill] sm:$0xff] %v2639_v7  ;;  %v2657_v13 = vld [vmem:[#allocation7 + $0x90] sm:$0xff]  ;;  %v2660_v14 = vld [vmem:[#allocation7 + $0x98] sm:$0xff]  ;;  %v2663_v15 = vld [vmem:[#allocation7 + $0x60] sm:$0xff] }
 0x19a   :  { %3147 = vst [vmem:[#allocation15_spill] sm:$0xff] %v2642_v8 }
 0x19b   :  { %1712 = vtanh.f32 %v2513_v17  ;;  %v667_v21 = vsel %vm666_vm7, %v1709_v63, %v663_v18  ;;  %v2621_v63 = vld [vmem:[#allocation7 + $0xf0] sm:$0xff]  ;;  %3148 = vst [vmem:[#allocation17_spill] sm:$0xff] %v2645_v9  ;;  %v2666_v18 = vld [vmem:[#allocation7 + $0x68] sm:$0xff] }
 0x19c   :  { %v672_v24 = vsel %vm669_vm8, %v671_v22, %v667_v21  ;;  %3149 = vst [vmem:[#allocation16_spill] sm:$0xff] %v2648_v10  ;;  %v2675_v21 = vld [vmem:[#allocation7 + $0x40] sm:$0xff]  ;;  %v2678_v22 = vld [vmem:[#allocation7 + $0x48] sm:$0xff] }
 0x19d   :  { %3150 = vst [vmem:[#allocation18_spill] sm:$0xff] %v2651_v11 }
 0x19e   :  { %3151 = vst [vmem:[#allocation19_spill] sm:$0xff] %v2654_v12 }
 0x19f   :  { %3152 = vst [vmem:[#allocation21_spill] sm:$0xff] %v2657_v13 }
 0x1a0   :  { %3153 = vst [vmem:[#allocation20_spill] sm:$0xff] %v2660_v14 }
 0x1a1   :  { %v1713_v23 = vpop.eup %1712  ;;  %3154 = vst [vmem:[#allocation22_spill] sm:$0xff] %v2663_v15 }
 0x1a2   :  { %v678_v25 = vmul.f32 %v1713_v23, %v672_v24  ;;  %3155 = vst [vmem:[#allocation23_spill] sm:$0xff] %v2666_v18  ;;  %v2681_v23 = vld [vmem:[#allocation7 + $0x50] sm:$0xff]  ;;  %v2684_v24 = vld [vmem:[#allocation7 + $0x58] sm:$0xff] }
 0x1a3   :  { %3158 = vst [vmem:[#allocation26_spill] sm:$0xff] %v2675_v21 }
 0x1a4   :  { %1651 = vst [vmem:[%s2970_s4 + $0x8] sm:$0xff] %v678_v25  ;;  %702 = vmatmul.f32.vlgmr.msrb.gmra.mxu0 %v678_v25  ;;  %722 = vmatmul.f32.vlgmr.msrb.gmra.mxu1 %v678_v25 }
 0x1a5   :  { %742 = vmatmul.f32.vlgmr.msrb.gmra.mxu2 %v678_v25  ;;  %762 = vmatmul.f32.vlgmr.msrb.gmra.mxu3 %v678_v25  ;;  %3159 = vst [vmem:[#allocation27_spill] sm:$0xff] %v2678_v22  ;;  %v2687_v25 = vld [vmem:[#allocation7 + $0x20] sm:$0xff] }
 0x1a6   :  { %994 = vmatpush.msrb.mxu0 %v2519_v30  ;;  %1014 = vmatpush.msrb.mxu1 %v2522_v33  ;;  %3160 = vst [vmem:[#allocation29_spill] sm:$0xff] %v2681_v23 }
 0x1a7   :  { %1034 = vmatpush.msrb.mxu2 %v2525_v34  ;;  %1054 = vmatpush.msrb.mxu3 %v2528_v35  ;;  %3161 = vst [vmem:[#allocation28_spill] sm:$0xff] %v2684_v24 }
 0x1a8   :  { %995 = vmatpush.msrb.mxu0 %v2531_v36  ;;  %1015 = vmatpush.msrb.mxu1 %v2534_v37  ;;  %3162 = vst [vmem:[#allocation30_spill] sm:$0xff] %v2687_v25 }
 0x1a9   :  { %1035 = vmatpush.msrb.mxu2 %v2537_v38  ;;  %1055 = vmatpush.msrb.mxu3 %v2540_v39 }
 0x1aa   :  { %996 = vmatpush.msrb.mxu0 %v2543_v40  ;;  %1016 = vmatpush.msrb.mxu1 %v2546_v41 }
 0x1ab   :  { %1036 = vmatpush.msrb.mxu2 %v2549_v42  ;;  %1056 = vmatpush.msrb.mxu3 %v2552_v44 }
 0x1ac   :  { %997 = vmatpush.msrb.mxu0 %v2555_v45  ;;  %1017 = vmatpush.msrb.mxu1 %v2558_v46 }
 0x1ad   :  { %1037 = vmatpush.msrb.mxu2 %v2561_v47  ;;  %1057 = vmatpush.msrb.mxu3 %v2564_v51 }
 0x1ae   :  { %998 = vmatpush.msrb.mxu0 %v2567_v4  ;;  %1018 = vmatpush.msrb.mxu1 %v2570_v50 }
 0x1af   :  { %1038 = vmatpush.msrb.mxu2 %v2573_v0  ;;  %1058 = vmatpush.msrb.mxu3 %v2576_v16 }
 0x1b0   :  { %999 = vmatpush.msrb.mxu0 %v2579_v1  ;;  %1019 = vmatpush.msrb.mxu1 %v2582_v43 }
 0x1b1   :  { %1039 = vmatpush.msrb.mxu2 %v2585_v54  ;;  %1059 = vmatpush.msrb.mxu3 %v2588_v3 }
 0x1b2   :  { %1000 = vmatpush.msrb.mxu0 %v2591_v53  ;;  %1020 = vmatpush.msrb.mxu1 %v2594_v48 }
 0x1b3   :  { %1040 = vmatpush.msrb.mxu2 %v2597_v49  ;;  %1060 = vmatpush.msrb.mxu3 %v2600_v56 }
 0x1b4   :  { %1001 = vmatpush.msrb.mxu0 %v2603_v55  ;;  %1021 = vmatpush.msrb.mxu1 %v2606_v60 }
 0x1b5   :  { %1041 = vmatpush.msrb.mxu2 %v2609_v57  ;;  %1061 = vmatpush.msrb.mxu3 %v2612_v52 }
 0x1b6   :  { %1002 = vmatpush.msrb.mxu0 %v2615_v58  ;;  %1022 = vmatpush.msrb.mxu1 %v2618_v61 }
 0x1b7   :  { %1042 = vmatpush.msrb.mxu2 %v2621_v63  ;;  %1062 = vmatpush.msrb.mxu3 %v2624_v2 }
 0x1b8   :  { %1003 = vmatpush.msrb.mxu0 %v2627_v62  ;;  %1023 = vmatpush.msrb.mxu1 %v2630_v59 }
 0x1b9   :  { %1043 = vmatpush.msrb.mxu2 %v2633_v5  ;;  %1063 = vmatpush.msrb.mxu3 %v2636_v6 }
 0x1ba   :  { %1004 = vmatpush.msrb.mxu0 %v2639_v7  ;;  %1024 = vmatpush.msrb.mxu1 %v2642_v8 }
 0x1bb   :  { %1044 = vmatpush.msrb.mxu2 %v2645_v9  ;;  %1064 = vmatpush.msrb.mxu3 %v2648_v10 }
 0x1bc   :  { %1005 = vmatpush.msrb.mxu0 %v2651_v11  ;;  %1025 = vmatpush.msrb.mxu1 %v2654_v12 }
 0x1bd   :  { %1045 = vmatpush.msrb.mxu2 %v2657_v13  ;;  %1065 = vmatpush.msrb.mxu3 %v2660_v14 }
 0x1be   :  { %1006 = vmatpush.msrb.mxu0 %v2663_v15  ;;  %1026 = vmatpush.msrb.mxu1 %v2666_v18 }
 0x1bf   :  { %1046 = vmatpush.msrb.mxu2 %v2669_v19  ;;  %1066 = vmatpush.msrb.mxu3 %v2672_v20  ;;  %v2690_v20 = vld [vmem:[#allocation7 + $0x28] sm:$0xff] }
 0x1c0   :  { %1007 = vmatpush.msrb.mxu0 %v2675_v21  ;;  %1027 = vmatpush.msrb.mxu1 %v2678_v22  ;;  %3163 = vst [vmem:[#allocation31_spill] sm:$0xff] %v2690_v20  ;;  %v3164_v22 = vld [vmem:[#allocation42_spill] sm:$0xff]  ;;  %v3165_v21 = vld [vmem:[#allocation43_spill] sm:$0xff] }
 0x1c1   :  { %1047 = vmatpush.msrb.mxu2 %v2681_v23  ;;  %1067 = vmatpush.msrb.mxu3 %v2684_v24 }
 0x1c2   :  { %1008 = vmatpush.msrb.mxu0 %v2687_v25  ;;  %1028 = vmatpush.msrb.mxu1 %v2690_v20 }
 0x1c3   :  { %1048 = vmatpush.msrb.mxu2 %v3134_v26  ;;  %1068 = vmatpush.msrb.mxu3 %v3135_v27  ;;  %v3166_v27 = vld [vmem:[#allocation45_spill] sm:$0xff] }
 0x1c4   :  { %1009 = vmatpush.msrb.mxu0 %v3136_v28  ;;  %1029 = vmatpush.msrb.mxu1 %v3137_v29 }
 0x1c5   :  { %1049 = vmatpush.msrb.mxu2 %v3138_v31  ;;  %1069 = vmatpush.msrb.mxu3 %v3139_v32 }
 0x221   :  { %v703_v24 = vpop.f32.mrf.mxu0  ;;  %v723_v23 = vpop.f32.mrf.mxu1 }
 0x222   :  { %v766_v25 = vadd.f32 %v703_v24, %v3164_v22  ;;  %v767_v19 = vadd.f32 %v723_v23, %v3165_v21  ;;  %v3167_v21 = vld [vmem:[#allocation44_spill] sm:$0xff] }
 0x224   :  { %v1652_v18 = vmul.f32 -1.442695, %v766_v25  ;;  %v1653_v20 = vmul.f32 -1.442695, %v767_v19 }
 0x226   :  { %1714 = vpow2.f32 %v1652_v18 }
 0x227   :  { %1716 = vpow2.f32 %v1653_v20 }
 0x228   :  { %v763_v26 = vpop.f32.mrf.mxu3  ;;  %v743_v32 = vpop.f32.mrf.mxu2 }
 0x229   :  { %v769_v15 = vadd.f32 %v763_v26, %v3166_v27  ;;  %v768_v23 = vadd.f32 %v743_v32, %v3167_v21 }
 0x22b   :  { %v1654_v28 = vmul.f32 -1.442695, %v769_v15 }
 0x22c   :  { %v1715_v14 = vpop.eup %1714 }
 0x22d   :  { %v1717_v29 = vpop.eup %1716  ;;  %v773_v13 = vadd.f32 1.0, %v1715_v14  ;;  %1718 = vpow2.f32 %v1654_v28 }
 0x22e   :  { %v792_v31 = vadd.f32 1.0, %v1717_v29 }
 0x22f   :  { %1720 = vrcp.f32 %v773_v13  ;;  %v785_v15 = vand.u32 2147483648, %v773_v13  ;;  %v783_v28 = vand.u32 2147483647, %v773_v13  ;;  %vm779_vm11 = vweird.f32 %v773_v13 }
 0x230   :  { %1722 = vrcp.f32 %v792_v31  ;;  %v804_v27 = vand.u32 2147483648, %v792_v31  ;;  %v802_v11 = vand.u32 2147483647, %v792_v31  ;;  %vm798_vm12 = vweird.f32 %v792_v31 }
 0x231   :  { %v786_v32 = vor.u32 1.1754944e-38, %v785_v15  ;;  %vm784_vm15 = vcmp.eq.f32.partialorder %v783_v28, 8.507059e+37 }
 0x232   :  { %vm803_vm0 = vcmp.eq.f32.partialorder %v802_v11, 8.507059e+37 }
 0x233   :  { %v1719_v12 = vpop.eup %1718 }
 0x234   :  { %v812_v22 = vadd.f32 1.0, %v1719_v12 }
 0x235   :  { %v1721_v24 = vpop.eup %1720 }
 0x236   :  { %v1723_v19 = vpop.eup %1722  ;;  %v775_v18 = vmul.f32 %v1721_v24, %v773_v13  ;;  %1724 = vrcp.f32 %v812_v22  ;;  %vm780_vm9 = vweird.f32 %v1721_v24  ;;  %v824_v15 = vand.u32 2147483648, %v812_v22 }
 0x237   :  { %v794_v20 = vmul.f32 %v1723_v19, %v792_v31  ;;  %1726 = vtanh.f32 %v768_v23  ;;  %vm799_vm10 = vweird.f32 %v1723_v19  ;;  %vm781_vm13 = vmor %vm779_vm11, %vm780_vm9  ;;  %vm818_vm2 = vweird.f32 %v812_v22 }
 0x238   :  { %v776_v25 = vsub.f32 1.0, %v775_v18  ;;  %vm800_vm14 = vmor %vm798_vm12, %vm799_vm10  ;;  %v805_v18 = vor.u32 1.1754944e-38, %v804_v27  ;;  %v825_v28 = vor.u32 1.1754944e-38, %v824_v15  ;;  %v3186_v15 = vld [vmem:[#allocation30_spill] sm:$0xff] }
 0x239   :  { %v795_v26 = vsub.f32 1.0, %v794_v20 }
 0x23a   :  { %v777_v14 = vmul.f32 %v1721_v24, %v776_v25 }
 0x23b   :  { %v796_v29 = vmul.f32 %v1723_v19, %v795_v26 }
 0x23c   :  { %v1725_v10 = vpop.eup %1724  ;;  %v778_v12 = vadd.f32 %v1721_v24, %v777_v14 }
 0x23d   :  { %v797_v21 = vadd.f32 %v1723_v19, %v796_v29  ;;  %v814_v9 = vmul.f32 %v1725_v10, %v812_v22  ;;  %v1727_v23 = vpop.eup %1726  ;;  %vm819_vm1 = vweird.f32 %v1725_v10  ;;  %v3175_v29 = vld [vmem:[#allocation19_spill] sm:$0xff] }
 0x23e   :  { %v782_v20 = vsel %vm781_vm13, %v1721_v24, %v778_v12  ;;  %v822_v24 = vand.u32 2147483647, %v812_v22  ;;  %vm820_vm3 = vmor %vm818_vm2, %vm819_vm1  ;;  %v3174_v22 = vld [vmem:[#allocation18_spill] sm:$0xff]  ;;  %v3176_v12 = vld [vmem:[#allocation21_spill] sm:$0xff] }
 0x23f   :  { %v787_v8 = vsel %vm784_vm15, %v786_v32, %v782_v20  ;;  %v801_v25 = vsel %vm800_vm14, %v1723_v19, %v797_v21  ;;  %v815_v7 = vsub.f32 1.0, %v814_v9  ;;  %v3177_v32 = vld [vmem:[#allocation20_spill] sm:$0xff]  ;;  %v3178_v21 = vld [vmem:[#allocation22_spill] sm:$0xff]  ;;  %v3180_v20 = vld [vmem:[#allocation25_spill] sm:$0xff] }
 0x240   :  { %v806_v26 = vsel %vm803_vm0, %v805_v18, %v801_v25  ;;  %v829_v6 = vmul.f32 %v1727_v23, %v787_v8  ;;  %vm823_vm4 = vcmp.eq.f32.partialorder %v822_v24, 8.507059e+37  ;;  %v3172_v8 = vld [vmem:[#allocation17_spill] sm:$0xff]  ;;  %v3179_v18 = vld [vmem:[#allocation23_spill] sm:$0xff]  ;;  %v3181_v23 = vld [vmem:[#allocation24_spill] sm:$0xff] }
 0x241   :  { %v828_v5 = vmul.f32 %v806_v26, %v2513_v17  ;;  %v816_v14 = vmul.f32 %v1725_v10, %v815_v7  ;;  %v3168_v17 = vld [vmem:[#allocation13_spill] sm:$0xff]  ;;  %v3171_v7 = vld [vmem:[#allocation15_spill] sm:$0xff]  ;;  %v3182_v25 = vld [vmem:[#allocation26_spill] sm:$0xff] }
 0x242   :  { %v3183_v26 = vld [vmem:[#allocation27_spill] sm:$0xff] }
 0x243   :  { %v2704_v13 = vadd.f32 %v829_v6, %v828_v5  ;;  %v817_v31 = vadd.f32 %v1725_v10, %v816_v14  ;;  %v3169_v5 = vld [vmem:[#allocation12_spill] sm:$0xff]  ;;  %v3170_v6 = vld [vmem:[#allocation14_spill] sm:$0xff]  ;;  %v3184_v14 = vld [vmem:[#allocation29_spill] sm:$0xff] }
 0x244   :  { %v3187_v24 = vld [vmem:[#allocation31_spill] sm:$0xff] }
 0x245   :  { %1728 = vtanh.f32 %v2704_v13  ;;  %v821_v27 = vsel %vm820_vm3, %v1725_v10, %v817_v31  ;;  %v3173_v10 = vld [vmem:[#allocation16_spill] sm:$0xff] }
 0x246   :  { %v826_v9 = vsel %vm823_vm4, %v825_v28, %v821_v27  ;;  %v3185_v31 = vld [vmem:[#allocation28_spill] sm:$0xff]  ;;  %v2768_v27 = vld [vmem:[#allocation7 + $0x30] sm:$0xff]  ;;  %v2771_v28 = vld [vmem:[#allocation7 + $0x38] sm:$0xff] }
 0x247   :  { %3188 = vst [vmem:[#allocation32_spill] sm:$0xff] %v2768_v27 }
 0x248   :  { %3189 = vst [vmem:[#allocation33_spill] sm:$0xff] %v2771_v28 }
 0x24b   :  { %v1729_v11 = vpop.eup %1728 }
 0x24c   :  { %v832_v19 = vmul.f32 %v1729_v11, %v826_v9  ;;  %v2774_v11 = vld [vmem:[#allocation7] sm:$0xff]  ;;  %v2777_v9 = vld [vmem:[#allocation7 + $0x8] sm:$0xff] }
 0x24d   :  { %3190 = vst [vmem:[#allocation34_spill] sm:$0xff] %v2774_v11 }
 0x24e   :  { %1655 = vst [vmem:[%s2970_s4 + $0x10] sm:$0xff] %v832_v19  ;;  %856 = vmatmul.f32.vlgmr.msra.gmra.mxu0 %v832_v19  ;;  %876 = vmatmul.f32.vlgmr.msra.gmra.mxu1 %v832_v19 }
 0x24f   :  { %896 = vmatmul.f32.vlgmr.msra.gmra.mxu2 %v832_v19  ;;  %916 = vmatmul.f32.vlgmr.msra.gmra.mxu3 %v832_v19  ;;  %3191 = vst [vmem:[#allocation35_spill] sm:$0xff] %v2777_v9  ;;  %v2780_v19 = vld [vmem:[#allocation7 + $0x10] sm:$0xff] }
 0x250   :  { %1148 = vmatpush.msra.mxu0 %v2519_v30  ;;  %1168 = vmatpush.msra.mxu1 %v2522_v33  ;;  %3192 = vst [vmem:[#allocation36_spill] sm:$0xff] %v2780_v19 }
 0x251   :  { %1188 = vmatpush.msra.mxu2 %v2525_v34  ;;  %1208 = vmatpush.msra.mxu3 %v2528_v35 }
 0x252   :  { %1149 = vmatpush.msra.mxu0 %v2531_v36  ;;  %1169 = vmatpush.msra.mxu1 %v2534_v37 }
 0x253   :  { %1189 = vmatpush.msra.mxu2 %v2537_v38  ;;  %1209 = vmatpush.msra.mxu3 %v2540_v39 }
 0x254   :  { %1150 = vmatpush.msra.mxu0 %v2543_v40  ;;  %1170 = vmatpush.msra.mxu1 %v2546_v41 }
 0x255   :  { %1190 = vmatpush.msra.mxu2 %v2549_v42  ;;  %1210 = vmatpush.msra.mxu3 %v2552_v44 }
 0x256   :  { %1151 = vmatpush.msra.mxu0 %v2555_v45  ;;  %1171 = vmatpush.msra.mxu1 %v2558_v46 }
 0x257   :  { %1191 = vmatpush.msra.mxu2 %v2561_v47  ;;  %1211 = vmatpush.msra.mxu3 %v2564_v51 }
 0x258   :  { %1152 = vmatpush.msra.mxu0 %v2567_v4  ;;  %1172 = vmatpush.msra.mxu1 %v2570_v50 }
 0x259   :  { %1192 = vmatpush.msra.mxu2 %v2573_v0  ;;  %1212 = vmatpush.msra.mxu3 %v2576_v16 }
 0x25a   :  { %1153 = vmatpush.msra.mxu0 %v2579_v1  ;;  %1173 = vmatpush.msra.mxu1 %v2582_v43 }
 0x25b   :  { %1193 = vmatpush.msra.mxu2 %v2585_v54  ;;  %1213 = vmatpush.msra.mxu3 %v2588_v3 }
 0x25c   :  { %1154 = vmatpush.msra.mxu0 %v2591_v53  ;;  %1174 = vmatpush.msra.mxu1 %v2594_v48 }
 0x25d   :  { %1194 = vmatpush.msra.mxu2 %v2597_v49  ;;  %1214 = vmatpush.msra.mxu3 %v2600_v56 }
 0x25e   :  { %1155 = vmatpush.msra.mxu0 %v2603_v55  ;;  %1175 = vmatpush.msra.mxu1 %v2606_v60 }
 0x25f   :  { %1195 = vmatpush.msra.mxu2 %v2609_v57  ;;  %1215 = vmatpush.msra.mxu3 %v2612_v52 }
 0x260   :  { %1156 = vmatpush.msra.mxu0 %v2615_v58  ;;  %1176 = vmatpush.msra.mxu1 %v2618_v61 }
 0x261   :  { %1196 = vmatpush.msra.mxu2 %v2621_v63  ;;  %1216 = vmatpush.msra.mxu3 %v2624_v2 }
 0x262   :  { %1157 = vmatpush.msra.mxu0 %v2627_v62  ;;  %1177 = vmatpush.msra.mxu1 %v2630_v59 }
 0x263   :  { %1197 = vmatpush.msra.mxu2 %v3168_v17  ;;  %1217 = vmatpush.msra.mxu3 %v3169_v5 }
 0x264   :  { %1158 = vmatpush.msra.mxu0 %v3170_v6  ;;  %1178 = vmatpush.msra.mxu1 %v3171_v7 }
 0x265   :  { %1198 = vmatpush.msra.mxu2 %v3172_v8  ;;  %1218 = vmatpush.msra.mxu3 %v3173_v10 }
 0x266   :  { %1159 = vmatpush.msra.mxu0 %v3174_v22  ;;  %1179 = vmatpush.msra.mxu1 %v3175_v29 }
 0x267   :  { %1199 = vmatpush.msra.mxu2 %v3176_v12  ;;  %1219 = vmatpush.msra.mxu3 %v3177_v32 }
 0x268   :  { %1160 = vmatpush.msra.mxu0 %v3178_v21  ;;  %1180 = vmatpush.msra.mxu1 %v3179_v18 }
 0x269   :  { %1200 = vmatpush.msra.mxu2 %v3180_v20  ;;  %1220 = vmatpush.msra.mxu3 %v3181_v23 }
 0x26a   :  { %1161 = vmatpush.msra.mxu0 %v3182_v25  ;;  %1181 = vmatpush.msra.mxu1 %v3183_v26 }
 0x26b   :  { %1201 = vmatpush.msra.mxu2 %v3184_v14  ;;  %1221 = vmatpush.msra.mxu3 %v3185_v31  ;;  %v3194_v31 = vld [vmem:[#allocation46_spill] sm:$0xff]  ;;  %v3195_v14 = vld [vmem:[#allocation47_spill] sm:$0xff] }
 0x26c   :  { %1162 = vmatpush.msra.mxu0 %v3186_v15  ;;  %1182 = vmatpush.msra.mxu1 %v3187_v24  ;;  %v2783_v24 = vld [vmem:[#allocation7 + $0x18] sm:$0xff] }
 0x26d   :  { %1202 = vmatpush.msra.mxu2 %v2768_v27  ;;  %1222 = vmatpush.msra.mxu3 %v2771_v28  ;;  %3193 = vst [vmem:[#allocation37_spill] sm:$0xff] %v2783_v24 }
 0x26e   :  { %1163 = vmatpush.msra.mxu0 %v2774_v11  ;;  %1183 = vmatpush.msra.mxu1 %v2777_v9  ;;  %v3196_v9 = vld [vmem:[#allocation49_spill] sm:$0xff] }
 0x26f   :  { %1203 = vmatpush.msra.mxu2 %v2780_v19  ;;  %1223 = vmatpush.msra.mxu3 %v2783_v24 }
 0x2cb   :  { %v857_v27 = vpop.f32.mrf.mxu0  ;;  %v877_v15 = vpop.f32.mrf.mxu1 }
 0x2cc   :  { %v920_v28 = vadd.f32 %v857_v27, %v3194_v31  ;;  %v921_v26 = vadd.f32 %v877_v15, %v3195_v14  ;;  %v3197_v14 = vld [vmem:[#allocation48_spill] sm:$0xff] }
 0x2ce   :  { %v1656_v25 = vmul.f32 -1.442695, %v920_v28  ;;  %v1657_v11 = vmul.f32 -1.442695, %v921_v26 }
 0x2d0   :  { %1730 = vpow2.f32 %v1656_v25 }
 0x2d1   :  { %1732 = vpow2.f32 %v1657_v11 }
 0x2d2   :  { %v917_v23 = vpop.f32.mrf.mxu3  ;;  %v897_v24 = vpop.f32.mrf.mxu2 }
 0x2d3   :  { %v923_v20 = vadd.f32 %v917_v23, %v3196_v9  ;;  %v922_v15 = vadd.f32 %v897_v24, %v3197_v14 }
 0x2d5   :  { %v1658_v18 = vmul.f32 -1.442695, %v923_v20 }
 0x2d6   :  { %v1731_v21 = vpop.eup %1730 }
 0x2d7   :  { %v1733_v19 = vpop.eup %1732  ;;  %v927_v32 = vadd.f32 1.0, %v1731_v21  ;;  %1734 = vpow2.f32 %v1658_v18 }
 0x2d8   :  { %v946_v12 = vadd.f32 1.0, %v1733_v19 }
 0x2d9   :  { %1736 = vrcp.f32 %v927_v32  ;;  %v939_v20 = vand.u32 2147483648, %v927_v32  ;;  %v937_v18 = vand.u32 2147483647, %v927_v32  ;;  %vm933_vm7 = vweird.f32 %v927_v32 }
 0x2da   :  { %1738 = vrcp.f32 %v946_v12  ;;  %v958_v9 = vand.u32 2147483648, %v946_v12  ;;  %v956_v22 = vand.u32 2147483647, %v946_v12  ;;  %vm952_vm8 = vweird.f32 %v946_v12 }
 0x2db   :  { %v940_v24 = vor.u32 1.1754944e-38, %v939_v20  ;;  %vm938_vm11 = vcmp.eq.f32.partialorder %v937_v18, 8.507059e+37 }
 0x2dc   :  { %vm957_vm12 = vcmp.eq.f32.partialorder %v956_v22, 8.507059e+37 }
 0x2dd   :  { %v1735_v29 = vpop.eup %1734 }
 0x2de   :  { %v966_v31 = vadd.f32 1.0, %v1735_v29 }
 0x2df   :  { %v1737_v27 = vpop.eup %1736 }
 0x2e0   :  { %v1739_v26 = vpop.eup %1738  ;;  %v929_v25 = vmul.f32 %v1737_v27, %v927_v32  ;;  %1740 = vrcp.f32 %v966_v31  ;;  %vm934_vm5 = vweird.f32 %v1737_v27  ;;  %v978_v20 = vand.u32 2147483648, %v966_v31 }
 0x2e1   :  { %v948_v28 = vmul.f32 %v1739_v26, %v946_v12  ;;  %1742 = vtanh.f32 %v922_v15  ;;  %vm953_vm6 = vweird.f32 %v1739_v26  ;;  %vm935_vm9 = vmor %vm933_vm7, %vm934_vm5  ;;  %vm972_vm14 = vweird.f32 %v966_v31 }
 0x2e2   :  { %v930_v11 = vsub.f32 1.0, %v929_v25  ;;  %vm954_vm10 = vmor %vm952_vm8, %vm953_vm6  ;;  %v959_v25 = vor.u32 1.1754944e-38, %v958_v9  ;;  %v979_v18 = vor.u32 1.1754944e-38, %v978_v20  ;;  %v3216_v20 = vld [vmem:[#allocation30_spill] sm:$0xff] }
 0x2e3   :  { %v949_v23 = vsub.f32 1.0, %v948_v28 }
 0x2e4   :  { %v931_v21 = vmul.f32 %v1737_v27, %v930_v11 }
 0x2e5   :  { %v950_v19 = vmul.f32 %v1739_v26, %v949_v23 }
 0x2e6   :  { %v1741_v10 = vpop.eup %1740  ;;  %v932_v29 = vadd.f32 %v1737_v27, %v931_v21 }
 0x2e7   :  { %v951_v14 = vadd.f32 %v1739_v26, %v950_v19  ;;  %v968_v8 = vmul.f32 %v1741_v10, %v966_v31  ;;  %v1743_v15 = vpop.eup %1742  ;;  %vm973_vm13 = vweird.f32 %v1741_v10  ;;  %v3205_v19 = vld [vmem:[#allocation19_spill] sm:$0xff] }
 0x2e8   :  { %v936_v28 = vsel %vm935_vm9, %v1737_v27, %v932_v29  ;;  %v976_v27 = vand.u32 2147483647, %v966_v31  ;;  %vm974_vm15 = vmor %vm972_vm14, %vm973_vm13  ;;  %v3204_v31 = vld [vmem:[#allocation18_spill] sm:$0xff]  ;;  %v3206_v29 = vld [vmem:[#allocation21_spill] sm:$0xff] }
 0x2e9   :  { %v941_v7 = vsel %vm938_vm11, %v940_v24, %v936_v28  ;;  %v955_v11 = vsel %vm954_vm10, %v1739_v26, %v951_v14  ;;  %v969_v6 = vsub.f32 1.0, %v968_v8  ;;  %v3207_v24 = vld [vmem:[#allocation20_spill] sm:$0xff]  ;;  %v3208_v14 = vld [vmem:[#allocation22_spill] sm:$0xff]  ;;  %v3210_v28 = vld [vmem:[#allocation25_spill] sm:$0xff] }
 0x2ea   :  { %v960_v23 = vsel %vm957_vm12, %v959_v25, %v955_v11  ;;  %v983_v5 = vmul.f32 %v1743_v15, %v941_v7  ;;  %vm977_vm0 = vcmp.eq.f32.partialorder %v976_v27, 8.507059e+37  ;;  %v3202_v7 = vld [vmem:[#allocation17_spill] sm:$0xff]  ;;  %v3209_v25 = vld [vmem:[#allocation23_spill] sm:$0xff]  ;;  %v3211_v15 = vld [vmem:[#allocation24_spill] sm:$0xff] }
 0x2eb   :  { %v982_v17 = vmul.f32 %v960_v23, %v2704_v13  ;;  %v970_v21 = vmul.f32 %v1741_v10, %v969_v6  ;;  %v3198_v13 = vld [vmem:[#allocation13_spill] sm:$0xff]  ;;  %v3201_v6 = vld [vmem:[#allocation15_spill] sm:$0xff]  ;;  %v3212_v11 = vld [vmem:[#allocation26_spill] sm:$0xff] }
 0x2ec   :  { %v3213_v23 = vld [vmem:[#allocation27_spill] sm:$0xff] }
 0x2ed   :  { %v2791_v32 = vadd.f32 %v983_v5, %v982_v17  ;;  %v971_v12 = vadd.f32 %v1741_v10, %v970_v21  ;;  %v3199_v17 = vld [vmem:[#allocation12_spill] sm:$0xff]  ;;  %v3200_v5 = vld [vmem:[#allocation14_spill] sm:$0xff]  ;;  %v3214_v21 = vld [vmem:[#allocation29_spill] sm:$0xff] }
 0x2ee   :  { %v3217_v27 = vld [vmem:[#allocation31_spill] sm:$0xff] }
 0x2ef   :  { %1744 = vtanh.f32 %v2791_v32  ;;  %v975_v9 = vsel %vm974_vm15, %v1741_v10, %v971_v12  ;;  %v3203_v10 = vld [vmem:[#allocation16_spill] sm:$0xff] }
 0x2f0   :  { %v980_v8 = vsel %vm977_vm0, %v979_v18, %v975_v9  ;;  %v3215_v12 = vld [vmem:[#allocation28_spill] sm:$0xff]  ;;  %v3219_v18 = vld [vmem:[#allocation33_spill] sm:$0xff] }
 0x2f1   :  { %v3218_v9 = vld [vmem:[#allocation32_spill] sm:$0xff] }
 0x2f5   :  { %v1745_v22 = vpop.eup %1744 }
 0x2f6   :  { %v986_v26 = vmul.f32 %v1745_v22, %v980_v8  ;;  %v3220_v22 = vld [vmem:[#allocation34_spill] sm:$0xff]  ;;  %v3221_v8 = vld [vmem:[#allocation35_spill] sm:$0xff] }
 0x2f8   :  { %1659 = vst [vmem:[%s2970_s4 + $0x18] sm:$0xff] %v986_v26  ;;  %1010 = vmatmul.f32.vlgmr.msrb.gmra.mxu0 %v986_v26  ;;  %1030 = vmatmul.f32.vlgmr.msrb.gmra.mxu1 %v986_v26 }
 0x2f9   :  { %1050 = vmatmul.f32.vlgmr.msrb.gmra.mxu2 %v986_v26  ;;  %1070 = vmatmul.f32.vlgmr.msrb.gmra.mxu3 %v986_v26  ;;  %v3222_v26 = vld [vmem:[#allocation36_spill] sm:$0xff] }
 0x2fa   :  { %1302 = vmatpush.msrb.mxu0 %v2519_v30  ;;  %1322 = vmatpush.msrb.mxu1 %v2522_v33 }
 0x2fb   :  { %1342 = vmatpush.msrb.mxu2 %v2525_v34  ;;  %1362 = vmatpush.msrb.mxu3 %v2528_v35 }
 0x2fc   :  { %1303 = vmatpush.msrb.mxu0 %v2531_v36  ;;  %1323 = vmatpush.msrb.mxu1 %v2534_v37 }
 0x2fd   :  { %1343 = vmatpush.msrb.mxu2 %v2537_v38  ;;  %1363 = vmatpush.msrb.mxu3 %v2540_v39 }
 0x2fe   :  { %1304 = vmatpush.msrb.mxu0 %v2543_v40  ;;  %1324 = vmatpush.msrb.mxu1 %v2546_v41 }
 0x2ff   :  { %1344 = vmatpush.msrb.mxu2 %v2549_v42  ;;  %1364 = vmatpush.msrb.mxu3 %v2552_v44 }
 0x300   :  { %1305 = vmatpush.msrb.mxu0 %v2555_v45  ;;  %1325 = vmatpush.msrb.mxu1 %v2558_v46 }
 0x301   :  { %1345 = vmatpush.msrb.mxu2 %v2561_v47  ;;  %1365 = vmatpush.msrb.mxu3 %v2564_v51 }
 0x302   :  { %1306 = vmatpush.msrb.mxu0 %v2567_v4  ;;  %1326 = vmatpush.msrb.mxu1 %v2570_v50 }
 0x303   :  { %1346 = vmatpush.msrb.mxu2 %v2573_v0  ;;  %1366 = vmatpush.msrb.mxu3 %v2576_v16 }
 0x304   :  { %1307 = vmatpush.msrb.mxu0 %v2579_v1  ;;  %1327 = vmatpush.msrb.mxu1 %v2582_v43 }
 0x305   :  { %1347 = vmatpush.msrb.mxu2 %v2585_v54  ;;  %1367 = vmatpush.msrb.mxu3 %v2588_v3 }
 0x306   :  { %1308 = vmatpush.msrb.mxu0 %v2591_v53  ;;  %1328 = vmatpush.msrb.mxu1 %v2594_v48 }
 0x307   :  { %1348 = vmatpush.msrb.mxu2 %v2597_v49  ;;  %1368 = vmatpush.msrb.mxu3 %v2600_v56 }
 0x308   :  { %1309 = vmatpush.msrb.mxu0 %v2603_v55  ;;  %1329 = vmatpush.msrb.mxu1 %v2606_v60 }
 0x309   :  { %1349 = vmatpush.msrb.mxu2 %v2609_v57  ;;  %1369 = vmatpush.msrb.mxu3 %v2612_v52 }
 0x30a   :  { %1310 = vmatpush.msrb.mxu0 %v2615_v58  ;;  %1330 = vmatpush.msrb.mxu1 %v2618_v61 }
 0x30b   :  { %1350 = vmatpush.msrb.mxu2 %v2621_v63  ;;  %1370 = vmatpush.msrb.mxu3 %v2624_v2 }
 0x30c   :  { %1311 = vmatpush.msrb.mxu0 %v2627_v62  ;;  %1331 = vmatpush.msrb.mxu1 %v2630_v59 }
 0x30d   :  { %1351 = vmatpush.msrb.mxu2 %v3198_v13  ;;  %1371 = vmatpush.msrb.mxu3 %v3199_v17 }
 0x30e   :  { %1312 = vmatpush.msrb.mxu0 %v3200_v5  ;;  %1332 = vmatpush.msrb.mxu1 %v3201_v6 }
 0x30f   :  { %1352 = vmatpush.msrb.mxu2 %v3202_v7  ;;  %1372 = vmatpush.msrb.mxu3 %v3203_v10 }
 0x310   :  { %1313 = vmatpush.msrb.mxu0 %v3204_v31  ;;  %1333 = vmatpush.msrb.mxu1 %v3205_v19 }
 0x311   :  { %1353 = vmatpush.msrb.mxu2 %v3206_v29  ;;  %1373 = vmatpush.msrb.mxu3 %v3207_v24 }
 0x312   :  { %1314 = vmatpush.msrb.mxu0 %v3208_v14  ;;  %1334 = vmatpush.msrb.mxu1 %v3209_v25 }
 0x313   :  { %1354 = vmatpush.msrb.mxu2 %v3210_v28  ;;  %1374 = vmatpush.msrb.mxu3 %v3211_v15  ;;  %v3224_v15 = vld [vmem:[#allocation50_spill] sm:$0xff]  ;;  %v3225_v28 = vld [vmem:[#allocation51_spill] sm:$0xff] }
 0x314   :  { %1315 = vmatpush.msrb.mxu0 %v3212_v11  ;;  %1335 = vmatpush.msrb.mxu1 %v3213_v23  ;;  %v3223_v11 = vld [vmem:[#allocation37_spill] sm:$0xff] }
 0x315   :  { %1355 = vmatpush.msrb.mxu2 %v3214_v21  ;;  %1375 = vmatpush.msrb.mxu3 %v3215_v12 }
 0x316   :  { %1316 = vmatpush.msrb.mxu0 %v3216_v20  ;;  %1336 = vmatpush.msrb.mxu1 %v3217_v27 }
 0x317   :  { %1356 = vmatpush.msrb.mxu2 %v3218_v9  ;;  %1376 = vmatpush.msrb.mxu3 %v3219_v18  ;;  %v3226_v18 = vld [vmem:[#allocation53_spill] sm:$0xff] }
 0x318   :  { %1317 = vmatpush.msrb.mxu0 %v3220_v22  ;;  %1337 = vmatpush.msrb.mxu1 %v3221_v8 }
 0x319   :  { %1357 = vmatpush.msrb.mxu2 %v3222_v26  ;;  %1377 = vmatpush.msrb.mxu3 %v3223_v11 }
 0x375   :  { %v1011_v23 = vpop.f32.mrf.mxu0  ;;  %v1031_v21 = vpop.f32.mrf.mxu1 }
 0x376   :  { %v1074_v12 = vadd.f32 %v1011_v23, %v3224_v15  ;;  %v1075_v20 = vadd.f32 %v1031_v21, %v3225_v28  ;;  %v3227_v28 = vld [vmem:[#allocation52_spill] sm:$0xff] }
 0x378   :  { %v1660_v25 = vmul.f32 -1.442695, %v1074_v12  ;;  %v1661_v27 = vmul.f32 -1.442695, %v1075_v20 }
 0x37a   :  { %1746 = vpow2.f32 %v1660_v25 }
 0x37b   :  { %1748 = vpow2.f32 %v1661_v27 }
 0x37c   :  { %v1071_v9 = vpop.f32.mrf.mxu3  ;;  %v1051_v11 = vpop.f32.mrf.mxu2 }
 0x37d   :  { %v1077_v14 = vadd.f32 %v1071_v9, %v3226_v18  ;;  %v1076_v21 = vadd.f32 %v1051_v11, %v3227_v28 }
 0x37f   :  { %v1662_v22 = vmul.f32 -1.442695, %v1077_v14 }
 0x380   :  { %v1747_v24 = vpop.eup %1746 }
 0x381   :  { %v1749_v8 = vpop.eup %1748  ;;  %v1081_v29 = vadd.f32 1.0, %v1747_v24  ;;  %1750 = vpow2.f32 %v1662_v22 }
 0x382   :  { %v1100_v26 = vadd.f32 1.0, %v1749_v8 }
 0x383   :  { %1752 = vrcp.f32 %v1081_v29  ;;  %v1093_v14 = vand.u32 2147483648, %v1081_v29  ;;  %v1091_v22 = vand.u32 2147483647, %v1081_v29  ;;  %vm1087_vm3 = vweird.f32 %v1081_v29 }
 0x384   :  { %1754 = vrcp.f32 %v1100_v26  ;;  %v1112_v18 = vand.u32 2147483648, %v1100_v26  ;;  %v1110_v31 = vand.u32 2147483647, %v1100_v26  ;;  %vm1106_vm4 = vweird.f32 %v1100_v26 }
 0x385   :  { %v1094_v11 = vor.u32 1.1754944e-38, %v1093_v14  ;;  %vm1092_vm7 = vcmp.eq.f32.partialorder %v1091_v22, 8.507059e+37 }
 0x386   :  { %vm1111_vm8 = vcmp.eq.f32.partialorder %v1110_v31, 8.507059e+37 }
 0x387   :  { %v1751_v19 = vpop.eup %1750 }
 0x388   :  { %v1120_v15 = vadd.f32 1.0, %v1751_v19 }
 0x389   :  { %v1753_v23 = vpop.eup %1752 }
 0x38a   :  { %v1755_v12 = vpop.eup %1754  ;;  %v1083_v25 = vmul.f32 %v1753_v23, %v1081_v29  ;;  %1756 = vrcp.f32 %v1120_v15  ;;  %vm1088_vm1 = vweird.f32 %v1753_v23  ;;  %v1132_v14 = vand.u32 2147483648, %v1120_v15 }
 0x38b   :  { %v1102_v20 = vmul.f32 %v1755_v12, %v1100_v26  ;;  %1758 = vtanh.f32 %v1076_v21  ;;  %vm1107_vm2 = vweird.f32 %v1755_v12  ;;  %vm1089_vm5 = vmor %vm1087_vm3, %vm1088_vm1  ;;  %vm1126_vm10 = vweird.f32 %v1120_v15 }
 0x38c   :  { %v1084_v27 = vsub.f32 1.0, %v1083_v25  ;;  %vm1108_vm6 = vmor %vm1106_vm4, %vm1107_vm2  ;;  %v1113_v25 = vor.u32 1.1754944e-38, %v1112_v18  ;;  %v1133_v22 = vor.u32 1.1754944e-38, %v1132_v14 }
 0x38d   :  { %v1103_v9 = vsub.f32 1.0, %v1102_v20 }
 0x38e   :  { %v1085_v24 = vmul.f32 %v1753_v23, %v1084_v27 }
 0x38f   :  { %v1104_v8 = vmul.f32 %v1755_v12, %v1103_v9 }
 0x390   :  { %v1757_v10 = vpop.eup %1756  ;;  %v1086_v19 = vadd.f32 %v1753_v23, %v1085_v24 }
 0x391   :  { %v1105_v28 = vadd.f32 %v1755_v12, %v1104_v8  ;;  %v1122_v7 = vmul.f32 %v1757_v10, %v1120_v15  ;;  %v1759_v21 = vpop.eup %1758  ;;  %vm1127_vm9 = vweird.f32 %v1757_v10 }
 0x392   :  { %v1090_v20 = vsel %vm1089_vm5, %v1753_v23, %v1086_v19  ;;  %v1130_v23 = vand.u32 2147483647, %v1120_v15  ;;  %vm1128_vm11 = vmor %vm1126_vm10, %vm1127_vm9  ;;  %v3257_v19 = vld [vmem:[#allocation56_spill] sm:$0xff] }
 0x393   :  { %v1095_v6 = vsel %vm1092_vm7, %v1094_v11, %v1090_v20  ;;  %v1109_v27 = vsel %vm1108_vm6, %v1755_v12, %v1105_v28  ;;  %v1123_v5 = vsub.f32 1.0, %v1122_v7 }
 0x394   :  { %v1114_v9 = vsel %vm1111_vm8, %v1113_v25, %v1109_v27  ;;  %v1137_v17 = vmul.f32 %v1759_v21, %v1095_v6  ;;  %vm1131_vm12 = vcmp.eq.f32.partialorder %v1130_v23, 8.507059e+37 }
 0x395   :  { %v1136_v13 = vmul.f32 %v1114_v9, %v2791_v32  ;;  %v1124_v24 = vmul.f32 %v1757_v10, %v1123_v5 }
 0x397   :  { %v2866_v29 = vadd.f32 %v1137_v17, %v1136_v13  ;;  %v1125_v26 = vadd.f32 %v1757_v10, %v1124_v24 }
 0x399   :  { %1760 = vtanh.f32 %v2866_v29  ;;  %v1129_v18 = vsel %vm1128_vm11, %v1757_v10, %v1125_v26 }
 0x39a   :  { %v1134_v7 = vsel %vm1131_vm12, %v1133_v22, %v1129_v18 }
 0x39f   :  { %v1761_v31 = vpop.eup %1760 }
 0x3a0   :  { %v1140_v12 = vmul.f32 %v1761_v31, %v1134_v7 }
 0x3a2   :  { %1663 = vst [vmem:[%s2970_s4 + $0x20] sm:$0xff] %v1140_v12  ;;  %1164 = vmatmul.f32.vlgmr.msra.gmra.mxu0 %v1140_v12  ;;  %1184 = vmatmul.f32.vlgmr.msra.gmra.mxu1 %v1140_v12 }
 0x3a3   :  { %1204 = vmatmul.f32.vlgmr.msra.gmra.mxu2 %v1140_v12  ;;  %1224 = vmatmul.f32.vlgmr.msra.gmra.mxu3 %v1140_v12 }
 0x3a4   :  { %1456 = vmatpush.msra.mxu0 %v2519_v30  ;;  %1476 = vmatpush.msra.mxu1 %v2522_v33  ;;  %v3228_v30 = vld [vmem:[#allocation13_spill] sm:$0xff]  ;;  %v3229_v33 = vld [vmem:[#allocation12_spill] sm:$0xff] }
 0x3a5   :  { %1496 = vmatpush.msra.mxu2 %v2525_v34  ;;  %1516 = vmatpush.msra.mxu3 %v2528_v35  ;;  %v3230_v34 = vld [vmem:[#allocation14_spill] sm:$0xff]  ;;  %v3231_v35 = vld [vmem:[#allocation15_spill] sm:$0xff] }
 0x3a6   :  { %1457 = vmatpush.msra.mxu0 %v2531_v36  ;;  %1477 = vmatpush.msra.mxu1 %v2534_v37  ;;  %v3232_v36 = vld [vmem:[#allocation17_spill] sm:$0xff]  ;;  %v3233_v37 = vld [vmem:[#allocation16_spill] sm:$0xff] }
 0x3a7   :  { %1497 = vmatpush.msra.mxu2 %v2537_v38  ;;  %1517 = vmatpush.msra.mxu3 %v2540_v39  ;;  %v3234_v38 = vld [vmem:[#allocation18_spill] sm:$0xff]  ;;  %v3235_v39 = vld [vmem:[#allocation19_spill] sm:$0xff] }
 0x3a8   :  { %1458 = vmatpush.msra.mxu0 %v2543_v40  ;;  %1478 = vmatpush.msra.mxu1 %v2546_v41  ;;  %v3236_v40 = vld [vmem:[#allocation21_spill] sm:$0xff]  ;;  %v3237_v41 = vld [vmem:[#allocation20_spill] sm:$0xff] }
 0x3a9   :  { %1498 = vmatpush.msra.mxu2 %v2549_v42  ;;  %1518 = vmatpush.msra.mxu3 %v2552_v44  ;;  %v3238_v42 = vld [vmem:[#allocation22_spill] sm:$0xff]  ;;  %v3239_v44 = vld [vmem:[#allocation23_spill] sm:$0xff] }
 0x3aa   :  { %1459 = vmatpush.msra.mxu0 %v2555_v45  ;;  %1479 = vmatpush.msra.mxu1 %v2558_v46  ;;  %v3240_v45 = vld [vmem:[#allocation25_spill] sm:$0xff]  ;;  %v3241_v46 = vld [vmem:[#allocation24_spill] sm:$0xff] }
 0x3ab   :  { %1499 = vmatpush.msra.mxu2 %v2561_v47  ;;  %1519 = vmatpush.msra.mxu3 %v2564_v51  ;;  %v3242_v47 = vld [vmem:[#allocation26_spill] sm:$0xff]  ;;  %v3243_v51 = vld [vmem:[#allocation27_spill] sm:$0xff] }
 0x3ac   :  { %1460 = vmatpush.msra.mxu0 %v2567_v4  ;;  %1480 = vmatpush.msra.mxu1 %v2570_v50  ;;  %v3244_v4 = vld [vmem:[#allocation29_spill] sm:$0xff]  ;;  %v3245_v50 = vld [vmem:[#allocation28_spill] sm:$0xff] }
 0x3ad   :  { %1500 = vmatpush.msra.mxu2 %v2573_v0  ;;  %1520 = vmatpush.msra.mxu3 %v2576_v16  ;;  %v3246_v0 = vld [vmem:[#allocation30_spill] sm:$0xff]  ;;  %v3247_v16 = vld [vmem:[#allocation31_spill] sm:$0xff] }
 0x3ae   :  { %1461 = vmatpush.msra.mxu0 %v2579_v1  ;;  %1481 = vmatpush.msra.mxu1 %v2582_v43  ;;  %v3248_v1 = vld [vmem:[#allocation32_spill] sm:$0xff]  ;;  %v3249_v43 = vld [vmem:[#allocation33_spill] sm:$0xff] }
 0x3af   :  { %1501 = vmatpush.msra.mxu2 %v2585_v54  ;;  %1521 = vmatpush.msra.mxu3 %v2588_v3  ;;  %v3250_v54 = vld [vmem:[#allocation34_spill] sm:$0xff]  ;;  %v3251_v3 = vld [vmem:[#allocation35_spill] sm:$0xff] }
 0x3b0   :  { %1462 = vmatpush.msra.mxu0 %v2591_v53  ;;  %1482 = vmatpush.msra.mxu1 %v2594_v48  ;;  %v3252_v53 = vld [vmem:[#allocation36_spill] sm:$0xff]  ;;  %v3253_v48 = vld [vmem:[#allocation37_spill] sm:$0xff] }
 0x3b1   :  { %1502 = vmatpush.msra.mxu2 %v2597_v49  ;;  %1522 = vmatpush.msra.mxu3 %v2600_v56 }
 0x3b2   :  { %1463 = vmatpush.msra.mxu0 %v2603_v55  ;;  %1483 = vmatpush.msra.mxu1 %v2606_v60  ;;  %v3254_v55 = vld [vmem:[#allocation54_spill] sm:$0xff] }
 0x3b3   :  { %1503 = vmatpush.msra.mxu2 %v2609_v57  ;;  %1523 = vmatpush.msra.mxu3 %v2612_v52  ;;  %v3255_v57 = vld [vmem:[#allocation55_spill] sm:$0xff] }
 0x3b4   :  { %1464 = vmatpush.msra.mxu0 %v2615_v58  ;;  %1484 = vmatpush.msra.mxu1 %v2618_v61 }
 0x3b5   :  { %1504 = vmatpush.msra.mxu2 %v2621_v63  ;;  %1524 = vmatpush.msra.mxu3 %v2624_v2  ;;  %v3256_v2 = vld [vmem:[#allocation57_spill] sm:$0xff] }
 0x3b6   :  { %1465 = vmatpush.msra.mxu0 %v2627_v62  ;;  %1485 = vmatpush.msra.mxu1 %v2630_v59 }
 0x3b7   :  { %1505 = vmatpush.msra.mxu2 %v3228_v30  ;;  %1525 = vmatpush.msra.mxu3 %v3229_v33 }
 0x3b8   :  { %1466 = vmatpush.msra.mxu0 %v3230_v34  ;;  %1486 = vmatpush.msra.mxu1 %v3231_v35 }
 0x3b9   :  { %1506 = vmatpush.msra.mxu2 %v3232_v36  ;;  %1526 = vmatpush.msra.mxu3 %v3233_v37 }
 0x3ba   :  { %1467 = vmatpush.msra.mxu0 %v3234_v38  ;;  %1487 = vmatpush.msra.mxu1 %v3235_v39 }
 0x3bb   :  { %1507 = vmatpush.msra.mxu2 %v3236_v40  ;;  %1527 = vmatpush.msra.mxu3 %v3237_v41 }
 0x3bc   :  { %1468 = vmatpush.msra.mxu0 %v3238_v42  ;;  %1488 = vmatpush.msra.mxu1 %v3239_v44 }
 0x3bd   :  { %1508 = vmatpush.msra.mxu2 %v3240_v45  ;;  %1528 = vmatpush.msra.mxu3 %v3241_v46 }
 0x3be   :  { %1469 = vmatpush.msra.mxu0 %v3242_v47  ;;  %1489 = vmatpush.msra.mxu1 %v3243_v51 }
 0x3bf   :  { %1509 = vmatpush.msra.mxu2 %v3244_v4  ;;  %1529 = vmatpush.msra.mxu3 %v3245_v50 }
 0x3c0   :  { %1470 = vmatpush.msra.mxu0 %v3246_v0  ;;  %1490 = vmatpush.msra.mxu1 %v3247_v16 }
 0x3c1   :  { %1510 = vmatpush.msra.mxu2 %v3248_v1  ;;  %1530 = vmatpush.msra.mxu3 %v3249_v43  ;;  %v3258_v43 = vld [vmem:[#allocation58_spill] sm:$0xff] }
 0x3c2   :  { %1471 = vmatpush.msra.mxu0 %v3250_v54  ;;  %1491 = vmatpush.msra.mxu1 %v3251_v3  ;;  %v3259_v3 = vld [vmem:[#allocation59_spill] sm:$0xff] }
 0x3c3   :  { %1511 = vmatpush.msra.mxu2 %v3252_v53  ;;  %1531 = vmatpush.msra.mxu3 %v3253_v48 }
 0x41f   :  { %v1165_v49 = vpop.f32.mrf.mxu0  ;;  %v1185_v56 = vpop.f32.mrf.mxu1 }
 0x420   :  { %v1228_v60 = vadd.f32 %v1165_v49, %v3254_v55  ;;  %v1229_v52 = vadd.f32 %v1185_v56, %v3255_v57  ;;  %v3260_v55 = vld [vmem:[#allocation61_spill] sm:$0xff] }
 0x422   :  { %v1664_v58 = vmul.f32 -1.442695, %v1228_v60  ;;  %v1665_v61 = vmul.f32 -1.442695, %v1229_v52 }
 0x424   :  { %1762 = vpow2.f32 %v1664_v58 }
 0x425   :  { %1764 = vpow2.f32 %v1665_v61 }
 0x426   :  { %v1225_v63 = vpop.f32.mrf.mxu3  ;;  %v1205_v6 = vpop.f32.mrf.mxu2 }
 0x427   :  { %v1231_v62 = vadd.f32 %v1225_v63, %v3256_v2  ;;  %v1230_v11 = vadd.f32 %v1205_v6, %v3257_v19 }
 0x429   :  { %v1666_v59 = vmul.f32 -1.442695, %v1231_v62 }
 0x42a   :  { %v1763_v32 = vpop.eup %1762 }
 0x42b   :  { %v1765_v13 = vpop.eup %1764  ;;  %v1235_v17 = vadd.f32 1.0, %v1763_v32  ;;  %1766 = vpow2.f32 %v1666_v59 }
 0x42c   :  { %v1254_v5 = vadd.f32 1.0, %v1765_v13  ;;  %v3261_v13 = vld [vmem:[#allocation60_spill] sm:$0xff] }
 0x42d   :  { %1768 = vrcp.f32 %v1235_v17  ;;  %v1247_v9 = vand.u32 2147483648, %v1235_v17  ;;  %v1245_v14 = vand.u32 2147483647, %v1235_v17  ;;  %vm1241_vm15 = vweird.f32 %v1235_v17 }
 0x42e   :  { %1770 = vrcp.f32 %v1254_v5  ;;  %v1266_v24 = vand.u32 2147483648, %v1254_v5  ;;  %v1264_v18 = vand.u32 2147483647, %v1254_v5  ;;  %vm1260_vm0 = vweird.f32 %v1254_v5 }
 0x42f   :  { %v1248_v7 = vor.u32 1.1754944e-38, %v1247_v9  ;;  %vm1246_vm3 = vcmp.eq.f32.partialorder %v1245_v14, 8.507059e+37 }
 0x430   :  { %v1267_v33 = vor.u32 1.1754944e-38, %v1266_v24  ;;  %vm1265_vm4 = vcmp.eq.f32.partialorder %v1264_v18, 8.507059e+37 }
 0x431   :  { %v1767_v10 = vpop.eup %1766 }
 0x432   :  { %v1274_v15 = vadd.f32 1.0, %v1767_v10 }
 0x433   :  { %v1769_v8 = vpop.eup %1768 }
 0x434   :  { %v1771_v28 = vpop.eup %1770  ;;  %v1237_v25 = vmul.f32 %v1769_v8, %v1235_v17  ;;  %1772 = vrcp.f32 %v1274_v15  ;;  %vm1242_vm13 = vweird.f32 %v1769_v8  ;;  %v1286_v46 = vand.u32 2147483648, %v1274_v15 }
 0x435   :  { %v1256_v20 = vmul.f32 %v1771_v28, %v1254_v5  ;;  %1774 = vtanh.f32 %v1230_v11  ;;  %vm1261_vm14 = vweird.f32 %v1771_v28  ;;  %vm1243_vm1 = vmor %vm1241_vm15, %vm1242_vm13  ;;  %vm1280_vm6 = vweird.f32 %v1274_v15 }
 0x436   :  { %v1238_v21 = vsub.f32 1.0, %v1237_v25  ;;  %vm1262_vm2 = vmor %vm1260_vm0, %vm1261_vm14  ;;  %v1284_v47 = vand.u32 2147483647, %v1274_v15  ;;  %v1287_v4 = vor.u32 1.1754944e-38, %v1286_v46 }
 0x437   :  { %v1257_v27 = vsub.f32 1.0, %v1256_v20 }
 0x438   :  { %v1239_v26 = vmul.f32 %v1769_v8, %v1238_v21  ;;  %vm1285_vm8 = vcmp.eq.f32.partialorder %v1284_v47, 8.507059e+37 }
 0x439   :  { %v1258_v23 = vmul.f32 %v1771_v28, %v1257_v27 }
 0x43a   :  { %v1773_v22 = vpop.eup %1772  ;;  %v1240_v31 = vadd.f32 %v1769_v8, %v1239_v26 }
 0x43b   :  { %v1259_v12 = vadd.f32 %v1771_v28, %v1258_v23  ;;  %v1276_v30 = vmul.f32 %v1773_v22, %v1274_v15  ;;  %v1775_v35 = vpop.eup %1774  ;;  %vm1281_vm5 = vweird.f32 %v1773_v22 }
 0x43c   :  { %v1244_v34 = vsel %vm1243_vm1, %v1769_v8, %v1240_v31  ;;  %vm1282_vm7 = vmor %vm1280_vm6, %vm1281_vm5 }
 0x43d   :  { %v1249_v36 = vsel %vm1246_vm3, %v1248_v7, %v1244_v34  ;;  %v1263_v37 = vsel %vm1262_vm2, %v1771_v28, %v1259_v12  ;;  %v1277_v38 = vsub.f32 1.0, %v1276_v30 }
 0x43e   :  { %v1268_v39 = vsel %vm1265_vm4, %v1267_v33, %v1263_v37  ;;  %v1291_v40 = vmul.f32 %v1775_v35, %v1249_v36 }
 0x43f   :  { %v1290_v41 = vmul.f32 %v1268_v39, %v2866_v29  ;;  %v1278_v42 = vmul.f32 %v1773_v22, %v1277_v38 }
 0x441   :  { %v2941_v44 = vadd.f32 %v1291_v40, %v1290_v41  ;;  %v1279_v45 = vadd.f32 %v1773_v22, %v1278_v42 }
 0x443   :  { %1776 = vtanh.f32 %v2941_v44  ;;  %v1283_v51 = vsel %vm1282_vm7, %v1773_v22, %v1279_v45 }
 0x444   :  { %v1288_v0 = vsel %vm1285_vm8, %v1287_v4, %v1283_v51  ;;  %v3262_v51 = vld [vmem:[#allocation62_spill] sm:$0xff] }
 0x449   :  { %v1777_v50 = vpop.eup %1776 }
 0x44a   :  { %v1294_v16 = vmul.f32 %v1777_v50, %v1288_v0  ;;  %v3263_v50 = vld [vmem:[#allocation63_spill] sm:$0xff] }
 0x44c   :  { %1667 = vst [vmem:[%s2970_s4 + $0x28] sm:$0xff] %v1294_v16  ;;  %1318 = vmatmul.f32.vlgmr.msrb.gmra.mxu0 %v1294_v16  ;;  %1338 = vmatmul.f32.vlgmr.msrb.gmra.mxu1 %v1294_v16 }
 0x44d   :  { %1358 = vmatmul.f32.vlgmr.msrb.gmra.mxu2 %v1294_v16  ;;  %1378 = vmatmul.f32.vlgmr.msrb.gmra.mxu3 %v1294_v16 }
 0x4c9   :  { %v1319_v29 = vpop.f32.mrf.mxu0  ;;  %v1339_v1 = vpop.f32.mrf.mxu1 }
 0x4ca   :  { %v1382_v54 = vadd.f32 %v1319_v29, %v3258_v43  ;;  %v1383_v53 = vadd.f32 %v1339_v1, %v3259_v3  ;;  %v3264_v43 = vld [vmem:[#allocation65_spill] sm:$0xff] }
 0x4cc   :  { %v1668_v48 = vmul.f32 -1.442695, %v1382_v54  ;;  %v1669_v49 = vmul.f32 -1.442695, %v1383_v53 }
 0x4ce   :  { %1778 = vpow2.f32 %v1668_v48 }
 0x4cf   :  { %1780 = vpow2.f32 %v1669_v49 }
 0x4d0   :  { %v1379_v56 = vpop.f32.mrf.mxu3  ;;  %v1359_v2 = vpop.f32.mrf.mxu2 }
 0x4d1   :  { %v1385_v60 = vadd.f32 %v1379_v56, %v3260_v55  ;;  %v1384_v17 = vadd.f32 %v1359_v2, %v3261_v13 }
 0x4d3   :  { %v1670_v57 = vmul.f32 -1.442695, %v1385_v60 }
 0x4d4   :  { %v1779_v52 = vpop.eup %1778 }
 0x4d5   :  { %v1781_v58 = vpop.eup %1780  ;;  %v1389_v61 = vadd.f32 1.0, %v1779_v52  ;;  %1782 = vpow2.f32 %v1670_v57 }
 0x4d6   :  { %v1408_v63 = vadd.f32 1.0, %v1781_v58  ;;  %v3265_v58 = vld [vmem:[#allocation64_spill] sm:$0xff] }
 0x4d7   :  { %1784 = vrcp.f32 %v1389_v61  ;;  %v1401_v19 = vand.u32 2147483648, %v1389_v61  ;;  %v1399_v25 = vand.u32 2147483647, %v1389_v61  ;;  %vm1395_vm11 = vweird.f32 %v1389_v61 }
 0x4d8   :  { %1786 = vrcp.f32 %v1408_v63  ;;  %v1420_v11 = vand.u32 2147483648, %v1408_v63  ;;  %v1418_v21 = vand.u32 2147483647, %v1408_v63  ;;  %vm1414_vm12 = vweird.f32 %v1408_v63 }
 0x4d9   :  { %v1402_v24 = vor.u32 1.1754944e-38, %v1401_v19  ;;  %vm1400_vm15 = vcmp.eq.f32.partialorder %v1399_v25, 8.507059e+37 }
 0x4da   :  { %v1421_v23 = vor.u32 1.1754944e-38, %v1420_v11  ;;  %vm1419_vm0 = vcmp.eq.f32.partialorder %v1418_v21, 8.507059e+37 }
 0x4db   :  { %v1783_v62 = vpop.eup %1782 }
 0x4dc   :  { %v1428_v59 = vadd.f32 1.0, %v1783_v62 }
 0x4dd   :  { %v1785_v32 = vpop.eup %1784 }
 0x4de   :  { %v1787_v5 = vpop.eup %1786  ;;  %v1391_v6 = vmul.f32 %v1785_v32, %v1389_v61  ;;  %1788 = vrcp.f32 %v1428_v59  ;;  %vm1396_vm9 = vweird.f32 %v1785_v32  ;;  %v1440_v38 = vand.u32 2147483648, %v1428_v59 }
 0x4df   :  { %v1410_v10 = vmul.f32 %v1787_v5, %v1408_v63  ;;  %1790 = vtanh.f32 %v1384_v17  ;;  %vm1415_vm10 = vweird.f32 %v1787_v5  ;;  %vm1397_vm13 = vmor %vm1395_vm11, %vm1396_vm9  ;;  %vm1434_vm2 = vweird.f32 %v1428_v59 }
 0x4e0   :  { %v1392_v15 = vsub.f32 1.0, %v1391_v6  ;;  %vm1416_vm14 = vmor %vm1414_vm12, %vm1415_vm10  ;;  %v1438_v39 = vand.u32 2147483647, %v1428_v59  ;;  %v1441_v41 = vor.u32 1.1754944e-38, %v1440_v38 }
 0x4e1   :  { %v1411_v8 = vsub.f32 1.0, %v1410_v10 }
 0x4e2   :  { %v1393_v28 = vmul.f32 %v1785_v32, %v1392_v15  ;;  %vm1439_vm4 = vcmp.eq.f32.partialorder %v1438_v39, 8.507059e+37 }
 0x4e3   :  { %v1412_v20 = vmul.f32 %v1787_v5, %v1411_v8 }
 0x4e4   :  { %v1789_v27 = vpop.eup %1788  ;;  %v1394_v9 = vadd.f32 %v1785_v32, %v1393_v28 }
 0x4e5   :  { %v1413_v26 = vadd.f32 %v1787_v5, %v1412_v20  ;;  %v1430_v14 = vmul.f32 %v1789_v27, %v1428_v59  ;;  %v1791_v22 = vpop.eup %1790  ;;  %vm1435_vm1 = vweird.f32 %v1789_v27 }
 0x4e6   :  { %v1398_v18 = vsel %vm1397_vm13, %v1785_v32, %v1394_v9  ;;  %vm1436_vm3 = vmor %vm1434_vm2, %vm1435_vm1 }
 0x4e7   :  { %v1403_v31 = vsel %vm1400_vm15, %v1402_v24, %v1398_v18  ;;  %v1417_v7 = vsel %vm1416_vm14, %v1787_v5, %v1413_v26  ;;  %v1431_v12 = vsub.f32 1.0, %v1430_v14 }
 0x4e8   :  { %v1422_v30 = vsel %vm1419_vm0, %v1421_v23, %v1417_v7  ;;  %v1445_v33 = vmul.f32 %v1791_v22, %v1403_v31 }
 0x4e9   :  { %v1444_v34 = vmul.f32 %v1422_v30, %v2941_v44  ;;  %v1432_v35 = vmul.f32 %v1789_v27, %v1431_v12 }
 0x4eb   :  { %v2952_v36 = vadd.f32 %v1445_v33, %v1444_v34  ;;  %v1433_v37 = vadd.f32 %v1789_v27, %v1432_v35 }
 0x4ed   :  { %1792 = vtanh.f32 %v2952_v36  ;;  %v1437_v40 = vsel %vm1436_vm3, %v1789_v27, %v1433_v37 }
 0x4ee   :  { %v1442_v45 = vsel %vm1439_vm4, %v1441_v41, %v1437_v40 }
 0x4f3   :  { %v1793_v42 = vpop.eup %1792 }
 0x4f4   :  { %v1448_v46 = vmul.f32 %v1793_v42, %v1442_v45 }
 0x4f6   :  { %1671 = vst [vmem:[%s2970_s4 + $0x30] sm:$0xff] %v1448_v46  ;;  %1472 = vmatmul.f32.vlgmr.msra.gmra.mxu0 %v1448_v46  ;;  %1492 = vmatmul.f32.vlgmr.msra.gmra.mxu1 %v1448_v46 }
 0x4f7   :  { %1512 = vmatmul.f32.vlgmr.msra.gmra.mxu2 %v1448_v46  ;;  %1532 = vmatmul.f32.vlgmr.msra.gmra.mxu3 %v1448_v46 }
 0x573   :  { %v1473_v44 = vpop.f32.mrf.mxu0  ;;  %v1493_v47 = vpop.f32.mrf.mxu1 }
 0x574   :  { %v1536_v4 = vadd.f32 %v1473_v44, %v3262_v51  ;;  %v1537_v0 = vadd.f32 %v1493_v47, %v3263_v50 }
 0x576   :  { %v1672_v16 = vmul.f32 -1.442695, %v1536_v4  ;;  %v1673_v29 = vmul.f32 -1.442695, %v1537_v0 }
 0x578   :  { %1794 = vpow2.f32 %v1672_v16 }
 0x579   :  { %1796 = vpow2.f32 %v1673_v29 }
 0x57a   :  { %v1533_v1 = vpop.f32.mrf.mxu3  ;;  %v1513_v55 = vpop.f32.mrf.mxu2 }
 0x57b   :  { %v1539_v54 = vadd.f32 %v1533_v1, %v3264_v43  ;;  %v1538_v61 = vadd.f32 %v1513_v55, %v3265_v58 }
 0x57d   :  { %v1674_v3 = vmul.f32 -1.442695, %v1539_v54 }
 0x57e   :  { %v1795_v53 = vpop.eup %1794 }
 0x57f   :  { %v1797_v48 = vpop.eup %1796  ;;  %v1543_v49 = vadd.f32 1.0, %v1795_v53  ;;  %1798 = vpow2.f32 %v1674_v3 }
 0x580   :  { %v1562_v56 = vadd.f32 1.0, %v1797_v48 }
 0x581   :  { %1800 = vrcp.f32 %v1543_v49  ;;  %v1555_v13 = vand.u32 2147483648, %v1543_v49  ;;  %v1553_v6 = vand.u32 2147483647, %v1543_v49  ;;  %vm1549_vm7 = vweird.f32 %v1543_v49 }
 0x582   :  { %1802 = vrcp.f32 %v1562_v56  ;;  %v1574_v17 = vand.u32 2147483648, %v1562_v56  ;;  %v1572_v15 = vand.u32 2147483647, %v1562_v56  ;;  %vm1568_vm8 = vweird.f32 %v1562_v56 }
 0x583   :  { %v1556_v11 = vor.u32 1.1754944e-38, %v1555_v13  ;;  %vm1554_vm11 = vcmp.eq.f32.partialorder %v1553_v6, 8.507059e+37 }
 0x584   :  { %v1575_v20 = vor.u32 1.1754944e-38, %v1574_v17  ;;  %vm1573_vm12 = vcmp.eq.f32.partialorder %v1572_v15, 8.507059e+37 }
 0x585   :  { %v1799_v60 = vpop.eup %1798 }
 0x586   :  { %v1582_v57 = vadd.f32 1.0, %v1799_v60 }
 0x587   :  { %v1801_v52 = vpop.eup %1800 }
 0x588   :  { %v1803_v63 = vpop.eup %1802  ;;  %v1545_v2 = vmul.f32 %v1801_v52, %v1543_v49  ;;  %1804 = vrcp.f32 %v1582_v57  ;;  %vm1550_vm5 = vweird.f32 %v1801_v52  ;;  %v1594_v12 = vand.u32 2147483648, %v1582_v57 }
 0x589   :  { %v1564_v62 = vmul.f32 %v1803_v63, %v1562_v56  ;;  %1806 = vtanh.f32 %v1538_v61  ;;  %vm1569_vm6 = vweird.f32 %v1803_v63  ;;  %vm1551_vm9 = vmor %vm1549_vm7, %vm1550_vm5  ;;  %vm1588_vm14 = vweird.f32 %v1582_v57 }
 0x58a   :  { %v1546_v59 = vsub.f32 1.0, %v1545_v2  ;;  %vm1570_vm10 = vmor %vm1568_vm8, %vm1569_vm6  ;;  %v1592_v30 = vand.u32 2147483647, %v1582_v57  ;;  %v1595_v34 = vor.u32 1.1754944e-38, %v1594_v12 }
 0x58b   :  { %v1565_v32 = vsub.f32 1.0, %v1564_v62 }
 0x58c   :  { %v1547_v5 = vmul.f32 %v1801_v52, %v1546_v59  ;;  %vm1593_vm0 = vcmp.eq.f32.partialorder %v1592_v30, 8.507059e+37 }
 0x58d   :  { %v1566_v10 = vmul.f32 %v1803_v63, %v1565_v32 }
 0x58e   :  { %v1805_v8 = vpop.eup %1804  ;;  %v1548_v19 = vadd.f32 %v1801_v52, %v1547_v5 }
 0x58f   :  { %v1567_v28 = vadd.f32 %v1803_v63, %v1566_v10  ;;  %v1584_v25 = vmul.f32 %v1805_v8, %v1582_v57  ;;  %v1807_v27 = vpop.eup %1806  ;;  %vm1589_vm13 = vweird.f32 %v1805_v8 }
 0x590   :  { %v1552_v21 = vsel %vm1551_vm9, %v1801_v52, %v1548_v19  ;;  %vm1590_vm15 = vmor %vm1588_vm14, %vm1589_vm13 }
 0x591   :  { %v1557_v9 = vsel %vm1554_vm11, %v1556_v11, %v1552_v21  ;;  %v1571_v24 = vsel %vm1570_vm10, %v1803_v63, %v1567_v28  ;;  %v1585_v26 = vsub.f32 1.0, %v1584_v25 }
 0x592   :  { %v1576_v14 = vsel %vm1573_vm12, %v1575_v20, %v1571_v24  ;;  %v1599_v23 = vmul.f32 %v1807_v27, %v1557_v9 }
 0x593   :  { %v1598_v18 = vmul.f32 %v1576_v14, %v2952_v36  ;;  %v1586_v22 = vmul.f32 %v1805_v8, %v1585_v26 }
 0x595   :  { %v1600_v31 = vadd.f32 %v1599_v23, %v1598_v18  ;;  %v1587_v7 = vadd.f32 %v1805_v8, %v1586_v22 }
 0x597   :  { %1808 = vtanh.f32 %v1600_v31  ;;  %v1591_v33 = vsel %vm1590_vm15, %v1805_v8, %v1587_v7 }
 0x598   :  { %v1596_v37 = vsel %vm1593_vm0, %v1595_v34, %v1591_v33 }
 0x59d   :  { %v1809_v35 = vpop.eup %1808 }
 0x59e   :  { %v1602_v38 = vmul.f32 %v1809_v35, %v1596_v37 }
 0x5a0   :  { %1675 = vst [vmem:[%s2970_s4 + $0x38] sm:$0xff] %v1602_v38 }
 0x5a1   :  { %1611 = vsyncpa [#allocation6], 1 }
 0x5a2   :  { %1612 = vsyncpa [#allocation8], 1 }

// kernel: lstm_with_attention.4
= control target key start
LH: loop header
LB: loop body
LE: loop exit
PB: predicated region body
PF: predicated region fallthrough
CT: control target
= control target key end

     0   :  { %9 = vsyncpa [#allocation6], 0  ;;  %s1873_s18 = smov [#allocation5]   ;;  %s1874_s20 = smov 512   ;;  %s3044_s0 = inlined_call_operand.vmem [shape: f32[8,8,128], index: 0, kind: input, shape index: {}]   ;;  %s3045_s1 = inlined_call_operand.vmem [shape: f32[128,512], index: 1, kind: input, shape index: {}]   ;;  %s3046_s2 = inlined_call_operand.hbm [shape: f32[128,512], index: 2, kind: input, shape index: {}]   ;;  %s3047_s3 = inlined_call_operand.vmem [shape: f32[1,512], index: 3, kind: input, shape index: {}]   ;;  %s3048_s4 = inlined_call_operand.vmem [shape: f32[8,8,128], index: 4, kind: output, shape index: {}]  }
   0x1   :  { %s18_s17 = sshll.u32 %s3046_s2, 4  ;;  %s20_s19 = sshll.u32 %s1873_s18, 4  ;;  %s19_s17 = int_to_ptr.hbm [resolvable:$true] %s18_s17  ;;  %s21_s19 = int_to_ptr.vmem [resolvable:$true] %s20_s19 }
   0x2   :  { %s1875_s21 = smov 32  }
   0x3   :  { %26 = dma.hbm_to_vmem [thread:$0]  %s19_s17, 8192, %s21_s19, [#allocation6], %s1874_s20, %s1874_s20, %s1875_s21  }
   0x4   :  { %1871 = dma.done.wait [#allocation6], 8192  }
   0x5   :  { %1872 = vsyncadd [#allocation6], 4294959104  ;;  %v107_v0 = vld [vmem:[%s3045_s1 + $0x1e0] sm:$0xff]  ;;  %v108_v1 = vld [vmem:[%s3045_s1 + $0x1e8] sm:$0xff] }
   0x6   :  { %v109_v2 = vld [vmem:[%s3045_s1 + $0x1f0] sm:$0xff]  ;;  %121 = vmatpush.msra.mxu0 %v107_v0  ;;  %162 = vmatpush.msra.mxu1 %v108_v1  ;;  %v110_v3 = vld [vmem:[%s3045_s1 + $0x1f8] sm:$0xff]  ;;  %v103_v4 = vld [vmem:[%s3045_s1 + $0x1c0] sm:$0xff] }
   0x7   :  { %v104_v5 = vld [vmem:[%s3045_s1 + $0x1c8] sm:$0xff]  ;;  %203 = vmatpush.msra.mxu2 %v109_v2  ;;  %244 = vmatpush.msra.mxu3 %v110_v3  ;;  %v105_v6 = vld [vmem:[%s3045_s1 + $0x1d0] sm:$0xff]  ;;  %v106_v7 = vld [vmem:[%s3045_s1 + $0x1d8] sm:$0xff] }
   0x8   :  { %v99_v8 = vld [vmem:[%s3045_s1 + $0x1a0] sm:$0xff]  ;;  %122 = vmatpush.msra.mxu0 %v103_v4  ;;  %163 = vmatpush.msra.mxu1 %v104_v5  ;;  %v100_v9 = vld [vmem:[%s3045_s1 + $0x1a8] sm:$0xff]  ;;  %v101_v10 = vld [vmem:[%s3045_s1 + $0x1b0] sm:$0xff] }
   0x9   :  { %v102_v11 = vld [vmem:[%s3045_s1 + $0x1b8] sm:$0xff]  ;;  %204 = vmatpush.msra.mxu2 %v105_v6  ;;  %245 = vmatpush.msra.mxu3 %v106_v7  ;;  %v95_v12 = vld [vmem:[%s3045_s1 + $0x180] sm:$0xff]  ;;  %v96_v13 = vld [vmem:[%s3045_s1 + $0x188] sm:$0xff] }
   0xa   :  { %123 = vmatpush.msra.mxu0 %v99_v8  ;;  %164 = vmatpush.msra.mxu1 %v100_v9  ;;  %v97_v14 = vld [vmem:[%s3045_s1 + $0x190] sm:$0xff]  ;;  %v98_v15 = vld [vmem:[%s3045_s1 + $0x198] sm:$0xff]  ;;  %v91_v16 = vld [vmem:[%s3045_s1 + $0x160] sm:$0xff] }
   0xb   :  { %205 = vmatpush.msra.mxu2 %v101_v10  ;;  %246 = vmatpush.msra.mxu3 %v102_v11  ;;  %v92_v17 = vld [vmem:[%s3045_s1 + $0x168] sm:$0xff]  ;;  %v93_v18 = vld [vmem:[%s3045_s1 + $0x170] sm:$0xff]  ;;  %v94_v19 = vld [vmem:[%s3045_s1 + $0x178] sm:$0xff] }
   0xc   :  { %124 = vmatpush.msra.mxu0 %v95_v12  ;;  %165 = vmatpush.msra.mxu1 %v96_v13  ;;  %v87_v20 = vld [vmem:[%s3045_s1 + $0x140] sm:$0xff]  ;;  %v88_v21 = vld [vmem:[%s3045_s1 + $0x148] sm:$0xff]  ;;  %v89_v22 = vld [vmem:[%s3045_s1 + $0x150] sm:$0xff] }
   0xd   :  { %206 = vmatpush.msra.mxu2 %v97_v14  ;;  %247 = vmatpush.msra.mxu3 %v98_v15  ;;  %v90_v23 = vld [vmem:[%s3045_s1 + $0x158] sm:$0xff]  ;;  %v83_v24 = vld [vmem:[%s3045_s1 + $0x120] sm:$0xff]  ;;  %v84_v25 = vld [vmem:[%s3045_s1 + $0x128] sm:$0xff] }
   0xe   :  { %125 = vmatpush.msra.mxu0 %v91_v16  ;;  %166 = vmatpush.msra.mxu1 %v92_v17  ;;  %v85_v26 = vld [vmem:[%s3045_s1 + $0x130] sm:$0xff]  ;;  %v86_v27 = vld [vmem:[%s3045_s1 + $0x138] sm:$0xff]  ;;  %v79_v28 = vld [vmem:[%s3045_s1 + $0x100] sm:$0xff] }
   0xf   :  { %207 = vmatpush.msra.mxu2 %v93_v18  ;;  %248 = vmatpush.msra.mxu3 %v94_v19  ;;  %v80_v29 = vld [vmem:[%s3045_s1 + $0x108] sm:$0xff]  ;;  %v81_v30 = vld [vmem:[%s3045_s1 + $0x110] sm:$0xff]  ;;  %v82_v31 = vld [vmem:[%s3045_s1 + $0x118] sm:$0xff] }
  0x10   :  { %126 = vmatpush.msra.mxu0 %v87_v20  ;;  %167 = vmatpush.msra.mxu1 %v88_v21  ;;  %v75_v32 = vld [vmem:[%s3045_s1 + $0xe0] sm:$0xff]  ;;  %v76_v33 = vld [vmem:[%s3045_s1 + $0xe8] sm:$0xff]  ;;  %v77_v34 = vld [vmem:[%s3045_s1 + $0xf0] sm:$0xff] }
  0x11   :  { %208 = vmatpush.msra.mxu2 %v89_v22  ;;  %249 = vmatpush.msra.mxu3 %v90_v23  ;;  %v78_v35 = vld [vmem:[%s3045_s1 + $0xf8] sm:$0xff]  ;;  %v71_v36 = vld [vmem:[%s3045_s1 + $0xc0] sm:$0xff]  ;;  %v72_v37 = vld [vmem:[%s3045_s1 + $0xc8] sm:$0xff] }
  0x12   :  { %127 = vmatpush.msra.mxu0 %v83_v24  ;;  %168 = vmatpush.msra.mxu1 %v84_v25  ;;  %v73_v38 = vld [vmem:[%s3045_s1 + $0xd0] sm:$0xff]  ;;  %v74_v39 = vld [vmem:[%s3045_s1 + $0xd8] sm:$0xff]  ;;  %v67_v40 = vld [vmem:[%s3045_s1 + $0xa0] sm:$0xff] }
  0x13   :  { %209 = vmatpush.msra.mxu2 %v85_v26  ;;  %250 = vmatpush.msra.mxu3 %v86_v27  ;;  %v68_v41 = vld [vmem:[%s3045_s1 + $0xa8] sm:$0xff]  ;;  %v69_v42 = vld [vmem:[%s3045_s1 + $0xb0] sm:$0xff]  ;;  %v70_v43 = vld [vmem:[%s3045_s1 + $0xb8] sm:$0xff] }
  0x14   :  { %128 = vmatpush.msra.mxu0 %v79_v28  ;;  %169 = vmatpush.msra.mxu1 %v80_v29  ;;  %v63_v44 = vld [vmem:[%s3045_s1 + $0x80] sm:$0xff]  ;;  %v64_v45 = vld [vmem:[%s3045_s1 + $0x88] sm:$0xff]  ;;  %v65_v46 = vld [vmem:[%s3045_s1 + $0x90] sm:$0xff] }
  0x15   :  { %210 = vmatpush.msra.mxu2 %v81_v30  ;;  %251 = vmatpush.msra.mxu3 %v82_v31  ;;  %v66_v47 = vld [vmem:[%s3045_s1 + $0x98] sm:$0xff]  ;;  %v59_v48 = vld [vmem:[%s3045_s1 + $0x60] sm:$0xff]  ;;  %v60_v49 = vld [vmem:[%s3045_s1 + $0x68] sm:$0xff] }
  0x16   :  { %129 = vmatpush.msra.mxu0 %v75_v32  ;;  %170 = vmatpush.msra.mxu1 %v76_v33  ;;  %v61_v50 = vld [vmem:[%s3045_s1 + $0x70] sm:$0xff]  ;;  %v62_v51 = vld [vmem:[%s3045_s1 + $0x78] sm:$0xff]  ;;  %v55_v52 = vld [vmem:[%s3045_s1 + $0x40] sm:$0xff] }
  0x17   :  { %211 = vmatpush.msra.mxu2 %v77_v34  ;;  %252 = vmatpush.msra.mxu3 %v78_v35  ;;  %v56_v53 = vld [vmem:[%s3045_s1 + $0x48] sm:$0xff]  ;;  %v57_v54 = vld [vmem:[%s3045_s1 + $0x50] sm:$0xff]  ;;  %v58_v55 = vld [vmem:[%s3045_s1 + $0x58] sm:$0xff] }
  0x18   :  { %130 = vmatpush.msra.mxu0 %v71_v36  ;;  %171 = vmatpush.msra.mxu1 %v72_v37  ;;  %v51_v56 = vld [vmem:[%s3045_s1 + $0x20] sm:$0xff]  ;;  %v52_v57 = vld [vmem:[%s3045_s1 + $0x28] sm:$0xff]  ;;  %v53_v58 = vld [vmem:[%s3045_s1 + $0x30] sm:$0xff] }
  0x19   :  { %212 = vmatpush.msra.mxu2 %v73_v38  ;;  %253 = vmatpush.msra.mxu3 %v74_v39  ;;  %v54_v59 = vld [vmem:[%s3045_s1 + $0x38] sm:$0xff]  ;;  %v47_v60 = vld [vmem:[%s3045_s1] sm:$0xff]  ;;  %v48_v61 = vld [vmem:[%s3045_s1 + $0x8] sm:$0xff] }
  0x1a   :  { %131 = vmatpush.msra.mxu0 %v67_v40  ;;  %172 = vmatpush.msra.mxu1 %v68_v41  ;;  %v49_v62 = vld [vmem:[%s3045_s1 + $0x10] sm:$0xff]  ;;  %v50_v63 = vld [vmem:[%s3045_s1 + $0x18] sm:$0xff]  ;;  %v39_v0 = vld [vmem:[%s3044_s0] sm:$0xff] }
  0x1b   :  { %213 = vmatpush.msra.mxu2 %v69_v42  ;;  %254 = vmatpush.msra.mxu3 %v70_v43  ;;  %v2100_v1 = vld [vmem:[#allocation5 + $0x1e0] sm:$0xff]  ;;  %v2102_v2 = vld [vmem:[#allocation5 + $0x1e8] sm:$0xff]  ;;  %v2104_v3 = vld [vmem:[#allocation5 + $0x1f8] sm:$0xff] }
  0x1c   :  { %132 = vmatpush.msra.mxu0 %v63_v44  ;;  %173 = vmatpush.msra.mxu1 %v64_v45  ;;  %v2106_v4 = vld [vmem:[#allocation5 + $0x1f0] sm:$0xff]  ;;  %v2108_v5 = vld [vmem:[#allocation5 + $0x1c0] sm:$0xff]  ;;  %v2110_v6 = vld [vmem:[#allocation5 + $0x1c8] sm:$0xff] }
  0x1d   :  { %214 = vmatpush.msra.mxu2 %v65_v46  ;;  %255 = vmatpush.msra.mxu3 %v66_v47  ;;  %v2114_v7 = vld [vmem:[#allocation5 + $0x1d8] sm:$0xff]  ;;  %v2116_v8 = vld [vmem:[#allocation5 + $0x1d0] sm:$0xff]  ;;  %v2119_v9 = vld [vmem:[#allocation5 + $0x1a0] sm:$0xff] }
  0x1e   :  { %133 = vmatpush.msra.mxu0 %v59_v48  ;;  %174 = vmatpush.msra.mxu1 %v60_v49  ;;  %v2121_v10 = vld [vmem:[#allocation5 + $0x1a8] sm:$0xff]  ;;  %v2126_v11 = vld [vmem:[#allocation5 + $0x1b8] sm:$0xff]  ;;  %v2128_v12 = vld [vmem:[#allocation5 + $0x1b0] sm:$0xff] }
  0x1f   :  { %215 = vmatpush.msra.mxu2 %v61_v50  ;;  %256 = vmatpush.msra.mxu3 %v62_v51  ;;  %v40_v13 = vld [vmem:[%s3044_s0 + $0x8] sm:$0xff]  ;;  %v2137_v14 = vld [vmem:[#allocation5 + $0x180] sm:$0xff]  ;;  %v2143_v16 = vld [vmem:[#allocation5 + $0x198] sm:$0xff] }
  0x20   :  { %134 = vmatpush.msra.mxu0 %v55_v52  ;;  %175 = vmatpush.msra.mxu1 %v56_v53  ;;  %v2139_v15 = vld [vmem:[#allocation5 + $0x188] sm:$0xff]  ;;  %v2145_v17 = vld [vmem:[#allocation5 + $0x190] sm:$0xff]  ;;  %v2147_v18 = vld [vmem:[#allocation5 + $0x160] sm:$0xff] }
  0x21   :  { %216 = vmatpush.msra.mxu2 %v57_v54  ;;  %257 = vmatpush.msra.mxu3 %v58_v55  ;;  %v2149_v19 = vld [vmem:[#allocation5 + $0x168] sm:$0xff]  ;;  %v2153_v20 = vld [vmem:[#allocation5 + $0x178] sm:$0xff]  ;;  %v2155_v21 = vld [vmem:[#allocation5 + $0x170] sm:$0xff] }
  0x22   :  { %135 = vmatpush.msra.mxu0 %v51_v56  ;;  %176 = vmatpush.msra.mxu1 %v52_v57  ;;  %v2158_v22 = vld [vmem:[#allocation5 + $0x140] sm:$0xff]  ;;  %v2160_v23 = vld [vmem:[#allocation5 + $0x148] sm:$0xff]  ;;  %v2165_v24 = vld [vmem:[#allocation5 + $0x158] sm:$0xff] }
  0x23   :  { %217 = vmatpush.msra.mxu2 %v53_v58  ;;  %258 = vmatpush.msra.mxu3 %v54_v59  ;;  %v2167_v25 = vld [vmem:[#allocation5 + $0x150] sm:$0xff]  ;;  %v2176_v27 = vld [vmem:[#allocation5 + $0x120] sm:$0xff]  ;;  %v2178_v28 = vld [vmem:[#allocation5 + $0x128] sm:$0xff] }
  0x24   :  { %136 = vmatpush.msra.mxu0 %v47_v60  ;;  %177 = vmatpush.msra.mxu1 %v48_v61  ;;  %v41_v26 = vld [vmem:[%s3044_s0 + $0x10] sm:$0xff]  ;;  %v2182_v29 = vld [vmem:[#allocation5 + $0x138] sm:$0xff]  ;;  %v2186_v31 = vld [vmem:[#allocation5 + $0x100] sm:$0xff] }
  0x25   :  { %218 = vmatpush.msra.mxu2 %v49_v62  ;;  %259 = vmatpush.msra.mxu3 %v50_v63  ;;  %v2184_v30 = vld [vmem:[#allocation5 + $0x130] sm:$0xff]  ;;  %v2188_v32 = vld [vmem:[#allocation5 + $0x108] sm:$0xff]  ;;  %v2192_v33 = vld [vmem:[#allocation5 + $0x118] sm:$0xff] }
  0x26   :  { %137 = vmatmul.f32.vlgmr.msra.gmra.mxu0 %v39_v0  ;;  %178 = vmatmul.f32.vlgmr.msra.gmra.mxu1 %v39_v0  ;;  %v2194_v34 = vld [vmem:[#allocation5 + $0x110] sm:$0xff]  ;;  %v2197_v35 = vld [vmem:[#allocation5 + $0xe0] sm:$0xff]  ;;  %v2199_v36 = vld [vmem:[#allocation5 + $0xe8] sm:$0xff] }
  0x27   :  { %219 = vmatmul.f32.vlgmr.msra.gmra.mxu2 %v39_v0  ;;  %260 = vmatmul.f32.vlgmr.msra.gmra.mxu3 %v39_v0  ;;  %v2204_v37 = vld [vmem:[#allocation5 + $0xf8] sm:$0xff]  ;;  %v2206_v38 = vld [vmem:[#allocation5 + $0xf0] sm:$0xff]  ;;  %v2215_v40 = vld [vmem:[#allocation5 + $0xc0] sm:$0xff] }
  0x28   :  { %387 = vmatpush.msrb.mxu0 %v2100_v1  ;;  %407 = vmatpush.msrb.mxu1 %v2102_v2  ;;  %v42_v39 = vld [vmem:[%s3044_s0 + $0x18] sm:$0xff]  ;;  %v2217_v41 = vld [vmem:[#allocation5 + $0xc8] sm:$0xff]  ;;  %v2223_v43 = vld [vmem:[#allocation5 + $0xd0] sm:$0xff] }
  0x29   :  { %447 = vmatpush.msrb.mxu3 %v2104_v3  ;;  %427 = vmatpush.msrb.mxu2 %v2106_v4  ;;  %v2221_v42 = vld [vmem:[#allocation5 + $0xd8] sm:$0xff]  ;;  %3137 = vst [vmem:[#allocation9_spill] sm:$0xff] %v2223_v43  ;;  %v2225_v44 = vld [vmem:[#allocation5 + $0xa0] sm:$0xff]  ;;  %v2227_v45 = vld [vmem:[#allocation5 + $0xa8] sm:$0xff] }
  0x2a   :  { %388 = vmatpush.msrb.mxu0 %v2108_v5  ;;  %408 = vmatpush.msrb.mxu1 %v2110_v6  ;;  %3136 = vst [vmem:[#allocation8_spill] sm:$0xff] %v2221_v42  ;;  %v2231_v46 = vld [vmem:[#allocation5 + $0xb8] sm:$0xff]  ;;  %v2233_v47 = vld [vmem:[#allocation5 + $0xb0] sm:$0xff]  ;;  %v2236_v48 = vld [vmem:[#allocation5 + $0x80] sm:$0xff] }
  0x2b   :  { %448 = vmatpush.msrb.mxu3 %v2114_v7  ;;  %428 = vmatpush.msrb.mxu2 %v2116_v8  ;;  %3138 = vst [vmem:[#allocation10_spill] sm:$0xff] %v2225_v44  ;;  %v2238_v49 = vld [vmem:[#allocation5 + $0x88] sm:$0xff]  ;;  %v2243_v50 = vld [vmem:[#allocation5 + $0x98] sm:$0xff]  ;;  %v2245_v51 = vld [vmem:[#allocation5 + $0x90] sm:$0xff] }
  0x2c   :  { %389 = vmatpush.msrb.mxu0 %v2119_v9  ;;  %409 = vmatpush.msrb.mxu1 %v2121_v10  ;;  %3139 = vst [vmem:[#allocation11_spill] sm:$0xff] %v2227_v45  ;;  %v43_v52 = vld [vmem:[%s3044_s0 + $0x20] sm:$0xff]  ;;  %v2256_v54 = vld [vmem:[#allocation5 + $0x68] sm:$0xff]  ;;  %v2260_v55 = vld [vmem:[#allocation5 + $0x78] sm:$0xff] }
  0x2d   :  { %449 = vmatpush.msrb.mxu3 %v2126_v11  ;;  %429 = vmatpush.msrb.mxu2 %v2128_v12  ;;  %3140 = vst [vmem:[#allocation12_spill] sm:$0xff] %v2231_v46  ;;  %v2254_v53 = vld [vmem:[#allocation5 + $0x60] sm:$0xff]  ;;  %v2262_v56 = vld [vmem:[#allocation5 + $0x70] sm:$0xff]  ;;  %v2266_v58 = vld [vmem:[#allocation5 + $0x48] sm:$0xff] }
  0x2e   :  { %140 = vmatmul.f32.gmra.mxu0 %v40_v13  ;;  %181 = vmatmul.f32.gmra.mxu1 %v40_v13  ;;  %3141 = vst [vmem:[#allocation13_spill] sm:$0xff] %v2233_v47  ;;  %v2264_v57 = vld [vmem:[#allocation5 + $0x40] sm:$0xff]  ;;  %v2270_v59 = vld [vmem:[#allocation5 + $0x58] sm:$0xff]  ;;  %v2272_v60 = vld [vmem:[#allocation5 + $0x50] sm:$0xff] }
  0x2f   :  { %222 = vmatmul.f32.gmra.mxu2 %v40_v13  ;;  %263 = vmatmul.f32.gmra.mxu3 %v40_v13  ;;  %3142 = vst [vmem:[#allocation14_spill] sm:$0xff] %v2236_v48  ;;  %v2275_v61 = vld [vmem:[#allocation5 + $0x20] sm:$0xff]  ;;  %v2277_v62 = vld [vmem:[#allocation5 + $0x28] sm:$0xff]  ;;  %v2282_v63 = vld [vmem:[#allocation5 + $0x30] sm:$0xff] }
  0x30   :  { %390 = vmatpush.msrb.mxu0 %v2137_v14  ;;  %410 = vmatpush.msrb.mxu1 %v2139_v15  ;;  %3143 = vst [vmem:[#allocation15_spill] sm:$0xff] %v2238_v49  ;;  %v2284_v0 = vld [vmem:[#allocation5 + $0x38] sm:$0xff]  ;;  %v44_v13 = vld [vmem:[%s3044_s0 + $0x28] sm:$0xff] }
  0x31   :  { %450 = vmatpush.msrb.mxu3 %v2143_v16  ;;  %430 = vmatpush.msrb.mxu2 %v2145_v17  ;;  %3144 = vst [vmem:[#allocation16_spill] sm:$0xff] %v2243_v50 }
  0x32   :  { %391 = vmatpush.msrb.mxu0 %v2147_v18  ;;  %411 = vmatpush.msrb.mxu1 %v2149_v19  ;;  %3145 = vst [vmem:[#allocation17_spill] sm:$0xff] %v2245_v51 }
  0x33   :  { %451 = vmatpush.msrb.mxu3 %v2153_v20  ;;  %431 = vmatpush.msrb.mxu2 %v2155_v21  ;;  %3146 = vst [vmem:[#allocation18_spill] sm:$0xff] %v2254_v53 }
  0x34   :  { %392 = vmatpush.msrb.mxu0 %v2158_v22  ;;  %412 = vmatpush.msrb.mxu1 %v2160_v23  ;;  %3147 = vst [vmem:[#allocation19_spill] sm:$0xff] %v2256_v54 }
  0x35   :  { %452 = vmatpush.msrb.mxu3 %v2165_v24  ;;  %432 = vmatpush.msrb.mxu2 %v2167_v25  ;;  %3148 = vst [vmem:[#allocation20_spill] sm:$0xff] %v2260_v55 }
  0x36   :  { %143 = vmatmul.f32.gmra.mxu0 %v41_v26  ;;  %184 = vmatmul.f32.gmra.mxu1 %v41_v26  ;;  %3149 = vst [vmem:[#allocation21_spill] sm:$0xff] %v2262_v56 }
  0x37   :  { %225 = vmatmul.f32.gmra.mxu2 %v41_v26  ;;  %266 = vmatmul.f32.gmra.mxu3 %v41_v26  ;;  %3150 = vst [vmem:[#allocation22_spill] sm:$0xff] %v2264_v57  ;;  %v2293_v26 = vld [vmem:[#allocation5] sm:$0xff] }
  0x38   :  { %393 = vmatpush.msrb.mxu0 %v2176_v27  ;;  %413 = vmatpush.msrb.mxu1 %v2178_v28  ;;  %3151 = vst [vmem:[#allocation23_spill] sm:$0xff] %v2266_v58 }
  0x39   :  { %453 = vmatpush.msrb.mxu3 %v2182_v29  ;;  %433 = vmatpush.msrb.mxu2 %v2184_v30  ;;  %3152 = vst [vmem:[#allocation24_spill] sm:$0xff] %v2270_v59 }
  0x3a   :  { %394 = vmatpush.msrb.mxu0 %v2186_v31  ;;  %414 = vmatpush.msrb.mxu1 %v2188_v32  ;;  %3153 = vst [vmem:[#allocation25_spill] sm:$0xff] %v2272_v60 }
  0x3b   :  { %454 = vmatpush.msrb.mxu3 %v2192_v33  ;;  %434 = vmatpush.msrb.mxu2 %v2194_v34  ;;  %3154 = vst [vmem:[#allocation26_spill] sm:$0xff] %v2275_v61 }
  0x3c   :  { %395 = vmatpush.msrb.mxu0 %v2197_v35  ;;  %415 = vmatpush.msrb.mxu1 %v2199_v36  ;;  %3155 = vst [vmem:[#allocation27_spill] sm:$0xff] %v2277_v62 }
  0x3d   :  { %455 = vmatpush.msrb.mxu3 %v2204_v37  ;;  %435 = vmatpush.msrb.mxu2 %v2206_v38  ;;  %3156 = vst [vmem:[#allocation28_spill] sm:$0xff] %v2282_v63 }
  0x3e   :  { %146 = vmatmul.f32.gmra.mxu0 %v42_v39  ;;  %187 = vmatmul.f32.gmra.mxu1 %v42_v39  ;;  %3157 = vst [vmem:[#allocation29_spill] sm:$0xff] %v2284_v0 }
  0x3f   :  { %228 = vmatmul.f32.gmra.mxu2 %v42_v39  ;;  %269 = vmatmul.f32.gmra.mxu3 %v42_v39  ;;  %3158 = vst [vmem:[#allocation30_spill] sm:$0xff] %v2293_v26  ;;  %v2295_v39 = vld [vmem:[#allocation5 + $0x8] sm:$0xff] }
  0x40   :  { %396 = vmatpush.msrb.mxu0 %v2215_v40  ;;  %416 = vmatpush.msrb.mxu1 %v2217_v41  ;;  %3159 = vst [vmem:[#allocation31_spill] sm:$0xff] %v2295_v39 }
  0x41   :  { %456 = vmatpush.msrb.mxu3 %v2221_v42  ;;  %436 = vmatpush.msrb.mxu2 %v2223_v43 }
  0x42   :  { %397 = vmatpush.msrb.mxu0 %v2225_v44  ;;  %417 = vmatpush.msrb.mxu1 %v2227_v45 }
  0x43   :  { %457 = vmatpush.msrb.mxu3 %v2231_v46  ;;  %437 = vmatpush.msrb.mxu2 %v2233_v47 }
  0x44   :  { %398 = vmatpush.msrb.mxu0 %v2236_v48  ;;  %418 = vmatpush.msrb.mxu1 %v2238_v49 }
  0x45   :  { %458 = vmatpush.msrb.mxu3 %v2243_v50  ;;  %438 = vmatpush.msrb.mxu2 %v2245_v51 }
  0x46   :  { %149 = vmatmul.f32.gmra.mxu0 %v43_v52  ;;  %190 = vmatmul.f32.gmra.mxu1 %v43_v52 }
  0x47   :  { %231 = vmatmul.f32.gmra.mxu2 %v43_v52  ;;  %272 = vmatmul.f32.gmra.mxu3 %v43_v52  ;;  %v2299_v52 = vld [vmem:[#allocation5 + $0x10] sm:$0xff] }
  0x48   :  { %399 = vmatpush.msrb.mxu0 %v2254_v53  ;;  %419 = vmatpush.msrb.mxu1 %v2256_v54  ;;  %3160 = vst [vmem:[#allocation32_spill] sm:$0xff] %v2299_v52 }
  0x49   :  { %459 = vmatpush.msrb.mxu3 %v2260_v55  ;;  %439 = vmatpush.msrb.mxu2 %v2262_v56 }
  0x4a   :  { %400 = vmatpush.msrb.mxu0 %v2264_v57  ;;  %420 = vmatpush.msrb.mxu1 %v2266_v58  ;;  %v2301_v58 = vld [vmem:[#allocation5 + $0x18] sm:$0xff] }
  0x4b   :  { %460 = vmatpush.msrb.mxu3 %v2270_v59  ;;  %440 = vmatpush.msrb.mxu2 %v2272_v60  ;;  %3161 = vst [vmem:[#allocation33_spill] sm:$0xff] %v2301_v58 }
  0x4c   :  { %401 = vmatpush.msrb.mxu0 %v2275_v61  ;;  %421 = vmatpush.msrb.mxu1 %v2277_v62 }
  0x4d   :  { %441 = vmatpush.msrb.mxu2 %v2282_v63  ;;  %461 = vmatpush.msrb.mxu3 %v2284_v0  ;;  %v45_v0 = vld [vmem:[%s3044_s0 + $0x30] sm:$0xff] }
  0x4e   :  { %152 = vmatmul.f32.gmra.mxu0 %v44_v13  ;;  %193 = vmatmul.f32.gmra.mxu1 %v44_v13 }
  0x4f   :  { %234 = vmatmul.f32.gmra.mxu2 %v44_v13  ;;  %275 = vmatmul.f32.gmra.mxu3 %v44_v13  ;;  %v46_v13 = vld [vmem:[%s3044_s0 + $0x38] sm:$0xff] }
  0x50   :  { %402 = vmatpush.msrb.mxu0 %v2293_v26  ;;  %422 = vmatpush.msrb.mxu1 %v2295_v39 }
  0x51   :  { %442 = vmatpush.msrb.mxu2 %v2299_v52  ;;  %462 = vmatpush.msrb.mxu3 %v2301_v58 }
  0x52   :  { %540 = vmatpush.msra.mxu0 %v2100_v1  ;;  %560 = vmatpush.msra.mxu1 %v2102_v2 }
  0x53   :  { %580 = vmatpush.msra.mxu2 %v2106_v4  ;;  %600 = vmatpush.msra.mxu3 %v2104_v3 }
  0x54   :  { %541 = vmatpush.msra.mxu0 %v2108_v5  ;;  %561 = vmatpush.msra.mxu1 %v2110_v6 }
  0x55   :  { %581 = vmatpush.msra.mxu2 %v2116_v8  ;;  %601 = vmatpush.msra.mxu3 %v2114_v7 }
  0x56   :  { %155 = vmatmul.f32.gmra.mxu0 %v45_v0  ;;  %196 = vmatmul.f32.gmra.mxu1 %v45_v0 }
  0x57   :  { %237 = vmatmul.f32.gmra.mxu2 %v45_v0  ;;  %278 = vmatmul.f32.gmra.mxu3 %v45_v0  ;;  %v1876_v0 = vmov 0.0  }
  0x58   :  { %542 = vmatpush.msra.mxu0 %v2119_v9  ;;  %562 = vmatpush.msra.mxu1 %v2121_v10 }
  0x59   :  { %582 = vmatpush.msra.mxu2 %v2128_v12  ;;  %602 = vmatpush.msra.mxu3 %v2126_v11 }
  0x5a   :  { %543 = vmatpush.msra.mxu0 %v2137_v14  ;;  %563 = vmatpush.msra.mxu1 %v2139_v15 }
  0x5b   :  { %583 = vmatpush.msra.mxu2 %v2145_v17  ;;  %603 = vmatpush.msra.mxu3 %v2143_v16 }
  0x5c   :  { %544 = vmatpush.msra.mxu0 %v2147_v18  ;;  %564 = vmatpush.msra.mxu1 %v2149_v19 }
  0x5d   :  { %584 = vmatpush.msra.mxu2 %v2155_v21  ;;  %604 = vmatpush.msra.mxu3 %v2153_v20 }
  0x5e   :  { %158 = vmatmul.f32.gmra.mxu0 %v46_v13  ;;  %199 = vmatmul.f32.gmra.mxu1 %v46_v13 }
  0x5f   :  { %240 = vmatmul.f32.gmra.mxu2 %v46_v13  ;;  %281 = vmatmul.f32.gmra.mxu3 %v46_v13  ;;  %v3162_v13 = vld [vmem:[#allocation23_spill] sm:$0xff] }
  0x60   :  { %545 = vmatpush.msra.mxu0 %v2158_v22  ;;  %565 = vmatpush.msra.mxu1 %v2160_v23 }
  0x61   :  { %585 = vmatpush.msra.mxu2 %v2167_v25  ;;  %605 = vmatpush.msra.mxu3 %v2165_v24 }
  0x62   :  { %546 = vmatpush.msra.mxu0 %v2176_v27  ;;  %566 = vmatpush.msra.mxu1 %v2178_v28 }
  0x63   :  { %586 = vmatpush.msra.mxu2 %v2184_v30  ;;  %606 = vmatpush.msra.mxu3 %v2182_v29 }
  0x64   :  { %547 = vmatpush.msra.mxu0 %v2186_v31  ;;  %567 = vmatpush.msra.mxu1 %v2188_v32 }
  0x65   :  { %587 = vmatpush.msra.mxu2 %v2194_v34  ;;  %607 = vmatpush.msra.mxu3 %v2192_v33 }
  0x66   :  { %403 = vmatmul.f32.vlgmr.msrb.gmra.mxu0 %v1876_v0  ;;  %423 = vmatmul.f32.vlgmr.msrb.gmra.mxu1 %v1876_v0 }
  0x67   :  { %443 = vmatmul.f32.vlgmr.msrb.gmra.mxu2 %v1876_v0  ;;  %463 = vmatmul.f32.vlgmr.msrb.gmra.mxu3 %v1876_v0  ;;  %v3163_v0 = vld [vmem:[#allocation29_spill] sm:$0xff] }
  0x68   :  { %548 = vmatpush.msra.mxu0 %v2197_v35  ;;  %568 = vmatpush.msra.mxu1 %v2199_v36 }
  0x69   :  { %588 = vmatpush.msra.mxu2 %v2206_v38  ;;  %608 = vmatpush.msra.mxu3 %v2204_v37 }
  0x6a   :  { %549 = vmatpush.msra.mxu0 %v2215_v40  ;;  %569 = vmatpush.msra.mxu1 %v2217_v41 }
  0x6b   :  { %589 = vmatpush.msra.mxu2 %v2223_v43  ;;  %609 = vmatpush.msra.mxu3 %v2221_v42 }
  0x6c   :  { %550 = vmatpush.msra.mxu0 %v2225_v44  ;;  %570 = vmatpush.msra.mxu1 %v2227_v45 }
  0x6d   :  { %590 = vmatpush.msra.mxu2 %v2233_v47  ;;  %610 = vmatpush.msra.mxu3 %v2231_v46 }
  0x6e   :  { %551 = vmatpush.msra.mxu0 %v2236_v48  ;;  %571 = vmatpush.msra.mxu1 %v2238_v49 }
  0x6f   :  { %591 = vmatpush.msra.mxu2 %v2245_v51  ;;  %611 = vmatpush.msra.mxu3 %v2243_v50 }
  0x70   :  { %552 = vmatpush.msra.mxu0 %v2254_v53  ;;  %572 = vmatpush.msra.mxu1 %v2256_v54 }
  0x71   :  { %592 = vmatpush.msra.mxu2 %v2262_v56  ;;  %612 = vmatpush.msra.mxu3 %v2260_v55 }
  0x72   :  { %553 = vmatpush.msra.mxu0 %v2264_v57  ;;  %573 = vmatpush.msra.mxu1 %v3162_v13 }
  0x73   :  { %593 = vmatpush.msra.mxu2 %v2272_v60  ;;  %613 = vmatpush.msra.mxu3 %v2270_v59 }
  0x74   :  { %554 = vmatpush.msra.mxu0 %v2275_v61  ;;  %574 = vmatpush.msra.mxu1 %v2277_v62 }
  0x75   :  { %594 = vmatpush.msra.mxu2 %v2282_v63  ;;  %614 = vmatpush.msra.mxu3 %v3163_v0 }
  0x76   :  { %555 = vmatpush.msra.mxu0 %v2293_v26  ;;  %575 = vmatpush.msra.mxu1 %v2295_v39 }
  0x77   :  { %595 = vmatpush.msra.mxu2 %v2299_v52  ;;  %615 = vmatpush.msra.mxu3 %v2301_v58 }
  0x78   :  { %694 = vmatpush.msrb.mxu0 %v2100_v1  ;;  %714 = vmatpush.msrb.mxu1 %v2102_v2 }
  0x79   :  { %734 = vmatpush.msrb.mxu2 %v2106_v4  ;;  %754 = vmatpush.msrb.mxu3 %v2104_v3 }
  0x7a   :  { %695 = vmatpush.msrb.mxu0 %v2108_v5  ;;  %715 = vmatpush.msrb.mxu1 %v2110_v6 }
  0x7b   :  { %735 = vmatpush.msrb.mxu2 %v2116_v8  ;;  %755 = vmatpush.msrb.mxu3 %v2114_v7 }
  0x7c   :  { %696 = vmatpush.msrb.mxu0 %v2119_v9  ;;  %716 = vmatpush.msrb.mxu1 %v2121_v10 }
  0x7d   :  { %736 = vmatpush.msrb.mxu2 %v2128_v12  ;;  %756 = vmatpush.msrb.mxu3 %v2126_v11 }
  0x7e   :  { %697 = vmatpush.msrb.mxu0 %v2137_v14  ;;  %717 = vmatpush.msrb.mxu1 %v2139_v15 }
  0x7f   :  { %737 = vmatpush.msrb.mxu2 %v2145_v17  ;;  %757 = vmatpush.msrb.mxu3 %v2143_v16 }
  0x80   :  { %698 = vmatpush.msrb.mxu0 %v2147_v18  ;;  %718 = vmatpush.msrb.mxu1 %v2149_v19 }
  0x81   :  { %738 = vmatpush.msrb.mxu2 %v2155_v21  ;;  %758 = vmatpush.msrb.mxu3 %v2153_v20 }
  0x82   :  { %699 = vmatpush.msrb.mxu0 %v2158_v22  ;;  %719 = vmatpush.msrb.mxu1 %v2160_v23 }
  0x83   :  { %739 = vmatpush.msrb.mxu2 %v2167_v25  ;;  %759 = vmatpush.msrb.mxu3 %v2165_v24 }
  0x84   :  { %700 = vmatpush.msrb.mxu0 %v2176_v27  ;;  %720 = vmatpush.msrb.mxu1 %v2178_v28 }
  0x85   :  { %740 = vmatpush.msrb.mxu2 %v2184_v30  ;;  %760 = vmatpush.msrb.mxu3 %v2182_v29 }
  0x86   :  { %701 = vmatpush.msrb.mxu0 %v2186_v31  ;;  %721 = vmatpush.msrb.mxu1 %v2188_v32 }
  0x87   :  { %741 = vmatpush.msrb.mxu2 %v2194_v34  ;;  %761 = vmatpush.msrb.mxu3 %v2192_v33 }
  0x88   :  { %702 = vmatpush.msrb.mxu0 %v2197_v35  ;;  %722 = vmatpush.msrb.mxu1 %v2199_v36 }
  0x89   :  { %742 = vmatpush.msrb.mxu2 %v2206_v38  ;;  %762 = vmatpush.msrb.mxu3 %v2204_v37 }
  0x8a   :  { %703 = vmatpush.msrb.mxu0 %v2215_v40  ;;  %723 = vmatpush.msrb.mxu1 %v2217_v41 }
  0x8b   :  { %743 = vmatpush.msrb.mxu2 %v2223_v43  ;;  %763 = vmatpush.msrb.mxu3 %v2221_v42 }
  0x8c   :  { %704 = vmatpush.msrb.mxu0 %v2225_v44  ;;  %724 = vmatpush.msrb.mxu1 %v2227_v45 }
  0x8d   :  { %744 = vmatpush.msrb.mxu2 %v2233_v47  ;;  %764 = vmatpush.msrb.mxu3 %v2231_v46 }
  0x8e   :  { %705 = vmatpush.msrb.mxu0 %v2236_v48  ;;  %725 = vmatpush.msrb.mxu1 %v2238_v49 }
  0x8f   :  { %745 = vmatpush.msrb.mxu2 %v2245_v51  ;;  %765 = vmatpush.msrb.mxu3 %v2243_v50 }
  0x90   :  { %706 = vmatpush.msrb.mxu0 %v2254_v53  ;;  %726 = vmatpush.msrb.mxu1 %v2256_v54 }
  0x91   :  { %746 = vmatpush.msrb.mxu2 %v2262_v56  ;;  %766 = vmatpush.msrb.mxu3 %v2260_v55 }
  0x92   :  { %707 = vmatpush.msrb.mxu0 %v2264_v57  ;;  %727 = vmatpush.msrb.mxu1 %v3162_v13 }
  0x93   :  { %747 = vmatpush.msrb.mxu2 %v2272_v60  ;;  %767 = vmatpush.msrb.mxu3 %v2270_v59 }
  0x94   :  { %708 = vmatpush.msrb.mxu0 %v2275_v61  ;;  %728 = vmatpush.msrb.mxu1 %v2277_v62  ;;  %v111_v61 = vld [vmem:[%s3047_s3] sm:$0xf] }
  0x95   :  { %748 = vmatpush.msrb.mxu2 %v2282_v63  ;;  %768 = vmatpush.msrb.mxu3 %v3163_v0  ;;  %v113_v59 = vperm.slane %v111_v61, 0  ;;  %v114_v62 = vperm.slane %v111_v61, 1 }
  0x96   :  { %709 = vmatpush.msrb.mxu0 %v2293_v26  ;;  %729 = vmatpush.msrb.mxu1 %v2295_v39 }
  0x97   :  { %749 = vmatpush.msrb.mxu2 %v2299_v52  ;;  %769 = vmatpush.msrb.mxu3 %v2301_v58  ;;  %v2452_v52 = vperm.slane %v111_v61, 2  ;;  %v116_v58 = vperm.slane %v111_v61, 3 }
  0xa3   :  { %v138_v13 = vpop.f32.mrf.mxu0  ;;  %v179_v60 = vpop.f32.mrf.mxu1 }
  0xaa   :  { %v2444_v57 = vpop.f32.mrf.mxu2  ;;  %v2446_v63 = vpop.f32.mrf.mxu3 }
  0xab   :  { %v141_v0 = vpop.f32.mrf.mxu0  ;;  %v182_v26 = vpop.f32.mrf.mxu1 }
  0xac   :  { %v2448_v55 = vadd.f32 %v141_v0, %v113_v59  ;;  %v2450_v39 = vadd.f32 %v182_v26, %v114_v62 }
  0xae   :  { %3164 = vst [vmem:[#allocation34_spill] sm:$0xff] %v2448_v55 }
  0xaf   :  { %3165 = vst [vmem:[#allocation35_spill] sm:$0xff] %v2450_v39 }
  0xb2   :  { %v223_v56 = vpop.f32.mrf.mxu2  ;;  %v264_v54 = vpop.f32.mrf.mxu3 }
  0xb3   :  { %v2455_v53 = vadd.f32 %v223_v56, %v2452_v52  ;;  %v2457_v50 = vadd.f32 %v264_v54, %v116_v58  ;;  %v144_v51 = vpop.f32.mrf.mxu0  ;;  %v185_v49 = vpop.f32.mrf.mxu1 }
  0xb4   :  { %v2459_v48 = vadd.f32 %v144_v51, %v113_v59  ;;  %v2461_v46 = vadd.f32 %v185_v49, %v114_v62 }
  0xb5   :  { %3166 = vst [vmem:[#allocation36_spill] sm:$0xff] %v2455_v53 }
  0xb6   :  { %3167 = vst [vmem:[#allocation37_spill] sm:$0xff] %v2457_v50 }
  0xb7   :  { %3168 = vst [vmem:[#allocation38_spill] sm:$0xff] %v2459_v48 }
  0xb8   :  { %3169 = vst [vmem:[#allocation39_spill] sm:$0xff] %v2461_v46 }
  0xba   :  { %v226_v0 = vpop.f32.mrf.mxu2  ;;  %v267_v55 = vpop.f32.mrf.mxu3 }
  0xbb   :  { %v2464_v26 = vadd.f32 %v226_v0, %v2452_v52  ;;  %v2466_v39 = vadd.f32 %v267_v55, %v116_v58  ;;  %v147_v61 = vpop.f32.mrf.mxu0  ;;  %v188_v47 = vpop.f32.mrf.mxu1 }
  0xbc   :  { %v2468_v45 = vadd.f32 %v147_v61, %v113_v59  ;;  %v2470_v56 = vadd.f32 %v188_v47, %v114_v62 }
  0xbd   :  { %3170 = vst [vmem:[#allocation40_spill] sm:$0xff] %v2464_v26 }
  0xbe   :  { %3171 = vst [vmem:[#allocation41_spill] sm:$0xff] %v2466_v39 }
  0xbf   :  { %3172 = vst [vmem:[#allocation42_spill] sm:$0xff] %v2468_v45 }
  0xc0   :  { %3173 = vst [vmem:[#allocation43_spill] sm:$0xff] %v2470_v56 }
  0xc2   :  { %v229_v54 = vpop.f32.mrf.mxu2  ;;  %v270_v53 = vpop.f32.mrf.mxu3 }
  0xc3   :  { %v2473_v51 = vadd.f32 %v229_v54, %v2452_v52  ;;  %v2475_v49 = vadd.f32 %v270_v53, %v116_v58  ;;  %v150_v46 = vpop.f32.mrf.mxu0  ;;  %v191_v48 = vpop.f32.mrf.mxu1 }
  0xc4   :  { %v2477_v50 = vadd.f32 %v150_v46, %v113_v59  ;;  %v2479_v0 = vadd.f32 %v191_v48, %v114_v62 }
  0xc5   :  { %3174 = vst [vmem:[#allocation44_spill] sm:$0xff] %v2473_v51 }
  0xc6   :  { %3175 = vst [vmem:[#allocation45_spill] sm:$0xff] %v2475_v49 }
  0xc7   :  { %3176 = vst [vmem:[#allocation46_spill] sm:$0xff] %v2477_v50 }
  0xc8   :  { %3177 = vst [vmem:[#allocation47_spill] sm:$0xff] %v2479_v0 }
  0xca   :  { %v232_v55 = vpop.f32.mrf.mxu2  ;;  %v273_v26 = vpop.f32.mrf.mxu3 }
  0xcb   :  { %v2482_v61 = vadd.f32 %v232_v55, %v2452_v52  ;;  %v2484_v47 = vadd.f32 %v273_v26, %v116_v58  ;;  %v153_v56 = vpop.f32.mrf.mxu0  ;;  %v194_v45 = vpop.f32.mrf.mxu1 }
  0xcc   :  { %v2486_v39 = vadd.f32 %v153_v56, %v113_v59  ;;  %v2488_v54 = vadd.f32 %v194_v45, %v114_v62 }
  0xcd   :  { %3178 = vst [vmem:[#allocation48_spill] sm:$0xff] %v2482_v61 }
  0xce   :  { %3179 = vst [vmem:[#allocation49_spill] sm:$0xff] %v2484_v47 }
  0xcf   :  { %3180 = vst [vmem:[#allocation50_spill] sm:$0xff] %v2486_v39 }
  0xd0   :  { %3181 = vst [vmem:[#allocation51_spill] sm:$0xff] %v2488_v54 }
  0xd2   :  { %v235_v53 = vpop.f32.mrf.mxu2  ;;  %v276_v51 = vpop.f32.mrf.mxu3 }
  0xd3   :  { %v2491_v46 = vadd.f32 %v235_v53, %v2452_v52  ;;  %v2493_v48 = vadd.f32 %v276_v51, %v116_v58  ;;  %v156_v0 = vpop.f32.mrf.mxu0  ;;  %v197_v50 = vpop.f32.mrf.mxu1  ;;  %v139_v51 = vadd.f32 %v138_v13, %v113_v59 }
  0xd4   :  { %v2495_v49 = vadd.f32 %v156_v0, %v113_v59  ;;  %v2497_v55 = vadd.f32 %v197_v50, %v114_v62 }
  0xd5   :  { %3182 = vst [vmem:[#allocation52_spill] sm:$0xff] %v2491_v46  ;;  %v180_v46 = vadd.f32 %v179_v60, %v114_v62 }
  0xd6   :  { %3183 = vst [vmem:[#allocation53_spill] sm:$0xff] %v2493_v48 }
  0xd7   :  { %3184 = vst [vmem:[#allocation54_spill] sm:$0xff] %v2495_v49 }
  0xd8   :  { %3185 = vst [vmem:[#allocation55_spill] sm:$0xff] %v2497_v55 }
  0xda   :  { %v238_v26 = vpop.f32.mrf.mxu2  ;;  %v279_v61 = vpop.f32.mrf.mxu3 }
  0xdb   :  { %v2500_v56 = vadd.f32 %v238_v26, %v2452_v52  ;;  %v2502_v45 = vadd.f32 %v279_v61, %v116_v58  ;;  %v159_v54 = vpop.f32.mrf.mxu0  ;;  %v200_v39 = vpop.f32.mrf.mxu1 }
  0xdc   :  { %v2504_v47 = vadd.f32 %v159_v54, %v113_v59  ;;  %v2506_v53 = vadd.f32 %v200_v39, %v114_v62  ;;  %v262_v54 = vadd.f32 %v2446_v63, %v116_v58 }
  0xdd   :  { %3186 = vst [vmem:[#allocation56_spill] sm:$0xff] %v2500_v56 }
  0xde   :  { %3187 = vst [vmem:[#allocation57_spill] sm:$0xff] %v2502_v45 }
  0xdf   :  { %3188 = vst [vmem:[#allocation58_spill] sm:$0xff] %v2504_v47 }
  0xe0   :  { %3189 = vst [vmem:[#allocation59_spill] sm:$0xff] %v2506_v53 }
  0xe2   :  { %v241_v48 = vpop.f32.mrf.mxu2  ;;  %v282_v0 = vpop.f32.mrf.mxu3 }
  0xe3   :  { %v2509_v50 = vadd.f32 %v241_v48, %v2452_v52  ;;  %v2511_v55 = vadd.f32 %v282_v0, %v116_v58  ;;  %v404_v49 = vpop.f32.mrf.mxu0  ;;  %v424_v26 = vpop.f32.mrf.mxu1 }
  0xe4   :  { %v467_v56 = vadd.f32 %v404_v49, %v139_v51  ;;  %v468_v61 = vadd.f32 %v424_v26, %v180_v46  ;;  %v221_v49 = vadd.f32 %v2444_v57, %v2452_v52 }
  0xe5   :  { %3190 = vst [vmem:[#allocation60_spill] sm:$0xff] %v2509_v50 }
  0xe6   :  { %3191 = vst [vmem:[#allocation61_spill] sm:$0xff] %v2511_v55  ;;  %v1620_v45 = vmul.f32 -1.442695, %v467_v56  ;;  %v1621_v44 = vmul.f32 -1.442695, %v468_v61 }
  0xe8   :  { %1655 = vpow2.f32 %v1620_v45 }
  0xe9   :  { %1657 = vpow2.f32 %v1621_v44 }
  0xea   :  { %v464_v39 = vpop.f32.mrf.mxu3  ;;  %v444_v0 = vpop.f32.mrf.mxu2 }
  0xeb   :  { %v470_v59 = vadd.f32 %v464_v39, %v262_v54  ;;  %v469_v45 = vadd.f32 %v444_v0, %v221_v49 }
  0xed   :  { %v1622_v60 = vmul.f32 -1.442695, %v470_v59 }
  0xee   :  { %v1656_v62 = vpop.eup %1655 }
  0xef   :  { %v1658_v13 = vpop.eup %1657  ;;  %v474_v53 = vadd.f32 1.0, %v1656_v62  ;;  %1659 = vpow2.f32 %v1622_v60 }
  0xf0   :  { %v493_v48 = vadd.f32 1.0, %v1658_v13 }
  0xf1   :  { %1661 = vrcp.f32 %v474_v53  ;;  %v486_v61 = vand.u32 2147483648, %v474_v53  ;;  %v484_v59 = vand.u32 2147483647, %v474_v53  ;;  %vm480_vm2 = vweird.f32 %v474_v53 }
  0xf2   :  { %1663 = vrcp.f32 %v493_v48  ;;  %v505_v54 = vand.u32 2147483648, %v493_v48  ;;  %v503_v62 = vand.u32 2147483647, %v493_v48  ;;  %vm499_vm3 = vweird.f32 %v493_v48 }
  0xf3   :  { %v487_v52 = vor.u32 1.1754944e-38, %v486_v61  ;;  %vm485_vm5 = vcmp.eq.f32.partialorder %v484_v59, 8.507059e+37 }
  0xf4   :  { %v506_v49 = vor.u32 1.1754944e-38, %v505_v54  ;;  %vm504_vm7 = vcmp.eq.f32.partialorder %v503_v62, 8.507059e+37 }
  0xf5   :  { %v1660_v50 = vpop.eup %1659 }
  0xf6   :  { %v513_v46 = vadd.f32 1.0, %v1660_v50 }
  0xf7   :  { %v1662_v56 = vpop.eup %1661 }
  0xf8   :  { %v1664_v58 = vpop.eup %1663  ;;  %v476_v44 = vmul.f32 %v1662_v56, %v474_v53  ;;  %1665 = vrcp.f32 %v513_v46  ;;  %vm481_vm0 = vweird.f32 %v1662_v56  ;;  %vm519_vm9 = vweird.f32 %v513_v46 }
  0xf9   :  { %v495_v63 = vmul.f32 %v1664_v58, %v493_v48  ;;  %1667 = vtanh.f32 %v469_v45  ;;  %vm500_vm1 = vweird.f32 %v1664_v58  ;;  %vm482_vm4 = vmor %vm480_vm2, %vm481_vm0  ;;  %v525_v48 = vand.u32 2147483648, %v513_v46 }
  0xfa   :  { %v477_v51 = vsub.f32 1.0, %v476_v44  ;;  %vm501_vm6 = vmor %vm499_vm3, %vm500_vm1 }
  0xfb   :  { %v496_v26 = vsub.f32 1.0, %v495_v63  ;;  %v526_v54 = vor.u32 1.1754944e-38, %v525_v48 }
  0xfc   :  { %v478_v39 = vmul.f32 %v1662_v56, %v477_v51 }
  0xfd   :  { %v497_v60 = vmul.f32 %v1664_v58, %v496_v26 }
  0xfe   :  { %v1666_v13 = vpop.eup %1665  ;;  %v479_v57 = vadd.f32 %v1662_v56, %v478_v39 }
  0xff   :  { %v498_v50 = vadd.f32 %v1664_v58, %v497_v60  ;;  %v515_v0 = vmul.f32 %v1666_v13, %v513_v46  ;;  %v1668_v45 = vpop.eup %1667  ;;  %vm520_vm8 = vweird.f32 %v1666_v13 }
 0x100   :  { %v483_v44 = vsel %vm482_vm4, %v1662_v56, %v479_v57  ;;  %v523_v56 = vand.u32 2147483647, %v513_v46  ;;  %vm521_vm10 = vmor %vm519_vm9, %vm520_vm8 }
 0x101   :  { %v488_v63 = vsel %vm485_vm5, %v487_v52, %v483_v44  ;;  %v502_v51 = vsel %vm501_vm6, %v1664_v58, %v498_v50  ;;  %v516_v55 = vsub.f32 1.0, %v515_v0  ;;  %v3221_v52 = vld [vmem:[#allocation36_spill] sm:$0xff] }
 0x102   :  { %v507_v26 = vsel %vm504_vm7, %v506_v49, %v502_v51  ;;  %v530_v47 = vmul.f32 %v1668_v45, %v488_v63  ;;  %vm524_vm11 = vcmp.eq.f32.partialorder %v523_v56, 8.507059e+37 }
 0x103   :  { %v529_v42 = vmul.f32 0.0, %v507_v26  ;;  %v517_v43 = vmul.f32 %v1666_v13, %v516_v55 }
 0x105   :  { %v2516_v39 = vadd.f32 %v530_v47, %v529_v42  ;;  %v518_v53 = vadd.f32 %v1666_v13, %v517_v43 }
 0x107   :  { %1669 = vtanh.f32 %v2516_v39  ;;  %v522_v61 = vsel %vm521_vm10, %v1666_v13, %v518_v53 }
 0x108   :  { %v527_v59 = vsel %vm524_vm11, %v526_v54, %v522_v61 }
 0x10d   :  { %v1670_v58 = vpop.eup %1669 }
 0x10e   :  { %v533_v60 = vmul.f32 %v1670_v58, %v527_v59 }
 0x110   :  { %534 = vst [vmem:[%s3048_s4] sm:$0xff] %v533_v60  ;;  %556 = vmatmul.f32.vlgmr.msra.gmra.mxu0 %v533_v60  ;;  %576 = vmatmul.f32.vlgmr.msra.gmra.mxu1 %v533_v60 }
 0x111   :  { %596 = vmatmul.f32.vlgmr.msra.gmra.mxu2 %v533_v60  ;;  %616 = vmatmul.f32.vlgmr.msra.gmra.mxu3 %v533_v60 }
 0x112   :  { %848 = vmatpush.msra.mxu0 %v2100_v1  ;;  %868 = vmatpush.msra.mxu1 %v2102_v2  ;;  %v3192_v1 = vld [vmem:[#allocation9_spill] sm:$0xff]  ;;  %v3193_v2 = vld [vmem:[#allocation8_spill] sm:$0xff] }
 0x113   :  { %888 = vmatpush.msra.mxu2 %v2106_v4  ;;  %908 = vmatpush.msra.mxu3 %v2104_v3  ;;  %v3194_v3 = vld [vmem:[#allocation10_spill] sm:$0xff]  ;;  %v3195_v4 = vld [vmem:[#allocation11_spill] sm:$0xff] }
 0x114   :  { %849 = vmatpush.msra.mxu0 %v2108_v5  ;;  %869 = vmatpush.msra.mxu1 %v2110_v6  ;;  %v3196_v5 = vld [vmem:[#allocation13_spill] sm:$0xff]  ;;  %v3197_v6 = vld [vmem:[#allocation12_spill] sm:$0xff] }
 0x115   :  { %889 = vmatpush.msra.mxu2 %v2116_v8  ;;  %909 = vmatpush.msra.mxu3 %v2114_v7  ;;  %v3198_v7 = vld [vmem:[#allocation14_spill] sm:$0xff]  ;;  %v3199_v8 = vld [vmem:[#allocation15_spill] sm:$0xff] }
 0x116   :  { %850 = vmatpush.msra.mxu0 %v2119_v9  ;;  %870 = vmatpush.msra.mxu1 %v2121_v10  ;;  %v3200_v9 = vld [vmem:[#allocation17_spill] sm:$0xff]  ;;  %v3201_v10 = vld [vmem:[#allocation16_spill] sm:$0xff] }
 0x117   :  { %890 = vmatpush.msra.mxu2 %v2128_v12  ;;  %910 = vmatpush.msra.mxu3 %v2126_v11  ;;  %v3202_v11 = vld [vmem:[#allocation18_spill] sm:$0xff]  ;;  %v3203_v12 = vld [vmem:[#allocation19_spill] sm:$0xff] }
 0x118   :  { %851 = vmatpush.msra.mxu0 %v2137_v14  ;;  %871 = vmatpush.msra.mxu1 %v2139_v15  ;;  %v3204_v14 = vld [vmem:[#allocation21_spill] sm:$0xff]  ;;  %v3205_v15 = vld [vmem:[#allocation20_spill] sm:$0xff] }
 0x119   :  { %891 = vmatpush.msra.mxu2 %v2145_v17  ;;  %911 = vmatpush.msra.mxu3 %v2143_v16  ;;  %v3206_v16 = vld [vmem:[#allocation22_spill] sm:$0xff]  ;;  %v3207_v17 = vld [vmem:[#allocation23_spill] sm:$0xff] }
 0x11a   :  { %852 = vmatpush.msra.mxu0 %v2147_v18  ;;  %872 = vmatpush.msra.mxu1 %v2149_v19  ;;  %v3208_v18 = vld [vmem:[#allocation25_spill] sm:$0xff]  ;;  %v3209_v19 = vld [vmem:[#allocation24_spill] sm:$0xff] }
 0x11b   :  { %892 = vmatpush.msra.mxu2 %v2155_v21  ;;  %912 = vmatpush.msra.mxu3 %v2153_v20  ;;  %v3210_v20 = vld [vmem:[#allocation26_spill] sm:$0xff]  ;;  %v3211_v21 = vld [vmem:[#allocation27_spill] sm:$0xff] }
 0x11c   :  { %853 = vmatpush.msra.mxu0 %v2158_v22  ;;  %873 = vmatpush.msra.mxu1 %v2160_v23  ;;  %v3212_v22 = vld [vmem:[#allocation28_spill] sm:$0xff]  ;;  %v3213_v23 = vld [vmem:[#allocation29_spill] sm:$0xff] }
 0x11d   :  { %893 = vmatpush.msra.mxu2 %v2167_v25  ;;  %913 = vmatpush.msra.mxu3 %v2165_v24  ;;  %v3214_v24 = vld [vmem:[#allocation30_spill] sm:$0xff]  ;;  %v3215_v25 = vld [vmem:[#allocation31_spill] sm:$0xff] }
 0x11e   :  { %854 = vmatpush.msra.mxu0 %v2176_v27  ;;  %874 = vmatpush.msra.mxu1 %v2178_v28  ;;  %v3216_v27 = vld [vmem:[#allocation32_spill] sm:$0xff]  ;;  %v3217_v28 = vld [vmem:[#allocation33_spill] sm:$0xff] }
 0x11f   :  { %894 = vmatpush.msra.mxu2 %v2184_v30  ;;  %914 = vmatpush.msra.mxu3 %v2182_v29 }
 0x120   :  { %855 = vmatpush.msra.mxu0 %v2186_v31  ;;  %875 = vmatpush.msra.mxu1 %v2188_v32  ;;  %v3218_v31 = vld [vmem:[#allocation34_spill] sm:$0xff] }
 0x121   :  { %895 = vmatpush.msra.mxu2 %v2194_v34  ;;  %915 = vmatpush.msra.mxu3 %v2192_v33  ;;  %v3219_v33 = vld [vmem:[#allocation35_spill] sm:$0xff] }
 0x122   :  { %856 = vmatpush.msra.mxu0 %v2197_v35  ;;  %876 = vmatpush.msra.mxu1 %v2199_v36 }
 0x123   :  { %896 = vmatpush.msra.mxu2 %v2206_v38  ;;  %916 = vmatpush.msra.mxu3 %v2204_v37  ;;  %v3220_v38 = vld [vmem:[#allocation37_spill] sm:$0xff] }
 0x124   :  { %857 = vmatpush.msra.mxu0 %v2215_v40  ;;  %877 = vmatpush.msra.mxu1 %v2217_v41 }
 0x125   :  { %897 = vmatpush.msra.mxu2 %v3192_v1  ;;  %917 = vmatpush.msra.mxu3 %v3193_v2 }
 0x126   :  { %858 = vmatpush.msra.mxu0 %v3194_v3  ;;  %878 = vmatpush.msra.mxu1 %v3195_v4 }
 0x127   :  { %898 = vmatpush.msra.mxu2 %v3196_v5  ;;  %918 = vmatpush.msra.mxu3 %v3197_v6 }
 0x128   :  { %859 = vmatpush.msra.mxu0 %v3198_v7  ;;  %879 = vmatpush.msra.mxu1 %v3199_v8 }
 0x129   :  { %899 = vmatpush.msra.mxu2 %v3200_v9  ;;  %919 = vmatpush.msra.mxu3 %v3201_v10 }
 0x12a   :  { %860 = vmatpush.msra.mxu0 %v3202_v11  ;;  %880 = vmatpush.msra.mxu1 %v3203_v12 }
 0x12b   :  { %900 = vmatpush.msra.mxu2 %v3204_v14  ;;  %920 = vmatpush.msra.mxu3 %v3205_v15 }
 0x12c   :  { %861 = vmatpush.msra.mxu0 %v3206_v16  ;;  %881 = vmatpush.msra.mxu1 %v3207_v17 }
 0x12d   :  { %901 = vmatpush.msra.mxu2 %v3208_v18  ;;  %921 = vmatpush.msra.mxu3 %v3209_v19 }
 0x12e   :  { %862 = vmatpush.msra.mxu0 %v3210_v20  ;;  %882 = vmatpush.msra.mxu1 %v3211_v21 }
 0x12f   :  { %902 = vmatpush.msra.mxu2 %v3212_v22  ;;  %922 = vmatpush.msra.mxu3 %v3213_v23 }
 0x130   :  { %863 = vmatpush.msra.mxu0 %v3214_v24  ;;  %883 = vmatpush.msra.mxu1 %v3215_v25 }
 0x131   :  { %903 = vmatpush.msra.mxu2 %v3216_v27  ;;  %923 = vmatpush.msra.mxu3 %v3217_v28 }
 0x18d   :  { %v557_v29 = vpop.f32.mrf.mxu0  ;;  %v577_v30 = vpop.f32.mrf.mxu1 }
 0x18e   :  { %v620_v32 = vadd.f32 %v557_v29, %v3218_v31  ;;  %v621_v34 = vadd.f32 %v577_v30, %v3219_v33  ;;  %v2600_v29 = vld [vmem:[#allocation5 + $0x1e8] sm:$0xff]  ;;  %v2603_v30 = vld [vmem:[#allocation5 + $0x1f0] sm:$0xff]  ;;  %v2606_v31 = vld [vmem:[#allocation5 + $0x1f8] sm:$0xff] }
 0x18f   :  { %v2612_v33 = vld [vmem:[#allocation5 + $0x1c8] sm:$0xff] }
 0x190   :  { %v1623_v35 = vmul.f32 -1.442695, %v620_v32  ;;  %v1624_v36 = vmul.f32 -1.442695, %v621_v34  ;;  %v2609_v32 = vld [vmem:[#allocation5 + $0x1c0] sm:$0xff]  ;;  %v2615_v34 = vld [vmem:[#allocation5 + $0x1d0] sm:$0xff] }
 0x192   :  { %1671 = vpow2.f32 %v1623_v35  ;;  %v2618_v35 = vld [vmem:[#allocation5 + $0x1d8] sm:$0xff] }
 0x193   :  { %1673 = vpow2.f32 %v1624_v36  ;;  %v2621_v36 = vld [vmem:[#allocation5 + $0x1a0] sm:$0xff] }
 0x194   :  { %v617_v37 = vpop.f32.mrf.mxu3  ;;  %v597_v46 = vpop.f32.mrf.mxu2 }
 0x195   :  { %v623_v40 = vadd.f32 %v617_v37, %v3220_v38  ;;  %v622_v50 = vadd.f32 %v597_v46, %v3221_v52  ;;  %v2624_v37 = vld [vmem:[#allocation5 + $0x1a8] sm:$0xff]  ;;  %v2627_v38 = vld [vmem:[#allocation5 + $0x1b0] sm:$0xff] }
 0x196   :  { %v2648_v46 = vld [vmem:[#allocation5 + $0x168] sm:$0xff] }
 0x197   :  { %v1625_v41 = vmul.f32 -1.442695, %v623_v40  ;;  %v2630_v40 = vld [vmem:[#allocation5 + $0x1b8] sm:$0xff]  ;;  %v2660_v52 = vld [vmem:[#allocation5 + $0x148] sm:$0xff] }
 0x198   :  { %v1672_v42 = vpop.eup %1671 }
 0x199   :  { %v1674_v43 = vpop.eup %1673  ;;  %v627_v47 = vadd.f32 1.0, %v1672_v42  ;;  %1675 = vpow2.f32 %v1625_v41  ;;  %v2633_v41 = vld [vmem:[#allocation5 + $0x180] sm:$0xff]  ;;  %v2636_v42 = vld [vmem:[#allocation5 + $0x188] sm:$0xff] }
 0x19a   :  { %v646_v55 = vadd.f32 1.0, %v1674_v43  ;;  %v2639_v43 = vld [vmem:[#allocation5 + $0x190] sm:$0xff] }
 0x19b   :  { %1677 = vrcp.f32 %v627_v47  ;;  %v639_v51 = vand.u32 2147483648, %v627_v47  ;;  %v637_v48 = vand.u32 2147483647, %v627_v47  ;;  %vm633_vm14 = vweird.f32 %v627_v47 }
 0x19c   :  { %1679 = vrcp.f32 %v646_v55  ;;  %v658_v26 = vand.u32 2147483648, %v646_v55  ;;  %v656_v61 = vand.u32 2147483647, %v646_v55  ;;  %vm652_vm15 = vweird.f32 %v646_v55 }
 0x19d   :  { %v640_v59 = vor.u32 1.1754944e-38, %v639_v51  ;;  %vm638_vm2 = vcmp.eq.f32.partialorder %v637_v48, 8.507059e+37  ;;  %v2681_v51 = vld [vmem:[#allocation5 + $0x100] sm:$0xff]  ;;  %v2690_v48 = vld [vmem:[#allocation5 + $0x118] sm:$0xff] }
 0x19e   :  { %v659_v2 = vor.u32 1.1754944e-38, %v658_v26  ;;  %vm657_vm3 = vcmp.eq.f32.partialorder %v656_v61, 8.507059e+37  ;;  %v2684_v26 = vld [vmem:[#allocation5 + $0x108] sm:$0xff] }
 0x19f   :  { %v1676_v62 = vpop.eup %1675  ;;  %v2696_v61 = vld [vmem:[#allocation5 + $0xe8] sm:$0xff] }
 0x1a0   :  { %v666_v13 = vadd.f32 1.0, %v1676_v62  ;;  %v2651_v62 = vld [vmem:[#allocation5 + $0x170] sm:$0xff] }
 0x1a1   :  { %v1678_v57 = vpop.eup %1677 }
 0x1a2   :  { %v1680_v0 = vpop.eup %1679  ;;  %v629_v49 = vmul.f32 %v1678_v57, %v627_v47  ;;  %1681 = vrcp.f32 %v666_v13  ;;  %vm634_vm12 = vweird.f32 %v1678_v57  ;;  %v678_v15 = vand.u32 2147483648, %v666_v13  ;;  %v2642_v47 = vld [vmem:[#allocation5 + $0x198] sm:$0xff] }
 0x1a3   :  { %v648_v44 = vmul.f32 %v1680_v0, %v646_v55  ;;  %1683 = vtanh.f32 %v622_v50  ;;  %vm653_vm13 = vweird.f32 %v1680_v0  ;;  %vm635_vm0 = vmor %vm633_vm14, %vm634_vm12  ;;  %vm672_vm5 = vweird.f32 %v666_v13  ;;  %v2645_v55 = vld [vmem:[#allocation5 + $0x160] sm:$0xff]  ;;  %v2663_v50 = vld [vmem:[#allocation5 + $0x150] sm:$0xff] }
 0x1a4   :  { %v630_v45 = vsub.f32 1.0, %v629_v49  ;;  %vm654_vm1 = vmor %vm652_vm15, %vm653_vm13  ;;  %v676_v16 = vand.u32 2147483647, %v666_v13  ;;  %v679_v18 = vor.u32 1.1754944e-38, %v678_v15  ;;  %v2669_v49 = vld [vmem:[#allocation5 + $0x120] sm:$0xff]  ;;  %v2747_v15 = vld [vmem:[#allocation5 + $0x70] sm:$0xff] }
 0x1a5   :  { %v649_v63 = vsub.f32 1.0, %v648_v44  ;;  %v2672_v44 = vld [vmem:[#allocation5 + $0x128] sm:$0xff]  ;;  %3234 = vst [vmem:[#allocation21_spill] sm:$0xff] %v2747_v15 }
 0x1a6   :  { %v631_v53 = vmul.f32 %v1678_v57, %v630_v45  ;;  %vm677_vm7 = vcmp.eq.f32.partialorder %v676_v16, 8.507059e+37  ;;  %v2675_v45 = vld [vmem:[#allocation5 + $0x130] sm:$0xff]  ;;  %v2750_v16 = vld [vmem:[#allocation5 + $0x78] sm:$0xff] }
 0x1a7   :  { %v650_v56 = vmul.f32 %v1680_v0, %v649_v63  ;;  %v2678_v63 = vld [vmem:[#allocation5 + $0x138] sm:$0xff]  ;;  %3235 = vst [vmem:[#allocation20_spill] sm:$0xff] %v2750_v16 }
 0x1a8   :  { %v1682_v54 = vpop.eup %1681  ;;  %v632_v58 = vadd.f32 %v1678_v57, %v631_v53  ;;  %v2687_v53 = vld [vmem:[#allocation5 + $0x110] sm:$0xff] }
 0x1a9   :  { %v651_v60 = vadd.f32 %v1680_v0, %v650_v56  ;;  %v668_v1 = vmul.f32 %v1682_v54, %v666_v13  ;;  %v1684_v4 = vpop.eup %1683  ;;  %vm673_vm4 = vweird.f32 %v1682_v54  ;;  %v2654_v13 = vld [vmem:[#allocation5 + $0x178] sm:$0xff]  ;;  %v2693_v56 = vld [vmem:[#allocation5 + $0xe0] sm:$0xff] }
 0x1aa   :  { %v636_v3 = vsel %vm635_vm0, %v1678_v57, %v632_v58  ;;  %vm674_vm6 = vmor %vm672_vm5, %vm673_vm4  ;;  %v2657_v57 = vld [vmem:[#allocation5 + $0x140] sm:$0xff]  ;;  %v2702_v58 = vld [vmem:[#allocation5 + $0xf8] sm:$0xff] }
 0x1ab   :  { %v641_v5 = vsel %vm638_vm2, %v640_v59, %v636_v3  ;;  %v655_v6 = vsel %vm654_vm1, %v1680_v0, %v651_v60  ;;  %v669_v7 = vsub.f32 1.0, %v668_v1  ;;  %v2666_v0 = vld [vmem:[#allocation5 + $0x158] sm:$0xff]  ;;  %v2705_v59 = vld [vmem:[#allocation5 + $0xc0] sm:$0xff]  ;;  %v2708_v60 = vld [vmem:[#allocation5 + $0xc8] sm:$0xff] }
 0x1ac   :  { %v660_v8 = vsel %vm657_vm3, %v659_v2, %v655_v6  ;;  %v683_v9 = vmul.f32 %v1684_v4, %v641_v5  ;;  %v2711_v1 = vld [vmem:[#allocation5 + $0xd0] sm:$0xff]  ;;  %v2714_v2 = vld [vmem:[#allocation5 + $0xd8] sm:$0xff]  ;;  %v2717_v3 = vld [vmem:[#allocation5 + $0xa0] sm:$0xff] }
 0x1ad   :  { %v682_v10 = vmul.f32 %v660_v8, %v2516_v39  ;;  %v670_v11 = vmul.f32 %v1682_v54, %v669_v7  ;;  %v2597_v39 = vld [vmem:[#allocation5 + $0x1e0] sm:$0xff]  ;;  %3222 = vst [vmem:[#allocation9_spill] sm:$0xff] %v2711_v1  ;;  %v2720_v4 = vld [vmem:[#allocation5 + $0xa8] sm:$0xff]  ;;  %v2723_v5 = vld [vmem:[#allocation5 + $0xb0] sm:$0xff] }
 0x1ae   :  { %3223 = vst [vmem:[#allocation8_spill] sm:$0xff] %v2714_v2  ;;  %v2726_v6 = vld [vmem:[#allocation5 + $0xb8] sm:$0xff]  ;;  %v2729_v7 = vld [vmem:[#allocation5 + $0x80] sm:$0xff]  ;;  %v2732_v8 = vld [vmem:[#allocation5 + $0x88] sm:$0xff] }
 0x1af   :  { %v2591_v12 = vadd.f32 %v683_v9, %v682_v10  ;;  %v671_v14 = vadd.f32 %v1682_v54, %v670_v11  ;;  %3224 = vst [vmem:[#allocation10_spill] sm:$0xff] %v2717_v3  ;;  %v2735_v9 = vld [vmem:[#allocation5 + $0x90] sm:$0xff]  ;;  %v2738_v10 = vld [vmem:[#allocation5 + $0x98] sm:$0xff]  ;;  %v2741_v11 = vld [vmem:[#allocation5 + $0x60] sm:$0xff] }
 0x1b0   :  { %3225 = vst [vmem:[#allocation11_spill] sm:$0xff] %v2720_v4 }
 0x1b1   :  { %1685 = vtanh.f32 %v2591_v12  ;;  %v675_v17 = vsel %vm674_vm6, %v1682_v54, %v671_v14  ;;  %v2699_v54 = vld [vmem:[#allocation5 + $0xf0] sm:$0xff]  ;;  %3226 = vst [vmem:[#allocation13_spill] sm:$0xff] %v2723_v5  ;;  %v2744_v14 = vld [vmem:[#allocation5 + $0x68] sm:$0xff] }
 0x1b2   :  { %v680_v20 = vsel %vm677_vm7, %v679_v18, %v675_v17  ;;  %3227 = vst [vmem:[#allocation12_spill] sm:$0xff] %v2726_v6  ;;  %v2753_v17 = vld [vmem:[#allocation5 + $0x40] sm:$0xff]  ;;  %v2756_v18 = vld [vmem:[#allocation5 + $0x48] sm:$0xff] }
 0x1b3   :  { %3228 = vst [vmem:[#allocation14_spill] sm:$0xff] %v2729_v7 }
 0x1b4   :  { %3229 = vst [vmem:[#allocation15_spill] sm:$0xff] %v2732_v8 }
 0x1b5   :  { %3230 = vst [vmem:[#allocation17_spill] sm:$0xff] %v2735_v9 }
 0x1b6   :  { %3231 = vst [vmem:[#allocation16_spill] sm:$0xff] %v2738_v10 }
 0x1b7   :  { %v1686_v19 = vpop.eup %1685  ;;  %3232 = vst [vmem:[#allocation18_spill] sm:$0xff] %v2741_v11 }
 0x1b8   :  { %v686_v21 = vmul.f32 %v1686_v19, %v680_v20  ;;  %3233 = vst [vmem:[#allocation19_spill] sm:$0xff] %v2744_v14  ;;  %v2759_v19 = vld [vmem:[#allocation5 + $0x50] sm:$0xff]  ;;  %v2762_v20 = vld [vmem:[#allocation5 + $0x58] sm:$0xff] }
 0x1b9   :  { %3236 = vst [vmem:[#allocation22_spill] sm:$0xff] %v2753_v17 }
 0x1ba   :  { %1626 = vst [vmem:[%s3048_s4 + $0x8] sm:$0xff] %v686_v21  ;;  %710 = vmatmul.f32.vlgmr.msrb.gmra.mxu0 %v686_v21  ;;  %730 = vmatmul.f32.vlgmr.msrb.gmra.mxu1 %v686_v21 }
 0x1bb   :  { %750 = vmatmul.f32.vlgmr.msrb.gmra.mxu2 %v686_v21  ;;  %770 = vmatmul.f32.vlgmr.msrb.gmra.mxu3 %v686_v21  ;;  %3237 = vst [vmem:[#allocation23_spill] sm:$0xff] %v2756_v18  ;;  %v2765_v21 = vld [vmem:[#allocation5 + $0x20] sm:$0xff] }
 0x1bc   :  { %1002 = vmatpush.msrb.mxu0 %v2597_v39  ;;  %1022 = vmatpush.msrb.mxu1 %v2600_v29  ;;  %3238 = vst [vmem:[#allocation25_spill] sm:$0xff] %v2759_v19 }
 0x1bd   :  { %1042 = vmatpush.msrb.mxu2 %v2603_v30  ;;  %1062 = vmatpush.msrb.mxu3 %v2606_v31  ;;  %3239 = vst [vmem:[#allocation24_spill] sm:$0xff] %v2762_v20 }
 0x1be   :  { %1003 = vmatpush.msrb.mxu0 %v2609_v32  ;;  %1023 = vmatpush.msrb.mxu1 %v2612_v33  ;;  %3240 = vst [vmem:[#allocation26_spill] sm:$0xff] %v2765_v21 }
 0x1bf   :  { %1043 = vmatpush.msrb.mxu2 %v2615_v34  ;;  %1063 = vmatpush.msrb.mxu3 %v2618_v35 }
 0x1c0   :  { %1004 = vmatpush.msrb.mxu0 %v2621_v36  ;;  %1024 = vmatpush.msrb.mxu1 %v2624_v37 }
 0x1c1   :  { %1044 = vmatpush.msrb.mxu2 %v2627_v38  ;;  %1064 = vmatpush.msrb.mxu3 %v2630_v40 }
 0x1c2   :  { %1005 = vmatpush.msrb.mxu0 %v2633_v41  ;;  %1025 = vmatpush.msrb.mxu1 %v2636_v42 }
 0x1c3   :  { %1045 = vmatpush.msrb.mxu2 %v2639_v43  ;;  %1065 = vmatpush.msrb.mxu3 %v2642_v47 }
 0x1c4   :  { %1006 = vmatpush.msrb.mxu0 %v2645_v55  ;;  %1026 = vmatpush.msrb.mxu1 %v2648_v46 }
 0x1c5   :  { %1046 = vmatpush.msrb.mxu2 %v2651_v62  ;;  %1066 = vmatpush.msrb.mxu3 %v2654_v13 }
 0x1c6   :  { %1007 = vmatpush.msrb.mxu0 %v2657_v57  ;;  %1027 = vmatpush.msrb.mxu1 %v2660_v52 }
 0x1c7   :  { %1047 = vmatpush.msrb.mxu2 %v2663_v50  ;;  %1067 = vmatpush.msrb.mxu3 %v2666_v0 }
 0x1c8   :  { %1008 = vmatpush.msrb.mxu0 %v2669_v49  ;;  %1028 = vmatpush.msrb.mxu1 %v2672_v44 }
 0x1c9   :  { %1048 = vmatpush.msrb.mxu2 %v2675_v45  ;;  %1068 = vmatpush.msrb.mxu3 %v2678_v63 }
 0x1ca   :  { %1009 = vmatpush.msrb.mxu0 %v2681_v51  ;;  %1029 = vmatpush.msrb.mxu1 %v2684_v26 }
 0x1cb   :  { %1049 = vmatpush.msrb.mxu2 %v2687_v53  ;;  %1069 = vmatpush.msrb.mxu3 %v2690_v48 }
 0x1cc   :  { %1010 = vmatpush.msrb.mxu0 %v2693_v56  ;;  %1030 = vmatpush.msrb.mxu1 %v2696_v61 }
 0x1cd   :  { %1050 = vmatpush.msrb.mxu2 %v2699_v54  ;;  %1070 = vmatpush.msrb.mxu3 %v2702_v58 }
 0x1ce   :  { %1011 = vmatpush.msrb.mxu0 %v2705_v59  ;;  %1031 = vmatpush.msrb.mxu1 %v2708_v60 }
 0x1cf   :  { %1051 = vmatpush.msrb.mxu2 %v2711_v1  ;;  %1071 = vmatpush.msrb.mxu3 %v2714_v2 }
 0x1d0   :  { %1012 = vmatpush.msrb.mxu0 %v2717_v3  ;;  %1032 = vmatpush.msrb.mxu1 %v2720_v4 }
 0x1d1   :  { %1052 = vmatpush.msrb.mxu2 %v2723_v5  ;;  %1072 = vmatpush.msrb.mxu3 %v2726_v6 }
 0x1d2   :  { %1013 = vmatpush.msrb.mxu0 %v2729_v7  ;;  %1033 = vmatpush.msrb.mxu1 %v2732_v8 }
 0x1d3   :  { %1053 = vmatpush.msrb.mxu2 %v2735_v9  ;;  %1073 = vmatpush.msrb.mxu3 %v2738_v10 }
 0x1d4   :  { %1014 = vmatpush.msrb.mxu0 %v2741_v11  ;;  %1034 = vmatpush.msrb.mxu1 %v2744_v14 }
 0x1d5   :  { %1054 = vmatpush.msrb.mxu2 %v2747_v15  ;;  %1074 = vmatpush.msrb.mxu3 %v2750_v16  ;;  %v2768_v16 = vld [vmem:[#allocation5 + $0x28] sm:$0xff] }
 0x1d6   :  { %1015 = vmatpush.msrb.mxu0 %v2753_v17  ;;  %1035 = vmatpush.msrb.mxu1 %v2756_v18  ;;  %3241 = vst [vmem:[#allocation27_spill] sm:$0xff] %v2768_v16  ;;  %v3242_v18 = vld [vmem:[#allocation38_spill] sm:$0xff]  ;;  %v3243_v17 = vld [vmem:[#allocation39_spill] sm:$0xff] }
 0x1d7   :  { %1055 = vmatpush.msrb.mxu2 %v2759_v19  ;;  %1075 = vmatpush.msrb.mxu3 %v2762_v20 }
 0x1d8   :  { %1016 = vmatpush.msrb.mxu0 %v2765_v21  ;;  %1036 = vmatpush.msrb.mxu1 %v2768_v16 }
 0x1d9   :  { %1056 = vmatpush.msrb.mxu2 %v3212_v22  ;;  %1076 = vmatpush.msrb.mxu3 %v3213_v23  ;;  %v3244_v23 = vld [vmem:[#allocation41_spill] sm:$0xff] }
 0x1da   :  { %1017 = vmatpush.msrb.mxu0 %v3214_v24  ;;  %1037 = vmatpush.msrb.mxu1 %v3215_v25 }
 0x1db   :  { %1057 = vmatpush.msrb.mxu2 %v3216_v27  ;;  %1077 = vmatpush.msrb.mxu3 %v3217_v28 }
 0x237   :  { %v711_v20 = vpop.f32.mrf.mxu0  ;;  %v731_v19 = vpop.f32.mrf.mxu1 }
 0x238   :  { %v774_v21 = vadd.f32 %v711_v20, %v3242_v18  ;;  %v775_v15 = vadd.f32 %v731_v19, %v3243_v17  ;;  %v3245_v17 = vld [vmem:[#allocation40_spill] sm:$0xff] }
 0x23a   :  { %v1627_v14 = vmul.f32 -1.442695, %v774_v21  ;;  %v1628_v16 = vmul.f32 -1.442695, %v775_v15 }
 0x23c   :  { %1687 = vpow2.f32 %v1627_v14 }
 0x23d   :  { %1689 = vpow2.f32 %v1628_v16 }
 0x23e   :  { %v771_v22 = vpop.f32.mrf.mxu3  ;;  %v751_v28 = vpop.f32.mrf.mxu2 }
 0x23f   :  { %v777_v11 = vadd.f32 %v771_v22, %v3244_v23  ;;  %v776_v19 = vadd.f32 %v751_v28, %v3245_v17 }
 0x241   :  { %v1629_v24 = vmul.f32 -1.442695, %v777_v11 }
 0x242   :  { %v1688_v10 = vpop.eup %1687 }
 0x243   :  { %v1690_v25 = vpop.eup %1689  ;;  %v781_v9 = vadd.f32 1.0, %v1688_v10  ;;  %1691 = vpow2.f32 %v1629_v24 }
 0x244   :  { %v800_v27 = vadd.f32 1.0, %v1690_v25 }
 0x245   :  { %1693 = vrcp.f32 %v781_v9  ;;  %v793_v11 = vand.u32 2147483648, %v781_v9  ;;  %v791_v24 = vand.u32 2147483647, %v781_v9  ;;  %vm787_vm10 = vweird.f32 %v781_v9 }
 0x246   :  { %1695 = vrcp.f32 %v800_v27  ;;  %v812_v23 = vand.u32 2147483648, %v800_v27  ;;  %v810_v7 = vand.u32 2147483647, %v800_v27  ;;  %vm806_vm11 = vweird.f32 %v800_v27 }
 0x247   :  { %v794_v28 = vor.u32 1.1754944e-38, %v793_v11  ;;  %vm792_vm14 = vcmp.eq.f32.partialorder %v791_v24, 8.507059e+37 }
 0x248   :  { %vm811_vm15 = vcmp.eq.f32.partialorder %v810_v7, 8.507059e+37 }
 0x249   :  { %v1692_v8 = vpop.eup %1691 }
 0x24a   :  { %v820_v18 = vadd.f32 1.0, %v1692_v8 }
 0x24b   :  { %v1694_v20 = vpop.eup %1693 }
 0x24c   :  { %v1696_v15 = vpop.eup %1695  ;;  %v783_v14 = vmul.f32 %v1694_v20, %v781_v9  ;;  %1697 = vrcp.f32 %v820_v18  ;;  %vm788_vm8 = vweird.f32 %v1694_v20  ;;  %v832_v11 = vand.u32 2147483648, %v820_v18 }
 0x24d   :  { %v802_v16 = vmul.f32 %v1696_v15, %v800_v27  ;;  %1699 = vtanh.f32 %v776_v19  ;;  %vm807_vm9 = vweird.f32 %v1696_v15  ;;  %vm789_vm12 = vmor %vm787_vm10, %vm788_vm8  ;;  %vm826_vm1 = vweird.f32 %v820_v18 }
 0x24e   :  { %v784_v21 = vsub.f32 1.0, %v783_v14  ;;  %vm808_vm13 = vmor %vm806_vm11, %vm807_vm9  ;;  %v813_v14 = vor.u32 1.1754944e-38, %v812_v23  ;;  %v833_v24 = vor.u32 1.1754944e-38, %v832_v11  ;;  %v3264_v11 = vld [vmem:[#allocation26_spill] sm:$0xff] }
 0x24f   :  { %v803_v22 = vsub.f32 1.0, %v802_v16 }
 0x250   :  { %v785_v10 = vmul.f32 %v1694_v20, %v784_v21 }
 0x251   :  { %v804_v25 = vmul.f32 %v1696_v15, %v803_v22 }
 0x252   :  { %v1698_v6 = vpop.eup %1697  ;;  %v786_v8 = vadd.f32 %v1694_v20, %v785_v10 }
 0x253   :  { %v805_v17 = vadd.f32 %v1696_v15, %v804_v25  ;;  %v822_v5 = vmul.f32 %v1698_v6, %v820_v18  ;;  %v1700_v19 = vpop.eup %1699  ;;  %vm827_vm0 = vweird.f32 %v1698_v6  ;;  %v3253_v25 = vld [vmem:[#allocation15_spill] sm:$0xff] }
 0x254   :  { %v790_v16 = vsel %vm789_vm12, %v1694_v20, %v786_v8  ;;  %v830_v20 = vand.u32 2147483647, %v820_v18  ;;  %vm828_vm2 = vmor %vm826_vm1, %vm827_vm0  ;;  %v3252_v18 = vld [vmem:[#allocation14_spill] sm:$0xff]  ;;  %v3254_v8 = vld [vmem:[#allocation17_spill] sm:$0xff] }
 0x255   :  { %v795_v4 = vsel %vm792_vm14, %v794_v28, %v790_v16  ;;  %v809_v21 = vsel %vm808_vm13, %v1696_v15, %v805_v17  ;;  %v823_v3 = vsub.f32 1.0, %v822_v5  ;;  %v3255_v28 = vld [vmem:[#allocation16_spill] sm:$0xff]  ;;  %v3256_v17 = vld [vmem:[#allocation18_spill] sm:$0xff]  ;;  %v3258_v16 = vld [vmem:[#allocation21_spill] sm:$0xff] }
 0x256   :  { %v814_v22 = vsel %vm811_vm15, %v813_v14, %v809_v21  ;;  %v837_v2 = vmul.f32 %v1700_v19, %v795_v4  ;;  %vm831_vm3 = vcmp.eq.f32.partialorder %v830_v20, 8.507059e+37  ;;  %v3250_v4 = vld [vmem:[#allocation13_spill] sm:$0xff]  ;;  %v3257_v14 = vld [vmem:[#allocation19_spill] sm:$0xff]  ;;  %v3259_v19 = vld [vmem:[#allocation20_spill] sm:$0xff] }
 0x257   :  { %v836_v1 = vmul.f32 %v814_v22, %v2591_v12  ;;  %v824_v10 = vmul.f32 %v1698_v6, %v823_v3  ;;  %v3246_v12 = vld [vmem:[#allocation9_spill] sm:$0xff]  ;;  %v3249_v3 = vld [vmem:[#allocation11_spill] sm:$0xff]  ;;  %v3260_v21 = vld [vmem:[#allocation22_spill] sm:$0xff] }
 0x258   :  { %v3261_v22 = vld [vmem:[#allocation23_spill] sm:$0xff] }
 0x259   :  { %v2782_v9 = vadd.f32 %v837_v2, %v836_v1  ;;  %v825_v27 = vadd.f32 %v1698_v6, %v824_v10  ;;  %v3247_v1 = vld [vmem:[#allocation8_spill] sm:$0xff]  ;;  %v3248_v2 = vld [vmem:[#allocation10_spill] sm:$0xff]  ;;  %v3262_v10 = vld [vmem:[#allocation25_spill] sm:$0xff] }
 0x25a   :  { %v3265_v20 = vld [vmem:[#allocation27_spill] sm:$0xff] }
 0x25b   :  { %1701 = vtanh.f32 %v2782_v9  ;;  %v829_v23 = vsel %vm828_vm2, %v1698_v6, %v825_v27  ;;  %v3251_v6 = vld [vmem:[#allocation12_spill] sm:$0xff] }
 0x25c   :  { %v834_v5 = vsel %vm831_vm3, %v833_v24, %v829_v23  ;;  %v3263_v27 = vld [vmem:[#allocation24_spill] sm:$0xff]  ;;  %v2846_v23 = vld [vmem:[#allocation5 + $0x30] sm:$0xff]  ;;  %v2849_v24 = vld [vmem:[#allocation5 + $0x38] sm:$0xff] }
 0x25d   :  { %3266 = vst [vmem:[#allocation28_spill] sm:$0xff] %v2846_v23 }
 0x25e   :  { %3267 = vst [vmem:[#allocation29_spill] sm:$0xff] %v2849_v24 }
 0x261   :  { %v1702_v7 = vpop.eup %1701 }
 0x262   :  { %v840_v15 = vmul.f32 %v1702_v7, %v834_v5  ;;  %v2852_v7 = vld [vmem:[#allocation5] sm:$0xff]  ;;  %v2855_v5 = vld [vmem:[#allocation5 + $0x8] sm:$0xff] }
 0x263   :  { %3268 = vst [vmem:[#allocation30_spill] sm:$0xff] %v2852_v7 }
 0x264   :  { %1630 = vst [vmem:[%s3048_s4 + $0x10] sm:$0xff] %v840_v15  ;;  %864 = vmatmul.f32.vlgmr.msra.gmra.mxu0 %v840_v15  ;;  %884 = vmatmul.f32.vlgmr.msra.gmra.mxu1 %v840_v15 }
 0x265   :  { %904 = vmatmul.f32.vlgmr.msra.gmra.mxu2 %v840_v15  ;;  %924 = vmatmul.f32.vlgmr.msra.gmra.mxu3 %v840_v15  ;;  %3269 = vst [vmem:[#allocation31_spill] sm:$0xff] %v2855_v5  ;;  %v2858_v15 = vld [vmem:[#allocation5 + $0x10] sm:$0xff] }
 0x266   :  { %1156 = vmatpush.msra.mxu0 %v2597_v39  ;;  %1176 = vmatpush.msra.mxu1 %v2600_v29  ;;  %3270 = vst [vmem:[#allocation32_spill] sm:$0xff] %v2858_v15 }
 0x267   :  { %1196 = vmatpush.msra.mxu2 %v2603_v30  ;;  %1216 = vmatpush.msra.mxu3 %v2606_v31 }
 0x268   :  { %1157 = vmatpush.msra.mxu0 %v2609_v32  ;;  %1177 = vmatpush.msra.mxu1 %v2612_v33 }
 0x269   :  { %1197 = vmatpush.msra.mxu2 %v2615_v34  ;;  %1217 = vmatpush.msra.mxu3 %v2618_v35 }
 0x26a   :  { %1158 = vmatpush.msra.mxu0 %v2621_v36  ;;  %1178 = vmatpush.msra.mxu1 %v2624_v37 }
 0x26b   :  { %1198 = vmatpush.msra.mxu2 %v2627_v38  ;;  %1218 = vmatpush.msra.mxu3 %v2630_v40 }
 0x26c   :  { %1159 = vmatpush.msra.mxu0 %v2633_v41  ;;  %1179 = vmatpush.msra.mxu1 %v2636_v42 }
 0x26d   :  { %1199 = vmatpush.msra.mxu2 %v2639_v43  ;;  %1219 = vmatpush.msra.mxu3 %v2642_v47 }
 0x26e   :  { %1160 = vmatpush.msra.mxu0 %v2645_v55  ;;  %1180 = vmatpush.msra.mxu1 %v2648_v46 }
 0x26f   :  { %1200 = vmatpush.msra.mxu2 %v2651_v62  ;;  %1220 = vmatpush.msra.mxu3 %v2654_v13 }
 0x270   :  { %1161 = vmatpush.msra.mxu0 %v2657_v57  ;;  %1181 = vmatpush.msra.mxu1 %v2660_v52 }
 0x271   :  { %1201 = vmatpush.msra.mxu2 %v2663_v50  ;;  %1221 = vmatpush.msra.mxu3 %v2666_v0 }
 0x272   :  { %1162 = vmatpush.msra.mxu0 %v2669_v49  ;;  %1182 = vmatpush.msra.mxu1 %v2672_v44 }
 0x273   :  { %1202 = vmatpush.msra.mxu2 %v2675_v45  ;;  %1222 = vmatpush.msra.mxu3 %v2678_v63 }
 0x274   :  { %1163 = vmatpush.msra.mxu0 %v2681_v51  ;;  %1183 = vmatpush.msra.mxu1 %v2684_v26 }
 0x275   :  { %1203 = vmatpush.msra.mxu2 %v2687_v53  ;;  %1223 = vmatpush.msra.mxu3 %v2690_v48 }
 0x276   :  { %1164 = vmatpush.msra.mxu0 %v2693_v56  ;;  %1184 = vmatpush.msra.mxu1 %v2696_v61 }
 0x277   :  { %1204 = vmatpush.msra.mxu2 %v2699_v54  ;;  %1224 = vmatpush.msra.mxu3 %v2702_v58 }
 0x278   :  { %1165 = vmatpush.msra.mxu0 %v2705_v59  ;;  %1185 = vmatpush.msra.mxu1 %v2708_v60 }
 0x279   :  { %1205 = vmatpush.msra.mxu2 %v3246_v12  ;;  %1225 = vmatpush.msra.mxu3 %v3247_v1 }
 0x27a   :  { %1166 = vmatpush.msra.mxu0 %v3248_v2  ;;  %1186 = vmatpush.msra.mxu1 %v3249_v3 }
 0x27b   :  { %1206 = vmatpush.msra.mxu2 %v3250_v4  ;;  %1226 = vmatpush.msra.mxu3 %v3251_v6 }
 0x27c   :  { %1167 = vmatpush.msra.mxu0 %v3252_v18  ;;  %1187 = vmatpush.msra.mxu1 %v3253_v25 }
 0x27d   :  { %1207 = vmatpush.msra.mxu2 %v3254_v8  ;;  %1227 = vmatpush.msra.mxu3 %v3255_v28 }
 0x27e   :  { %1168 = vmatpush.msra.mxu0 %v3256_v17  ;;  %1188 = vmatpush.msra.mxu1 %v3257_v14 }
 0x27f   :  { %1208 = vmatpush.msra.mxu2 %v3258_v16  ;;  %1228 = vmatpush.msra.mxu3 %v3259_v19 }
 0x280   :  { %1169 = vmatpush.msra.mxu0 %v3260_v21  ;;  %1189 = vmatpush.msra.mxu1 %v3261_v22 }
 0x281   :  { %1209 = vmatpush.msra.mxu2 %v3262_v10  ;;  %1229 = vmatpush.msra.mxu3 %v3263_v27  ;;  %v3272_v27 = vld [vmem:[#allocation42_spill] sm:$0xff]  ;;  %v3273_v10 = vld [vmem:[#allocation43_spill] sm:$0xff] }
 0x282   :  { %1170 = vmatpush.msra.mxu0 %v3264_v11  ;;  %1190 = vmatpush.msra.mxu1 %v3265_v20  ;;  %v2861_v20 = vld [vmem:[#allocation5 + $0x18] sm:$0xff] }
 0x283   :  { %1210 = vmatpush.msra.mxu2 %v2846_v23  ;;  %1230 = vmatpush.msra.mxu3 %v2849_v24  ;;  %3271 = vst [vmem:[#allocation33_spill] sm:$0xff] %v2861_v20 }
 0x284   :  { %1171 = vmatpush.msra.mxu0 %v2852_v7  ;;  %1191 = vmatpush.msra.mxu1 %v2855_v5  ;;  %v3274_v5 = vld [vmem:[#allocation45_spill] sm:$0xff] }
 0x285   :  { %1211 = vmatpush.msra.mxu2 %v2858_v15  ;;  %1231 = vmatpush.msra.mxu3 %v2861_v20 }
 0x2e1   :  { %v865_v23 = vpop.f32.mrf.mxu0  ;;  %v885_v11 = vpop.f32.mrf.mxu1 }
 0x2e2   :  { %v928_v24 = vadd.f32 %v865_v23, %v3272_v27  ;;  %v929_v22 = vadd.f32 %v885_v11, %v3273_v10  ;;  %v3275_v10 = vld [vmem:[#allocation44_spill] sm:$0xff] }
 0x2e4   :  { %v1631_v21 = vmul.f32 -1.442695, %v928_v24  ;;  %v1632_v7 = vmul.f32 -1.442695, %v929_v22 }
 0x2e6   :  { %1703 = vpow2.f32 %v1631_v21 }
 0x2e7   :  { %1705 = vpow2.f32 %v1632_v7 }
 0x2e8   :  { %v925_v19 = vpop.f32.mrf.mxu3  ;;  %v905_v20 = vpop.f32.mrf.mxu2 }
 0x2e9   :  { %v931_v16 = vadd.f32 %v925_v19, %v3274_v5  ;;  %v930_v11 = vadd.f32 %v905_v20, %v3275_v10 }
 0x2eb   :  { %v1633_v14 = vmul.f32 -1.442695, %v931_v16 }
 0x2ec   :  { %v1704_v17 = vpop.eup %1703 }
 0x2ed   :  { %v1706_v15 = vpop.eup %1705  ;;  %v935_v28 = vadd.f32 1.0, %v1704_v17  ;;  %1707 = vpow2.f32 %v1633_v14 }
 0x2ee   :  { %v954_v8 = vadd.f32 1.0, %v1706_v15 }
 0x2ef   :  { %1709 = vrcp.f32 %v935_v28  ;;  %v947_v16 = vand.u32 2147483648, %v935_v28  ;;  %v945_v14 = vand.u32 2147483647, %v935_v28  ;;  %vm941_vm6 = vweird.f32 %v935_v28 }
 0x2f0   :  { %1711 = vrcp.f32 %v954_v8  ;;  %v966_v5 = vand.u32 2147483648, %v954_v8  ;;  %v964_v18 = vand.u32 2147483647, %v954_v8  ;;  %vm960_vm7 = vweird.f32 %v954_v8 }
 0x2f1   :  { %v948_v20 = vor.u32 1.1754944e-38, %v947_v16  ;;  %vm946_vm10 = vcmp.eq.f32.partialorder %v945_v14, 8.507059e+37 }
 0x2f2   :  { %vm965_vm11 = vcmp.eq.f32.partialorder %v964_v18, 8.507059e+37 }
 0x2f3   :  { %v1708_v25 = vpop.eup %1707 }
 0x2f4   :  { %v974_v27 = vadd.f32 1.0, %v1708_v25 }
 0x2f5   :  { %v1710_v23 = vpop.eup %1709 }
 0x2f6   :  { %v1712_v22 = vpop.eup %1711  ;;  %v937_v21 = vmul.f32 %v1710_v23, %v935_v28  ;;  %1713 = vrcp.f32 %v974_v27  ;;  %vm942_vm4 = vweird.f32 %v1710_v23  ;;  %v986_v16 = vand.u32 2147483648, %v974_v27 }
 0x2f7   :  { %v956_v24 = vmul.f32 %v1712_v22, %v954_v8  ;;  %1715 = vtanh.f32 %v930_v11  ;;  %vm961_vm5 = vweird.f32 %v1712_v22  ;;  %vm943_vm8 = vmor %vm941_vm6, %vm942_vm4  ;;  %vm980_vm13 = vweird.f32 %v974_v27 }
 0x2f8   :  { %v938_v7 = vsub.f32 1.0, %v937_v21  ;;  %vm962_vm9 = vmor %vm960_vm7, %vm961_vm5  ;;  %v967_v21 = vor.u32 1.1754944e-38, %v966_v5  ;;  %v987_v14 = vor.u32 1.1754944e-38, %v986_v16  ;;  %v3294_v16 = vld [vmem:[#allocation26_spill] sm:$0xff] }
 0x2f9   :  { %v957_v19 = vsub.f32 1.0, %v956_v24 }
 0x2fa   :  { %v939_v17 = vmul.f32 %v1710_v23, %v938_v7 }
 0x2fb   :  { %v958_v15 = vmul.f32 %v1712_v22, %v957_v19 }
 0x2fc   :  { %v1714_v6 = vpop.eup %1713  ;;  %v940_v25 = vadd.f32 %v1710_v23, %v939_v17 }
 0x2fd   :  { %v959_v10 = vadd.f32 %v1712_v22, %v958_v15  ;;  %v976_v4 = vmul.f32 %v1714_v6, %v974_v27  ;;  %v1716_v11 = vpop.eup %1715  ;;  %vm981_vm12 = vweird.f32 %v1714_v6  ;;  %v3283_v15 = vld [vmem:[#allocation15_spill] sm:$0xff] }
 0x2fe   :  { %v944_v24 = vsel %vm943_vm8, %v1710_v23, %v940_v25  ;;  %v984_v23 = vand.u32 2147483647, %v974_v27  ;;  %vm982_vm14 = vmor %vm980_vm13, %vm981_vm12  ;;  %v3282_v27 = vld [vmem:[#allocation14_spill] sm:$0xff]  ;;  %v3284_v25 = vld [vmem:[#allocation17_spill] sm:$0xff] }
 0x2ff   :  { %v949_v3 = vsel %vm946_vm10, %v948_v20, %v944_v24  ;;  %v963_v7 = vsel %vm962_vm9, %v1712_v22, %v959_v10  ;;  %v977_v2 = vsub.f32 1.0, %v976_v4  ;;  %v3285_v20 = vld [vmem:[#allocation16_spill] sm:$0xff]  ;;  %v3286_v10 = vld [vmem:[#allocation18_spill] sm:$0xff]  ;;  %v3288_v24 = vld [vmem:[#allocation21_spill] sm:$0xff] }
 0x300   :  { %v968_v19 = vsel %vm965_vm11, %v967_v21, %v963_v7  ;;  %v991_v1 = vmul.f32 %v1716_v11, %v949_v3  ;;  %vm985_vm15 = vcmp.eq.f32.partialorder %v984_v23, 8.507059e+37  ;;  %v3280_v3 = vld [vmem:[#allocation13_spill] sm:$0xff]  ;;  %v3287_v21 = vld [vmem:[#allocation19_spill] sm:$0xff]  ;;  %v3289_v11 = vld [vmem:[#allocation20_spill] sm:$0xff] }
 0x301   :  { %v990_v12 = vmul.f32 %v968_v19, %v2782_v9  ;;  %v978_v17 = vmul.f32 %v1714_v6, %v977_v2  ;;  %v3276_v9 = vld [vmem:[#allocation9_spill] sm:$0xff]  ;;  %v3279_v2 = vld [vmem:[#allocation11_spill] sm:$0xff]  ;;  %v3290_v7 = vld [vmem:[#allocation22_spill] sm:$0xff] }
 0x302   :  { %v3291_v19 = vld [vmem:[#allocation23_spill] sm:$0xff] }
 0x303   :  { %v2869_v28 = vadd.f32 %v991_v1, %v990_v12  ;;  %v979_v8 = vadd.f32 %v1714_v6, %v978_v17  ;;  %v3277_v12 = vld [vmem:[#allocation8_spill] sm:$0xff]  ;;  %v3278_v1 = vld [vmem:[#allocation10_spill] sm:$0xff]  ;;  %v3292_v17 = vld [vmem:[#allocation25_spill] sm:$0xff] }
 0x304   :  { %v3295_v23 = vld [vmem:[#allocation27_spill] sm:$0xff] }
 0x305   :  { %1717 = vtanh.f32 %v2869_v28  ;;  %v983_v5 = vsel %vm982_vm14, %v1714_v6, %v979_v8  ;;  %v3281_v6 = vld [vmem:[#allocation12_spill] sm:$0xff] }
 0x306   :  { %v988_v4 = vsel %vm985_vm15, %v987_v14, %v983_v5  ;;  %v3293_v8 = vld [vmem:[#allocation24_spill] sm:$0xff]  ;;  %v3297_v14 = vld [vmem:[#allocation29_spill] sm:$0xff] }
 0x307   :  { %v3296_v5 = vld [vmem:[#allocation28_spill] sm:$0xff] }
 0x30b   :  { %v1718_v18 = vpop.eup %1717 }
 0x30c   :  { %v994_v22 = vmul.f32 %v1718_v18, %v988_v4  ;;  %v3298_v18 = vld [vmem:[#allocation30_spill] sm:$0xff]  ;;  %v3299_v4 = vld [vmem:[#allocation31_spill] sm:$0xff] }
 0x30e   :  { %1634 = vst [vmem:[%s3048_s4 + $0x18] sm:$0xff] %v994_v22  ;;  %1018 = vmatmul.f32.vlgmr.msrb.gmra.mxu0 %v994_v22  ;;  %1038 = vmatmul.f32.vlgmr.msrb.gmra.mxu1 %v994_v22 }
 0x30f   :  { %1058 = vmatmul.f32.vlgmr.msrb.gmra.mxu2 %v994_v22  ;;  %1078 = vmatmul.f32.vlgmr.msrb.gmra.mxu3 %v994_v22  ;;  %v3300_v22 = vld [vmem:[#allocation32_spill] sm:$0xff] }
 0x310   :  { %1310 = vmatpush.msrb.mxu0 %v2597_v39  ;;  %1330 = vmatpush.msrb.mxu1 %v2600_v29 }
 0x311   :  { %1350 = vmatpush.msrb.mxu2 %v2603_v30  ;;  %1370 = vmatpush.msrb.mxu3 %v2606_v31 }
 0x312   :  { %1311 = vmatpush.msrb.mxu0 %v2609_v32  ;;  %1331 = vmatpush.msrb.mxu1 %v2612_v33 }
 0x313   :  { %1351 = vmatpush.msrb.mxu2 %v2615_v34  ;;  %1371 = vmatpush.msrb.mxu3 %v2618_v35 }
 0x314   :  { %1312 = vmatpush.msrb.mxu0 %v2621_v36  ;;  %1332 = vmatpush.msrb.mxu1 %v2624_v37 }
 0x315   :  { %1352 = vmatpush.msrb.mxu2 %v2627_v38  ;;  %1372 = vmatpush.msrb.mxu3 %v2630_v40 }
 0x316   :  { %1313 = vmatpush.msrb.mxu0 %v2633_v41  ;;  %1333 = vmatpush.msrb.mxu1 %v2636_v42 }
 0x317   :  { %1353 = vmatpush.msrb.mxu2 %v2639_v43  ;;  %1373 = vmatpush.msrb.mxu3 %v2642_v47 }
 0x318   :  { %1314 = vmatpush.msrb.mxu0 %v2645_v55  ;;  %1334 = vmatpush.msrb.mxu1 %v2648_v46 }
 0x319   :  { %1354 = vmatpush.msrb.mxu2 %v2651_v62  ;;  %1374 = vmatpush.msrb.mxu3 %v2654_v13 }
 0x31a   :  { %1315 = vmatpush.msrb.mxu0 %v2657_v57  ;;  %1335 = vmatpush.msrb.mxu1 %v2660_v52 }
 0x31b   :  { %1355 = vmatpush.msrb.mxu2 %v2663_v50  ;;  %1375 = vmatpush.msrb.mxu3 %v2666_v0 }
 0x31c   :  { %1316 = vmatpush.msrb.mxu0 %v2669_v49  ;;  %1336 = vmatpush.msrb.mxu1 %v2672_v44 }
 0x31d   :  { %1356 = vmatpush.msrb.mxu2 %v2675_v45  ;;  %1376 = vmatpush.msrb.mxu3 %v2678_v63 }
 0x31e   :  { %1317 = vmatpush.msrb.mxu0 %v2681_v51  ;;  %1337 = vmatpush.msrb.mxu1 %v2684_v26 }
 0x31f   :  { %1357 = vmatpush.msrb.mxu2 %v2687_v53  ;;  %1377 = vmatpush.msrb.mxu3 %v2690_v48 }
 0x320   :  { %1318 = vmatpush.msrb.mxu0 %v2693_v56  ;;  %1338 = vmatpush.msrb.mxu1 %v2696_v61 }
 0x321   :  { %1358 = vmatpush.msrb.mxu2 %v2699_v54  ;;  %1378 = vmatpush.msrb.mxu3 %v2702_v58 }
 0x322   :  { %1319 = vmatpush.msrb.mxu0 %v2705_v59  ;;  %1339 = vmatpush.msrb.mxu1 %v2708_v60 }
 0x323   :  { %1359 = vmatpush.msrb.mxu2 %v3276_v9  ;;  %1379 = vmatpush.msrb.mxu3 %v3277_v12 }
 0x324   :  { %1320 = vmatpush.msrb.mxu0 %v3278_v1  ;;  %1340 = vmatpush.msrb.mxu1 %v3279_v2 }
 0x325   :  { %1360 = vmatpush.msrb.mxu2 %v3280_v3  ;;  %1380 = vmatpush.msrb.mxu3 %v3281_v6 }
 0x326   :  { %1321 = vmatpush.msrb.mxu0 %v3282_v27  ;;  %1341 = vmatpush.msrb.mxu1 %v3283_v15 }
 0x327   :  { %1361 = vmatpush.msrb.mxu2 %v3284_v25  ;;  %1381 = vmatpush.msrb.mxu3 %v3285_v20 }
 0x328   :  { %1322 = vmatpush.msrb.mxu0 %v3286_v10  ;;  %1342 = vmatpush.msrb.mxu1 %v3287_v21 }
 0x329   :  { %1362 = vmatpush.msrb.mxu2 %v3288_v24  ;;  %1382 = vmatpush.msrb.mxu3 %v3289_v11  ;;  %v3302_v11 = vld [vmem:[#allocation46_spill] sm:$0xff]  ;;  %v3303_v24 = vld [vmem:[#allocation47_spill] sm:$0xff] }
 0x32a   :  { %1323 = vmatpush.msrb.mxu0 %v3290_v7  ;;  %1343 = vmatpush.msrb.mxu1 %v3291_v19  ;;  %v3301_v7 = vld [vmem:[#allocation33_spill] sm:$0xff] }
 0x32b   :  { %1363 = vmatpush.msrb.mxu2 %v3292_v17  ;;  %1383 = vmatpush.msrb.mxu3 %v3293_v8 }
 0x32c   :  { %1324 = vmatpush.msrb.mxu0 %v3294_v16  ;;  %1344 = vmatpush.msrb.mxu1 %v3295_v23 }
 0x32d   :  { %1364 = vmatpush.msrb.mxu2 %v3296_v5  ;;  %1384 = vmatpush.msrb.mxu3 %v3297_v14  ;;  %v3304_v14 = vld [vmem:[#allocation49_spill] sm:$0xff] }
 0x32e   :  { %1325 = vmatpush.msrb.mxu0 %v3298_v18  ;;  %1345 = vmatpush.msrb.mxu1 %v3299_v4 }
 0x32f   :  { %1365 = vmatpush.msrb.mxu2 %v3300_v22  ;;  %1385 = vmatpush.msrb.mxu3 %v3301_v7 }
 0x38b   :  { %v1019_v19 = vpop.f32.mrf.mxu0  ;;  %v1039_v17 = vpop.f32.mrf.mxu1 }
 0x38c   :  { %v1082_v8 = vadd.f32 %v1019_v19, %v3302_v11  ;;  %v1083_v16 = vadd.f32 %v1039_v17, %v3303_v24  ;;  %v3305_v24 = vld [vmem:[#allocation48_spill] sm:$0xff] }
 0x38e   :  { %v1635_v21 = vmul.f32 -1.442695, %v1082_v8  ;;  %v1636_v23 = vmul.f32 -1.442695, %v1083_v16 }
 0x390   :  { %1719 = vpow2.f32 %v1635_v21 }
 0x391   :  { %1721 = vpow2.f32 %v1636_v23 }
 0x392   :  { %v1079_v5 = vpop.f32.mrf.mxu3  ;;  %v1059_v7 = vpop.f32.mrf.mxu2 }
 0x393   :  { %v1085_v10 = vadd.f32 %v1079_v5, %v3304_v14  ;;  %v1084_v17 = vadd.f32 %v1059_v7, %v3305_v24 }
 0x395   :  { %v1637_v18 = vmul.f32 -1.442695, %v1085_v10 }
 0x396   :  { %v1720_v20 = vpop.eup %1719 }
 0x397   :  { %v1722_v4 = vpop.eup %1721  ;;  %v1089_v25 = vadd.f32 1.0, %v1720_v20  ;;  %1723 = vpow2.f32 %v1637_v18 }
 0x398   :  { %v1108_v22 = vadd.f32 1.0, %v1722_v4 }
 0x399   :  { %1725 = vrcp.f32 %v1089_v25  ;;  %v1101_v10 = vand.u32 2147483648, %v1089_v25  ;;  %v1099_v18 = vand.u32 2147483647, %v1089_v25  ;;  %vm1095_vm2 = vweird.f32 %v1089_v25 }
 0x39a   :  { %1727 = vrcp.f32 %v1108_v22  ;;  %v1120_v14 = vand.u32 2147483648, %v1108_v22  ;;  %v1118_v27 = vand.u32 2147483647, %v1108_v22  ;;  %vm1114_vm3 = vweird.f32 %v1108_v22 }
 0x39b   :  { %v1102_v7 = vor.u32 1.1754944e-38, %v1101_v10  ;;  %vm1100_vm6 = vcmp.eq.f32.partialorder %v1099_v18, 8.507059e+37 }
 0x39c   :  { %vm1119_vm7 = vcmp.eq.f32.partialorder %v1118_v27, 8.507059e+37 }
 0x39d   :  { %v1724_v15 = vpop.eup %1723 }
 0x39e   :  { %v1128_v11 = vadd.f32 1.0, %v1724_v15 }
 0x39f   :  { %v1726_v19 = vpop.eup %1725 }
 0x3a0   :  { %v1728_v8 = vpop.eup %1727  ;;  %v1091_v21 = vmul.f32 %v1726_v19, %v1089_v25  ;;  %1729 = vrcp.f32 %v1128_v11  ;;  %vm1096_vm0 = vweird.f32 %v1726_v19  ;;  %v1140_v10 = vand.u32 2147483648, %v1128_v11 }
 0x3a1   :  { %v1110_v16 = vmul.f32 %v1728_v8, %v1108_v22  ;;  %1731 = vtanh.f32 %v1084_v17  ;;  %vm1115_vm1 = vweird.f32 %v1728_v8  ;;  %vm1097_vm4 = vmor %vm1095_vm2, %vm1096_vm0  ;;  %vm1134_vm9 = vweird.f32 %v1128_v11 }
 0x3a2   :  { %v1092_v23 = vsub.f32 1.0, %v1091_v21  ;;  %vm1116_vm5 = vmor %vm1114_vm3, %vm1115_vm1  ;;  %v1121_v21 = vor.u32 1.1754944e-38, %v1120_v14  ;;  %v1141_v18 = vor.u32 1.1754944e-38, %v1140_v10 }
 0x3a3   :  { %v1111_v5 = vsub.f32 1.0, %v1110_v16 }
 0x3a4   :  { %v1093_v20 = vmul.f32 %v1726_v19, %v1092_v23 }
 0x3a5   :  { %v1112_v4 = vmul.f32 %v1728_v8, %v1111_v5 }
 0x3a6   :  { %v1730_v6 = vpop.eup %1729  ;;  %v1094_v15 = vadd.f32 %v1726_v19, %v1093_v20 }
 0x3a7   :  { %v1113_v24 = vadd.f32 %v1728_v8, %v1112_v4  ;;  %v1130_v3 = vmul.f32 %v1730_v6, %v1128_v11  ;;  %v1732_v17 = vpop.eup %1731  ;;  %vm1135_vm8 = vweird.f32 %v1730_v6 }
 0x3a8   :  { %v1098_v16 = vsel %vm1097_vm4, %v1726_v19, %v1094_v15  ;;  %v1138_v19 = vand.u32 2147483647, %v1128_v11  ;;  %vm1136_vm10 = vmor %vm1134_vm9, %vm1135_vm8  ;;  %v3335_v15 = vld [vmem:[#allocation52_spill] sm:$0xff] }
 0x3a9   :  { %v1103_v2 = vsel %vm1100_vm6, %v1102_v7, %v1098_v16  ;;  %v1117_v23 = vsel %vm1116_vm5, %v1728_v8, %v1113_v24  ;;  %v1131_v1 = vsub.f32 1.0, %v1130_v3 }
 0x3aa   :  { %v1122_v5 = vsel %vm1119_vm7, %v1121_v21, %v1117_v23  ;;  %v1145_v12 = vmul.f32 %v1732_v17, %v1103_v2  ;;  %vm1139_vm11 = vcmp.eq.f32.partialorder %v1138_v19, 8.507059e+37 }
 0x3ab   :  { %v1144_v9 = vmul.f32 %v1122_v5, %v2869_v28  ;;  %v1132_v20 = vmul.f32 %v1730_v6, %v1131_v1 }
 0x3ad   :  { %v2944_v25 = vadd.f32 %v1145_v12, %v1144_v9  ;;  %v1133_v22 = vadd.f32 %v1730_v6, %v1132_v20 }
 0x3af   :  { %1733 = vtanh.f32 %v2944_v25  ;;  %v1137_v14 = vsel %vm1136_vm10, %v1730_v6, %v1133_v22 }
 0x3b0   :  { %v1142_v3 = vsel %vm1139_vm11, %v1141_v18, %v1137_v14 }
 0x3b5   :  { %v1734_v27 = vpop.eup %1733 }
 0x3b6   :  { %v1148_v8 = vmul.f32 %v1734_v27, %v1142_v3 }
 0x3b8   :  { %1638 = vst [vmem:[%s3048_s4 + $0x20] sm:$0xff] %v1148_v8  ;;  %1172 = vmatmul.f32.vlgmr.msra.gmra.mxu0 %v1148_v8  ;;  %1192 = vmatmul.f32.vlgmr.msra.gmra.mxu1 %v1148_v8 }
 0x3b9   :  { %1212 = vmatmul.f32.vlgmr.msra.gmra.mxu2 %v1148_v8  ;;  %1232 = vmatmul.f32.vlgmr.msra.gmra.mxu3 %v1148_v8 }
 0x3ba   :  { %1464 = vmatpush.msra.mxu0 %v2597_v39  ;;  %1484 = vmatpush.msra.mxu1 %v2600_v29  ;;  %v3306_v39 = vld [vmem:[#allocation9_spill] sm:$0xff]  ;;  %v3307_v29 = vld [vmem:[#allocation8_spill] sm:$0xff] }
 0x3bb   :  { %1504 = vmatpush.msra.mxu2 %v2603_v30  ;;  %1524 = vmatpush.msra.mxu3 %v2606_v31  ;;  %v3308_v30 = vld [vmem:[#allocation10_spill] sm:$0xff]  ;;  %v3309_v31 = vld [vmem:[#allocation11_spill] sm:$0xff] }
 0x3bc   :  { %1465 = vmatpush.msra.mxu0 %v2609_v32  ;;  %1485 = vmatpush.msra.mxu1 %v2612_v33  ;;  %v3310_v32 = vld [vmem:[#allocation13_spill] sm:$0xff]  ;;  %v3311_v33 = vld [vmem:[#allocation12_spill] sm:$0xff] }
 0x3bd   :  { %1505 = vmatpush.msra.mxu2 %v2615_v34  ;;  %1525 = vmatpush.msra.mxu3 %v2618_v35  ;;  %v3312_v34 = vld [vmem:[#allocation14_spill] sm:$0xff]  ;;  %v3313_v35 = vld [vmem:[#allocation15_spill] sm:$0xff] }
 0x3be   :  { %1466 = vmatpush.msra.mxu0 %v2621_v36  ;;  %1486 = vmatpush.msra.mxu1 %v2624_v37  ;;  %v3314_v36 = vld [vmem:[#allocation17_spill] sm:$0xff]  ;;  %v3315_v37 = vld [vmem:[#allocation16_spill] sm:$0xff] }
 0x3bf   :  { %1506 = vmatpush.msra.mxu2 %v2627_v38  ;;  %1526 = vmatpush.msra.mxu3 %v2630_v40  ;;  %v3316_v38 = vld [vmem:[#allocation18_spill] sm:$0xff]  ;;  %v3317_v40 = vld [vmem:[#allocation19_spill] sm:$0xff] }
 0x3c0   :  { %1467 = vmatpush.msra.mxu0 %v2633_v41  ;;  %1487 = vmatpush.msra.mxu1 %v2636_v42  ;;  %v3318_v41 = vld [vmem:[#allocation21_spill] sm:$0xff]  ;;  %v3319_v42 = vld [vmem:[#allocation20_spill] sm:$0xff] }
 0x3c1   :  { %1507 = vmatpush.msra.mxu2 %v2639_v43  ;;  %1527 = vmatpush.msra.mxu3 %v2642_v47  ;;  %v3320_v43 = vld [vmem:[#allocation22_spill] sm:$0xff]  ;;  %v3321_v47 = vld [vmem:[#allocation23_spill] sm:$0xff] }
 0x3c2   :  { %1468 = vmatpush.msra.mxu0 %v2645_v55  ;;  %1488 = vmatpush.msra.mxu1 %v2648_v46  ;;  %v3322_v55 = vld [vmem:[#allocation25_spill] sm:$0xff]  ;;  %v3323_v46 = vld [vmem:[#allocation24_spill] sm:$0xff] }
 0x3c3   :  { %1508 = vmatpush.msra.mxu2 %v2651_v62  ;;  %1528 = vmatpush.msra.mxu3 %v2654_v13  ;;  %v3324_v62 = vld [vmem:[#allocation26_spill] sm:$0xff]  ;;  %v3325_v13 = vld [vmem:[#allocation27_spill] sm:$0xff] }
 0x3c4   :  { %1469 = vmatpush.msra.mxu0 %v2657_v57  ;;  %1489 = vmatpush.msra.mxu1 %v2660_v52  ;;  %v3326_v57 = vld [vmem:[#allocation28_spill] sm:$0xff]  ;;  %v3327_v52 = vld [vmem:[#allocation29_spill] sm:$0xff] }
 0x3c5   :  { %1509 = vmatpush.msra.mxu2 %v2663_v50  ;;  %1529 = vmatpush.msra.mxu3 %v2666_v0  ;;  %v3328_v50 = vld [vmem:[#allocation30_spill] sm:$0xff]  ;;  %v3329_v0 = vld [vmem:[#allocation31_spill] sm:$0xff] }
 0x3c6   :  { %1470 = vmatpush.msra.mxu0 %v2669_v49  ;;  %1490 = vmatpush.msra.mxu1 %v2672_v44  ;;  %v3330_v49 = vld [vmem:[#allocation32_spill] sm:$0xff]  ;;  %v3331_v44 = vld [vmem:[#allocation33_spill] sm:$0xff] }
 0x3c7   :  { %1510 = vmatpush.msra.mxu2 %v2675_v45  ;;  %1530 = vmatpush.msra.mxu3 %v2678_v63 }
 0x3c8   :  { %1471 = vmatpush.msra.mxu0 %v2681_v51  ;;  %1491 = vmatpush.msra.mxu1 %v2684_v26  ;;  %v3332_v51 = vld [vmem:[#allocation50_spill] sm:$0xff] }
 0x3c9   :  { %1511 = vmatpush.msra.mxu2 %v2687_v53  ;;  %1531 = vmatpush.msra.mxu3 %v2690_v48  ;;  %v3333_v53 = vld [vmem:[#allocation51_spill] sm:$0xff] }
 0x3ca   :  { %1472 = vmatpush.msra.mxu0 %v2693_v56  ;;  %1492 = vmatpush.msra.mxu1 %v2696_v61 }
 0x3cb   :  { %1512 = vmatpush.msra.mxu2 %v2699_v54  ;;  %1532 = vmatpush.msra.mxu3 %v2702_v58  ;;  %v3334_v58 = vld [vmem:[#allocation53_spill] sm:$0xff] }
 0x3cc   :  { %1473 = vmatpush.msra.mxu0 %v2705_v59  ;;  %1493 = vmatpush.msra.mxu1 %v2708_v60 }
 0x3cd   :  { %1513 = vmatpush.msra.mxu2 %v3306_v39  ;;  %1533 = vmatpush.msra.mxu3 %v3307_v29 }
 0x3ce   :  { %1474 = vmatpush.msra.mxu0 %v3308_v30  ;;  %1494 = vmatpush.msra.mxu1 %v3309_v31 }
 0x3cf   :  { %1514 = vmatpush.msra.mxu2 %v3310_v32  ;;  %1534 = vmatpush.msra.mxu3 %v3311_v33 }
 0x3d0   :  { %1475 = vmatpush.msra.mxu0 %v3312_v34  ;;  %1495 = vmatpush.msra.mxu1 %v3313_v35 }
 0x3d1   :  { %1515 = vmatpush.msra.mxu2 %v3314_v36  ;;  %1535 = vmatpush.msra.mxu3 %v3315_v37 }
 0x3d2   :  { %1476 = vmatpush.msra.mxu0 %v3316_v38  ;;  %1496 = vmatpush.msra.mxu1 %v3317_v40 }
 0x3d3   :  { %1516 = vmatpush.msra.mxu2 %v3318_v41  ;;  %1536 = vmatpush.msra.mxu3 %v3319_v42 }
 0x3d4   :  { %1477 = vmatpush.msra.mxu0 %v3320_v43  ;;  %1497 = vmatpush.msra.mxu1 %v3321_v47 }
 0x3d5   :  { %1517 = vmatpush.msra.mxu2 %v3322_v55  ;;  %1537 = vmatpush.msra.mxu3 %v3323_v46 }
 0x3d6   :  { %1478 = vmatpush.msra.mxu0 %v3324_v62  ;;  %1498 = vmatpush.msra.mxu1 %v3325_v13 }
 0x3d7   :  { %1518 = vmatpush.msra.mxu2 %v3326_v57  ;;  %1538 = vmatpush.msra.mxu3 %v3327_v52  ;;  %v3336_v52 = vld [vmem:[#allocation54_spill] sm:$0xff] }
 0x3d8   :  { %1479 = vmatpush.msra.mxu0 %v3328_v50  ;;  %1499 = vmatpush.msra.mxu1 %v3329_v0  ;;  %v3337_v0 = vld [vmem:[#allocation55_spill] sm:$0xff] }
 0x3d9   :  { %1519 = vmatpush.msra.mxu2 %v3330_v49  ;;  %1539 = vmatpush.msra.mxu3 %v3331_v44 }
 0x435   :  { %v1173_v45 = vpop.f32.mrf.mxu0  ;;  %v1193_v63 = vpop.f32.mrf.mxu1 }
 0x436   :  { %v1236_v26 = vadd.f32 %v1173_v45, %v3332_v51  ;;  %v1237_v48 = vadd.f32 %v1193_v63, %v3333_v53  ;;  %v3338_v51 = vld [vmem:[#allocation57_spill] sm:$0xff] }
 0x438   :  { %v1639_v56 = vmul.f32 -1.442695, %v1236_v26  ;;  %v1640_v61 = vmul.f32 -1.442695, %v1237_v48 }
 0x43a   :  { %1735 = vpow2.f32 %v1639_v56 }
 0x43b   :  { %1737 = vpow2.f32 %v1640_v61 }
 0x43c   :  { %v1233_v54 = vpop.f32.mrf.mxu3  ;;  %v1213_v2 = vpop.f32.mrf.mxu2 }
 0x43d   :  { %v1239_v59 = vadd.f32 %v1233_v54, %v3334_v58  ;;  %v1238_v7 = vadd.f32 %v1213_v2, %v3335_v15 }
 0x43f   :  { %v1641_v60 = vmul.f32 -1.442695, %v1239_v59 }
 0x440   :  { %v1736_v28 = vpop.eup %1735 }
 0x441   :  { %v1738_v9 = vpop.eup %1737  ;;  %v1243_v12 = vadd.f32 1.0, %v1736_v28  ;;  %1739 = vpow2.f32 %v1641_v60 }
 0x442   :  { %v1262_v1 = vadd.f32 1.0, %v1738_v9  ;;  %v3339_v9 = vld [vmem:[#allocation56_spill] sm:$0xff] }
 0x443   :  { %1741 = vrcp.f32 %v1243_v12  ;;  %v1255_v5 = vand.u32 2147483648, %v1243_v12  ;;  %v1253_v10 = vand.u32 2147483647, %v1243_v12  ;;  %vm1249_vm14 = vweird.f32 %v1243_v12 }
 0x444   :  { %1743 = vrcp.f32 %v1262_v1  ;;  %v1274_v20 = vand.u32 2147483648, %v1262_v1  ;;  %v1272_v14 = vand.u32 2147483647, %v1262_v1  ;;  %vm1268_vm15 = vweird.f32 %v1262_v1 }
 0x445   :  { %v1256_v3 = vor.u32 1.1754944e-38, %v1255_v5  ;;  %vm1254_vm2 = vcmp.eq.f32.partialorder %v1253_v10, 8.507059e+37 }
 0x446   :  { %v1275_v29 = vor.u32 1.1754944e-38, %v1274_v20  ;;  %vm1273_vm3 = vcmp.eq.f32.partialorder %v1272_v14, 8.507059e+37 }
 0x447   :  { %v1740_v6 = vpop.eup %1739 }
 0x448   :  { %v1282_v11 = vadd.f32 1.0, %v1740_v6 }
 0x449   :  { %v1742_v4 = vpop.eup %1741 }
 0x44a   :  { %v1744_v24 = vpop.eup %1743  ;;  %v1245_v21 = vmul.f32 %v1742_v4, %v1243_v12  ;;  %1745 = vrcp.f32 %v1282_v11  ;;  %vm1250_vm12 = vweird.f32 %v1742_v4  ;;  %v1294_v42 = vand.u32 2147483648, %v1282_v11 }
 0x44b   :  { %v1264_v16 = vmul.f32 %v1744_v24, %v1262_v1  ;;  %1747 = vtanh.f32 %v1238_v7  ;;  %vm1269_vm13 = vweird.f32 %v1744_v24  ;;  %vm1251_vm0 = vmor %vm1249_vm14, %vm1250_vm12  ;;  %vm1288_vm5 = vweird.f32 %v1282_v11 }
 0x44c   :  { %v1246_v17 = vsub.f32 1.0, %v1245_v21  ;;  %vm1270_vm1 = vmor %vm1268_vm15, %vm1269_vm13  ;;  %v1292_v43 = vand.u32 2147483647, %v1282_v11  ;;  %v1295_v55 = vor.u32 1.1754944e-38, %v1294_v42 }
 0x44d   :  { %v1265_v23 = vsub.f32 1.0, %v1264_v16 }
 0x44e   :  { %v1247_v22 = vmul.f32 %v1742_v4, %v1246_v17  ;;  %vm1293_vm7 = vcmp.eq.f32.partialorder %v1292_v43, 8.507059e+37 }
 0x44f   :  { %v1266_v19 = vmul.f32 %v1744_v24, %v1265_v23 }
 0x450   :  { %v1746_v18 = vpop.eup %1745  ;;  %v1248_v27 = vadd.f32 %v1742_v4, %v1247_v22 }
 0x451   :  { %v1267_v8 = vadd.f32 %v1744_v24, %v1266_v19  ;;  %v1284_v39 = vmul.f32 %v1746_v18, %v1282_v11  ;;  %v1748_v31 = vpop.eup %1747  ;;  %vm1289_vm4 = vweird.f32 %v1746_v18 }
 0x452   :  { %v1252_v30 = vsel %vm1251_vm0, %v1742_v4, %v1248_v27  ;;  %vm1290_vm6 = vmor %vm1288_vm5, %vm1289_vm4 }
 0x453   :  { %v1257_v32 = vsel %vm1254_vm2, %v1256_v3, %v1252_v30  ;;  %v1271_v33 = vsel %vm1270_vm1, %v1744_v24, %v1267_v8  ;;  %v1285_v34 = vsub.f32 1.0, %v1284_v39 }
 0x454   :  { %v1276_v35 = vsel %vm1273_vm3, %v1275_v29, %v1271_v33  ;;  %v1299_v36 = vmul.f32 %v1748_v31, %v1257_v32 }
 0x455   :  { %v1298_v37 = vmul.f32 %v1276_v35, %v2944_v25  ;;  %v1286_v38 = vmul.f32 %v1746_v18, %v1285_v34 }
 0x457   :  { %v3019_v40 = vadd.f32 %v1299_v36, %v1298_v37  ;;  %v1287_v41 = vadd.f32 %v1746_v18, %v1286_v38 }
 0x459   :  { %1749 = vtanh.f32 %v3019_v40  ;;  %v1291_v47 = vsel %vm1290_vm6, %v1746_v18, %v1287_v41 }
 0x45a   :  { %v1296_v62 = vsel %vm1293_vm7, %v1295_v55, %v1291_v47  ;;  %v3340_v47 = vld [vmem:[#allocation58_spill] sm:$0xff] }
 0x45f   :  { %v1750_v46 = vpop.eup %1749 }
 0x460   :  { %v1302_v13 = vmul.f32 %v1750_v46, %v1296_v62  ;;  %v3341_v46 = vld [vmem:[#allocation59_spill] sm:$0xff] }
 0x462   :  { %1642 = vst [vmem:[%s3048_s4 + $0x28] sm:$0xff] %v1302_v13  ;;  %1326 = vmatmul.f32.vlgmr.msrb.gmra.mxu0 %v1302_v13  ;;  %1346 = vmatmul.f32.vlgmr.msrb.gmra.mxu1 %v1302_v13 }
 0x463   :  { %1366 = vmatmul.f32.vlgmr.msrb.gmra.mxu2 %v1302_v13  ;;  %1386 = vmatmul.f32.vlgmr.msrb.gmra.mxu3 %v1302_v13 }
 0x4df   :  { %v1327_v25 = vpop.f32.mrf.mxu0  ;;  %v1347_v57 = vpop.f32.mrf.mxu1 }
 0x4e0   :  { %v1390_v50 = vadd.f32 %v1327_v25, %v3336_v52  ;;  %v1391_v49 = vadd.f32 %v1347_v57, %v3337_v0  ;;  %v3342_v52 = vld [vmem:[#allocation61_spill] sm:$0xff] }
 0x4e2   :  { %v1643_v44 = vmul.f32 -1.442695, %v1390_v50  ;;  %v1644_v45 = vmul.f32 -1.442695, %v1391_v49 }
 0x4e4   :  { %1751 = vpow2.f32 %v1643_v44 }
 0x4e5   :  { %1753 = vpow2.f32 %v1644_v45 }
 0x4e6   :  { %v1387_v63 = vpop.f32.mrf.mxu3  ;;  %v1367_v58 = vpop.f32.mrf.mxu2 }
 0x4e7   :  { %v1393_v26 = vadd.f32 %v1387_v63, %v3338_v51  ;;  %v1392_v12 = vadd.f32 %v1367_v58, %v3339_v9 }
 0x4e9   :  { %v1645_v53 = vmul.f32 -1.442695, %v1393_v26 }
 0x4ea   :  { %v1752_v48 = vpop.eup %1751 }
 0x4eb   :  { %v1754_v56 = vpop.eup %1753  ;;  %v1397_v61 = vadd.f32 1.0, %v1752_v48  ;;  %1755 = vpow2.f32 %v1645_v53 }
 0x4ec   :  { %v1416_v54 = vadd.f32 1.0, %v1754_v56  ;;  %v3343_v56 = vld [vmem:[#allocation60_spill] sm:$0xff] }
 0x4ed   :  { %1757 = vrcp.f32 %v1397_v61  ;;  %v1409_v15 = vand.u32 2147483648, %v1397_v61  ;;  %v1407_v21 = vand.u32 2147483647, %v1397_v61  ;;  %vm1403_vm10 = vweird.f32 %v1397_v61 }
 0x4ee   :  { %1759 = vrcp.f32 %v1416_v54  ;;  %v1428_v7 = vand.u32 2147483648, %v1416_v54  ;;  %v1426_v17 = vand.u32 2147483647, %v1416_v54  ;;  %vm1422_vm11 = vweird.f32 %v1416_v54 }
 0x4ef   :  { %v1410_v20 = vor.u32 1.1754944e-38, %v1409_v15  ;;  %vm1408_vm14 = vcmp.eq.f32.partialorder %v1407_v21, 8.507059e+37 }
 0x4f0   :  { %v1429_v19 = vor.u32 1.1754944e-38, %v1428_v7  ;;  %vm1427_vm15 = vcmp.eq.f32.partialorder %v1426_v17, 8.507059e+37 }
 0x4f1   :  { %v1756_v59 = vpop.eup %1755 }
 0x4f2   :  { %v1436_v60 = vadd.f32 1.0, %v1756_v59 }
 0x4f3   :  { %v1758_v28 = vpop.eup %1757 }
 0x4f4   :  { %v1760_v1 = vpop.eup %1759  ;;  %v1399_v2 = vmul.f32 %v1758_v28, %v1397_v61  ;;  %1761 = vrcp.f32 %v1436_v60  ;;  %vm1404_vm8 = vweird.f32 %v1758_v28  ;;  %v1448_v34 = vand.u32 2147483648, %v1436_v60 }
 0x4f5   :  { %v1418_v6 = vmul.f32 %v1760_v1, %v1416_v54  ;;  %1763 = vtanh.f32 %v1392_v12  ;;  %vm1423_vm9 = vweird.f32 %v1760_v1  ;;  %vm1405_vm12 = vmor %vm1403_vm10, %vm1404_vm8  ;;  %vm1442_vm1 = vweird.f32 %v1436_v60 }
 0x4f6   :  { %v1400_v11 = vsub.f32 1.0, %v1399_v2  ;;  %vm1424_vm13 = vmor %vm1422_vm11, %vm1423_vm9  ;;  %v1446_v35 = vand.u32 2147483647, %v1436_v60  ;;  %v1449_v37 = vor.u32 1.1754944e-38, %v1448_v34 }
 0x4f7   :  { %v1419_v4 = vsub.f32 1.0, %v1418_v6 }
 0x4f8   :  { %v1401_v24 = vmul.f32 %v1758_v28, %v1400_v11  ;;  %vm1447_vm3 = vcmp.eq.f32.partialorder %v1446_v35, 8.507059e+37 }
 0x4f9   :  { %v1420_v16 = vmul.f32 %v1760_v1, %v1419_v4 }
 0x4fa   :  { %v1762_v23 = vpop.eup %1761  ;;  %v1402_v5 = vadd.f32 %v1758_v28, %v1401_v24 }
 0x4fb   :  { %v1421_v22 = vadd.f32 %v1760_v1, %v1420_v16  ;;  %v1438_v10 = vmul.f32 %v1762_v23, %v1436_v60  ;;  %v1764_v18 = vpop.eup %1763  ;;  %vm1443_vm0 = vweird.f32 %v1762_v23 }
 0x4fc   :  { %v1406_v14 = vsel %vm1405_vm12, %v1758_v28, %v1402_v5  ;;  %vm1444_vm2 = vmor %vm1442_vm1, %vm1443_vm0 }
 0x4fd   :  { %v1411_v27 = vsel %vm1408_vm14, %v1410_v20, %v1406_v14  ;;  %v1425_v3 = vsel %vm1424_vm13, %v1760_v1, %v1421_v22  ;;  %v1439_v8 = vsub.f32 1.0, %v1438_v10 }
 0x4fe   :  { %v1430_v39 = vsel %vm1427_vm15, %v1429_v19, %v1425_v3  ;;  %v1453_v29 = vmul.f32 %v1764_v18, %v1411_v27 }
 0x4ff   :  { %v1452_v30 = vmul.f32 %v1430_v39, %v3019_v40  ;;  %v1440_v31 = vmul.f32 %v1762_v23, %v1439_v8 }
 0x501   :  { %v3030_v32 = vadd.f32 %v1453_v29, %v1452_v30  ;;  %v1441_v33 = vadd.f32 %v1762_v23, %v1440_v31 }
 0x503   :  { %1765 = vtanh.f32 %v3030_v32  ;;  %v1445_v36 = vsel %vm1444_vm2, %v1762_v23, %v1441_v33 }
 0x504   :  { %v1450_v41 = vsel %vm1447_vm3, %v1449_v37, %v1445_v36 }
 0x509   :  { %v1766_v38 = vpop.eup %1765 }
 0x50a   :  { %v1456_v42 = vmul.f32 %v1766_v38, %v1450_v41 }
 0x50c   :  { %1646 = vst [vmem:[%s3048_s4 + $0x30] sm:$0xff] %v1456_v42  ;;  %1480 = vmatmul.f32.vlgmr.msra.gmra.mxu0 %v1456_v42  ;;  %1500 = vmatmul.f32.vlgmr.msra.gmra.mxu1 %v1456_v42 }
 0x50d   :  { %1520 = vmatmul.f32.vlgmr.msra.gmra.mxu2 %v1456_v42  ;;  %1540 = vmatmul.f32.vlgmr.msra.gmra.mxu3 %v1456_v42 }
 0x589   :  { %v1481_v40 = vpop.f32.mrf.mxu0  ;;  %v1501_v43 = vpop.f32.mrf.mxu1 }
 0x58a   :  { %v1544_v55 = vadd.f32 %v1481_v40, %v3340_v47  ;;  %v1545_v62 = vadd.f32 %v1501_v43, %v3341_v46 }
 0x58c   :  { %v1647_v13 = vmul.f32 -1.442695, %v1544_v55  ;;  %v1648_v25 = vmul.f32 -1.442695, %v1545_v62 }
 0x58e   :  { %1767 = vpow2.f32 %v1647_v13 }
 0x58f   :  { %1769 = vpow2.f32 %v1648_v25 }
 0x590   :  { %v1541_v57 = vpop.f32.mrf.mxu3  ;;  %v1521_v51 = vpop.f32.mrf.mxu2 }
 0x591   :  { %v1547_v50 = vadd.f32 %v1541_v57, %v3342_v52  ;;  %v1546_v61 = vadd.f32 %v1521_v51, %v3343_v56 }
 0x593   :  { %v1649_v0 = vmul.f32 -1.442695, %v1547_v50 }
 0x594   :  { %v1768_v49 = vpop.eup %1767 }
 0x595   :  { %v1770_v44 = vpop.eup %1769  ;;  %v1551_v45 = vadd.f32 1.0, %v1768_v49  ;;  %1771 = vpow2.f32 %v1649_v0 }
 0x596   :  { %v1570_v63 = vadd.f32 1.0, %v1770_v44 }
 0x597   :  { %1773 = vrcp.f32 %v1551_v45  ;;  %v1563_v9 = vand.u32 2147483648, %v1551_v45  ;;  %v1561_v2 = vand.u32 2147483647, %v1551_v45  ;;  %vm1557_vm6 = vweird.f32 %v1551_v45 }
 0x598   :  { %1775 = vrcp.f32 %v1570_v63  ;;  %v1582_v12 = vand.u32 2147483648, %v1570_v63  ;;  %v1580_v11 = vand.u32 2147483647, %v1570_v63  ;;  %vm1576_vm7 = vweird.f32 %v1570_v63 }
 0x599   :  { %v1564_v7 = vor.u32 1.1754944e-38, %v1563_v9  ;;  %vm1562_vm10 = vcmp.eq.f32.partialorder %v1561_v2, 8.507059e+37 }
 0x59a   :  { %v1583_v16 = vor.u32 1.1754944e-38, %v1582_v12  ;;  %vm1581_vm11 = vcmp.eq.f32.partialorder %v1580_v11, 8.507059e+37 }
 0x59b   :  { %v1772_v26 = vpop.eup %1771 }
 0x59c   :  { %v1590_v53 = vadd.f32 1.0, %v1772_v26 }
 0x59d   :  { %v1774_v48 = vpop.eup %1773 }
 0x59e   :  { %v1776_v54 = vpop.eup %1775  ;;  %v1553_v58 = vmul.f32 %v1774_v48, %v1551_v45  ;;  %1777 = vrcp.f32 %v1590_v53  ;;  %vm1558_vm4 = vweird.f32 %v1774_v48  ;;  %v1602_v8 = vand.u32 2147483648, %v1590_v53 }
 0x59f   :  { %v1572_v59 = vmul.f32 %v1776_v54, %v1570_v63  ;;  %1779 = vtanh.f32 %v1546_v61  ;;  %vm1577_vm5 = vweird.f32 %v1776_v54  ;;  %vm1559_vm8 = vmor %vm1557_vm6, %vm1558_vm4  ;;  %vm1596_vm13 = vweird.f32 %v1590_v53 }
 0x5a0   :  { %v1554_v60 = vsub.f32 1.0, %v1553_v58  ;;  %vm1578_vm9 = vmor %vm1576_vm7, %vm1577_vm5  ;;  %v1600_v39 = vand.u32 2147483647, %v1590_v53  ;;  %v1603_v30 = vor.u32 1.1754944e-38, %v1602_v8 }
 0x5a1   :  { %v1573_v28 = vsub.f32 1.0, %v1572_v59 }
 0x5a2   :  { %v1555_v1 = vmul.f32 %v1774_v48, %v1554_v60  ;;  %vm1601_vm15 = vcmp.eq.f32.partialorder %v1600_v39, 8.507059e+37 }
 0x5a3   :  { %v1574_v6 = vmul.f32 %v1776_v54, %v1573_v28 }
 0x5a4   :  { %v1778_v4 = vpop.eup %1777  ;;  %v1556_v15 = vadd.f32 %v1774_v48, %v1555_v1 }
 0x5a5   :  { %v1575_v24 = vadd.f32 %v1776_v54, %v1574_v6  ;;  %v1592_v21 = vmul.f32 %v1778_v4, %v1590_v53  ;;  %v1780_v23 = vpop.eup %1779  ;;  %vm1597_vm12 = vweird.f32 %v1778_v4 }
 0x5a6   :  { %v1560_v17 = vsel %vm1559_vm8, %v1774_v48, %v1556_v15  ;;  %vm1598_vm14 = vmor %vm1596_vm13, %vm1597_vm12 }
 0x5a7   :  { %v1565_v5 = vsel %vm1562_vm10, %v1564_v7, %v1560_v17  ;;  %v1579_v20 = vsel %vm1578_vm9, %v1776_v54, %v1575_v24  ;;  %v1593_v22 = vsub.f32 1.0, %v1592_v21 }
 0x5a8   :  { %v1584_v10 = vsel %vm1581_vm11, %v1583_v16, %v1579_v20  ;;  %v1607_v19 = vmul.f32 %v1780_v23, %v1565_v5 }
 0x5a9   :  { %v1606_v14 = vmul.f32 %v1584_v10, %v3030_v32  ;;  %v1594_v18 = vmul.f32 %v1778_v4, %v1593_v22 }
 0x5ab   :  { %v1608_v27 = vadd.f32 %v1607_v19, %v1606_v14  ;;  %v1595_v3 = vadd.f32 %v1778_v4, %v1594_v18 }
 0x5ad   :  { %1781 = vtanh.f32 %v1608_v27  ;;  %v1599_v29 = vsel %vm1598_vm14, %v1778_v4, %v1595_v3 }
 0x5ae   :  { %v1604_v33 = vsel %vm1601_vm15, %v1603_v30, %v1599_v29 }
 0x5b3   :  { %v1782_v31 = vpop.eup %1781 }
 0x5b4   :  { %v1610_v34 = vmul.f32 %v1782_v31, %v1604_v33 }
 0x5b6   :  { %1650 = vst [vmem:[%s3048_s4 + $0x38] sm:$0xff] %v1610_v34 }
 0x5b7   :  { %1619 = vsyncpa [#allocation6], 1 }

</bundles_post_ra>
